<compile_context>
chip_gen: v5e
topology: v5e:2x2
jax: 0.10.0
libtpu: 0.0.40
codegen_flags: <defaults>
</compile_context>

<pallas_src>
import functools

import jax
import jax.numpy as jnp
from jax.experimental import pallas as pl
from jax.experimental.pallas import tpu as pltpu

LANE = 128  # lane width used to pad feature / concept / class axes


def _round_up(x, m):
    return (x + m - 1) // m * m


# ----------------------------------------------------------------------------- in-kernel helpers

def _ln(x, g, b, eps=1e-6):
    mu = jnp.mean(x, axis=-1, keepdims=True)
    var = jnp.mean(jnp.square(x - mu), axis=-1, keepdims=True)
    return (x - mu) * jax.lax.rsqrt(var + eps) * g + b


def _concept_ct(x, k_ref, v_ref, wq_ref, wp_ref, bp_ref, *, num_heads, n_real):
    """Cross-attention from tokens x to (pre-projected, zero-padded) learned concepts.

    x: (Nx, D) f32.  k_ref/v_ref: (Ncp, D) bf16, head-major columns (image-independent,
    projected once outside the kernel).  wq_ref: (D, D) bf16 with 1/sqrt(hd) folded in.
    wp_ref: (D, CLS_PAD) bf16.  Returns (pooled logits (1, CLS_PAD), head-mean attn (Nx, Ncp)).
    """
    Nx, D = x.shape
    hd = D // num_heads
    kc = k_ref[...]                                     # (Ncp, D) bf16
    vc = v_ref[...]
    Ncp = kc.shape[0]
    # one full-width query projection (MXU N = D); heads split afterwards via lane slices
    q = jnp.dot(x.astype(jnp.bfloat16), wq_ref[...], preferred_element_type=jnp.float32)
    valid = jax.lax.broadcasted_iota(jnp.int32, (Nx, Ncp), 1) < n_real

    attn_acc = jnp.zeros((Nx, Ncp), jnp.float32)
    pooled_parts = []
    for hh in range(num_heads):
        lo = hh * hd
        q_h = q[:, lo:lo + hd].astype(jnp.bfloat16)
        k_h = kc[:, lo:lo + hd]
        v_h = vc[:, lo:lo + hd]
        s = jax.lax.dot_general(q_h, k_h, (((1,), (1,)), ((), ())),
                                preferred_element_type=jnp.float32)
        s = jnp.where(valid, s, -1e30)                  # mask padded concepts
        s = s - jnp.max(s, axis=-1, keepdims=True)
        e = jnp.exp(s)
        p = e / jnp.sum(e, axis=-1, keepdims=True)      # exact: user-facing attention map
        attn_acc = attn_acc + p
        ctx_h = jnp.dot(p.astype(jnp.bfloat16), v_h, preferred_element_type=jnp.float32)
        # pool over tokens BEFORE the class projection (linear -> identical result)
        pooled_parts.append(jnp.mean(ctx_h, axis=0, keepdims=True))
    pooled_ctx = jnp.concatenate(pooled_parts, axis=-1).astype(jnp.bfloat16)   # (1, D)
    logits = jnp.dot(pooled_ctx, wp_ref[...], preferred_element_type=jnp.float32) + bp_ref[...]
    return logits, attn_acc * (1.0 / num_heads)


# ----------------------------------------------------------------------------- fused kernel

def _cub_ct_kernel(
    patches_ref,
    # constants (index (0,...); single-buffered when supported)
    w_patch_ref, b_patch_ref, pos_ref, lnf_g_ref, lnf_b_ref,
    g_k_ref, g_v_ref, g_wq_ref, g_wp_ref, g_bp_ref,
    s_k_ref, s_v_ref, s_wq_ref, s_wp_ref, s_bp_ref,
    # per-layer weights (streamed along the depth grid axis)
    ln1_g_ref, ln1_b_ref, wqkv_ref, bqkv_ref, wo_ref, bo_ref,
    ln2_g_ref, ln2_b_ref, w1_ref, b1_ref, w2_ref, b2_ref,
    # outputs
    out_ref, attn_g_ref, attn_s_ref,
    # scratch: activation carried across the depth grid axis
    x_scr,
    *, num_heads, seq_real, n_patches, n_global, n_spatial):

    l = pl.program_id(1)
    S_pad, D = x_scr.shape
    hd = D // num_heads

    # ---- prologue: patch embedding (layer 0 only) ----
    @pl.when(l == 0)
    def _():
        pe = jnp.dot(patches_ref[0], w_patch_ref[...],
                     preferred_element_type=jnp.float32) + b_patch_ref[...]   # (N, D)
        # token order: [patch tokens | CLS | zero pad]  (8-aligned slices, no concat)
        x_scr[0:n_patches, :] = pe + pos_ref[0:n_patches, :]
        x_scr[n_patches:, :] = pos_ref[n_patches:, :]   # CLS(+pos) row + zero tail

    # ---- encoder block l ----
    x = x_scr[...]                                      # (S_pad, D) f32
    key_valid = jax.lax.broadcasted_iota(jnp.int32, (S_pad, S_pad), 1) < seq_real

    h = _ln(x, ln1_g_ref[0], ln1_b_ref[0]).astype(jnp.bfloat16)
    # fused full-width QKV projection: (S, D) @ (D, 3D); 1/sqrt(hd) folded into Q cols
    qkv = jnp.dot(h, wqkv_ref[0], preferred_element_type=jnp.float32) + bqkv_ref[0]
    ctx_parts = []
    for hh in range(num_heads):
        lo = hh * hd
        q_h = qkv[:, lo:lo + hd].astype(jnp.bfloat16)
        k_h = qkv[:, D + lo:D + lo + hd].astype(jnp.bfloat16)
        v_h = qkv[:, 2 * D + lo:2 * D + lo + hd].astype(jnp.bfloat16)
        s = jax.lax.dot_general(q_h, k_h, (((1,), (1,)), ((), ())),
                                preferred_element_type=jnp.float32)
        s = jnp.where(key_valid, s, -1e30)              # mask padded sequence tail
        s = s - jnp.max(s, axis=-1, keepdims=True)
        e = jnp.exp(s)
        p = e * pl.reciprocal(jnp.sum(e, axis=-1, keepdims=True), approx=True)
        ctx_parts.append(jnp.dot(p.astype(jnp.bfloat16), v_h,
                                 preferred_element_type=jnp.float32))
    # merge heads ONCE: (S, H*hd) @ (H*hd, D) output projection
    ctx = jnp.concatenate(ctx_parts, axis=-1).astype(jnp.bfloat16)
    x = x + jnp.dot(ctx, wo_ref[0], preferred_element_type=jnp.float32) + bo_ref[0]

    h2 = _ln(x, ln2_g_ref[0], ln2_b_ref[0]).astype(jnp.bfloat16)
    m = jnp.dot(h2, w1_ref[0], preferred_element_type=jnp.float32) + b1_ref[0]
    m = jax.nn.gelu(m, approximate=True)
    m = jnp.dot(m.astype(jnp.bfloat16), w2_ref[0],
                preferred_element_type=jnp.float32) + b2_ref[0]
    x = x + m
    x_scr[...] = x                                      # carry to next depth grid step

    # ---- epilogue: final LN + concept heads (last layer only) ----
    @pl.when(l == pl.num_programs(1) - 1)
    def _():
        emb = _ln(x, lnf_g_ref[...], lnf_b_ref[...])    # (S_pad, D)
        out_g, attn_g = _concept_ct(emb[n_patches:n_patches + 1, :],        # CLS token
                                    g_k_ref, g_v_ref, g_wq_ref, g_wp_ref, g_bp_ref,
                                    num_heads=num_heads, n_real=n_global)
        out_s, attn_s = _concept_ct(emb[0:n_patches, :],                    # patch tokens
                                    s_k_ref, s_v_ref, s_wq_ref, s_wp_ref, s_bp_ref,
                                    num_heads=num_heads, n_real=n_spatial)
        out_ref[0] = out_g + out_s                      # (1, CLS_PAD)
        attn_g_ref[0] = attn_g                          # (1, NCG_PAD)
        attn_s_ref[0] = attn_s                          # (N, NCS_PAD)


# ----------------------------------------------------------------------------- params

def init_params(key, *, in_ch, patch, img, dim, depth, num_heads, mlp_dim,
                n_global, n_spatial, n_classes):
    n_patches = (img // patch) ** 2
    seq = n_patches + 1
    seq_pad = _round_up(seq, 8)
    feat = in_ch * patch * patch
    feat_pad = _round_up(feat, LANE)
    hd = dim // num_heads
    scale = hd ** -0.5
    ncls_pad = _round_up(n_classes, LANE)
    ncg_pad = _round_up(n_global, LANE)
    ncs_pad = _round_up(n_spatial, LANE)
    bf = jnp.bfloat16

    keys = iter(jax.random.split(key, 64))

    def nrm(shape, std=0.02):
        return std * jax.random.normal(next(keys), shape, jnp.float32)

    # positional embedding with token order [patches | CLS | zero pad]; the CLS token
    # embedding is folded into its positional row (they are only ever added).
    pos = nrm((seq, dim))
    cls = nrm((1, dim))
    pos = pos.at[n_patches].add(cls[0])
    pos = jnp.pad(pos, ((0, seq_pad - seq), (0, 0)))

    def concept_branch(n_concepts, nc_pad):
        concepts = jnp.pad(nrm((n_concepts, dim)), ((0, nc_pad - n_concepts), (0, 0)))
        wq = (nrm((dim, dim)) * scale).astype(bf)       # attention scale folded in
        wk = nrm((dim, dim))
        wv = nrm((dim, dim))
        return dict(
            k=jnp.dot(concepts, wk).astype(bf),         # image-independent: hoisted
            v=jnp.dot(concepts, wv).astype(bf),
            wq=wq,
            wp=jnp.pad(nrm((dim, n_classes)),
                       ((0, 0), (0, ncls_pad - n_classes))).astype(bf),
            bp=jnp.zeros((1, ncls_pad), jnp.float32),
        )

    g = concept_branch(n_global, ncg_pad)
    s = concept_branch(n_spatial, ncs_pad)

    wq_enc = nrm((depth, dim, dim)) * scale             # 1/sqrt(hd) folded into Q cols
    wk_enc = nrm((depth, dim, dim))
    wv_enc = nrm((depth, dim, dim))

    return dict(
        w_patch=jnp.pad(nrm((feat, dim)), ((0, feat_pad - feat), (0, 0))).astype(bf),
        b_patch=jnp.zeros((1, dim), jnp.float32),
        pos=pos,
        lnf_g=jnp.ones((1, dim), jnp.float32),
        lnf_b=jnp.zeros((1, dim), jnp.float32),
        g_k=g['k'], g_v=g['v'], g_wq=g['wq'], g_wp=g['wp'], g_bp=g['bp'],
        s_k=s['k'], s_v=s['v'], s_wq=s['wq'], s_wp=s['wp'], s_bp=s['bp'],
        ln1_g=jnp.ones((depth, 1, dim), jnp.float32),
        ln1_b=jnp.zeros((depth, 1, dim), jnp.float32),
        w_qkv=jnp.concatenate([wq_enc, wk_enc, wv_enc], axis=-1).astype(bf),
        b_qkv=jnp.zeros((depth, 1, 3 * dim), jnp.float32),
        wo=nrm((depth, dim, dim)).astype(bf),
        bo=jnp.zeros((depth, 1, dim), jnp.float32),
        ln2_g=jnp.ones((depth, 1, dim), jnp.float32),
        ln2_b=jnp.zeros((depth, 1, dim), jnp.float32),
        w1=nrm((depth, dim, mlp_dim)).astype(bf),
        b1=jnp.zeros((depth, 1, mlp_dim), jnp.float32),
        w2=nrm((depth, mlp_dim, dim)).astype(bf),
        b2=jnp.zeros((depth, 1, dim), jnp.float32),
        meta=dict(depth=depth, num_heads=num_heads, dim=dim, n_classes=n_classes,
                  n_global=n_global, n_spatial=n_spatial, n_patches=n_patches,
                  seq=seq, seq_pad=seq_pad, feat_pad=feat_pad),
    )


# ----------------------------------------------------------------------------- forward

_CONST_NAMES = ('w_patch', 'b_patch', 'pos', 'lnf_g', 'lnf_b',
                'g_k', 'g_v', 'g_wq', 'g_wp', 'g_bp',
                's_k', 's_v', 's_wq', 's_wp', 's_bp')
_LAYER_NAMES = ('ln1_g', 'ln1_b', 'w_qkv', 'b_qkv', 'wo', 'bo',
                'ln2_g', 'ln2_b', 'w1', 'b1', 'w2', 'b2')


def _probe_buffered():
    try:
        pl.BlockSpec((8, 128), lambda b, l: (0, 0), pipeline_mode=pl.Buffered(1))
        return True
    except Exception:
        return False


_BUFFERED_OK = _probe_buffered()


def _const_spec(shape, single_buffer):
    nd = len(shape)
    idx = lambda b, l: (0,) * nd
    if single_buffer:
        # constant index_map -> a second pipeline buffer is pure VMEM waste
        return pl.BlockSpec(shape, idx, pipeline_mode=pl.Buffered(1))
    return pl.BlockSpec(shape, idx)


def _layer_spec(shape):
    nd = len(shape)
    return pl.BlockSpec((1,) + tuple(shape[1:]), lambda b, l: (l,) + (0,) * (nd - 1))


def _forward_impl(params, image, *, patch, single_buffer_consts):
    meta = params['meta']
    depth, num_heads, dim = meta['depth'], meta['num_heads'], meta['dim']
    n_classes, n_global, n_spatial = meta['n_classes'], meta['n_global'], meta['n_spatial']
    n_patches, seq = meta['n_patches'], meta['seq']
    seq_pad, feat_pad = meta['seq_pad'], meta['feat_pad']

    B, C, H, W = image.shape
    P = patch
    nH, nW = H // P, W // P
    feat = C * P * P

    # unfold NCHW image into per-patch features (== Conv2d(C, dim, P, stride=P)),
    # zero-padded to a lane-dense feature width.
    patches = image.reshape(B, C, nH, P, nW, P).transpose(0, 2, 4, 1, 3, 5)
    patches = patches.reshape(B, n_patches, feat)
    patches = jnp.pad(patches, ((0, 0), (0, 0), (0, feat_pad - feat))).astype(jnp.bfloat16)

    const_args = [params[n] for n in _CONST_NAMES]
    layer_args = [params[n] for n in _LAYER_NAMES]
    ncls_pad = params['g_wp'].shape[-1]
    ncg_pad = params['g_k'].shape[0]
    ncs_pad = params['s_k'].shape[0]

    kernel = functools.partial(
        _cub_ct_kernel, num_heads=num_heads, seq_real=seq,
        n_patches=n_patches, n_global=n_global, n_spatial=n_spatial)

    in_specs = [pl.BlockSpec((1, n_patches, feat_pad), lambda b, l: (b, 0, 0))]
    in_specs += [_const_spec(a.shape, single_buffer_consts) for a in const_args]
    in_specs += [_layer_spec(a.shape) for a in layer_args]

    out, attn_g, attn_s = pl.pallas_call(
        kernel,
        grid=(B, depth),
        in_specs=in_specs,
        out_specs=[
            pl.BlockSpec((1, 1, ncls_pad), lambda b, l: (b, 0, 0)),
            pl.BlockSpec((1, 1, ncg_pad), lambda b, l: (b, 0, 0)),
            pl.BlockSpec((1, n_patches, ncs_pad), lambda b, l: (b, 0, 0)),
        ],
        out_shape=(
            jax.ShapeDtypeStruct((B, 1, ncls_pad), jnp.float32),
            jax.ShapeDtypeStruct((B, 1, ncg_pad), jnp.float32),
            jax.ShapeDtypeStruct((B, n_patches, ncs_pad), jnp.float32),
        ),
        scratch_shapes=[pltpu.VMEM((seq_pad, dim), jnp.float32)],
        compiler_params=pltpu.CompilerParams(
            dimension_semantics=("parallel", "arbitrary"),
            vmem_limit_bytes=48 * 1024 * 1024),
    )(patches, *const_args, *layer_args)

    # slice the lane padding back off
    out = out[:, 0, :n_classes]
    attn_global = attn_g[:, :, :n_global]
    attn_spatial = attn_s[:, :, :n_spatial]
    return out, attn_global, attn_spatial


def cub_ct_forward(params, image, *, patch):
    if _BUFFERED_OK:
        try:
            return jax.block_until_ready(
                _forward_impl(params, image, patch=patch, single_buffer_consts=True))
        except Exception:
            pass  # fall back for Pallas versions where Buffered(1) doesn't lower
    return jax.block_until_ready(
        _forward_impl(params, image, patch=patch, single_buffer_consts=False))


# ----------------------------------------------------------------------------- main

if __name__ == "__main__":
    B, C, IMG = 2, 3, 16
    PATCH, DIM, DEPTH, HEADS, MLP = 4, 32, 2, 4, 128
    N_GLOBAL, N_SPATIAL, N_CLASSES = 8, 16, 10
    N_PATCHES = (IMG // PATCH) ** 2

    root = jax.random.PRNGKey(0)
    k_param, k_img = jax.random.split(root)
    params = init_params(k_param, in_ch=C, patch=PATCH, img=IMG, dim=DIM, depth=DEPTH,
                         num_heads=HEADS, mlp_dim=MLP, n_global=N_GLOBAL,
                         n_spatial=N_SPATIAL, n_classes=N_CLASSES)
    image = jax.random.normal(k_img, (B, C, IMG, IMG), jnp.float32)

    out, attn_global, attn_spatial = cub_ct_forward(params, image, patch=PATCH)

    assert out.shape == (B, N_CLASSES)
    assert attn_global.shape == (B, 1, N_GLOBAL)
    assert attn_spatial.shape == (B, N_PATCHES, N_SPATIAL)
    assert bool(jnp.all(jnp.isfinite(out)))
    assert bool(jnp.all(jnp.isfinite(attn_global)))
    assert bool(jnp.all(jnp.isfinite(attn_spatial)))
    # concept-attention maps use an exact softmax over the real concepts -> rows sum to 1
    assert bool(jnp.allclose(jnp.sum(attn_global, axis=-1), 1.0, atol=1e-2))
    assert bool(jnp.allclose(jnp.sum(attn_spatial, axis=-1), 1.0, atol=1e-2))
    print("KERNEL_OK")
</pallas_src>

<mosaic_0001>
module attributes {stable_mosaic.version = 11 : i64} {
  func.func @_cub_ct_kernel(%arg0: i32, %arg1: i32, %arg2: memref<1x16x128xbf16, #tpu.memory_space<vmem>>, %arg3: memref<128x32xbf16, #tpu.memory_space<vmem>>, %arg4: memref<1x32xf32, #tpu.memory_space<vmem>>, %arg5: memref<24x32xf32, #tpu.memory_space<vmem>>, %arg6: memref<1x32xf32, #tpu.memory_space<vmem>>, %arg7: memref<1x32xf32, #tpu.memory_space<vmem>>, %arg8: memref<128x32xbf16, #tpu.memory_space<vmem>>, %arg9: memref<128x32xbf16, #tpu.memory_space<vmem>>, %arg10: memref<32x32xbf16, #tpu.memory_space<vmem>>, %arg11: memref<32x128xbf16, #tpu.memory_space<vmem>>, %arg12: memref<1x128xf32, #tpu.memory_space<vmem>>, %arg13: memref<128x32xbf16, #tpu.memory_space<vmem>>, %arg14: memref<128x32xbf16, #tpu.memory_space<vmem>>, %arg15: memref<32x32xbf16, #tpu.memory_space<vmem>>, %arg16: memref<32x128xbf16, #tpu.memory_space<vmem>>, %arg17: memref<1x128xf32, #tpu.memory_space<vmem>>, %arg18: memref<1x1x32xf32, #tpu.memory_space<vmem>>, %arg19: memref<1x1x32xf32, #tpu.memory_space<vmem>>, %arg20: memref<1x32x96xbf16, #tpu.memory_space<vmem>>, %arg21: memref<1x1x96xf32, #tpu.memory_space<vmem>>, %arg22: memref<1x32x32xbf16, #tpu.memory_space<vmem>>, %arg23: memref<1x1x32xf32, #tpu.memory_space<vmem>>, %arg24: memref<1x1x32xf32, #tpu.memory_space<vmem>>, %arg25: memref<1x1x32xf32, #tpu.memory_space<vmem>>, %arg26: memref<1x32x128xbf16, #tpu.memory_space<vmem>>, %arg27: memref<1x1x128xf32, #tpu.memory_space<vmem>>, %arg28: memref<1x128x32xbf16, #tpu.memory_space<vmem>>, %arg29: memref<1x1x32xf32, #tpu.memory_space<vmem>>, %arg30: memref<1x1x128xf32, #tpu.memory_space<vmem>>, %arg31: memref<1x1x128xf32, #tpu.memory_space<vmem>>, %arg32: memref<1x16x128xf32, #tpu.memory_space<vmem>>, %arg33: memref<24x32xf32, #tpu.memory_space<vmem>>) attributes {dimension_semantics = [#tpu.dimension_semantics<parallel>, #tpu.dimension_semantics<arbitrary>], iteration_bounds = array<i64: 2, 2>, scalar_prefetch = 0 : i64, scratch_operands = 1 : i64, tpu.core_type = #tpu.core_type<tc>, window_params = [{transform_indices = @transform_0, window_bounds = array<i64: 1, 16, 128>}, {pipeline_mode = #tpu.pipeline_mode<synchronous>, transform_indices = @transform_1, window_bounds = array<i64: 128, 32>}, {pipeline_mode = #tpu.pipeline_mode<synchronous>, transform_indices = @transform_2, window_bounds = array<i64: 1, 32>}, {pipeline_mode = #tpu.pipeline_mode<synchronous>, transform_indices = @transform_3, window_bounds = array<i64: 24, 32>}, {pipeline_mode = #tpu.pipeline_mode<synchronous>, transform_indices = @transform_4, window_bounds = array<i64: 1, 32>}, {pipeline_mode = #tpu.pipeline_mode<synchronous>, transform_indices = @transform_5, window_bounds = array<i64: 1, 32>}, {pipeline_mode = #tpu.pipeline_mode<synchronous>, transform_indices = @transform_6, window_bounds = array<i64: 128, 32>}, {pipeline_mode = #tpu.pipeline_mode<synchronous>, transform_indices = @transform_7, window_bounds = array<i64: 128, 32>}, {pipeline_mode = #tpu.pipeline_mode<synchronous>, transform_indices = @transform_8, window_bounds = array<i64: 32, 32>}, {pipeline_mode = #tpu.pipeline_mode<synchronous>, transform_indices = @transform_9, window_bounds = array<i64: 32, 128>}, {pipeline_mode = #tpu.pipeline_mode<synchronous>, transform_indices = @transform_10, window_bounds = array<i64: 1, 128>}, {pipeline_mode = #tpu.pipeline_mode<synchronous>, transform_indices = @transform_11, window_bounds = array<i64: 128, 32>}, {pipeline_mode = #tpu.pipeline_mode<synchronous>, transform_indices = @transform_12, window_bounds = array<i64: 128, 32>}, {pipeline_mode = #tpu.pipeline_mode<synchronous>, transform_indices = @transform_13, window_bounds = array<i64: 32, 32>}, {pipeline_mode = #tpu.pipeline_mode<synchronous>, transform_indices = @transform_14, window_bounds = array<i64: 32, 128>}, {pipeline_mode = #tpu.pipeline_mode<synchronous>, transform_indices = @transform_15, window_bounds = array<i64: 1, 128>}, {transform_indices = @transform_16, window_bounds = array<i64: 1, 1, 32>}, {transform_indices = @transform_17, window_bounds = array<i64: 1, 1, 32>}, {transform_indices = @transform_18, window_bounds = array<i64: 1, 32, 96>}, {transform_indices = @transform_19, window_bounds = array<i64: 1, 1, 96>}, {transform_indices = @transform_20, window_bounds = array<i64: 1, 32, 32>}, {transform_indices = @transform_21, window_bounds = array<i64: 1, 1, 32>}, {transform_indices = @transform_22, window_bounds = array<i64: 1, 1, 32>}, {transform_indices = @transform_23, window_bounds = array<i64: 1, 1, 32>}, {transform_indices = @transform_24, window_bounds = array<i64: 1, 32, 128>}, {transform_indices = @transform_25, window_bounds = array<i64: 1, 1, 128>}, {transform_indices = @transform_26, window_bounds = array<i64: 1, 128, 32>}, {transform_indices = @transform_27, window_bounds = array<i64: 1, 1, 32>}, {transform_indices = @transform_28, window_bounds = array<i64: 1, 1, 128>}, {transform_indices = @transform_29, window_bounds = array<i64: 1, 1, 128>}, {transform_indices = @transform_30, window_bounds = array<i64: 1, 16, 128>}]} {
    %c0_i32 = arith.constant 0 : i32
    %0 = arith.cmpi eq, %arg1, %c0_i32 : i32
    %1 = arith.extui %0 : i1 to i32
    %c0_i32_0 = arith.constant 0 : i32
    %2 = arith.cmpi ne, %1, %c0_i32_0 : i32
    scf.if %2 {
      %c0_78 = arith.constant 0 : index
      %c0_79 = arith.constant 0 : index
      %c0_80 = arith.constant 0 : index
      %195 = vector.load %arg2[%c0_78, %c0_79, %c0_80] : memref<1x16x128xbf16, #tpu.memory_space<vmem>>, vector<1x16x128xbf16>
      %196 = vector.shape_cast %195 : vector<1x16x128xbf16> to vector<16x128xbf16>
      %c0_81 = arith.constant 0 : index
      %c0_82 = arith.constant 0 : index
      %197 = vector.load %arg3[%c0_81, %c0_82] : memref<128x32xbf16, #tpu.memory_space<vmem>>, vector<128x32xbf16>
      %cst_83 = arith.constant dense<0.000000e+00> : vector<16x32xf32>
      %198 = tpu.matmul %196, %197, %cst_83 {dimension_numbers = #tpu.dot_dimension_numbers<[1], [0], [0], [1], [0, 0, 1, 1], [], []>} : vector<16x128xbf16>, vector<128x32xbf16>, vector<16x32xf32> -> vector<16x32xf32>
      %c0_84 = arith.constant 0 : index
      %c0_85 = arith.constant 0 : index
      %199 = vector.load %arg4[%c0_84, %c0_85] : memref<1x32xf32, #tpu.memory_space<vmem>>, vector<1x32xf32>
      %200 = vector.broadcast %199 : vector<1x32xf32> to vector<16x32xf32>
      %201 = arith.addf %198, %200 : vector<16x32xf32>
      %c0_86 = arith.constant 0 : index
      %c0_87 = arith.constant 0 : index
      %202 = vector.load %arg5[%c0_86, %c0_87] : memref<24x32xf32, #tpu.memory_space<vmem>>, vector<16x32xf32>
      %203 = arith.addf %201, %202 : vector<16x32xf32>
      %c0_88 = arith.constant 0 : index
      %c0_89 = arith.constant 0 : index
      %204 = vector.load %arg33[%c0_88, %c0_89] : memref<24x32xf32, #tpu.memory_space<vmem>>, vector<16x32xf32>
      tpu.vector_store %arg33[%c0_88, %c0_89], %203 {strides = array<i32>} : memref<24x32xf32, #tpu.memory_space<vmem>>, vector<16x32xf32>,
      %c16 = arith.constant 16 : index
      %c0_90 = arith.constant 0 : index
      %205 = vector.load %arg5[%c16, %c0_90] : memref<24x32xf32, #tpu.memory_space<vmem>>, vector<8x32xf32>
      %c16_91 = arith.constant 16 : index
      %c0_92 = arith.constant 0 : index
      %206 = vector.load %arg33[%c16_91, %c0_92] : memref<24x32xf32, #tpu.memory_space<vmem>>, vector<8x32xf32>
      tpu.vector_store %arg33[%c16_91, %c0_92], %205 {strides = array<i32>} : memref<24x32xf32, #tpu.memory_space<vmem>>, vector<8x32xf32>,
    } else {
    }
    %c0 = arith.constant 0 : index
    %c0_1 = arith.constant 0 : index
    %3 = vector.load %arg33[%c0, %c0_1] : memref<24x32xf32, #tpu.memory_space<vmem>>, vector<24x32xf32>
    %4 = tpu.iota {dimensions = array<i32: 1>} : vector<24x24xi32>
    %c17_i32 = arith.constant 17 : i32
    %5 = vector.broadcast %c17_i32 : i32 to vector<24x24xi32>
    %6 = arith.cmpi slt, %4, %5 : vector<24x24xi32>
    %c0_2 = arith.constant 0 : index
    %c0_3 = arith.constant 0 : index
    %c0_4 = arith.constant 0 : index
    %7 = vector.load %arg18[%c0_2, %c0_3, %c0_4] : memref<1x1x32xf32, #tpu.memory_space<vmem>>, vector<1x1x32xf32>
    %8 = vector.shape_cast %7 : vector<1x1x32xf32> to vector<1x32xf32>
    %c0_5 = arith.constant 0 : index
    %c0_6 = arith.constant 0 : index
    %c0_7 = arith.constant 0 : index
    %9 = vector.load %arg19[%c0_5, %c0_6, %c0_7] : memref<1x1x32xf32, #tpu.memory_space<vmem>>, vector<1x1x32xf32>
    %10 = vector.shape_cast %9 : vector<1x1x32xf32> to vector<1x32xf32>
    %cst = arith.constant dense<0.000000e+00> : vector<24xf32>
    %11 = vector.multi_reduction <add>, %3, %cst [1] : vector<24x32xf32> to vector<24xf32>
    %12 = vector.shape_cast %11 : vector<24xf32> to vector<24x1xf32>
    %cst_8 = arith.constant 3.200000e+01 : f32
    %13 = vector.broadcast %cst_8 : f32 to vector<24x1xf32>
    %14 = arith.divf %12, %13 : vector<24x1xf32>
    %15 = vector.broadcast %14 : vector<24x1xf32> to vector<24x32xf32>
    %16 = arith.subf %3, %15 : vector<24x32xf32>
    %17 = arith.mulf %16, %16 : vector<24x32xf32>
    %cst_9 = arith.constant dense<0.000000e+00> : vector<24xf32>
    %18 = vector.multi_reduction <add>, %17, %cst_9 [1] : vector<24x32xf32> to vector<24xf32>
    %19 = vector.shape_cast %18 : vector<24xf32> to vector<24x1xf32>
    %cst_10 = arith.constant 3.200000e+01 : f32
    %20 = vector.broadcast %cst_10 : f32 to vector<24x1xf32>
    %21 = arith.divf %19, %20 : vector<24x1xf32>
    %22 = vector.broadcast %14 : vector<24x1xf32> to vector<24x32xf32>
    %23 = arith.subf %3, %22 : vector<24x32xf32>
    %cst_11 = arith.constant 9.99999997E-7 : f32
    %24 = vector.broadcast %cst_11 : f32 to vector<24x1xf32>
    %25 = arith.addf %21, %24 : vector<24x1xf32>
    %26 = math.rsqrt %25 : vector<24x1xf32>
    %27 = vector.broadcast %26 : vector<24x1xf32> to vector<24x32xf32>
    %28 = arith.mulf %23, %27 : vector<24x32xf32>
    %29 = vector.broadcast %8 : vector<1x32xf32> to vector<24x32xf32>
    %30 = arith.mulf %28, %29 : vector<24x32xf32>
    %31 = vector.broadcast %10 : vector<1x32xf32> to vector<24x32xf32>
    %32 = arith.addf %30, %31 : vector<24x32xf32>
    %33 = arith.truncf %32 : vector<24x32xf32> to vector<24x32xbf16>
    %c0_12 = arith.constant 0 : index
    %c0_13 = arith.constant 0 : index
    %c0_14 = arith.constant 0 : index
    %34 = vector.load %arg20[%c0_12, %c0_13, %c0_14] : memref<1x32x96xbf16, #tpu.memory_space<vmem>>, vector<1x32x96xbf16>
    %35 = vector.shape_cast %34 : vector<1x32x96xbf16> to vector<32x96xbf16>
    %cst_15 = arith.constant dense<0.000000e+00> : vector<24x96xf32>
    %36 = tpu.matmul %33, %35, %cst_15 {dimension_numbers = #tpu.dot_dimension_numbers<[1], [0], [0], [1], [0, 0, 1, 1], [], []>} : vector<24x32xbf16>, vector<32x96xbf16>, vector<24x96xf32> -> vector<24x96xf32>
    %c0_16 = arith.constant 0 : index
    %c0_17 = arith.constant 0 : index
    %c0_18 = arith.constant 0 : index
    %37 = vector.load %arg21[%c0_16, %c0_17, %c0_18] : memref<1x1x96xf32, #tpu.memory_space<vmem>>, vector<1x1x96xf32>
    %38 = vector.shape_cast %37 : vector<1x1x96xf32> to vector<1x96xf32>
    %39 = vector.broadcast %38 : vector<1x96xf32> to vector<24x96xf32>
    %40 = arith.addf %36, %39 : vector<24x96xf32>
    %41 = vector.extract_strided_slice %40 {offsets = [0, 0], sizes = [24, 8], strides = [1, 1]} : vector<24x96xf32> to vector<24x8xf32>
    %42 = arith.truncf %41 : vector<24x8xf32> to vector<24x8xbf16>
    %43 = vector.extract_strided_slice %40 {offsets = [0, 32], sizes = [24, 8], strides = [1, 1]} : vector<24x96xf32> to vector<24x8xf32>
    %44 = arith.truncf %43 : vector<24x8xf32> to vector<24x8xbf16>
    %45 = vector.extract_strided_slice %40 {offsets = [0, 64], sizes = [24, 8], strides = [1, 1]} : vector<24x96xf32> to vector<24x8xf32>
    %46 = arith.truncf %45 : vector<24x8xf32> to vector<24x8xbf16>
    %cst_19 = arith.constant dense<0.000000e+00> : vector<24x24xf32>
    %47 = tpu.matmul %42, %44, %cst_19 {dimension_numbers = #tpu.dot_dimension_numbers<[1], [1], [0], [0], [0, 0, 1, 0], [], []>} : vector<24x8xbf16>, vector<24x8xbf16>, vector<24x24xf32> -> vector<24x24xf32>
    %cst_20 = arith.constant -1.000000e+30 : f32
    %48 = vector.broadcast %cst_20 : f32 to vector<24x24xf32>
    %49 = arith.select %6, %47, %48 : vector<24x24xi1>, vector<24x24xf32>
    %cst_21 = arith.constant dense<0xFF800000> : vector<24xf32>
    %50 = vector.multi_reduction <maximumf>, %49, %cst_21 [1] : vector<24x24xf32> to vector<24xf32>
    %51 = vector.shape_cast %50 : vector<24xf32> to vector<24x1xf32>
    %52 = vector.broadcast %51 : vector<24x1xf32> to vector<24x24xf32>
    %53 = arith.subf %49, %52 : vector<24x24xf32>
    %54 = math.exp %53 : vector<24x24xf32>
    %cst_22 = arith.constant dense<0.000000e+00> : vector<24xf32>
    %55 = vector.multi_reduction <add>, %54, %cst_22 [1] : vector<24x24xf32> to vector<24xf32>
    %56 = vector.shape_cast %55 : vector<24xf32> to vector<24x1xf32>
    %57 = tpu.reciprocal %56 {approx = true} : vector<24x1xf32> -> vector<24x1xf32>
    %58 = vector.broadcast %57 : vector<24x1xf32> to vector<24x24xf32>
    %59 = arith.mulf %54, %58 : vector<24x24xf32>
    %60 = arith.truncf %59 : vector<24x24xf32> to vector<24x24xbf16>
    %cst_23 = arith.constant dense<0.000000e+00> : vector<24x8xf32>
    %61 = tpu.matmul %60, %46, %cst_23 {dimension_numbers = #tpu.dot_dimension_numbers<[1], [0], [0], [1], [0, 0, 1, 1], [], []>} : vector<24x24xbf16>, vector<24x8xbf16>, vector<24x8xf32> -> vector<24x8xf32>
    %62 = vector.extract_strided_slice %40 {offsets = [0, 8], sizes = [24, 8], strides = [1, 1]} : vector<24x96xf32> to vector<24x8xf32>
    %63 = arith.truncf %62 : vector<24x8xf32> to vector<24x8xbf16>
    %64 = vector.extract_strided_slice %40 {offsets = [0, 40], sizes = [24, 8], strides = [1, 1]} : vector<24x96xf32> to vector<24x8xf32>
    %65 = arith.truncf %64 : vector<24x8xf32> to vector<24x8xbf16>
    %66 = vector.extract_strided_slice %40 {offsets = [0, 72], sizes = [24, 8], strides = [1, 1]} : vector<24x96xf32> to vector<24x8xf32>
    %67 = arith.truncf %66 : vector<24x8xf32> to vector<24x8xbf16>
    %cst_24 = arith.constant dense<0.000000e+00> : vector<24x24xf32>
    %68 = tpu.matmul %63, %65, %cst_24 {dimension_numbers = #tpu.dot_dimension_numbers<[1], [1], [0], [0], [0, 0, 1, 0], [], []>} : vector<24x8xbf16>, vector<24x8xbf16>, vector<24x24xf32> -> vector<24x24xf32>
    %cst_25 = arith.constant -1.000000e+30 : f32
    %69 = vector.broadcast %cst_25 : f32 to vector<24x24xf32>
    %70 = arith.select %6, %68, %69 : vector<24x24xi1>, vector<24x24xf32>
    %cst_26 = arith.constant dense<0xFF800000> : vector<24xf32>
    %71 = vector.multi_reduction <maximumf>, %70, %cst_26 [1] : vector<24x24xf32> to vector<24xf32>
    %72 = vector.shape_cast %71 : vector<24xf32> to vector<24x1xf32>
    %73 = vector.broadcast %72 : vector<24x1xf32> to vector<24x24xf32>
    %74 = arith.subf %70, %73 : vector<24x24xf32>
    %75 = math.exp %74 : vector<24x24xf32>
    %cst_27 = arith.constant dense<0.000000e+00> : vector<24xf32>
    %76 = vector.multi_reduction <add>, %75, %cst_27 [1] : vector<24x24xf32> to vector<24xf32>
    %77 = vector.shape_cast %76 : vector<24xf32> to vector<24x1xf32>
    %78 = tpu.reciprocal %77 {approx = true} : vector<24x1xf32> -> vector<24x1xf32>
    %79 = vector.broadcast %78 : vector<24x1xf32> to vector<24x24xf32>
    %80 = arith.mulf %75, %79 : vector<24x24xf32>
    %81 = arith.truncf %80 : vector<24x24xf32> to vector<24x24xbf16>
    %cst_28 = arith.constant dense<0.000000e+00> : vector<24x8xf32>
    %82 = tpu.matmul %81, %67, %cst_28 {dimension_numbers = #tpu.dot_dimension_numbers<[1], [0], [0], [1], [0, 0, 1, 1], [], []>} : vector<24x24xbf16>, vector<24x8xbf16>, vector<24x8xf32> -> vector<24x8xf32>
    %83 = vector.extract_strided_slice %40 {offsets = [0, 16], sizes = [24, 8], strides = [1, 1]} : vector<24x96xf32> to vector<24x8xf32>
    %84 = arith.truncf %83 : vector<24x8xf32> to vector<24x8xbf16>
    %85 = vector.extract_strided_slice %40 {offsets = [0, 48], sizes = [24, 8], strides = [1, 1]} : vector<24x96xf32> to vector<24x8xf32>
    %86 = arith.truncf %85 : vector<24x8xf32> to vector<24x8xbf16>
    %87 = vector.extract_strided_slice %40 {offsets = [0, 80], sizes = [24, 8], strides = [1, 1]} : vector<24x96xf32> to vector<24x8xf32>
    %88 = arith.truncf %87 : vector<24x8xf32> to vector<24x8xbf16>
    %cst_29 = arith.constant dense<0.000000e+00> : vector<24x24xf32>
    %89 = tpu.matmul %84, %86, %cst_29 {dimension_numbers = #tpu.dot_dimension_numbers<[1], [1], [0], [0], [0, 0, 1, 0], [], []>} : vector<24x8xbf16>, vector<24x8xbf16>, vector<24x24xf32> -> vector<24x24xf32>
    %cst_30 = arith.constant -1.000000e+30 : f32
    %90 = vector.broadcast %cst_30 : f32 to vector<24x24xf32>
    %91 = arith.select %6, %89, %90 : vector<24x24xi1>, vector<24x24xf32>
    %cst_31 = arith.constant dense<0xFF800000> : vector<24xf32>
    %92 = vector.multi_reduction <maximumf>, %91, %cst_31 [1] : vector<24x24xf32> to vector<24xf32>
    %93 = vector.shape_cast %92 : vector<24xf32> to vector<24x1xf32>
    %94 = vector.broadcast %93 : vector<24x1xf32> to vector<24x24xf32>
    %95 = arith.subf %91, %94 : vector<24x24xf32>
    %96 = math.exp %95 : vector<24x24xf32>
    %cst_32 = arith.constant dense<0.000000e+00> : vector<24xf32>
    %97 = vector.multi_reduction <add>, %96, %cst_32 [1] : vector<24x24xf32> to vector<24xf32>
    %98 = vector.shape_cast %97 : vector<24xf32> to vector<24x1xf32>
    %99 = tpu.reciprocal %98 {approx = true} : vector<24x1xf32> -> vector<24x1xf32>
    %100 = vector.broadcast %99 : vector<24x1xf32> to vector<24x24xf32>
    %101 = arith.mulf %96, %100 : vector<24x24xf32>
    %102 = arith.truncf %101 : vector<24x24xf32> to vector<24x24xbf16>
    %cst_33 = arith.constant dense<0.000000e+00> : vector<24x8xf32>
    %103 = tpu.matmul %102, %88, %cst_33 {dimension_numbers = #tpu.dot_dimension_numbers<[1], [0], [0], [1], [0, 0, 1, 1], [], []>} : vector<24x24xbf16>, vector<24x8xbf16>, vector<24x8xf32> -> vector<24x8xf32>
    %104 = vector.extract_strided_slice %40 {offsets = [0, 24], sizes = [24, 8], strides = [1, 1]} : vector<24x96xf32> to vector<24x8xf32>
    %105 = arith.truncf %104 : vector<24x8xf32> to vector<24x8xbf16>
    %106 = vector.extract_strided_slice %40 {offsets = [0, 56], sizes = [24, 8], strides = [1, 1]} : vector<24x96xf32> to vector<24x8xf32>
    %107 = arith.truncf %106 : vector<24x8xf32> to vector<24x8xbf16>
    %108 = vector.extract_strided_slice %40 {offsets = [0, 88], sizes = [24, 8], strides = [1, 1]} : vector<24x96xf32> to vector<24x8xf32>
    %109 = arith.truncf %108 : vector<24x8xf32> to vector<24x8xbf16>
    %cst_34 = arith.constant dense<0.000000e+00> : vector<24x24xf32>
    %110 = tpu.matmul %105, %107, %cst_34 {dimension_numbers = #tpu.dot_dimension_numbers<[1], [1], [0], [0], [0, 0, 1, 0], [], []>} : vector<24x8xbf16>, vector<24x8xbf16>, vector<24x24xf32> -> vector<24x24xf32>
    %cst_35 = arith.constant -1.000000e+30 : f32
    %111 = vector.broadcast %cst_35 : f32 to vector<24x24xf32>
    %112 = arith.select %6, %110, %111 : vector<24x24xi1>, vector<24x24xf32>
    %cst_36 = arith.constant dense<0xFF800000> : vector<24xf32>
    %113 = vector.multi_reduction <maximumf>, %112, %cst_36 [1] : vector<24x24xf32> to vector<24xf32>
    %114 = vector.shape_cast %113 : vector<24xf32> to vector<24x1xf32>
    %115 = vector.broadcast %114 : vector<24x1xf32> to vector<24x24xf32>
    %116 = arith.subf %112, %115 : vector<24x24xf32>
    %117 = math.exp %116 : vector<24x24xf32>
    %cst_37 = arith.constant dense<0.000000e+00> : vector<24xf32>
    %118 = vector.multi_reduction <add>, %117, %cst_37 [1] : vector<24x24xf32> to vector<24xf32>
    %119 = vector.shape_cast %118 : vector<24xf32> to vector<24x1xf32>
    %120 = tpu.reciprocal %119 {approx = true} : vector<24x1xf32> -> vector<24x1xf32>
    %121 = vector.broadcast %120 : vector<24x1xf32> to vector<24x24xf32>
    %122 = arith.mulf %117, %121 : vector<24x24xf32>
    %123 = arith.truncf %122 : vector<24x24xf32> to vector<24x24xbf16>
    %cst_38 = arith.constant dense<0.000000e+00> : vector<24x8xf32>
    %124 = tpu.matmul %123, %109, %cst_38 {dimension_numbers = #tpu.dot_dimension_numbers<[1], [0], [0], [1], [0, 0, 1, 1], [], []>} : vector<24x24xbf16>, vector<24x8xbf16>, vector<24x8xf32> -> vector<24x8xf32>
    %125 = tpu.concatenate %61, %82, %103, %124 in 1 : vector<24x8xf32>, vector<24x8xf32>, vector<24x8xf32>, vector<24x8xf32> -> vector<24x32xf32>
    %126 = arith.truncf %125 : vector<24x32xf32> to vector<24x32xbf16>
    %c0_39 = arith.constant 0 : index
    %c0_40 = arith.constant 0 : index
    %c0_41 = arith.constant 0 : index
    %127 = vector.load %arg22[%c0_39, %c0_40, %c0_41] : memref<1x32x32xbf16, #tpu.memory_space<vmem>>, vector<1x32x32xbf16>
    %128 = vector.shape_cast %127 : vector<1x32x32xbf16> to vector<32x32xbf16>
    %cst_42 = arith.constant dense<0.000000e+00> : vector<24x32xf32>
    %129 = tpu.matmul %126, %128, %cst_42 {dimension_numbers = #tpu.dot_dimension_numbers<[1], [0], [0], [1], [0, 0, 1, 1], [], []>} : vector<24x32xbf16>, vector<32x32xbf16>, vector<24x32xf32> -> vector<24x32xf32>
    %130 = arith.addf %3, %129 : vector<24x32xf32>
    %c0_43 = arith.constant 0 : index
    %c0_44 = arith.constant 0 : index
    %c0_45 = arith.constant 0 : index
    %131 = vector.load %arg23[%c0_43, %c0_44, %c0_45] : memref<1x1x32xf32, #tpu.memory_space<vmem>>, vector<1x1x32xf32>
    %132 = vector.shape_cast %131 : vector<1x1x32xf32> to vector<1x32xf32>
    %133 = vector.broadcast %132 : vector<1x32xf32> to vector<24x32xf32>
    %134 = arith.addf %130, %133 : vector<24x32xf32>
    %c0_46 = arith.constant 0 : index
    %c0_47 = arith.constant 0 : index
    %c0_48 = arith.constant 0 : index
    %135 = vector.load %arg24[%c0_46, %c0_47, %c0_48] : memref<1x1x32xf32, #tpu.memory_space<vmem>>, vector<1x1x32xf32>
    %136 = vector.shape_cast %135 : vector<1x1x32xf32> to vector<1x32xf32>
    %c0_49 = arith.constant 0 : index
    %c0_50 = arith.constant 0 : index
    %c0_51 = arith.constant 0 : index
    %137 = vector.load %arg25[%c0_49, %c0_50, %c0_51] : memref<1x1x32xf32, #tpu.memory_space<vmem>>, vector<1x1x32xf32>
    %138 = vector.shape_cast %137 : vector<1x1x32xf32> to vector<1x32xf32>
    %cst_52 = arith.constant dense<0.000000e+00> : vector<24xf32>
    %139 = vector.multi_reduction <add>, %134, %cst_52 [1] : vector<24x32xf32> to vector<24xf32>
    %140 = vector.shape_cast %139 : vector<24xf32> to vector<24x1xf32>
    %cst_53 = arith.constant 3.200000e+01 : f32
    %141 = vector.broadcast %cst_53 : f32 to vector<24x1xf32>
    %142 = arith.divf %140, %141 : vector<24x1xf32>
    %143 = vector.broadcast %142 : vector<24x1xf32> to vector<24x32xf32>
    %144 = arith.subf %134, %143 : vector<24x32xf32>
    %145 = arith.mulf %144, %144 : vector<24x32xf32>
    %cst_54 = arith.constant dense<0.000000e+00> : vector<24xf32>
    %146 = vector.multi_reduction <add>, %145, %cst_54 [1] : vector<24x32xf32> to vector<24xf32>
    %147 = vector.shape_cast %146 : vector<24xf32> to vector<24x1xf32>
    %cst_55 = arith.constant 3.200000e+01 : f32
    %148 = vector.broadcast %cst_55 : f32 to vector<24x1xf32>
    %149 = arith.divf %147, %148 : vector<24x1xf32>
    %150 = vector.broadcast %142 : vector<24x1xf32> to vector<24x32xf32>
    %151 = arith.subf %134, %150 : vector<24x32xf32>
    %cst_56 = arith.constant 9.99999997E-7 : f32
    %152 = vector.broadcast %cst_56 : f32 to vector<24x1xf32>
    %153 = arith.addf %149, %152 : vector<24x1xf32>
    %154 = math.rsqrt %153 : vector<24x1xf32>
    %155 = vector.broadcast %154 : vector<24x1xf32> to vector<24x32xf32>
    %156 = arith.mulf %151, %155 : vector<24x32xf32>
    %157 = vector.broadcast %136 : vector<1x32xf32> to vector<24x32xf32>
    %158 = arith.mulf %156, %157 : vector<24x32xf32>
    %159 = vector.broadcast %138 : vector<1x32xf32> to vector<24x32xf32>
    %160 = arith.addf %158, %159 : vector<24x32xf32>
    %161 = arith.truncf %160 : vector<24x32xf32> to vector<24x32xbf16>
    %c0_57 = arith.constant 0 : index
    %c0_58 = arith.constant 0 : index
    %c0_59 = arith.constant 0 : index
    %162 = vector.load %arg26[%c0_57, %c0_58, %c0_59] : memref<1x32x128xbf16, #tpu.memory_space<vmem>>, vector<1x32x128xbf16>
    %163 = vector.shape_cast %162 : vector<1x32x128xbf16> to vector<32x128xbf16>
    %cst_60 = arith.constant dense<0.000000e+00> : vector<24x128xf32>
    %164 = tpu.matmul %161, %163, %cst_60 {dimension_numbers = #tpu.dot_dimension_numbers<[1], [0], [0], [1], [0, 0, 1, 1], [], []>} : vector<24x32xbf16>, vector<32x128xbf16>, vector<24x128xf32> -> vector<24x128xf32>
    %c0_61 = arith.constant 0 : index
    %c0_62 = arith.constant 0 : index
    %c0_63 = arith.constant 0 : index
    %165 = vector.load %arg27[%c0_61, %c0_62, %c0_63] : memref<1x1x128xf32, #tpu.memory_space<vmem>>, vector<1x1x128xf32>
    %166 = vector.shape_cast %165 : vector<1x1x128xf32> to vector<1x128xf32>
    %167 = vector.broadcast %166 : vector<1x128xf32> to vector<24x128xf32>
    %168 = arith.addf %164, %167 : vector<24x128xf32>
    %169 = arith.mulf %168, %168 : vector<24x128xf32>
    %170 = arith.mulf %168, %169 : vector<24x128xf32>
    %cst_64 = arith.constant 4.471500e-02 : f32
    %171 = vector.broadcast %cst_64 : f32 to vector<24x128xf32>
    %172 = arith.mulf %171, %170 : vector<24x128xf32>
    %173 = arith.addf %168, %172 : vector<24x128xf32>
    %cst_65 = arith.constant 0.797884583 : f32
    %174 = vector.broadcast %cst_65 : f32 to vector<24x128xf32>
    %175 = arith.mulf %174, %173 : vector<24x128xf32>
    %176 = math.tanh %175 : vector<24x128xf32>
    %cst_66 = arith.constant 1.000000e+00 : f32
    %177 = vector.broadcast %cst_66 : f32 to vector<24x128xf32>
    %178 = arith.addf %177, %176 : vector<24x128xf32>
    %cst_67 = arith.constant 5.000000e-01 : f32
    %179 = vector.broadcast %cst_67 : f32 to vector<24x128xf32>
    %180 = arith.mulf %179, %178 : vector<24x128xf32>
    %181 = arith.mulf %168, %180 : vector<24x128xf32>
    %182 = arith.truncf %181 : vector<24x128xf32> to vector<24x128xbf16>
    %c0_68 = arith.constant 0 : index
    %c0_69 = arith.constant 0 : index
    %c0_70 = arith.constant 0 : index
    %183 = vector.load %arg28[%c0_68, %c0_69, %c0_70] : memref<1x128x32xbf16, #tpu.memory_space<vmem>>, vector<1x128x32xbf16>
    %184 = vector.shape_cast %183 : vector<1x128x32xbf16> to vector<128x32xbf16>
    %cst_71 = arith.constant dense<0.000000e+00> : vector<24x32xf32>
    %185 = tpu.matmul %182, %184, %cst_71 {dimension_numbers = #tpu.dot_dimension_numbers<[1], [0], [0], [1], [0, 0, 1, 1], [], []>} : vector<24x128xbf16>, vector<128x32xbf16>, vector<24x32xf32> -> vector<24x32xf32>
    %c0_72 = arith.constant 0 : index
    %c0_73 = arith.constant 0 : index
    %c0_74 = arith.constant 0 : index
    %186 = vector.load %arg29[%c0_72, %c0_73, %c0_74] : memref<1x1x32xf32, #tpu.memory_space<vmem>>, vector<1x1x32xf32>
    %187 = vector.shape_cast %186 : vector<1x1x32xf32> to vector<1x32xf32>
    %188 = vector.broadcast %187 : vector<1x32xf32> to vector<24x32xf32>
    %189 = arith.addf %185, %188 : vector<24x32xf32>
    %190 = arith.addf %134, %189 : vector<24x32xf32>
    %c0_75 = arith.constant 0 : index
    %c0_76 = arith.constant 0 : index
    %191 = vector.load %arg33[%c0_75, %c0_76] : memref<24x32xf32, #tpu.memory_space<vmem>>, vector<24x32xf32>
    tpu.vector_store %arg33[%c0_75, %c0_76], %190 {strides = array<i32>} : memref<24x32xf32, #tpu.memory_space<vmem>>, vector<24x32xf32>,
    %c1_i32 = arith.constant 1 : i32
    %192 = arith.cmpi eq, %arg1, %c1_i32 : i32
    %193 = arith.extui %192 : i1 to i32
    %c0_i32_77 = arith.constant 0 : i32
    %194 = arith.cmpi ne, %193, %c0_i32_77 : i32
    scf.if %194 {
      %c0_78 = arith.constant 0 : index
      %c0_79 = arith.constant 0 : index
      %195 = vector.load %arg6[%c0_78, %c0_79] : memref<1x32xf32, #tpu.memory_space<vmem>>, vector<1x32xf32>
      %c0_80 = arith.constant 0 : index
      %c0_81 = arith.constant 0 : index
      %196 = vector.load %arg7[%c0_80, %c0_81] : memref<1x32xf32, #tpu.memory_space<vmem>>, vector<1x32xf32>
      %cst_82 = arith.constant dense<0.000000e+00> : vector<24xf32>
      %197 = vector.multi_reduction <add>, %190, %cst_82 [1] : vector<24x32xf32> to vector<24xf32>
      %198 = vector.shape_cast %197 : vector<24xf32> to vector<24x1xf32>
      %cst_83 = arith.constant 3.200000e+01 : f32
      %199 = vector.broadcast %cst_83 : f32 to vector<24x1xf32>
      %200 = arith.divf %198, %199 : vector<24x1xf32>
      %201 = vector.broadcast %200 : vector<24x1xf32> to vector<24x32xf32>
      %202 = arith.subf %190, %201 : vector<24x32xf32>
      %203 = arith.mulf %202, %202 : vector<24x32xf32>
      %cst_84 = arith.constant dense<0.000000e+00> : vector<24xf32>
      %204 = vector.multi_reduction <add>, %203, %cst_84 [1] : vector<24x32xf32> to vector<24xf32>
      %205 = vector.shape_cast %204 : vector<24xf32> to vector<24x1xf32>
      %cst_85 = arith.constant 3.200000e+01 : f32
      %206 = vector.broadcast %cst_85 : f32 to vector<24x1xf32>
      %207 = arith.divf %205, %206 : vector<24x1xf32>
      %208 = vector.broadcast %200 : vector<24x1xf32> to vector<24x32xf32>
      %209 = arith.subf %190, %208 : vector<24x32xf32>
      %cst_86 = arith.constant 9.99999997E-7 : f32
      %210 = vector.broadcast %cst_86 : f32 to vector<24x1xf32>
      %211 = arith.addf %207, %210 : vector<24x1xf32>
      %212 = math.rsqrt %211 : vector<24x1xf32>
      %213 = vector.broadcast %212 : vector<24x1xf32> to vector<24x32xf32>
      %214 = arith.mulf %209, %213 : vector<24x32xf32>
      %215 = vector.broadcast %195 : vector<1x32xf32> to vector<24x32xf32>
      %216 = arith.mulf %214, %215 : vector<24x32xf32>
      %217 = vector.broadcast %196 : vector<1x32xf32> to vector<24x32xf32>
      %218 = arith.addf %216, %217 : vector<24x32xf32>
      %219 = vector.extract_strided_slice %218 {offsets = [16, 0], sizes = [1, 32], strides = [1, 1]} : vector<24x32xf32> to vector<1x32xf32>
      %c0_87 = arith.constant 0 : index
      %c0_88 = arith.constant 0 : index
      %220 = vector.load %arg8[%c0_87, %c0_88] : memref<128x32xbf16, #tpu.memory_space<vmem>>, vector<128x32xbf16>
      %c0_89 = arith.constant 0 : index
      %c0_90 = arith.constant 0 : index
      %221 = vector.load %arg9[%c0_89, %c0_90] : memref<128x32xbf16, #tpu.memory_space<vmem>>, vector<128x32xbf16>
      %222 = arith.truncf %219 : vector<1x32xf32> to vector<1x32xbf16>
      %c0_91 = arith.constant 0 : index
      %c0_92 = arith.constant 0 : index
      %223 = vector.load %arg10[%c0_91, %c0_92] : memref<32x32xbf16, #tpu.memory_space<vmem>>, vector<32x32xbf16>
      %cst_93 = arith.constant dense<0.000000e+00> : vector<1x32xf32>
      %224 = tpu.matmul %222, %223, %cst_93 {dimension_numbers = #tpu.dot_dimension_numbers<[1], [0], [0], [1], [0, 0, 1, 1], [], []>} : vector<1x32xbf16>, vector<32x32xbf16>, vector<1x32xf32> -> vector<1x32xf32>
      %225 = tpu.iota {dimensions = array<i32: 1>} : vector<1x128xi32>
      %c8_i32 = arith.constant 8 : i32
      %226 = vector.broadcast %c8_i32 : i32 to vector<1x128xi32>
      %227 = arith.cmpi slt, %225, %226 : vector<1x128xi32>
      %cst_94 = arith.constant 0.000000e+00 : f32
      %228 = vector.broadcast %cst_94 : f32 to vector<1x128xf32>
      %229 = vector.extract_strided_slice %224 {offsets = [0, 0], sizes = [1, 8], strides = [1, 1]} : vector<1x32xf32> to vector<1x8xf32>
      %230 = arith.truncf %229 : vector<1x8xf32> to vector<1x8xbf16>
      %231 = vector.extract_strided_slice %220 {offsets = [0, 0], sizes = [128, 8], strides = [1, 1]} : vector<128x32xbf16> to vector<128x8xbf16>
      %232 = vector.extract_strided_slice %221 {offsets = [0, 0], sizes = [128, 8], strides = [1, 1]} : vector<128x32xbf16> to vector<128x8xbf16>
      %cst_95 = arith.constant dense<0.000000e+00> : vector<1x128xf32>
      %233 = tpu.matmul %230, %231, %cst_95 {dimension_numbers = #tpu.dot_dimension_numbers<[1], [1], [0], [0], [0, 0, 1, 0], [], []>} : vector<1x8xbf16>, vector<128x8xbf16>, vector<1x128xf32> -> vector<1x128xf32>
      %cst_96 = arith.constant -1.000000e+30 : f32
      %234 = vector.broadcast %cst_96 : f32 to vector<1x128xf32>
      %235 = arith.select %227, %233, %234 : vector<1x128xi1>, vector<1x128xf32>
      %cst_97 = arith.constant dense<0xFF800000> : vector<1xf32>
      %236 = vector.multi_reduction <maximumf>, %235, %cst_97 [1] : vector<1x128xf32> to vector<1xf32>
      %237 = vector.shape_cast %236 : vector<1xf32> to vector<1x1xf32>
      %238 = vector.broadcast %237 : vector<1x1xf32> to vector<1x128xf32>
      %239 = arith.subf %235, %238 : vector<1x128xf32>
      %240 = math.exp %239 : vector<1x128xf32>
      %cst_98 = arith.constant dense<0.000000e+00> : vector<1xf32>
      %241 = vector.multi_reduction <add>, %240, %cst_98 [1] : vector<1x128xf32> to vector<1xf32>
      %242 = vector.shape_cast %241 : vector<1xf32> to vector<1x1xf32>
      %243 = vector.broadcast %242 : vector<1x1xf32> to vector<1x128xf32>
      %244 = arith.divf %240, %243 : vector<1x128xf32>
      %245 = arith.addf %228, %244 : vector<1x128xf32>
      %246 = arith.truncf %244 : vector<1x128xf32> to vector<1x128xbf16>
      %cst_99 = arith.constant dense<0.000000e+00> : vector<1x8xf32>
      %247 = tpu.matmul %246, %232, %cst_99 {dimension_numbers = #tpu.dot_dimension_numbers<[1], [0], [0], [1], [0, 0, 1, 1], [], []>} : vector<1x128xbf16>, vector<128x8xbf16>, vector<1x8xf32> -> vector<1x8xf32>
      %cst_100 = arith.constant dense<0.000000e+00> : vector<8xf32>
      %248 = vector.multi_reduction <add>, %247, %cst_100 [0] : vector<1x8xf32> to vector<8xf32>
      %249 = vector.shape_cast %248 : vector<8xf32> to vector<1x8xf32>
      %cst_101 = arith.constant 1.000000e+00 : f32
      %250 = vector.broadcast %cst_101 : f32 to vector<1x8xf32>
      %251 = arith.divf %249, %250 : vector<1x8xf32>
      %252 = vector.extract_strided_slice %224 {offsets = [0, 8], sizes = [1, 8], strides = [1, 1]} : vector<1x32xf32> to vector<1x8xf32>
      %253 = arith.truncf %252 : vector<1x8xf32> to vector<1x8xbf16>
      %254 = vector.extract_strided_slice %220 {offsets = [0, 8], sizes = [128, 8], strides = [1, 1]} : vector<128x32xbf16> to vector<128x8xbf16>
      %255 = vector.extract_strided_slice %221 {offsets = [0, 8], sizes = [128, 8], strides = [1, 1]} : vector<128x32xbf16> to vector<128x8xbf16>
      %cst_102 = arith.constant dense<0.000000e+00> : vector<1x128xf32>
      %256 = tpu.matmul %253, %254, %cst_102 {dimension_numbers = #tpu.dot_dimension_numbers<[1], [1], [0], [0], [0, 0, 1, 0], [], []>} : vector<1x8xbf16>, vector<128x8xbf16>, vector<1x128xf32> -> vector<1x128xf32>
      %cst_103 = arith.constant -1.000000e+30 : f32
      %257 = vector.broadcast %cst_103 : f32 to vector<1x128xf32>
      %258 = arith.select %227, %256, %257 : vector<1x128xi1>, vector<1x128xf32>
      %cst_104 = arith.constant dense<0xFF800000> : vector<1xf32>
      %259 = vector.multi_reduction <maximumf>, %258, %cst_104 [1] : vector<1x128xf32> to vector<1xf32>
      %260 = vector.shape_cast %259 : vector<1xf32> to vector<1x1xf32>
      %261 = vector.broadcast %260 : vector<1x1xf32> to vector<1x128xf32>
      %262 = arith.subf %258, %261 : vector<1x128xf32>
      %263 = math.exp %262 : vector<1x128xf32>
      %cst_105 = arith.constant dense<0.000000e+00> : vector<1xf32>
      %264 = vector.multi_reduction <add>, %263, %cst_105 [1] : vector<1x128xf32> to vector<1xf32>
      %265 = vector.shape_cast %264 : vector<1xf32> to vector<1x1xf32>
      %266 = vector.broadcast %265 : vector<1x1xf32> to vector<1x128xf32>
      %267 = arith.divf %263, %266 : vector<1x128xf32>
      %268 = arith.addf %245, %267 : vector<1x128xf32>
      %269 = arith.truncf %267 : vector<1x128xf32> to vector<1x128xbf16>
      %cst_106 = arith.constant dense<0.000000e+00> : vector<1x8xf32>
      %270 = tpu.matmul %269, %255, %cst_106 {dimension_numbers = #tpu.dot_dimension_numbers<[1], [0], [0], [1], [0, 0, 1, 1], [], []>} : vector<1x128xbf16>, vector<128x8xbf16>, vector<1x8xf32> -> vector<1x8xf32>
      %cst_107 = arith.constant dense<0.000000e+00> : vector<8xf32>
      %271 = vector.multi_reduction <add>, %270, %cst_107 [0] : vector<1x8xf32> to vector<8xf32>
      %272 = vector.shape_cast %271 : vector<8xf32> to vector<1x8xf32>
      %cst_108 = arith.constant 1.000000e+00 : f32
      %273 = vector.broadcast %cst_108 : f32 to vector<1x8xf32>
      %274 = arith.divf %272, %273 : vector<1x8xf32>
      %275 = vector.extract_strided_slice %224 {offsets = [0, 16], sizes = [1, 8], strides = [1, 1]} : vector<1x32xf32> to vector<1x8xf32>
      %276 = arith.truncf %275 : vector<1x8xf32> to vector<1x8xbf16>
      %277 = vector.extract_strided_slice %220 {offsets = [0, 16], sizes = [128, 8], strides = [1, 1]} : vector<128x32xbf16> to vector<128x8xbf16>
      %278 = vector.extract_strided_slice %221 {offsets = [0, 16], sizes = [128, 8], strides = [1, 1]} : vector<128x32xbf16> to vector<128x8xbf16>
      %cst_109 = arith.constant dense<0.000000e+00> : vector<1x128xf32>
      %279 = tpu.matmul %276, %277, %cst_109 {dimension_numbers = #tpu.dot_dimension_numbers<[1], [1], [0], [0], [0, 0, 1, 0], [], []>} : vector<1x8xbf16>, vector<128x8xbf16>, vector<1x128xf32> -> vector<1x128xf32>
      %cst_110 = arith.constant -1.000000e+30 : f32
      %280 = vector.broadcast %cst_110 : f32 to vector<1x128xf32>
      %281 = arith.select %227, %279, %280 : vector<1x128xi1>, vector<1x128xf32>
      %cst_111 = arith.constant dense<0xFF800000> : vector<1xf32>
      %282 = vector.multi_reduction <maximumf>, %281, %cst_111 [1] : vector<1x128xf32> to vector<1xf32>
      %283 = vector.shape_cast %282 : vector<1xf32> to vector<1x1xf32>
      %284 = vector.broadcast %283 : vector<1x1xf32> to vector<1x128xf32>
      %285 = arith.subf %281, %284 : vector<1x128xf32>
      %286 = math.exp %285 : vector<1x128xf32>
      %cst_112 = arith.constant dense<0.000000e+00> : vector<1xf32>
      %287 = vector.multi_reduction <add>, %286, %cst_112 [1] : vector<1x128xf32> to vector<1xf32>
      %288 = vector.shape_cast %287 : vector<1xf32> to vector<1x1xf32>
      %289 = vector.broadcast %288 : vector<1x1xf32> to vector<1x128xf32>
      %290 = arith.divf %286, %289 : vector<1x128xf32>
      %291 = arith.addf %268, %290 : vector<1x128xf32>
      %292 = arith.truncf %290 : vector<1x128xf32> to vector<1x128xbf16>
      %cst_113 = arith.constant dense<0.000000e+00> : vector<1x8xf32>
      %293 = tpu.matmul %292, %278, %cst_113 {dimension_numbers = #tpu.dot_dimension_numbers<[1], [0], [0], [1], [0, 0, 1, 1], [], []>} : vector<1x128xbf16>, vector<128x8xbf16>, vector<1x8xf32> -> vector<1x8xf32>
      %cst_114 = arith.constant dense<0.000000e+00> : vector<8xf32>
      %294 = vector.multi_reduction <add>, %293, %cst_114 [0] : vector<1x8xf32> to vector<8xf32>
      %295 = vector.shape_cast %294 : vector<8xf32> to vector<1x8xf32>
      %cst_115 = arith.constant 1.000000e+00 : f32
      %296 = vector.broadcast %cst_115 : f32 to vector<1x8xf32>
      %297 = arith.divf %295, %296 : vector<1x8xf32>
      %298 = vector.extract_strided_slice %224 {offsets = [0, 24], sizes = [1, 8], strides = [1, 1]} : vector<1x32xf32> to vector<1x8xf32>
      %299 = arith.truncf %298 : vector<1x8xf32> to vector<1x8xbf16>
      %300 = vector.extract_strided_slice %220 {offsets = [0, 24], sizes = [128, 8], strides = [1, 1]} : vector<128x32xbf16> to vector<128x8xbf16>
      %301 = vector.extract_strided_slice %221 {offsets = [0, 24], sizes = [128, 8], strides = [1, 1]} : vector<128x32xbf16> to vector<128x8xbf16>
      %cst_116 = arith.constant dense<0.000000e+00> : vector<1x128xf32>
      %302 = tpu.matmul %299, %300, %cst_116 {dimension_numbers = #tpu.dot_dimension_numbers<[1], [1], [0], [0], [0, 0, 1, 0], [], []>} : vector<1x8xbf16>, vector<128x8xbf16>, vector<1x128xf32> -> vector<1x128xf32>
      %cst_117 = arith.constant -1.000000e+30 : f32
      %303 = vector.broadcast %cst_117 : f32 to vector<1x128xf32>
      %304 = arith.select %227, %302, %303 : vector<1x128xi1>, vector<1x128xf32>
      %cst_118 = arith.constant dense<0xFF800000> : vector<1xf32>
      %305 = vector.multi_reduction <maximumf>, %304, %cst_118 [1] : vector<1x128xf32> to vector<1xf32>
      %306 = vector.shape_cast %305 : vector<1xf32> to vector<1x1xf32>
      %307 = vector.broadcast %306 : vector<1x1xf32> to vector<1x128xf32>
      %308 = arith.subf %304, %307 : vector<1x128xf32>
      %309 = math.exp %308 : vector<1x128xf32>
      %cst_119 = arith.constant dense<0.000000e+00> : vector<1xf32>
      %310 = vector.multi_reduction <add>, %309, %cst_119 [1] : vector<1x128xf32> to vector<1xf32>
      %311 = vector.shape_cast %310 : vector<1xf32> to vector<1x1xf32>
      %312 = vector.broadcast %311 : vector<1x1xf32> to vector<1x128xf32>
      %313 = arith.divf %309, %312 : vector<1x128xf32>
      %314 = arith.addf %291, %313 : vector<1x128xf32>
      %315 = arith.truncf %313 : vector<1x128xf32> to vector<1x128xbf16>
      %cst_120 = arith.constant dense<0.000000e+00> : vector<1x8xf32>
      %316 = tpu.matmul %315, %301, %cst_120 {dimension_numbers = #tpu.dot_dimension_numbers<[1], [0], [0], [1], [0, 0, 1, 1], [], []>} : vector<1x128xbf16>, vector<128x8xbf16>, vector<1x8xf32> -> vector<1x8xf32>
      %cst_121 = arith.constant dense<0.000000e+00> : vector<8xf32>
      %317 = vector.multi_reduction <add>, %316, %cst_121 [0] : vector<1x8xf32> to vector<8xf32>
      %318 = vector.shape_cast %317 : vector<8xf32> to vector<1x8xf32>
      %cst_122 = arith.constant 1.000000e+00 : f32
      %319 = vector.broadcast %cst_122 : f32 to vector<1x8xf32>
      %320 = arith.divf %318, %319 : vector<1x8xf32>
      %321 = tpu.concatenate %251, %274, %297, %320 in 1 : vector<1x8xf32>, vector<1x8xf32>, vector<1x8xf32>, vector<1x8xf32> -> vector<1x32xf32>
      %322 = arith.truncf %321 : vector<1x32xf32> to vector<1x32xbf16>
      %c0_123 = arith.constant 0 : index
      %c0_124 = arith.constant 0 : index
      %323 = vector.load %arg11[%c0_123, %c0_124] : memref<32x128xbf16, #tpu.memory_space<vmem>>, vector<32x128xbf16>
      %cst_125 = arith.constant dense<0.000000e+00> : vector<1x128xf32>
      %324 = tpu.matmul %322, %323, %cst_125 {dimension_numbers = #tpu.dot_dimension_numbers<[1], [0], [0], [1], [0, 0, 1, 1], [], []>} : vector<1x32xbf16>, vector<32x128xbf16>, vector<1x128xf32> -> vector<1x128xf32>
      %c0_126 = arith.constant 0 : index
      %c0_127 = arith.constant 0 : index
      %325 = vector.load %arg12[%c0_126, %c0_127] : memref<1x128xf32, #tpu.memory_space<vmem>>, vector<1x128xf32>
      %326 = arith.addf %324, %325 : vector<1x128xf32>
      %cst_128 = arith.constant 2.500000e-01 : f32
      %327 = vector.broadcast %cst_128 : f32 to vector<1x128xf32>
      %328 = arith.mulf %314, %327 : vector<1x128xf32>
      %329 = vector.extract_strided_slice %218 {offsets = [0, 0], sizes = [16, 32], strides = [1, 1]} : vector<24x32xf32> to vector<16x32xf32>
      %c0_129 = arith.constant 0 : index
      %c0_130 = arith.constant 0 : index
      %330 = vector.load %arg13[%c0_129, %c0_130] : memref<128x32xbf16, #tpu.memory_space<vmem>>, vector<128x32xbf16>
      %c0_131 = arith.constant 0 : index
      %c0_132 = arith.constant 0 : index
      %331 = vector.load %arg14[%c0_131, %c0_132] : memref<128x32xbf16, #tpu.memory_space<vmem>>, vector<128x32xbf16>
      %332 = arith.truncf %329 : vector<16x32xf32> to vector<16x32xbf16>
      %c0_133 = arith.constant 0 : index
      %c0_134 = arith.constant 0 : index
      %333 = vector.load %arg15[%c0_133, %c0_134] : memref<32x32xbf16, #tpu.memory_space<vmem>>, vector<32x32xbf16>
      %cst_135 = arith.constant dense<0.000000e+00> : vector<16x32xf32>
      %334 = tpu.matmul %332, %333, %cst_135 {dimension_numbers = #tpu.dot_dimension_numbers<[1], [0], [0], [1], [0, 0, 1, 1], [], []>} : vector<16x32xbf16>, vector<32x32xbf16>, vector<16x32xf32> -> vector<16x32xf32>
      %335 = tpu.iota {dimensions = array<i32: 1>} : vector<16x128xi32>
      %c16_i32 = arith.constant 16 : i32
      %336 = vector.broadcast %c16_i32 : i32 to vector<16x128xi32>
      %337 = arith.cmpi slt, %335, %336 : vector<16x128xi32>
      %cst_136 = arith.constant 0.000000e+00 : f32
      %338 = vector.broadcast %cst_136 : f32 to vector<16x128xf32>
      %339 = vector.extract_strided_slice %334 {offsets = [0, 0], sizes = [16, 8], strides = [1, 1]} : vector<16x32xf32> to vector<16x8xf32>
      %340 = arith.truncf %339 : vector<16x8xf32> to vector<16x8xbf16>
      %341 = vector.extract_strided_slice %330 {offsets = [0, 0], sizes = [128, 8], strides = [1, 1]} : vector<128x32xbf16> to vector<128x8xbf16>
      %342 = vector.extract_strided_slice %331 {offsets = [0, 0], sizes = [128, 8], strides = [1, 1]} : vector<128x32xbf16> to vector<128x8xbf16>
      %cst_137 = arith.constant dense<0.000000e+00> : vector<16x128xf32>
      %343 = tpu.matmul %340, %341, %cst_137 {dimension_numbers = #tpu.dot_dimension_numbers<[1], [1], [0], [0], [0, 0, 1, 0], [], []>} : vector<16x8xbf16>, vector<128x8xbf16>, vector<16x128xf32> -> vector<16x128xf32>
      %cst_138 = arith.constant -1.000000e+30 : f32
      %344 = vector.broadcast %cst_138 : f32 to vector<16x128xf32>
      %345 = arith.select %337, %343, %344 : vector<16x128xi1>, vector<16x128xf32>
      %cst_139 = arith.constant dense<0xFF800000> : vector<16xf32>
      %346 = vector.multi_reduction <maximumf>, %345, %cst_139 [1] : vector<16x128xf32> to vector<16xf32>
      %347 = vector.shape_cast %346 : vector<16xf32> to vector<16x1xf32>
      %348 = vector.broadcast %347 : vector<16x1xf32> to vector<16x128xf32>
      %349 = arith.subf %345, %348 : vector<16x128xf32>
      %350 = math.exp %349 : vector<16x128xf32>
      %cst_140 = arith.constant dense<0.000000e+00> : vector<16xf32>
      %351 = vector.multi_reduction <add>, %350, %cst_140 [1] : vector<16x128xf32> to vector<16xf32>
      %352 = vector.shape_cast %351 : vector<16xf32> to vector<16x1xf32>
      %353 = vector.broadcast %352 : vector<16x1xf32> to vector<16x128xf32>
      %354 = arith.divf %350, %353 : vector<16x128xf32>
      %355 = arith.addf %338, %354 : vector<16x128xf32>
      %356 = arith.truncf %354 : vector<16x128xf32> to vector<16x128xbf16>
      %cst_141 = arith.constant dense<0.000000e+00> : vector<16x8xf32>
      %357 = tpu.matmul %356, %342, %cst_141 {dimension_numbers = #tpu.dot_dimension_numbers<[1], [0], [0], [1], [0, 0, 1, 1], [], []>} : vector<16x128xbf16>, vector<128x8xbf16>, vector<16x8xf32> -> vector<16x8xf32>
      %cst_142 = arith.constant dense<0.000000e+00> : vector<8xf32>
      %358 = vector.multi_reduction <add>, %357, %cst_142 [0] : vector<16x8xf32> to vector<8xf32>
      %359 = vector.shape_cast %358 : vector<8xf32> to vector<1x8xf32>
      %cst_143 = arith.constant 1.600000e+01 : f32
      %360 = vector.broadcast %cst_143 : f32 to vector<1x8xf32>
      %361 = arith.divf %359, %360 : vector<1x8xf32>
      %362 = vector.extract_strided_slice %334 {offsets = [0, 8], sizes = [16, 8], strides = [1, 1]} : vector<16x32xf32> to vector<16x8xf32>
      %363 = arith.truncf %362 : vector<16x8xf32> to vector<16x8xbf16>
      %364 = vector.extract_strided_slice %330 {offsets = [0, 8], sizes = [128, 8], strides = [1, 1]} : vector<128x32xbf16> to vector<128x8xbf16>
      %365 = vector.extract_strided_slice %331 {offsets = [0, 8], sizes = [128, 8], strides = [1, 1]} : vector<128x32xbf16> to vector<128x8xbf16>
      %cst_144 = arith.constant dense<0.000000e+00> : vector<16x128xf32>
      %366 = tpu.matmul %363, %364, %cst_144 {dimension_numbers = #tpu.dot_dimension_numbers<[1], [1], [0], [0], [0, 0, 1, 0], [], []>} : vector<16x8xbf16>, vector<128x8xbf16>, vector<16x128xf32> -> vector<16x128xf32>
      %cst_145 = arith.constant -1.000000e+30 : f32
      %367 = vector.broadcast %cst_145 : f32 to vector<16x128xf32>
      %368 = arith.select %337, %366, %367 : vector<16x128xi1>, vector<16x128xf32>
      %cst_146 = arith.constant dense<0xFF800000> : vector<16xf32>
      %369 = vector.multi_reduction <maximumf>, %368, %cst_146 [1] : vector<16x128xf32> to vector<16xf32>
      %370 = vector.shape_cast %369 : vector<16xf32> to vector<16x1xf32>
      %371 = vector.broadcast %370 : vector<16x1xf32> to vector<16x128xf32>
      %372 = arith.subf %368, %371 : vector<16x128xf32>
      %373 = math.exp %372 : vector<16x128xf32>
      %cst_147 = arith.constant dense<0.000000e+00> : vector<16xf32>
      %374 = vector.multi_reduction <add>, %373, %cst_147 [1] : vector<16x128xf32> to vector<16xf32>
      %375 = vector.shape_cast %374 : vector<16xf32> to vector<16x1xf32>
      %376 = vector.broadcast %375 : vector<16x1xf32> to vector<16x128xf32>
      %377 = arith.divf %373, %376 : vector<16x128xf32>
      %378 = arith.addf %355, %377 : vector<16x128xf32>
      %379 = arith.truncf %377 : vector<16x128xf32> to vector<16x128xbf16>
      %cst_148 = arith.constant dense<0.000000e+00> : vector<16x8xf32>
      %380 = tpu.matmul %379, %365, %cst_148 {dimension_numbers = #tpu.dot_dimension_numbers<[1], [0], [0], [1], [0, 0, 1, 1], [], []>} : vector<16x128xbf16>, vector<128x8xbf16>, vector<16x8xf32> -> vector<16x8xf32>
      %cst_149 = arith.constant dense<0.000000e+00> : vector<8xf32>
      %381 = vector.multi_reduction <add>, %380, %cst_149 [0] : vector<16x8xf32> to vector<8xf32>
      %382 = vector.shape_cast %381 : vector<8xf32> to vector<1x8xf32>
      %cst_150 = arith.constant 1.600000e+01 : f32
      %383 = vector.broadcast %cst_150 : f32 to vector<1x8xf32>
      %384 = arith.divf %382, %383 : vector<1x8xf32>
      %385 = vector.extract_strided_slice %334 {offsets = [0, 16], sizes = [16, 8], strides = [1, 1]} : vector<16x32xf32> to vector<16x8xf32>
      %386 = arith.truncf %385 : vector<16x8xf32> to vector<16x8xbf16>
      %387 = vector.extract_strided_slice %330 {offsets = [0, 16], sizes = [128, 8], strides = [1, 1]} : vector<128x32xbf16> to vector<128x8xbf16>
      %388 = vector.extract_strided_slice %331 {offsets = [0, 16], sizes = [128, 8], strides = [1, 1]} : vector<128x32xbf16> to vector<128x8xbf16>
      %cst_151 = arith.constant dense<0.000000e+00> : vector<16x128xf32>
      %389 = tpu.matmul %386, %387, %cst_151 {dimension_numbers = #tpu.dot_dimension_numbers<[1], [1], [0], [0], [0, 0, 1, 0], [], []>} : vector<16x8xbf16>, vector<128x8xbf16>, vector<16x128xf32> -> vector<16x128xf32>
      %cst_152 = arith.constant -1.000000e+30 : f32
      %390 = vector.broadcast %cst_152 : f32 to vector<16x128xf32>
      %391 = arith.select %337, %389, %390 : vector<16x128xi1>, vector<16x128xf32>
      %cst_153 = arith.constant dense<0xFF800000> : vector<16xf32>
      %392 = vector.multi_reduction <maximumf>, %391, %cst_153 [1] : vector<16x128xf32> to vector<16xf32>
      %393 = vector.shape_cast %392 : vector<16xf32> to vector<16x1xf32>
      %394 = vector.broadcast %393 : vector<16x1xf32> to vector<16x128xf32>
      %395 = arith.subf %391, %394 : vector<16x128xf32>
      %396 = math.exp %395 : vector<16x128xf32>
      %cst_154 = arith.constant dense<0.000000e+00> : vector<16xf32>
      %397 = vector.multi_reduction <add>, %396, %cst_154 [1] : vector<16x128xf32> to vector<16xf32>
      %398 = vector.shape_cast %397 : vector<16xf32> to vector<16x1xf32>
      %399 = vector.broadcast %398 : vector<16x1xf32> to vector<16x128xf32>
      %400 = arith.divf %396, %399 : vector<16x128xf32>
      %401 = arith.addf %378, %400 : vector<16x128xf32>
      %402 = arith.truncf %400 : vector<16x128xf32> to vector<16x128xbf16>
      %cst_155 = arith.constant dense<0.000000e+00> : vector<16x8xf32>
      %403 = tpu.matmul %402, %388, %cst_155 {dimension_numbers = #tpu.dot_dimension_numbers<[1], [0], [0], [1], [0, 0, 1, 1], [], []>} : vector<16x128xbf16>, vector<128x8xbf16>, vector<16x8xf32> -> vector<16x8xf32>
      %cst_156 = arith.constant dense<0.000000e+00> : vector<8xf32>
      %404 = vector.multi_reduction <add>, %403, %cst_156 [0] : vector<16x8xf32> to vector<8xf32>
      %405 = vector.shape_cast %404 : vector<8xf32> to vector<1x8xf32>
      %cst_157 = arith.constant 1.600000e+01 : f32
      %406 = vector.broadcast %cst_157 : f32 to vector<1x8xf32>
      %407 = arith.divf %405, %406 : vector<1x8xf32>
      %408 = vector.extract_strided_slice %334 {offsets = [0, 24], sizes = [16, 8], strides = [1, 1]} : vector<16x32xf32> to vector<16x8xf32>
      %409 = arith.truncf %408 : vector<16x8xf32> to vector<16x8xbf16>
      %410 = vector.extract_strided_slice %330 {offsets = [0, 24], sizes = [128, 8], strides = [1, 1]} : vector<128x32xbf16> to vector<128x8xbf16>
      %411 = vector.extract_strided_slice %331 {offsets = [0, 24], sizes = [128, 8], strides = [1, 1]} : vector<128x32xbf16> to vector<128x8xbf16>
      %cst_158 = arith.constant dense<0.000000e+00> : vector<16x128xf32>
      %412 = tpu.matmul %409, %410, %cst_158 {dimension_numbers = #tpu.dot_dimension_numbers<[1], [1], [0], [0], [0, 0, 1, 0], [], []>} : vector<16x8xbf16>, vector<128x8xbf16>, vector<16x128xf32> -> vector<16x128xf32>
      %cst_159 = arith.constant -1.000000e+30 : f32
      %413 = vector.broadcast %cst_159 : f32 to vector<16x128xf32>
      %414 = arith.select %337, %412, %413 : vector<16x128xi1>, vector<16x128xf32>
      %cst_160 = arith.constant dense<0xFF800000> : vector<16xf32>
      %415 = vector.multi_reduction <maximumf>, %414, %cst_160 [1] : vector<16x128xf32> to vector<16xf32>
      %416 = vector.shape_cast %415 : vector<16xf32> to vector<16x1xf32>
      %417 = vector.broadcast %416 : vector<16x1xf32> to vector<16x128xf32>
      %418 = arith.subf %414, %417 : vector<16x128xf32>
      %419 = math.exp %418 : vector<16x128xf32>
      %cst_161 = arith.constant dense<0.000000e+00> : vector<16xf32>
      %420 = vector.multi_reduction <add>, %419, %cst_161 [1] : vector<16x128xf32> to vector<16xf32>
      %421 = vector.shape_cast %420 : vector<16xf32> to vector<16x1xf32>
      %422 = vector.broadcast %421 : vector<16x1xf32> to vector<16x128xf32>
      %423 = arith.divf %419, %422 : vector<16x128xf32>
      %424 = arith.addf %401, %423 : vector<16x128xf32>
      %425 = arith.truncf %423 : vector<16x128xf32> to vector<16x128xbf16>
      %cst_162 = arith.constant dense<0.000000e+00> : vector<16x8xf32>
      %426 = tpu.matmul %425, %411, %cst_162 {dimension_numbers = #tpu.dot_dimension_numbers<[1], [0], [0], [1], [0, 0, 1, 1], [], []>} : vector<16x128xbf16>, vector<128x8xbf16>, vector<16x8xf32> -> vector<16x8xf32>
      %cst_163 = arith.constant dense<0.000000e+00> : vector<8xf32>
      %427 = vector.multi_reduction <add>, %426, %cst_163 [0] : vector<16x8xf32> to vector<8xf32>
      %428 = vector.shape_cast %427 : vector<8xf32> to vector<1x8xf32>
      %cst_164 = arith.constant 1.600000e+01 : f32
      %429 = vector.broadcast %cst_164 : f32 to vector<1x8xf32>
      %430 = arith.divf %428, %429 : vector<1x8xf32>
      %431 = tpu.concatenate %361, %384, %407, %430 in 1 : vector<1x8xf32>, vector<1x8xf32>, vector<1x8xf32>, vector<1x8xf32> -> vector<1x32xf32>
      %432 = arith.truncf %431 : vector<1x32xf32> to vector<1x32xbf16>
      %c0_165 = arith.constant 0 : index
      %c0_166 = arith.constant 0 : index
      %433 = vector.load %arg16[%c0_165, %c0_166] : memref<32x128xbf16, #tpu.memory_space<vmem>>, vector<32x128xbf16>
      %cst_167 = arith.constant dense<0.000000e+00> : vector<1x128xf32>
      %434 = tpu.matmul %432, %433, %cst_167 {dimension_numbers = #tpu.dot_dimension_numbers<[1], [0], [0], [1], [0, 0, 1, 1], [], []>} : vector<1x32xbf16>, vector<32x128xbf16>, vector<1x128xf32> -> vector<1x128xf32>
      %c0_168 = arith.constant 0 : index
      %c0_169 = arith.constant 0 : index
      %435 = vector.load %arg17[%c0_168, %c0_169] : memref<1x128xf32, #tpu.memory_space<vmem>>, vector<1x128xf32>
      %436 = arith.addf %434, %435 : vector<1x128xf32>
      %cst_170 = arith.constant 2.500000e-01 : f32
      %437 = vector.broadcast %cst_170 : f32 to vector<16x128xf32>
      %438 = arith.mulf %424, %437 : vector<16x128xf32>
      %439 = arith.addf %326, %436 : vector<1x128xf32>
      %c0_171 = arith.constant 0 : index
      %c0_172 = arith.constant 0 : index
      %c0_173 = arith.constant 0 : index
      %440 = vector.load %arg30[%c0_171, %c0_172, %c0_173] : memref<1x1x128xf32, #tpu.memory_space<vmem>>, vector<1x1x128xf32>
      %441 = vector.shape_cast %440 : vector<1x1x128xf32> to vector<1x128xf32>
      %442 = vector.shape_cast %439 : vector<1x128xf32> to vector<1x1x128xf32>
      tpu.vector_store %arg30[%c0_171, %c0_172, %c0_173], %442 {strides = array<i32>} : memref<1x1x128xf32, #tpu.memory_space<vmem>>, vector<1x1x128xf32>,
      %c0_174 = arith.constant 0 : index
      %c0_175 = arith.constant 0 : index
      %c0_176 = arith.constant 0 : index
      %443 = vector.load %arg31[%c0_174, %c0_175, %c0_176] : memref<1x1x128xf32, #tpu.memory_space<vmem>>, vector<1x1x128xf32>
      %444 = vector.shape_cast %443 : vector<1x1x128xf32> to vector<1x128xf32>
      %445 = vector.shape_cast %328 : vector<1x128xf32> to vector<1x1x128xf32>
      tpu.vector_store %arg31[%c0_174, %c0_175, %c0_176], %445 {strides = array<i32>} : memref<1x1x128xf32, #tpu.memory_space<vmem>>, vector<1x1x128xf32>,
      %c0_177 = arith.constant 0 : index
      %c0_178 = arith.constant 0 : index
      %c0_179 = arith.constant 0 : index
      %446 = vector.load %arg32[%c0_177, %c0_178, %c0_179] : memref<1x16x128xf32, #tpu.memory_space<vmem>>, vector<1x16x128xf32>
      %447 = vector.shape_cast %446 : vector<1x16x128xf32> to vector<16x128xf32>
      %448 = vector.shape_cast %438 : vector<16x128xf32> to vector<1x16x128xf32>
      tpu.vector_store %arg32[%c0_177, %c0_178, %c0_179], %448 {strides = array<i32>} : memref<1x16x128xf32, #tpu.memory_space<vmem>>, vector<1x16x128xf32>,
    } else {
    }
    return
  }
  func.func @transform_0(%arg0: i32, %arg1: i32) -> (i32, i32, i32) {
    %c0_i32 = arith.constant 0 : i32
    %c0_i32_0 = arith.constant 0 : i32
    %c0_i32_1 = arith.constant 0 : i32
    return %arg0, %c0_i32, %c0_i32_0 : i32, i32, i32
  }
  func.func @transform_1(%arg0: i32, %arg1: i32) -> (i32, i32) {
    %c0_i32 = arith.constant 0 : i32
    %c0_i32_0 = arith.constant 0 : i32
    %c0_i32_1 = arith.constant 0 : i32
    return %c0_i32, %c0_i32_0 : i32, i32
  }
  func.func @transform_2(%arg0: i32, %arg1: i32) -> (i32, i32) {
    %c0_i32 = arith.constant 0 : i32
    %c0_i32_0 = arith.constant 0 : i32
    %c0_i32_1 = arith.constant 0 : i32
    return %c0_i32, %c0_i32_0 : i32, i32
  }
  func.func @transform_3(%arg0: i32, %arg1: i32) -> (i32, i32) {
    %c0_i32 = arith.constant 0 : i32
    %c0_i32_0 = arith.constant 0 : i32
    %c0_i32_1 = arith.constant 0 : i32
    return %c0_i32, %c0_i32_0 : i32, i32
  }
  func.func @transform_4(%arg0: i32, %arg1: i32) -> (i32, i32) {
    %c0_i32 = arith.constant 0 : i32
    %c0_i32_0 = arith.constant 0 : i32
    %c0_i32_1 = arith.constant 0 : i32
    return %c0_i32, %c0_i32_0 : i32, i32
  }
  func.func @transform_5(%arg0: i32, %arg1: i32) -> (i32, i32) {
    %c0_i32 = arith.constant 0 : i32
    %c0_i32_0 = arith.constant 0 : i32
    %c0_i32_1 = arith.constant 0 : i32
    return %c0_i32, %c0_i32_0 : i32, i32
  }
  func.func @transform_6(%arg0: i32, %arg1: i32) -> (i32, i32) {
    %c0_i32 = arith.constant 0 : i32
    %c0_i32_0 = arith.constant 0 : i32
    %c0_i32_1 = arith.constant 0 : i32
    return %c0_i32, %c0_i32_0 : i32, i32
  }
  func.func @transform_7(%arg0: i32, %arg1: i32) -> (i32, i32) {
    %c0_i32 = arith.constant 0 : i32
    %c0_i32_0 = arith.constant 0 : i32
    %c0_i32_1 = arith.constant 0 : i32
    return %c0_i32, %c0_i32_0 : i32, i32
  }
  func.func @transform_8(%arg0: i32, %arg1: i32) -> (i32, i32) {
    %c0_i32 = arith.constant 0 : i32
    %c0_i32_0 = arith.constant 0 : i32
    %c0_i32_1 = arith.constant 0 : i32
    return %c0_i32, %c0_i32_0 : i32, i32
  }
  func.func @transform_9(%arg0: i32, %arg1: i32) -> (i32, i32) {
    %c0_i32 = arith.constant 0 : i32
    %c0_i32_0 = arith.constant 0 : i32
    %c0_i32_1 = arith.constant 0 : i32
    return %c0_i32, %c0_i32_0 : i32, i32
  }
  func.func @transform_10(%arg0: i32, %arg1: i32) -> (i32, i32) {
    %c0_i32 = arith.constant 0 : i32
    %c0_i32_0 = arith.constant 0 : i32
    %c0_i32_1 = arith.constant 0 : i32
    return %c0_i32, %c0_i32_0 : i32, i32
  }
  func.func @transform_11(%arg0: i32, %arg1: i32) -> (i32, i32) {
    %c0_i32 = arith.constant 0 : i32
    %c0_i32_0 = arith.constant 0 : i32
    %c0_i32_1 = arith.constant 0 : i32
    return %c0_i32, %c0_i32_0 : i32, i32
  }
  func.func @transform_12(%arg0: i32, %arg1: i32) -> (i32, i32) {
    %c0_i32 = arith.constant 0 : i32
    %c0_i32_0 = arith.constant 0 : i32
    %c0_i32_1 = arith.constant 0 : i32
    return %c0_i32, %c0_i32_0 : i32, i32
  }
  func.func @transform_13(%arg0: i32, %arg1: i32) -> (i32, i32) {
    %c0_i32 = arith.constant 0 : i32
    %c0_i32_0 = arith.constant 0 : i32
    %c0_i32_1 = arith.constant 0 : i32
    return %c0_i32, %c0_i32_0 : i32, i32
  }
  func.func @transform_14(%arg0: i32, %arg1: i32) -> (i32, i32) {
    %c0_i32 = arith.constant 0 : i32
    %c0_i32_0 = arith.constant 0 : i32
    %c0_i32_1 = arith.constant 0 : i32
    return %c0_i32, %c0_i32_0 : i32, i32
  }
  func.func @transform_15(%arg0: i32, %arg1: i32) -> (i32, i32) {
    %c0_i32 = arith.constant 0 : i32
    %c0_i32_0 = arith.constant 0 : i32
    %c0_i32_1 = arith.constant 0 : i32
    return %c0_i32, %c0_i32_0 : i32, i32
  }
  func.func @transform_16(%arg0: i32, %arg1: i32) -> (i32, i32, i32) {
    %c0_i32 = arith.constant 0 : i32
    %c0_i32_0 = arith.constant 0 : i32
    %c0_i32_1 = arith.constant 0 : i32
    return %arg1, %c0_i32, %c0_i32_0 : i32, i32, i32
  }
  func.func @transform_17(%arg0: i32, %arg1: i32) -> (i32, i32, i32) {
    %c0_i32 = arith.constant 0 : i32
    %c0_i32_0 = arith.constant 0 : i32
    %c0_i32_1 = arith.constant 0 : i32
    return %arg1, %c0_i32, %c0_i32_0 : i32, i32, i32
  }
  func.func @transform_18(%arg0: i32, %arg1: i32) -> (i32, i32, i32) {
    %c0_i32 = arith.constant 0 : i32
    %c0_i32_0 = arith.constant 0 : i32
    %c0_i32_1 = arith.constant 0 : i32
    return %arg1, %c0_i32, %c0_i32_0 : i32, i32, i32
  }
  func.func @transform_19(%arg0: i32, %arg1: i32) -> (i32, i32, i32) {
    %c0_i32 = arith.constant 0 : i32
    %c0_i32_0 = arith.constant 0 : i32
    %c0_i32_1 = arith.constant 0 : i32
    return %arg1, %c0_i32, %c0_i32_0 : i32, i32, i32
  }
  func.func @transform_20(%arg0: i32, %arg1: i32) -> (i32, i32, i32) {
    %c0_i32 = arith.constant 0 : i32
    %c0_i32_0 = arith.constant 0 : i32
    %c0_i32_1 = arith.constant 0 : i32
    return %arg1, %c0_i32, %c0_i32_0 : i32, i32, i32
  }
  func.func @transform_21(%arg0: i32, %arg1: i32) -> (i32, i32, i32) {
    %c0_i32 = arith.constant 0 : i32
    %c0_i32_0 = arith.constant 0 : i32
    %c0_i32_1 = arith.constant 0 : i32
    return %arg1, %c0_i32, %c0_i32_0 : i32, i32, i32
  }
  func.func @transform_22(%arg0: i32, %arg1: i32) -> (i32, i32, i32) {
    %c0_i32 = arith.constant 0 : i32
    %c0_i32_0 = arith.constant 0 : i32
    %c0_i32_1 = arith.constant 0 : i32
    return %arg1, %c0_i32, %c0_i32_0 : i32, i32, i32
  }
  func.func @transform_23(%arg0: i32, %arg1: i32) -> (i32, i32, i32) {
    %c0_i32 = arith.constant 0 : i32
    %c0_i32_0 = arith.constant 0 : i32
    %c0_i32_1 = arith.constant 0 : i32
    return %arg1, %c0_i32, %c0_i32_0 : i32, i32, i32
  }
  func.func @transform_24(%arg0: i32, %arg1: i32) -> (i32, i32, i32) {
    %c0_i32 = arith.constant 0 : i32
    %c0_i32_0 = arith.constant 0 : i32
    %c0_i32_1 = arith.constant 0 : i32
    return %arg1, %c0_i32, %c0_i32_0 : i32, i32, i32
  }
  func.func @transform_25(%arg0: i32, %arg1: i32) -> (i32, i32, i32) {
    %c0_i32 = arith.constant 0 : i32
    %c0_i32_0 = arith.constant 0 : i32
    %c0_i32_1 = arith.constant 0 : i32
    return %arg1, %c0_i32, %c0_i32_0 : i32, i32, i32
  }
  func.func @transform_26(%arg0: i32, %arg1: i32) -> (i32, i32, i32) {
    %c0_i32 = arith.constant 0 : i32
    %c0_i32_0 = arith.constant 0 : i32
    %c0_i32_1 = arith.constant 0 : i32
    return %arg1, %c0_i32, %c0_i32_0 : i32, i32, i32
  }
  func.func @transform_27(%arg0: i32, %arg1: i32) -> (i32, i32, i32) {
    %c0_i32 = arith.constant 0 : i32
    %c0_i32_0 = arith.constant 0 : i32
    %c0_i32_1 = arith.constant 0 : i32
    return %arg1, %c0_i32, %c0_i32_0 : i32, i32, i32
  }
  func.func @transform_28(%arg0: i32, %arg1: i32) -> (i32, i32, i32) {
    %c0_i32 = arith.constant 0 : i32
    %c0_i32_0 = arith.constant 0 : i32
    %c0_i32_1 = arith.constant 0 : i32
    return %arg0, %c0_i32, %c0_i32_0 : i32, i32, i32
  }
  func.func @transform_29(%arg0: i32, %arg1: i32) -> (i32, i32, i32) {
    %c0_i32 = arith.constant 0 : i32
    %c0_i32_0 = arith.constant 0 : i32
    %c0_i32_1 = arith.constant 0 : i32
    return %arg0, %c0_i32, %c0_i32_0 : i32, i32, i32
  }
  func.func @transform_30(%arg0: i32, %arg1: i32) -> (i32, i32, i32) {
    %c0_i32 = arith.constant 0 : i32
    %c0_i32_0 = arith.constant 0 : i32
    %c0_i32_1 = arith.constant 0 : i32
    return %arg0, %c0_i32, %c0_i32_0 : i32, i32, i32
  }
}

module attributes {stable_mosaic.version = 11 : i64} {
  func.func @_cub_ct_kernel(%arg0: i32, %arg1: i32, %arg2: memref<1x16x128xbf16, #tpu.memory_space<vmem>>, %arg3: memref<128x32xbf16, #tpu.memory_space<vmem>>, %arg4: memref<1x32xf32, #tpu.memory_space<vmem>>, %arg5: memref<24x32xf32, #tpu.memory_space<vmem>>, %arg6: memref<1x32xf32, #tpu.memory_space<vmem>>, %arg7: memref<1x32xf32, #tpu.memory_space<vmem>>, %arg8: memref<128x32xbf16, #tpu.memory_space<vmem>>, %arg9: memref<128x32xbf16, #tpu.memory_space<vmem>>, %arg10: memref<32x32xbf16, #tpu.memory_space<vmem>>, %arg11: memref<32x128xbf16, #tpu.memory_space<vmem>>, %arg12: memref<1x128xf32, #tpu.memory_space<vmem>>, %arg13: memref<128x32xbf16, #tpu.memory_space<vmem>>, %arg14: memref<128x32xbf16, #tpu.memory_space<vmem>>, %arg15: memref<32x32xbf16, #tpu.memory_space<vmem>>, %arg16: memref<32x128xbf16, #tpu.memory_space<vmem>>, %arg17: memref<1x128xf32, #tpu.memory_space<vmem>>, %arg18: memref<1x1x32xf32, #tpu.memory_space<vmem>>, %arg19: memref<1x1x32xf32, #tpu.memory_space<vmem>>, %arg20: memref<1x32x96xbf16, #tpu.memory_space<vmem>>, %arg21: memref<1x1x96xf32, #tpu.memory_space<vmem>>, %arg22: memref<1x32x32xbf16, #tpu.memory_space<vmem>>, %arg23: memref<1x1x32xf32, #tpu.memory_space<vmem>>, %arg24: memref<1x1x32xf32, #tpu.memory_space<vmem>>, %arg25: memref<1x1x32xf32, #tpu.memory_space<vmem>>, %arg26: memref<1x32x128xbf16, #tpu.memory_space<vmem>>, %arg27: memref<1x1x128xf32, #tpu.memory_space<vmem>>, %arg28: memref<1x128x32xbf16, #tpu.memory_space<vmem>>, %arg29: memref<1x1x32xf32, #tpu.memory_space<vmem>>, %arg30: memref<1x1x128xf32, #tpu.memory_space<vmem>>, %arg31: memref<1x1x128xf32, #tpu.memory_space<vmem>>, %arg32: memref<1x16x128xf32, #tpu.memory_space<vmem>>, %arg33: memref<24x32xf32, #tpu.memory_space<vmem>>) attributes {dimension_semantics = [#tpu.dimension_semantics<parallel>, #tpu.dimension_semantics<arbitrary>], iteration_bounds = array<i64: 2, 2>, scalar_prefetch = 0 : i64, scratch_operands = 1 : i64, tpu.core_type = #tpu.core_type<tc>, window_params = [{transform_indices = @transform_0, window_bounds = array<i64: 1, 16, 128>}, {pipeline_mode = #tpu.pipeline_mode<synchronous>, transform_indices = @transform_1, window_bounds = array<i64: 128, 32>}, {pipeline_mode = #tpu.pipeline_mode<synchronous>, transform_indices = @transform_2, window_bounds = array<i64: 1, 32>}, {pipeline_mode = #tpu.pipeline_mode<synchronous>, transform_indices = @transform_3, window_bounds = array<i64: 24, 32>}, {pipeline_mode = #tpu.pipeline_mode<synchronous>, transform_indices = @transform_4, window_bounds = array<i64: 1, 32>}, {pipeline_mode = #tpu.pipeline_mode<synchronous>, transform_indices = @transform_5, window_bounds = array<i64: 1, 32>}, {pipeline_mode = #tpu.pipeline_mode<synchronous>, transform_indices = @transform_6, window_bounds = array<i64: 128, 32>}, {pipeline_mode = #tpu.pipeline_mode<synchronous>, transform_indices = @transform_7, window_bounds = array<i64: 128, 32>}, {pipeline_mode = #tpu.pipeline_mode<synchronous>, transform_indices = @transform_8, window_bounds = array<i64: 32, 32>}, {pipeline_mode = #tpu.pipeline_mode<synchronous>, transform_indices = @transform_9, window_bounds = array<i64: 32, 128>}, {pipeline_mode = #tpu.pipeline_mode<synchronous>, transform_indices = @transform_10, window_bounds = array<i64: 1, 128>}, {pipeline_mode = #tpu.pipeline_mode<synchronous>, transform_indices = @transform_11, window_bounds = array<i64: 128, 32>}, {pipeline_mode = #tpu.pipeline_mode<synchronous>, transform_indices = @transform_12, window_bounds = array<i64: 128, 32>}, {pipeline_mode = #tpu.pipeline_mode<synchronous>, transform_indices = @transform_13, window_bounds = array<i64: 32, 32>}, {pipeline_mode = #tpu.pipeline_mode<synchronous>, transform_indices = @transform_14, window_bounds = array<i64: 32, 128>}, {pipeline_mode = #tpu.pipeline_mode<synchronous>, transform_indices = @transform_15, window_bounds = array<i64: 1, 128>}, {transform_indices = @transform_16, window_bounds = array<i64: 1, 1, 32>}, {transform_indices = @transform_17, window_bounds = array<i64: 1, 1, 32>}, {transform_indices = @transform_18, window_bounds = array<i64: 1, 32, 96>}, {transform_indices = @transform_19, window_bounds = array<i64: 1, 1, 96>}, {transform_indices = @transform_20, window_bounds = array<i64: 1, 32, 32>}, {transform_indices = @transform_21, window_bounds = array<i64: 1, 1, 32>}, {transform_indices = @transform_22, window_bounds = array<i64: 1, 1, 32>}, {transform_indices = @transform_23, window_bounds = array<i64: 1, 1, 32>}, {transform_indices = @transform_24, window_bounds = array<i64: 1, 32, 128>}, {transform_indices = @transform_25, window_bounds = array<i64: 1, 1, 128>}, {transform_indices = @transform_26, window_bounds = array<i64: 1, 128, 32>}, {transform_indices = @transform_27, window_bounds = array<i64: 1, 1, 32>}, {transform_indices = @transform_28, window_bounds = array<i64: 1, 1, 128>}, {transform_indices = @transform_29, window_bounds = array<i64: 1, 1, 128>}, {transform_indices = @transform_30, window_bounds = array<i64: 1, 16, 128>}]} {
    %c0_i32 = arith.constant 0 : i32
    %0 = arith.cmpi eq, %arg1, %c0_i32 : i32
    %1 = arith.extui %0 : i1 to i32
    %c0_i32_0 = arith.constant 0 : i32
    %2 = arith.cmpi ne, %1, %c0_i32_0 : i32
    scf.if %2 {
      %c0_78 = arith.constant 0 : index
      %c0_79 = arith.constant 0 : index
      %c0_80 = arith.constant 0 : index
      %195 = vector.load %arg2[%c0_78, %c0_79, %c0_80] : memref<1x16x128xbf16, #tpu.memory_space<vmem>>, vector<1x16x128xbf16>
      %196 = vector.shape_cast %195 : vector<1x16x128xbf16> to vector<16x128xbf16>
      %c0_81 = arith.constant 0 : index
      %c0_82 = arith.constant 0 : index
      %197 = vector.load %arg3[%c0_81, %c0_82] : memref<128x32xbf16, #tpu.memory_space<vmem>>, vector<128x32xbf16>
      %cst_83 = arith.constant dense<0.000000e+00> : vector<16x32xf32>
      %198 = tpu.matmul %196, %197, %cst_83 {dimension_numbers = #tpu.dot_dimension_numbers<[1], [0], [0], [1], [0, 0, 1, 1], [], []>} : vector<16x128xbf16>, vector<128x32xbf16>, vector<16x32xf32> -> vector<16x32xf32>
      %c0_84 = arith.constant 0 : index
      %c0_85 = arith.constant 0 : index
      %199 = vector.load %arg4[%c0_84, %c0_85] : memref<1x32xf32, #tpu.memory_space<vmem>>, vector<1x32xf32>
      %200 = vector.broadcast %199 : vector<1x32xf32> to vector<16x32xf32>
      %201 = arith.addf %198, %200 : vector<16x32xf32>
      %c0_86 = arith.constant 0 : index
      %c0_87 = arith.constant 0 : index
      %202 = vector.load %arg5[%c0_86, %c0_87] : memref<24x32xf32, #tpu.memory_space<vmem>>, vector<16x32xf32>
      %203 = arith.addf %201, %202 : vector<16x32xf32>
      %c0_88 = arith.constant 0 : index
      %c0_89 = arith.constant 0 : index
      %204 = vector.load %arg33[%c0_88, %c0_89] : memref<24x32xf32, #tpu.memory_space<vmem>>, vector<16x32xf32>
      tpu.vector_store %arg33[%c0_88, %c0_89], %203 {strides = array<i32>} : memref<24x32xf32, #tpu.memory_space<vmem>>, vector<16x32xf32>,
      %c16 = arith.constant 16 : index
      %c0_90 = arith.constant 0 : index
      %205 = vector.load %arg5[%c16, %c0_90] : memref<24x32xf32, #tpu.memory_space<vmem>>, vector<8x32xf32>
      %c16_91 = arith.constant 16 : index
      %c0_92 = arith.constant 0 : index
      %206 = vector.load %arg33[%c16_91, %c0_92] : memref<24x32xf32, #tpu.memory_space<vmem>>, vector<8x32xf32>
      tpu.vector_store %arg33[%c16_91, %c0_92], %205 {strides = array<i32>} : memref<24x32xf32, #tpu.memory_space<vmem>>, vector<8x32xf32>,
    } else {
    }
    %c0 = arith.constant 0 : index
    %c0_1 = arith.constant 0 : index
    %3 = vector.load %arg33[%c0, %c0_1] : memref<24x32xf32, #tpu.memory_space<vmem>>, vector<24x32xf32>
    %4 = tpu.iota {dimensions = array<i32: 1>} : vector<24x24xi32>
    %c17_i32 = arith.constant 17 : i32
    %5 = vector.broadcast %c17_i32 : i32 to vector<24x24xi32>
    %6 = arith.cmpi slt, %4, %5 : vector<24x24xi32>
    %c0_2 = arith.constant 0 : index
    %c0_3 = arith.constant 0 : index
    %c0_4 = arith.constant 0 : index
    %7 = vector.load %arg18[%c0_2, %c0_3, %c0_4] : memref<1x1x32xf32, #tpu.memory_space<vmem>>, vector<1x1x32xf32>
    %8 = vector.shape_cast %7 : vector<1x1x32xf32> to vector<1x32xf32>
    %c0_5 = arith.constant 0 : index
    %c0_6 = arith.constant 0 : index
    %c0_7 = arith.constant 0 : index
    %9 = vector.load %arg19[%c0_5, %c0_6, %c0_7] : memref<1x1x32xf32, #tpu.memory_space<vmem>>, vector<1x1x32xf32>
    %10 = vector.shape_cast %9 : vector<1x1x32xf32> to vector<1x32xf32>
    %cst = arith.constant dense<0.000000e+00> : vector<24xf32>
    %11 = vector.multi_reduction <add>, %3, %cst [1] : vector<24x32xf32> to vector<24xf32>
    %12 = vector.shape_cast %11 : vector<24xf32> to vector<24x1xf32>
    %cst_8 = arith.constant 3.200000e+01 : f32
    %13 = vector.broadcast %cst_8 : f32 to vector<24x1xf32>
    %14 = arith.divf %12, %13 : vector<24x1xf32>
    %15 = vector.broadcast %14 : vector<24x1xf32> to vector<24x32xf32>
    %16 = arith.subf %3, %15 : vector<24x32xf32>
    %17 = arith.mulf %16, %16 : vector<24x32xf32>
    %cst_9 = arith.constant dense<0.000000e+00> : vector<24xf32>
    %18 = vector.multi_reduction <add>, %17, %cst_9 [1] : vector<24x32xf32> to vector<24xf32>
    %19 = vector.shape_cast %18 : vector<24xf32> to vector<24x1xf32>
    %cst_10 = arith.constant 3.200000e+01 : f32
    %20 = vector.broadcast %cst_10 : f32 to vector<24x1xf32>
    %21 = arith.divf %19, %20 : vector<24x1xf32>
    %22 = vector.broadcast %14 : vector<24x1xf32> to vector<24x32xf32>
    %23 = arith.subf %3, %22 : vector<24x32xf32>
    %cst_11 = arith.constant 9.99999997E-7 : f32
    %24 = vector.broadcast %cst_11 : f32 to vector<24x1xf32>
    %25 = arith.addf %21, %24 : vector<24x1xf32>
    %26 = math.rsqrt %25 : vector<24x1xf32>
    %27 = vector.broadcast %26 : vector<24x1xf32> to vector<24x32xf32>
    %28 = arith.mulf %23, %27 : vector<24x32xf32>
    %29 = vector.broadcast %8 : vector<1x32xf32> to vector<24x32xf32>
    %30 = arith.mulf %28, %29 : vector<24x32xf32>
    %31 = vector.broadcast %10 : vector<1x32xf32> to vector<24x32xf32>
    %32 = arith.addf %30, %31 : vector<24x32xf32>
    %33 = arith.truncf %32 : vector<24x32xf32> to vector<24x32xbf16>
    %c0_12 = arith.constant 0 : index
    %c0_13 = arith.constant 0 : index
    %c0_14 = arith.constant 0 : index
    %34 = vector.load %arg20[%c0_12, %c0_13, %c0_14] : memref<1x32x96xbf16, #tpu.memory_space<vmem>>, vector<1x32x96xbf16>
    %35 = vector.shape_cast %34 : vector<1x32x96xbf16> to vector<32x96xbf16>
    %cst_15 = arith.constant dense<0.000000e+00> : vector<24x96xf32>
    %36 = tpu.matmul %33, %35, %cst_15 {dimension_numbers = #tpu.dot_dimension_numbers<[1], [0], [0], [1], [0, 0, 1, 1], [], []>} : vector<24x32xbf16>, vector<32x96xbf16>, vector<24x96xf32> -> vector<24x96xf32>
    %c0_16 = arith.constant 0 : index
    %c0_17 = arith.constant 0 : index
    %c0_18 = arith.constant 0 : index
    %37 = vector.load %arg21[%c0_16, %c0_17, %c0_18] : memref<1x1x96xf32, #tpu.memory_space<vmem>>, vector<1x1x96xf32>
    %38 = vector.shape_cast %37 : vector<1x1x96xf32> to vector<1x96xf32>
    %39 = vector.broadcast %38 : vector<1x96xf32> to vector<24x96xf32>
    %40 = arith.addf %36, %39 : vector<24x96xf32>
    %41 = vector.extract_strided_slice %40 {offsets = [0, 0], sizes = [24, 8], strides = [1, 1]} : vector<24x96xf32> to vector<24x8xf32>
    %42 = arith.truncf %41 : vector<24x8xf32> to vector<24x8xbf16>
    %43 = vector.extract_strided_slice %40 {offsets = [0, 32], sizes = [24, 8], strides = [1, 1]} : vector<24x96xf32> to vector<24x8xf32>
    %44 = arith.truncf %43 : vector<24x8xf32> to vector<24x8xbf16>
    %45 = vector.extract_strided_slice %40 {offsets = [0, 64], sizes = [24, 8], strides = [1, 1]} : vector<24x96xf32> to vector<24x8xf32>
    %46 = arith.truncf %45 : vector<24x8xf32> to vector<24x8xbf16>
    %cst_19 = arith.constant dense<0.000000e+00> : vector<24x24xf32>
    %47 = tpu.matmul %42, %44, %cst_19 {dimension_numbers = #tpu.dot_dimension_numbers<[1], [1], [0], [0], [0, 0, 1, 0], [], []>} : vector<24x8xbf16>, vector<24x8xbf16>, vector<24x24xf32> -> vector<24x24xf32>
    %cst_20 = arith.constant -1.000000e+30 : f32
    %48 = vector.broadcast %cst_20 : f32 to vector<24x24xf32>
    %49 = arith.select %6, %47, %48 : vector<24x24xi1>, vector<24x24xf32>
    %cst_21 = arith.constant dense<0xFF800000> : vector<24xf32>
    %50 = vector.multi_reduction <maximumf>, %49, %cst_21 [1] : vector<24x24xf32> to vector<24xf32>
    %51 = vector.shape_cast %50 : vector<24xf32> to vector<24x1xf32>
    %52 = vector.broadcast %51 : vector<24x1xf32> to vector<24x24xf32>
    %53 = arith.subf %49, %52 : vector<24x24xf32>
    %54 = math.exp %53 : vector<24x24xf32>
    %cst_22 = arith.constant dense<0.000000e+00> : vector<24xf32>
    %55 = vector.multi_reduction <add>, %54, %cst_22 [1] : vector<24x24xf32> to vector<24xf32>
    %56 = vector.shape_cast %55 : vector<24xf32> to vector<24x1xf32>
    %57 = tpu.reciprocal %56 {approx = true} : vector<24x1xf32> -> vector<24x1xf32>
    %58 = vector.broadcast %57 : vector<24x1xf32> to vector<24x24xf32>
    %59 = arith.mulf %54, %58 : vector<24x24xf32>
    %60 = arith.truncf %59 : vector<24x24xf32> to vector<24x24xbf16>
    %cst_23 = arith.constant dense<0.000000e+00> : vector<24x8xf32>
    %61 = tpu.matmul %60, %46, %cst_23 {dimension_numbers = #tpu.dot_dimension_numbers<[1], [0], [0], [1], [0, 0, 1, 1], [], []>} : vector<24x24xbf16>, vector<24x8xbf16>, vector<24x8xf32> -> vector<24x8xf32>
    %62 = vector.extract_strided_slice %40 {offsets = [0, 8], sizes = [24, 8], strides = [1, 1]} : vector<24x96xf32> to vector<24x8xf32>
    %63 = arith.truncf %62 : vector<24x8xf32> to vector<24x8xbf16>
    %64 = vector.extract_strided_slice %40 {offsets = [0, 40], sizes = [24, 8], strides = [1, 1]} : vector<24x96xf32> to vector<24x8xf32>
    %65 = arith.truncf %64 : vector<24x8xf32> to vector<24x8xbf16>
    %66 = vector.extract_strided_slice %40 {offsets = [0, 72], sizes = [24, 8], strides = [1, 1]} : vector<24x96xf32> to vector<24x8xf32>
    %67 = arith.truncf %66 : vector<24x8xf32> to vector<24x8xbf16>
    %cst_24 = arith.constant dense<0.000000e+00> : vector<24x24xf32>
    %68 = tpu.matmul %63, %65, %cst_24 {dimension_numbers = #tpu.dot_dimension_numbers<[1], [1], [0], [0], [0, 0, 1, 0], [], []>} : vector<24x8xbf16>, vector<24x8xbf16>, vector<24x24xf32> -> vector<24x24xf32>
    %cst_25 = arith.constant -1.000000e+30 : f32
    %69 = vector.broadcast %cst_25 : f32 to vector<24x24xf32>
    %70 = arith.select %6, %68, %69 : vector<24x24xi1>, vector<24x24xf32>
    %cst_26 = arith.constant dense<0xFF800000> : vector<24xf32>
    %71 = vector.multi_reduction <maximumf>, %70, %cst_26 [1] : vector<24x24xf32> to vector<24xf32>
    %72 = vector.shape_cast %71 : vector<24xf32> to vector<24x1xf32>
    %73 = vector.broadcast %72 : vector<24x1xf32> to vector<24x24xf32>
    %74 = arith.subf %70, %73 : vector<24x24xf32>
    %75 = math.exp %74 : vector<24x24xf32>
    %cst_27 = arith.constant dense<0.000000e+00> : vector<24xf32>
    %76 = vector.multi_reduction <add>, %75, %cst_27 [1] : vector<24x24xf32> to vector<24xf32>
    %77 = vector.shape_cast %76 : vector<24xf32> to vector<24x1xf32>
    %78 = tpu.reciprocal %77 {approx = true} : vector<24x1xf32> -> vector<24x1xf32>
    %79 = vector.broadcast %78 : vector<24x1xf32> to vector<24x24xf32>
    %80 = arith.mulf %75, %79 : vector<24x24xf32>
    %81 = arith.truncf %80 : vector<24x24xf32> to vector<24x24xbf16>
    %cst_28 = arith.constant dense<0.000000e+00> : vector<24x8xf32>
    %82 = tpu.matmul %81, %67, %cst_28 {dimension_numbers = #tpu.dot_dimension_numbers<[1], [0], [0], [1], [0, 0, 1, 1], [], []>} : vector<24x24xbf16>, vector<24x8xbf16>, vector<24x8xf32> -> vector<24x8xf32>
    %83 = vector.extract_strided_slice %40 {offsets = [0, 16], sizes = [24, 8], strides = [1, 1]} : vector<24x96xf32> to vector<24x8xf32>
    %84 = arith.truncf %83 : vector<24x8xf32> to vector<24x8xbf16>
    %85 = vector.extract_strided_slice %40 {offsets = [0, 48], sizes = [24, 8], strides = [1, 1]} : vector<24x96xf32> to vector<24x8xf32>
    %86 = arith.truncf %85 : vector<24x8xf32> to vector<24x8xbf16>
    %87 = vector.extract_strided_slice %40 {offsets = [0, 80], sizes = [24, 8], strides = [1, 1]} : vector<24x96xf32> to vector<24x8xf32>
    %88 = arith.truncf %87 : vector<24x8xf32> to vector<24x8xbf16>
    %cst_29 = arith.constant dense<0.000000e+00> : vector<24x24xf32>
    %89 = tpu.matmul %84, %86, %cst_29 {dimension_numbers = #tpu.dot_dimension_numbers<[1], [1], [0], [0], [0, 0, 1, 0], [], []>} : vector<24x8xbf16>, vector<24x8xbf16>, vector<24x24xf32> -> vector<24x24xf32>
    %cst_30 = arith.constant -1.000000e+30 : f32
    %90 = vector.broadcast %cst_30 : f32 to vector<24x24xf32>
    %91 = arith.select %6, %89, %90 : vector<24x24xi1>, vector<24x24xf32>
    %cst_31 = arith.constant dense<0xFF800000> : vector<24xf32>
    %92 = vector.multi_reduction <maximumf>, %91, %cst_31 [1] : vector<24x24xf32> to vector<24xf32>
    %93 = vector.shape_cast %92 : vector<24xf32> to vector<24x1xf32>
    %94 = vector.broadcast %93 : vector<24x1xf32> to vector<24x24xf32>
    %95 = arith.subf %91, %94 : vector<24x24xf32>
    %96 = math.exp %95 : vector<24x24xf32>
    %cst_32 = arith.constant dense<0.000000e+00> : vector<24xf32>
    %97 = vector.multi_reduction <add>, %96, %cst_32 [1] : vector<24x24xf32> to vector<24xf32>
    %98 = vector.shape_cast %97 : vector<24xf32> to vector<24x1xf32>
    %99 = tpu.reciprocal %98 {approx = true} : vector<24x1xf32> -> vector<24x1xf32>
    %100 = vector.broadcast %99 : vector<24x1xf32> to vector<24x24xf32>
    %101 = arith.mulf %96, %100 : vector<24x24xf32>
    %102 = arith.truncf %101 : vector<24x24xf32> to vector<24x24xbf16>
    %cst_33 = arith.constant dense<0.000000e+00> : vector<24x8xf32>
    %103 = tpu.matmul %102, %88, %cst_33 {dimension_numbers = #tpu.dot_dimension_numbers<[1], [0], [0], [1], [0, 0, 1, 1], [], []>} : vector<24x24xbf16>, vector<24x8xbf16>, vector<24x8xf32> -> vector<24x8xf32>
    %104 = vector.extract_strided_slice %40 {offsets = [0, 24], sizes = [24, 8], strides = [1, 1]} : vector<24x96xf32> to vector<24x8xf32>
    %105 = arith.truncf %104 : vector<24x8xf32> to vector<24x8xbf16>
    %106 = vector.extract_strided_slice %40 {offsets = [0, 56], sizes = [24, 8], strides = [1, 1]} : vector<24x96xf32> to vector<24x8xf32>
    %107 = arith.truncf %106 : vector<24x8xf32> to vector<24x8xbf16>
    %108 = vector.extract_strided_slice %40 {offsets = [0, 88], sizes = [24, 8], strides = [1, 1]} : vector<24x96xf32> to vector<24x8xf32>
    %109 = arith.truncf %108 : vector<24x8xf32> to vector<24x8xbf16>
    %cst_34 = arith.constant dense<0.000000e+00> : vector<24x24xf32>
    %110 = tpu.matmul %105, %107, %cst_34 {dimension_numbers = #tpu.dot_dimension_numbers<[1], [1], [0], [0], [0, 0, 1, 0], [], []>} : vector<24x8xbf16>, vector<24x8xbf16>, vector<24x24xf32> -> vector<24x24xf32>
    %cst_35 = arith.constant -1.000000e+30 : f32
    %111 = vector.broadcast %cst_35 : f32 to vector<24x24xf32>
    %112 = arith.select %6, %110, %111 : vector<24x24xi1>, vector<24x24xf32>
    %cst_36 = arith.constant dense<0xFF800000> : vector<24xf32>
    %113 = vector.multi_reduction <maximumf>, %112, %cst_36 [1] : vector<24x24xf32> to vector<24xf32>
    %114 = vector.shape_cast %113 : vector<24xf32> to vector<24x1xf32>
    %115 = vector.broadcast %114 : vector<24x1xf32> to vector<24x24xf32>
    %116 = arith.subf %112, %115 : vector<24x24xf32>
    %117 = math.exp %116 : vector<24x24xf32>
    %cst_37 = arith.constant dense<0.000000e+00> : vector<24xf32>
    %118 = vector.multi_reduction <add>, %117, %cst_37 [1] : vector<24x24xf32> to vector<24xf32>
    %119 = vector.shape_cast %118 : vector<24xf32> to vector<24x1xf32>
    %120 = tpu.reciprocal %119 {approx = true} : vector<24x1xf32> -> vector<24x1xf32>
    %121 = vector.broadcast %120 : vector<24x1xf32> to vector<24x24xf32>
    %122 = arith.mulf %117, %121 : vector<24x24xf32>
    %123 = arith.truncf %122 : vector<24x24xf32> to vector<24x24xbf16>
    %cst_38 = arith.constant dense<0.000000e+00> : vector<24x8xf32>
    %124 = tpu.matmul %123, %109, %cst_38 {dimension_numbers = #tpu.dot_dimension_numbers<[1], [0], [0], [1], [0, 0, 1, 1], [], []>} : vector<24x24xbf16>, vector<24x8xbf16>, vector<24x8xf32> -> vector<24x8xf32>
    %125 = tpu.concatenate %61, %82, %103, %124 in 1 : vector<24x8xf32>, vector<24x8xf32>, vector<24x8xf32>, vector<24x8xf32> -> vector<24x32xf32>
    %126 = arith.truncf %125 : vector<24x32xf32> to vector<24x32xbf16>
    %c0_39 = arith.constant 0 : index
    %c0_40 = arith.constant 0 : index
    %c0_41 = arith.constant 0 : index
    %127 = vector.load %arg22[%c0_39, %c0_40, %c0_41] : memref<1x32x32xbf16, #tpu.memory_space<vmem>>, vector<1x32x32xbf16>
    %128 = vector.shape_cast %127 : vector<1x32x32xbf16> to vector<32x32xbf16>
    %cst_42 = arith.constant dense<0.000000e+00> : vector<24x32xf32>
    %129 = tpu.matmul %126, %128, %cst_42 {dimension_numbers = #tpu.dot_dimension_numbers<[1], [0], [0], [1], [0, 0, 1, 1], [], []>} : vector<24x32xbf16>, vector<32x32xbf16>, vector<24x32xf32> -> vector<24x32xf32>
    %130 = arith.addf %3, %129 : vector<24x32xf32>
    %c0_43 = arith.constant 0 : index
    %c0_44 = arith.constant 0 : index
    %c0_45 = arith.constant 0 : index
    %131 = vector.load %arg23[%c0_43, %c0_44, %c0_45] : memref<1x1x32xf32, #tpu.memory_space<vmem>>, vector<1x1x32xf32>
    %132 = vector.shape_cast %131 : vector<1x1x32xf32> to vector<1x32xf32>
    %133 = vector.broadcast %132 : vector<1x32xf32> to vector<24x32xf32>
    %134 = arith.addf %130, %133 : vector<24x32xf32>
    %c0_46 = arith.constant 0 : index
    %c0_47 = arith.constant 0 : index
    %c0_48 = arith.constant 0 : index
    %135 = vector.load %arg24[%c0_46, %c0_47, %c0_48] : memref<1x1x32xf32, #tpu.memory_space<vmem>>, vector<1x1x32xf32>
    %136 = vector.shape_cast %135 : vector<1x1x32xf32> to vector<1x32xf32>
    %c0_49 = arith.constant 0 : index
    %c0_50 = arith.constant 0 : index
    %c0_51 = arith.constant 0 : index
    %137 = vector.load %arg25[%c0_49, %c0_50, %c0_51] : memref<1x1x32xf32, #tpu.memory_space<vmem>>, vector<1x1x32xf32>
    %138 = vector.shape_cast %137 : vector<1x1x32xf32> to vector<1x32xf32>
    %cst_52 = arith.constant dense<0.000000e+00> : vector<24xf32>
    %139 = vector.multi_reduction <add>, %134, %cst_52 [1] : vector<24x32xf32> to vector<24xf32>
    %140 = vector.shape_cast %139 : vector<24xf32> to vector<24x1xf32>
    %cst_53 = arith.constant 3.200000e+01 : f32
    %141 = vector.broadcast %cst_53 : f32 to vector<24x1xf32>
    %142 = arith.divf %140, %141 : vector<24x1xf32>
    %143 = vector.broadcast %142 : vector<24x1xf32> to vector<24x32xf32>
    %144 = arith.subf %134, %143 : vector<24x32xf32>
    %145 = arith.mulf %144, %144 : vector<24x32xf32>
    %cst_54 = arith.constant dense<0.000000e+00> : vector<24xf32>
    %146 = vector.multi_reduction <add>, %145, %cst_54 [1] : vector<24x32xf32> to vector<24xf32>
    %147 = vector.shape_cast %146 : vector<24xf32> to vector<24x1xf32>
    %cst_55 = arith.constant 3.200000e+01 : f32
    %148 = vector.broadcast %cst_55 : f32 to vector<24x1xf32>
    %149 = arith.divf %147, %148 : vector<24x1xf32>
    %150 = vector.broadcast %142 : vector<24x1xf32> to vector<24x32xf32>
    %151 = arith.subf %134, %150 : vector<24x32xf32>
    %cst_56 = arith.constant 9.99999997E-7 : f32
    %152 = vector.broadcast %cst_56 : f32 to vector<24x1xf32>
    %153 = arith.addf %149, %152 : vector<24x1xf32>
    %154 = math.rsqrt %153 : vector<24x1xf32>
    %155 = vector.broadcast %154 : vector<24x1xf32> to vector<24x32xf32>
    %156 = arith.mulf %151, %155 : vector<24x32xf32>
    %157 = vector.broadcast %136 : vector<1x32xf32> to vector<24x32xf32>
    %158 = arith.mulf %156, %157 : vector<24x32xf32>
    %159 = vector.broadcast %138 : vector<1x32xf32> to vector<24x32xf32>
    %160 = arith.addf %158, %159 : vector<24x32xf32>
    %161 = arith.truncf %160 : vector<24x32xf32> to vector<24x32xbf16>
    %c0_57 = arith.constant 0 : index
    %c0_58 = arith.constant 0 : index
    %c0_59 = arith.constant 0 : index
    %162 = vector.load %arg26[%c0_57, %c0_58, %c0_59] : memref<1x32x128xbf16, #tpu.memory_space<vmem>>, vector<1x32x128xbf16>
    %163 = vector.shape_cast %162 : vector<1x32x128xbf16> to vector<32x128xbf16>
    %cst_60 = arith.constant dense<0.000000e+00> : vector<24x128xf32>
    %164 = tpu.matmul %161, %163, %cst_60 {dimension_numbers = #tpu.dot_dimension_numbers<[1], [0], [0], [1], [0, 0, 1, 1], [], []>} : vector<24x32xbf16>, vector<32x128xbf16>, vector<24x128xf32> -> vector<24x128xf32>
    %c0_61 = arith.constant 0 : index
    %c0_62 = arith.constant 0 : index
    %c0_63 = arith.constant 0 : index
    %165 = vector.load %arg27[%c0_61, %c0_62, %c0_63] : memref<1x1x128xf32, #tpu.memory_space<vmem>>, vector<1x1x128xf32>
    %166 = vector.shape_cast %165 : vector<1x1x128xf32> to vector<1x128xf32>
    %167 = vector.broadcast %166 : vector<1x128xf32> to vector<24x128xf32>
    %168 = arith.addf %164, %167 : vector<24x128xf32>
    %169 = arith.mulf %168, %168 : vector<24x128xf32>
    %170 = arith.mulf %168, %169 : vector<24x128xf32>
    %cst_64 = arith.constant 4.471500e-02 : f32
    %171 = vector.broadcast %cst_64 : f32 to vector<24x128xf32>
    %172 = arith.mulf %171, %170 : vector<24x128xf32>
    %173 = arith.addf %168, %172 : vector<24x128xf32>
    %cst_65 = arith.constant 0.797884583 : f32
    %174 = vector.broadcast %cst_65 : f32 to vector<24x128xf32>
    %175 = arith.mulf %174, %173 : vector<24x128xf32>
    %176 = math.tanh %175 : vector<24x128xf32>
    %cst_66 = arith.constant 1.000000e+00 : f32
    %177 = vector.broadcast %cst_66 : f32 to vector<24x128xf32>
    %178 = arith.addf %177, %176 : vector<24x128xf32>
    %cst_67 = arith.constant 5.000000e-01 : f32
    %179 = vector.broadcast %cst_67 : f32 to vector<24x128xf32>
    %180 = arith.mulf %179, %178 : vector<24x128xf32>
    %181 = arith.mulf %168, %180 : vector<24x128xf32>
    %182 = arith.truncf %181 : vector<24x128xf32> to vector<24x128xbf16>
    %c0_68 = arith.constant 0 : index
    %c0_69 = arith.constant 0 : index
    %c0_70 = arith.constant 0 : index
    %183 = vector.load %arg28[%c0_68, %c0_69, %c0_70] : memref<1x128x32xbf16, #tpu.memory_space<vmem>>, vector<1x128x32xbf16>
    %184 = vector.shape_cast %183 : vector<1x128x32xbf16> to vector<128x32xbf16>
    %cst_71 = arith.constant dense<0.000000e+00> : vector<24x32xf32>
    %185 = tpu.matmul %182, %184, %cst_71 {dimension_numbers = #tpu.dot_dimension_numbers<[1], [0], [0], [1], [0, 0, 1, 1], [], []>} : vector<24x128xbf16>, vector<128x32xbf16>, vector<24x32xf32> -> vector<24x32xf32>
    %c0_72 = arith.constant 0 : index
    %c0_73 = arith.constant 0 : index
    %c0_74 = arith.constant 0 : index
    %186 = vector.load %arg29[%c0_72, %c0_73, %c0_74] : memref<1x1x32xf32, #tpu.memory_space<vmem>>, vector<1x1x32xf32>
    %187 = vector.shape_cast %186 : vector<1x1x32xf32> to vector<1x32xf32>
    %188 = vector.broadcast %187 : vector<1x32xf32> to vector<24x32xf32>
    %189 = arith.addf %185, %188 : vector<24x32xf32>
    %190 = arith.addf %134, %189 : vector<24x32xf32>
    %c0_75 = arith.constant 0 : index
    %c0_76 = arith.constant 0 : index
    %191 = vector.load %arg33[%c0_75, %c0_76] : memref<24x32xf32, #tpu.memory_space<vmem>>, vector<24x32xf32>
    tpu.vector_store %arg33[%c0_75, %c0_76], %190 {strides = array<i32>} : memref<24x32xf32, #tpu.memory_space<vmem>>, vector<24x32xf32>,
    %c1_i32 = arith.constant 1 : i32
    %192 = arith.cmpi eq, %arg1, %c1_i32 : i32
    %193 = arith.extui %192 : i1 to i32
    %c0_i32_77 = arith.constant 0 : i32
    %194 = arith.cmpi ne, %193, %c0_i32_77 : i32
    scf.if %194 {
      %c0_78 = arith.constant 0 : index
      %c0_79 = arith.constant 0 : index
      %195 = vector.load %arg6[%c0_78, %c0_79] : memref<1x32xf32, #tpu.memory_space<vmem>>, vector<1x32xf32>
      %c0_80 = arith.constant 0 : index
      %c0_81 = arith.constant 0 : index
      %196 = vector.load %arg7[%c0_80, %c0_81] : memref<1x32xf32, #tpu.memory_space<vmem>>, vector<1x32xf32>
      %cst_82 = arith.constant dense<0.000000e+00> : vector<24xf32>
      %197 = vector.multi_reduction <add>, %190, %cst_82 [1] : vector<24x32xf32> to vector<24xf32>
      %198 = vector.shape_cast %197 : vector<24xf32> to vector<24x1xf32>
      %cst_83 = arith.constant 3.200000e+01 : f32
      %199 = vector.broadcast %cst_83 : f32 to vector<24x1xf32>
      %200 = arith.divf %198, %199 : vector<24x1xf32>
      %201 = vector.broadcast %200 : vector<24x1xf32> to vector<24x32xf32>
      %202 = arith.subf %190, %201 : vector<24x32xf32>
      %203 = arith.mulf %202, %202 : vector<24x32xf32>
      %cst_84 = arith.constant dense<0.000000e+00> : vector<24xf32>
      %204 = vector.multi_reduction <add>, %203, %cst_84 [1] : vector<24x32xf32> to vector<24xf32>
      %205 = vector.shape_cast %204 : vector<24xf32> to vector<24x1xf32>
      %cst_85 = arith.constant 3.200000e+01 : f32
      %206 = vector.broadcast %cst_85 : f32 to vector<24x1xf32>
      %207 = arith.divf %205, %206 : vector<24x1xf32>
      %208 = vector.broadcast %200 : vector<24x1xf32> to vector<24x32xf32>
      %209 = arith.subf %190, %208 : vector<24x32xf32>
      %cst_86 = arith.constant 9.99999997E-7 : f32
      %210 = vector.broadcast %cst_86 : f32 to vector<24x1xf32>
      %211 = arith.addf %207, %210 : vector<24x1xf32>
      %212 = math.rsqrt %211 : vector<24x1xf32>
      %213 = vector.broadcast %212 : vector<24x1xf32> to vector<24x32xf32>
      %214 = arith.mulf %209, %213 : vector<24x32xf32>
      %215 = vector.broadcast %195 : vector<1x32xf32> to vector<24x32xf32>
      %216 = arith.mulf %214, %215 : vector<24x32xf32>
      %217 = vector.broadcast %196 : vector<1x32xf32> to vector<24x32xf32>
      %218 = arith.addf %216, %217 : vector<24x32xf32>
      %219 = vector.extract_strided_slice %218 {offsets = [16, 0], sizes = [1, 32], strides = [1, 1]} : vector<24x32xf32> to vector<1x32xf32>
      %c0_87 = arith.constant 0 : index
      %c0_88 = arith.constant 0 : index
      %220 = vector.load %arg8[%c0_87, %c0_88] : memref<128x32xbf16, #tpu.memory_space<vmem>>, vector<128x32xbf16>
      %c0_89 = arith.constant 0 : index
      %c0_90 = arith.constant 0 : index
      %221 = vector.load %arg9[%c0_89, %c0_90] : memref<128x32xbf16, #tpu.memory_space<vmem>>, vector<128x32xbf16>
      %222 = arith.truncf %219 : vector<1x32xf32> to vector<1x32xbf16>
      %c0_91 = arith.constant 0 : index
      %c0_92 = arith.constant 0 : index
      %223 = vector.load %arg10[%c0_91, %c0_92] : memref<32x32xbf16, #tpu.memory_space<vmem>>, vector<32x32xbf16>
      %cst_93 = arith.constant dense<0.000000e+00> : vector<1x32xf32>
      %224 = tpu.matmul %222, %223, %cst_93 {dimension_numbers = #tpu.dot_dimension_numbers<[1], [0], [0], [1], [0, 0, 1, 1], [], []>} : vector<1x32xbf16>, vector<32x32xbf16>, vector<1x32xf32> -> vector<1x32xf32>
      %225 = tpu.iota {dimensions = array<i32: 1>} : vector<1x128xi32>
      %c8_i32 = arith.constant 8 : i32
      %226 = vector.broadcast %c8_i32 : i32 to vector<1x128xi32>
      %227 = arith.cmpi slt, %225, %226 : vector<1x128xi32>
      %cst_94 = arith.constant 0.000000e+00 : f32
      %228 = vector.broadcast %cst_94 : f32 to vector<1x128xf32>
      %229 = vector.extract_strided_slice %224 {offsets = [0, 0], sizes = [1, 8], strides = [1, 1]} : vector<1x32xf32> to vector<1x8xf32>
      %230 = arith.truncf %229 : vector<1x8xf32> to vector<1x8xbf16>
      %231 = vector.extract_strided_slice %220 {offsets = [0, 0], sizes = [128, 8], strides = [1, 1]} : vector<128x32xbf16> to vector<128x8xbf16>
      %232 = vector.extract_strided_slice %221 {offsets = [0, 0], sizes = [128, 8], strides = [1, 1]} : vector<128x32xbf16> to vector<128x8xbf16>
      %cst_95 = arith.constant dense<0.000000e+00> : vector<1x128xf32>
      %233 = tpu.matmul %230, %231, %cst_95 {dimension_numbers = #tpu.dot_dimension_numbers<[1], [1], [0], [0], [0, 0, 1, 0], [], []>} : vector<1x8xbf16>, vector<128x8xbf16>, vector<1x128xf32> -> vector<1x128xf32>
      %cst_96 = arith.constant -1.000000e+30 : f32
      %234 = vector.broadcast %cst_96 : f32 to vector<1x128xf32>
      %235 = arith.select %227, %233, %234 : vector<1x128xi1>, vector<1x128xf32>
      %cst_97 = arith.constant dense<0xFF800000> : vector<1xf32>
      %236 = vector.multi_reduction <maximumf>, %235, %cst_97 [1] : vector<1x128xf32> to vector<1xf32>
      %237 = vector.shape_cast %236 : vector<1xf32> to vector<1x1xf32>
      %238 = vector.broadcast %237 : vector<1x1xf32> to vector<1x128xf32>
      %239 = arith.subf %235, %238 : vector<1x128xf32>
      %240 = math.exp %239 : vector<1x128xf32>
      %cst_98 = arith.constant dense<0.000000e+00> : vector<1xf32>
      %241 = vector.multi_reduction <add>, %240, %cst_98 [1] : vector<1x128xf32> to vector<1xf32>
      %242 = vector.shape_cast %241 : vector<1xf32> to vector<1x1xf32>
      %243 = vector.broadcast %242 : vector<1x1xf32> to vector<1x128xf32>
      %244 = arith.divf %240, %243 : vector<1x128xf32>
      %245 = arith.addf %228, %244 : vector<1x128xf32>
      %246 = arith.truncf %244 : vector<1x128xf32> to vector<1x128xbf16>
      %cst_99 = arith.constant dense<0.000000e+00> : vector<1x8xf32>
      %247 = tpu.matmul %246, %232, %cst_99 {dimension_numbers = #tpu.dot_dimension_numbers<[1], [0], [0], [1], [0, 0, 1, 1], [], []>} : vector<1x128xbf16>, vector<128x8xbf16>, vector<1x8xf32> -> vector<1x8xf32>
      %cst_100 = arith.constant dense<0.000000e+00> : vector<8xf32>
      %248 = vector.multi_reduction <add>, %247, %cst_100 [0] : vector<1x8xf32> to vector<8xf32>
      %249 = vector.shape_cast %248 : vector<8xf32> to vector<1x8xf32>
      %cst_101 = arith.constant 1.000000e+00 : f32
      %250 = vector.broadcast %cst_101 : f32 to vector<1x8xf32>
      %251 = arith.divf %249, %250 : vector<1x8xf32>
      %252 = vector.extract_strided_slice %224 {offsets = [0, 8], sizes = [1, 8], strides = [1, 1]} : vector<1x32xf32> to vector<1x8xf32>
      %253 = arith.truncf %252 : vector<1x8xf32> to vector<1x8xbf16>
      %254 = vector.extract_strided_slice %220 {offsets = [0, 8], sizes = [128, 8], strides = [1, 1]} : vector<128x32xbf16> to vector<128x8xbf16>
      %255 = vector.extract_strided_slice %221 {offsets = [0, 8], sizes = [128, 8], strides = [1, 1]} : vector<128x32xbf16> to vector<128x8xbf16>
      %cst_102 = arith.constant dense<0.000000e+00> : vector<1x128xf32>
      %256 = tpu.matmul %253, %254, %cst_102 {dimension_numbers = #tpu.dot_dimension_numbers<[1], [1], [0], [0], [0, 0, 1, 0], [], []>} : vector<1x8xbf16>, vector<128x8xbf16>, vector<1x128xf32> -> vector<1x128xf32>
      %cst_103 = arith.constant -1.000000e+30 : f32
      %257 = vector.broadcast %cst_103 : f32 to vector<1x128xf32>
      %258 = arith.select %227, %256, %257 : vector<1x128xi1>, vector<1x128xf32>
      %cst_104 = arith.constant dense<0xFF800000> : vector<1xf32>
      %259 = vector.multi_reduction <maximumf>, %258, %cst_104 [1] : vector<1x128xf32> to vector<1xf32>
      %260 = vector.shape_cast %259 : vector<1xf32> to vector<1x1xf32>
      %261 = vector.broadcast %260 : vector<1x1xf32> to vector<1x128xf32>
      %262 = arith.subf %258, %261 : vector<1x128xf32>
      %263 = math.exp %262 : vector<1x128xf32>
      %cst_105 = arith.constant dense<0.000000e+00> : vector<1xf32>
      %264 = vector.multi_reduction <add>, %263, %cst_105 [1] : vector<1x128xf32> to vector<1xf32>
      %265 = vector.shape_cast %264 : vector<1xf32> to vector<1x1xf32>
      %266 = vector.broadcast %265 : vector<1x1xf32> to vector<1x128xf32>
      %267 = arith.divf %263, %266 : vector<1x128xf32>
      %268 = arith.addf %245, %267 : vector<1x128xf32>
      %269 = arith.truncf %267 : vector<1x128xf32> to vector<1x128xbf16>
      %cst_106 = arith.constant dense<0.000000e+00> : vector<1x8xf32>
      %270 = tpu.matmul %269, %255, %cst_106 {dimension_numbers = #tpu.dot_dimension_numbers<[1], [0], [0], [1], [0, 0, 1, 1], [], []>} : vector<1x128xbf16>, vector<128x8xbf16>, vector<1x8xf32> -> vector<1x8xf32>
      %cst_107 = arith.constant dense<0.000000e+00> : vector<8xf32>
      %271 = vector.multi_reduction <add>, %270, %cst_107 [0] : vector<1x8xf32> to vector<8xf32>
      %272 = vector.shape_cast %271 : vector<8xf32> to vector<1x8xf32>
      %cst_108 = arith.constant 1.000000e+00 : f32
      %273 = vector.broadcast %cst_108 : f32 to vector<1x8xf32>
      %274 = arith.divf %272, %273 : vector<1x8xf32>
      %275 = vector.extract_strided_slice %224 {offsets = [0, 16], sizes = [1, 8], strides = [1, 1]} : vector<1x32xf32> to vector<1x8xf32>
      %276 = arith.truncf %275 : vector<1x8xf32> to vector<1x8xbf16>
      %277 = vector.extract_strided_slice %220 {offsets = [0, 16], sizes = [128, 8], strides = [1, 1]} : vector<128x32xbf16> to vector<128x8xbf16>
      %278 = vector.extract_strided_slice %221 {offsets = [0, 16], sizes = [128, 8], strides = [1, 1]} : vector<128x32xbf16> to vector<128x8xbf16>
      %cst_109 = arith.constant dense<0.000000e+00> : vector<1x128xf32>
      %279 = tpu.matmul %276, %277, %cst_109 {dimension_numbers = #tpu.dot_dimension_numbers<[1], [1], [0], [0], [0, 0, 1, 0], [], []>} : vector<1x8xbf16>, vector<128x8xbf16>, vector<1x128xf32> -> vector<1x128xf32>
      %cst_110 = arith.constant -1.000000e+30 : f32
      %280 = vector.broadcast %cst_110 : f32 to vector<1x128xf32>
      %281 = arith.select %227, %279, %280 : vector<1x128xi1>, vector<1x128xf32>
      %cst_111 = arith.constant dense<0xFF800000> : vector<1xf32>
      %282 = vector.multi_reduction <maximumf>, %281, %cst_111 [1] : vector<1x128xf32> to vector<1xf32>
      %283 = vector.shape_cast %282 : vector<1xf32> to vector<1x1xf32>
      %284 = vector.broadcast %283 : vector<1x1xf32> to vector<1x128xf32>
      %285 = arith.subf %281, %284 : vector<1x128xf32>
      %286 = math.exp %285 : vector<1x128xf32>
      %cst_112 = arith.constant dense<0.000000e+00> : vector<1xf32>
      %287 = vector.multi_reduction <add>, %286, %cst_112 [1] : vector<1x128xf32> to vector<1xf32>
      %288 = vector.shape_cast %287 : vector<1xf32> to vector<1x1xf32>
      %289 = vector.broadcast %288 : vector<1x1xf32> to vector<1x128xf32>
      %290 = arith.divf %286, %289 : vector<1x128xf32>
      %291 = arith.addf %268, %290 : vector<1x128xf32>
      %292 = arith.truncf %290 : vector<1x128xf32> to vector<1x128xbf16>
      %cst_113 = arith.constant dense<0.000000e+00> : vector<1x8xf32>
      %293 = tpu.matmul %292, %278, %cst_113 {dimension_numbers = #tpu.dot_dimension_numbers<[1], [0], [0], [1], [0, 0, 1, 1], [], []>} : vector<1x128xbf16>, vector<128x8xbf16>, vector<1x8xf32> -> vector<1x8xf32>
      %cst_114 = arith.constant dense<0.000000e+00> : vector<8xf32>
      %294 = vector.multi_reduction <add>, %293, %cst_114 [0] : vector<1x8xf32> to vector<8xf32>
      %295 = vector.shape_cast %294 : vector<8xf32> to vector<1x8xf32>
      %cst_115 = arith.constant 1.000000e+00 : f32
      %296 = vector.broadcast %cst_115 : f32 to vector<1x8xf32>
      %297 = arith.divf %295, %296 : vector<1x8xf32>
      %298 = vector.extract_strided_slice %224 {offsets = [0, 24], sizes = [1, 8], strides = [1, 1]} : vector<1x32xf32> to vector<1x8xf32>
      %299 = arith.truncf %298 : vector<1x8xf32> to vector<1x8xbf16>
      %300 = vector.extract_strided_slice %220 {offsets = [0, 24], sizes = [128, 8], strides = [1, 1]} : vector<128x32xbf16> to vector<128x8xbf16>
      %301 = vector.extract_strided_slice %221 {offsets = [0, 24], sizes = [128, 8], strides = [1, 1]} : vector<128x32xbf16> to vector<128x8xbf16>
      %cst_116 = arith.constant dense<0.000000e+00> : vector<1x128xf32>
      %302 = tpu.matmul %299, %300, %cst_116 {dimension_numbers = #tpu.dot_dimension_numbers<[1], [1], [0], [0], [0, 0, 1, 0], [], []>} : vector<1x8xbf16>, vector<128x8xbf16>, vector<1x128xf32> -> vector<1x128xf32>
      %cst_117 = arith.constant -1.000000e+30 : f32
      %303 = vector.broadcast %cst_117 : f32 to vector<1x128xf32>
      %304 = arith.select %227, %302, %303 : vector<1x128xi1>, vector<1x128xf32>
      %cst_118 = arith.constant dense<0xFF800000> : vector<1xf32>
      %305 = vector.multi_reduction <maximumf>, %304, %cst_118 [1] : vector<1x128xf32> to vector<1xf32>
      %306 = vector.shape_cast %305 : vector<1xf32> to vector<1x1xf32>
      %307 = vector.broadcast %306 : vector<1x1xf32> to vector<1x128xf32>
      %308 = arith.subf %304, %307 : vector<1x128xf32>
      %309 = math.exp %308 : vector<1x128xf32>
      %cst_119 = arith.constant dense<0.000000e+00> : vector<1xf32>
      %310 = vector.multi_reduction <add>, %309, %cst_119 [1] : vector<1x128xf32> to vector<1xf32>
      %311 = vector.shape_cast %310 : vector<1xf32> to vector<1x1xf32>
      %312 = vector.broadcast %311 : vector<1x1xf32> to vector<1x128xf32>
      %313 = arith.divf %309, %312 : vector<1x128xf32>
      %314 = arith.addf %291, %313 : vector<1x128xf32>
      %315 = arith.truncf %313 : vector<1x128xf32> to vector<1x128xbf16>
      %cst_120 = arith.constant dense<0.000000e+00> : vector<1x8xf32>
      %316 = tpu.matmul %315, %301, %cst_120 {dimension_numbers = #tpu.dot_dimension_numbers<[1], [0], [0], [1], [0, 0, 1, 1], [], []>} : vector<1x128xbf16>, vector<128x8xbf16>, vector<1x8xf32> -> vector<1x8xf32>
      %cst_121 = arith.constant dense<0.000000e+00> : vector<8xf32>
      %317 = vector.multi_reduction <add>, %316, %cst_121 [0] : vector<1x8xf32> to vector<8xf32>
      %318 = vector.shape_cast %317 : vector<8xf32> to vector<1x8xf32>
      %cst_122 = arith.constant 1.000000e+00 : f32
      %319 = vector.broadcast %cst_122 : f32 to vector<1x8xf32>
      %320 = arith.divf %318, %319 : vector<1x8xf32>
      %321 = tpu.concatenate %251, %274, %297, %320 in 1 : vector<1x8xf32>, vector<1x8xf32>, vector<1x8xf32>, vector<1x8xf32> -> vector<1x32xf32>
      %322 = arith.truncf %321 : vector<1x32xf32> to vector<1x32xbf16>
      %c0_123 = arith.constant 0 : index
      %c0_124 = arith.constant 0 : index
      %323 = vector.load %arg11[%c0_123, %c0_124] : memref<32x128xbf16, #tpu.memory_space<vmem>>, vector<32x128xbf16>
      %cst_125 = arith.constant dense<0.000000e+00> : vector<1x128xf32>
      %324 = tpu.matmul %322, %323, %cst_125 {dimension_numbers = #tpu.dot_dimension_numbers<[1], [0], [0], [1], [0, 0, 1, 1], [], []>} : vector<1x32xbf16>, vector<32x128xbf16>, vector<1x128xf32> -> vector<1x128xf32>
      %c0_126 = arith.constant 0 : index
      %c0_127 = arith.constant 0 : index
      %325 = vector.load %arg12[%c0_126, %c0_127] : memref<1x128xf32, #tpu.memory_space<vmem>>, vector<1x128xf32>
      %326 = arith.addf %324, %325 : vector<1x128xf32>
      %cst_128 = arith.constant 2.500000e-01 : f32
      %327 = vector.broadcast %cst_128 : f32 to vector<1x128xf32>
      %328 = arith.mulf %314, %327 : vector<1x128xf32>
      %329 = vector.extract_strided_slice %218 {offsets = [0, 0], sizes = [16, 32], strides = [1, 1]} : vector<24x32xf32> to vector<16x32xf32>
      %c0_129 = arith.constant 0 : index
      %c0_130 = arith.constant 0 : index
      %330 = vector.load %arg13[%c0_129, %c0_130] : memref<128x32xbf16, #tpu.memory_space<vmem>>, vector<128x32xbf16>
      %c0_131 = arith.constant 0 : index
      %c0_132 = arith.constant 0 : index
      %331 = vector.load %arg14[%c0_131, %c0_132] : memref<128x32xbf16, #tpu.memory_space<vmem>>, vector<128x32xbf16>
      %332 = arith.truncf %329 : vector<16x32xf32> to vector<16x32xbf16>
      %c0_133 = arith.constant 0 : index
      %c0_134 = arith.constant 0 : index
      %333 = vector.load %arg15[%c0_133, %c0_134] : memref<32x32xbf16, #tpu.memory_space<vmem>>, vector<32x32xbf16>
      %cst_135 = arith.constant dense<0.000000e+00> : vector<16x32xf32>
      %334 = tpu.matmul %332, %333, %cst_135 {dimension_numbers = #tpu.dot_dimension_numbers<[1], [0], [0], [1], [0, 0, 1, 1], [], []>} : vector<16x32xbf16>, vector<32x32xbf16>, vector<16x32xf32> -> vector<16x32xf32>
      %335 = tpu.iota {dimensions = array<i32: 1>} : vector<16x128xi32>
      %c16_i32 = arith.constant 16 : i32
      %336 = vector.broadcast %c16_i32 : i32 to vector<16x128xi32>
      %337 = arith.cmpi slt, %335, %336 : vector<16x128xi32>
      %cst_136 = arith.constant 0.000000e+00 : f32
      %338 = vector.broadcast %cst_136 : f32 to vector<16x128xf32>
      %339 = vector.extract_strided_slice %334 {offsets = [0, 0], sizes = [16, 8], strides = [1, 1]} : vector<16x32xf32> to vector<16x8xf32>
      %340 = arith.truncf %339 : vector<16x8xf32> to vector<16x8xbf16>
      %341 = vector.extract_strided_slice %330 {offsets = [0, 0], sizes = [128, 8], strides = [1, 1]} : vector<128x32xbf16> to vector<128x8xbf16>
      %342 = vector.extract_strided_slice %331 {offsets = [0, 0], sizes = [128, 8], strides = [1, 1]} : vector<128x32xbf16> to vector<128x8xbf16>
      %cst_137 = arith.constant dense<0.000000e+00> : vector<16x128xf32>
      %343 = tpu.matmul %340, %341, %cst_137 {dimension_numbers = #tpu.dot_dimension_numbers<[1], [1], [0], [0], [0, 0, 1, 0], [], []>} : vector<16x8xbf16>, vector<128x8xbf16>, vector<16x128xf32> -> vector<16x128xf32>
      %cst_138 = arith.constant -1.000000e+30 : f32
      %344 = vector.broadcast %cst_138 : f32 to vector<16x128xf32>
      %345 = arith.select %337, %343, %344 : vector<16x128xi1>, vector<16x128xf32>
      %cst_139 = arith.constant dense<0xFF800000> : vector<16xf32>
      %346 = vector.multi_reduction <maximumf>, %345, %cst_139 [1] : vector<16x128xf32> to vector<16xf32>
      %347 = vector.shape_cast %346 : vector<16xf32> to vector<16x1xf32>
      %348 = vector.broadcast %347 : vector<16x1xf32> to vector<16x128xf32>
      %349 = arith.subf %345, %348 : vector<16x128xf32>
      %350 = math.exp %349 : vector<16x128xf32>
      %cst_140 = arith.constant dense<0.000000e+00> : vector<16xf32>
      %351 = vector.multi_reduction <add>, %350, %cst_140 [1] : vector<16x128xf32> to vector<16xf32>
      %352 = vector.shape_cast %351 : vector<16xf32> to vector<16x1xf32>
      %353 = vector.broadcast %352 : vector<16x1xf32> to vector<16x128xf32>
      %354 = arith.divf %350, %353 : vector<16x128xf32>
      %355 = arith.addf %338, %354 : vector<16x128xf32>
      %356 = arith.truncf %354 : vector<16x128xf32> to vector<16x128xbf16>
      %cst_141 = arith.constant dense<0.000000e+00> : vector<16x8xf32>
      %357 = tpu.matmul %356, %342, %cst_141 {dimension_numbers = #tpu.dot_dimension_numbers<[1], [0], [0], [1], [0, 0, 1, 1], [], []>} : vector<16x128xbf16>, vector<128x8xbf16>, vector<16x8xf32> -> vector<16x8xf32>
      %cst_142 = arith.constant dense<0.000000e+00> : vector<8xf32>
      %358 = vector.multi_reduction <add>, %357, %cst_142 [0] : vector<16x8xf32> to vector<8xf32>
      %359 = vector.shape_cast %358 : vector<8xf32> to vector<1x8xf32>
      %cst_143 = arith.constant 1.600000e+01 : f32
      %360 = vector.broadcast %cst_143 : f32 to vector<1x8xf32>
      %361 = arith.divf %359, %360 : vector<1x8xf32>
      %362 = vector.extract_strided_slice %334 {offsets = [0, 8], sizes = [16, 8], strides = [1, 1]} : vector<16x32xf32> to vector<16x8xf32>
      %363 = arith.truncf %362 : vector<16x8xf32> to vector<16x8xbf16>
      %364 = vector.extract_strided_slice %330 {offsets = [0, 8], sizes = [128, 8], strides = [1, 1]} : vector<128x32xbf16> to vector<128x8xbf16>
      %365 = vector.extract_strided_slice %331 {offsets = [0, 8], sizes = [128, 8], strides = [1, 1]} : vector<128x32xbf16> to vector<128x8xbf16>
      %cst_144 = arith.constant dense<0.000000e+00> : vector<16x128xf32>
      %366 = tpu.matmul %363, %364, %cst_144 {dimension_numbers = #tpu.dot_dimension_numbers<[1], [1], [0], [0], [0, 0, 1, 0], [], []>} : vector<16x8xbf16>, vector<128x8xbf16>, vector<16x128xf32> -> vector<16x128xf32>
      %cst_145 = arith.constant -1.000000e+30 : f32
      %367 = vector.broadcast %cst_145 : f32 to vector<16x128xf32>
      %368 = arith.select %337, %366, %367 : vector<16x128xi1>, vector<16x128xf32>
      %cst_146 = arith.constant dense<0xFF800000> : vector<16xf32>
      %369 = vector.multi_reduction <maximumf>, %368, %cst_146 [1] : vector<16x128xf32> to vector<16xf32>
      %370 = vector.shape_cast %369 : vector<16xf32> to vector<16x1xf32>
      %371 = vector.broadcast %370 : vector<16x1xf32> to vector<16x128xf32>
      %372 = arith.subf %368, %371 : vector<16x128xf32>
      %373 = math.exp %372 : vector<16x128xf32>
      %cst_147 = arith.constant dense<0.000000e+00> : vector<16xf32>
      %374 = vector.multi_reduction <add>, %373, %cst_147 [1] : vector<16x128xf32> to vector<16xf32>
      %375 = vector.shape_cast %374 : vector<16xf32> to vector<16x1xf32>
      %376 = vector.broadcast %375 : vector<16x1xf32> to vector<16x128xf32>
      %377 = arith.divf %373, %376 : vector<16x128xf32>
      %378 = arith.addf %355, %377 : vector<16x128xf32>
      %379 = arith.truncf %377 : vector<16x128xf32> to vector<16x128xbf16>
      %cst_148 = arith.constant dense<0.000000e+00> : vector<16x8xf32>
      %380 = tpu.matmul %379, %365, %cst_148 {dimension_numbers = #tpu.dot_dimension_numbers<[1], [0], [0], [1], [0, 0, 1, 1], [], []>} : vector<16x128xbf16>, vector<128x8xbf16>, vector<16x8xf32> -> vector<16x8xf32>
      %cst_149 = arith.constant dense<0.000000e+00> : vector<8xf32>
      %381 = vector.multi_reduction <add>, %380, %cst_149 [0] : vector<16x8xf32> to vector<8xf32>
      %382 = vector.shape_cast %381 : vector<8xf32> to vector<1x8xf32>
      %cst_150 = arith.constant 1.600000e+01 : f32
      %383 = vector.broadcast %cst_150 : f32 to vector<1x8xf32>
      %384 = arith.divf %382, %383 : vector<1x8xf32>
      %385 = vector.extract_strided_slice %334 {offsets = [0, 16], sizes = [16, 8], strides = [1, 1]} : vector<16x32xf32> to vector<16x8xf32>
      %386 = arith.truncf %385 : vector<16x8xf32> to vector<16x8xbf16>
      %387 = vector.extract_strided_slice %330 {offsets = [0, 16], sizes = [128, 8], strides = [1, 1]} : vector<128x32xbf16> to vector<128x8xbf16>
      %388 = vector.extract_strided_slice %331 {offsets = [0, 16], sizes = [128, 8], strides = [1, 1]} : vector<128x32xbf16> to vector<128x8xbf16>
      %cst_151 = arith.constant dense<0.000000e+00> : vector<16x128xf32>
      %389 = tpu.matmul %386, %387, %cst_151 {dimension_numbers = #tpu.dot_dimension_numbers<[1], [1], [0], [0], [0, 0, 1, 0], [], []>} : vector<16x8xbf16>, vector<128x8xbf16>, vector<16x128xf32> -> vector<16x128xf32>
      %cst_152 = arith.constant -1.000000e+30 : f32
      %390 = vector.broadcast %cst_152 : f32 to vector<16x128xf32>
      %391 = arith.select %337, %389, %390 : vector<16x128xi1>, vector<16x128xf32>
      %cst_153 = arith.constant dense<0xFF800000> : vector<16xf32>
      %392 = vector.multi_reduction <maximumf>, %391, %cst_153 [1] : vector<16x128xf32> to vector<16xf32>
      %393 = vector.shape_cast %392 : vector<16xf32> to vector<16x1xf32>
      %394 = vector.broadcast %393 : vector<16x1xf32> to vector<16x128xf32>
      %395 = arith.subf %391, %394 : vector<16x128xf32>
      %396 = math.exp %395 : vector<16x128xf32>
      %cst_154 = arith.constant dense<0.000000e+00> : vector<16xf32>
      %397 = vector.multi_reduction <add>, %396, %cst_154 [1] : vector<16x128xf32> to vector<16xf32>
      %398 = vector.shape_cast %397 : vector<16xf32> to vector<16x1xf32>
      %399 = vector.broadcast %398 : vector<16x1xf32> to vector<16x128xf32>
      %400 = arith.divf %396, %399 : vector<16x128xf32>
      %401 = arith.addf %378, %400 : vector<16x128xf32>
      %402 = arith.truncf %400 : vector<16x128xf32> to vector<16x128xbf16>
      %cst_155 = arith.constant dense<0.000000e+00> : vector<16x8xf32>
      %403 = tpu.matmul %402, %388, %cst_155 {dimension_numbers = #tpu.dot_dimension_numbers<[1], [0], [0], [1], [0, 0, 1, 1], [], []>} : vector<16x128xbf16>, vector<128x8xbf16>, vector<16x8xf32> -> vector<16x8xf32>
      %cst_156 = arith.constant dense<0.000000e+00> : vector<8xf32>
      %404 = vector.multi_reduction <add>, %403, %cst_156 [0] : vector<16x8xf32> to vector<8xf32>
      %405 = vector.shape_cast %404 : vector<8xf32> to vector<1x8xf32>
      %cst_157 = arith.constant 1.600000e+01 : f32
      %406 = vector.broadcast %cst_157 : f32 to vector<1x8xf32>
      %407 = arith.divf %405, %406 : vector<1x8xf32>
      %408 = vector.extract_strided_slice %334 {offsets = [0, 24], sizes = [16, 8], strides = [1, 1]} : vector<16x32xf32> to vector<16x8xf32>
      %409 = arith.truncf %408 : vector<16x8xf32> to vector<16x8xbf16>
      %410 = vector.extract_strided_slice %330 {offsets = [0, 24], sizes = [128, 8], strides = [1, 1]} : vector<128x32xbf16> to vector<128x8xbf16>
      %411 = vector.extract_strided_slice %331 {offsets = [0, 24], sizes = [128, 8], strides = [1, 1]} : vector<128x32xbf16> to vector<128x8xbf16>
      %cst_158 = arith.constant dense<0.000000e+00> : vector<16x128xf32>
      %412 = tpu.matmul %409, %410, %cst_158 {dimension_numbers = #tpu.dot_dimension_numbers<[1], [1], [0], [0], [0, 0, 1, 0], [], []>} : vector<16x8xbf16>, vector<128x8xbf16>, vector<16x128xf32> -> vector<16x128xf32>
      %cst_159 = arith.constant -1.000000e+30 : f32
      %413 = vector.broadcast %cst_159 : f32 to vector<16x128xf32>
      %414 = arith.select %337, %412, %413 : vector<16x128xi1>, vector<16x128xf32>
      %cst_160 = arith.constant dense<0xFF800000> : vector<16xf32>
      %415 = vector.multi_reduction <maximumf>, %414, %cst_160 [1] : vector<16x128xf32> to vector<16xf32>
      %416 = vector.shape_cast %415 : vector<16xf32> to vector<16x1xf32>
      %417 = vector.broadcast %416 : vector<16x1xf32> to vector<16x128xf32>
      %418 = arith.subf %414, %417 : vector<16x128xf32>
      %419 = math.exp %418 : vector<16x128xf32>
      %cst_161 = arith.constant dense<0.000000e+00> : vector<16xf32>
      %420 = vector.multi_reduction <add>, %419, %cst_161 [1] : vector<16x128xf32> to vector<16xf32>
      %421 = vector.shape_cast %420 : vector<16xf32> to vector<16x1xf32>
      %422 = vector.broadcast %421 : vector<16x1xf32> to vector<16x128xf32>
      %423 = arith.divf %419, %422 : vector<16x128xf32>
      %424 = arith.addf %401, %423 : vector<16x128xf32>
      %425 = arith.truncf %423 : vector<16x128xf32> to vector<16x128xbf16>
      %cst_162 = arith.constant dense<0.000000e+00> : vector<16x8xf32>
      %426 = tpu.matmul %425, %411, %cst_162 {dimension_numbers = #tpu.dot_dimension_numbers<[1], [0], [0], [1], [0, 0, 1, 1], [], []>} : vector<16x128xbf16>, vector<128x8xbf16>, vector<16x8xf32> -> vector<16x8xf32>
      %cst_163 = arith.constant dense<0.000000e+00> : vector<8xf32>
      %427 = vector.multi_reduction <add>, %426, %cst_163 [0] : vector<16x8xf32> to vector<8xf32>
      %428 = vector.shape_cast %427 : vector<8xf32> to vector<1x8xf32>
      %cst_164 = arith.constant 1.600000e+01 : f32
      %429 = vector.broadcast %cst_164 : f32 to vector<1x8xf32>
      %430 = arith.divf %428, %429 : vector<1x8xf32>
      %431 = tpu.concatenate %361, %384, %407, %430 in 1 : vector<1x8xf32>, vector<1x8xf32>, vector<1x8xf32>, vector<1x8xf32> -> vector<1x32xf32>
      %432 = arith.truncf %431 : vector<1x32xf32> to vector<1x32xbf16>
      %c0_165 = arith.constant 0 : index
      %c0_166 = arith.constant 0 : index
      %433 = vector.load %arg16[%c0_165, %c0_166] : memref<32x128xbf16, #tpu.memory_space<vmem>>, vector<32x128xbf16>
      %cst_167 = arith.constant dense<0.000000e+00> : vector<1x128xf32>
      %434 = tpu.matmul %432, %433, %cst_167 {dimension_numbers = #tpu.dot_dimension_numbers<[1], [0], [0], [1], [0, 0, 1, 1], [], []>} : vector<1x32xbf16>, vector<32x128xbf16>, vector<1x128xf32> -> vector<1x128xf32>
      %c0_168 = arith.constant 0 : index
      %c0_169 = arith.constant 0 : index
      %435 = vector.load %arg17[%c0_168, %c0_169] : memref<1x128xf32, #tpu.memory_space<vmem>>, vector<1x128xf32>
      %436 = arith.addf %434, %435 : vector<1x128xf32>
      %cst_170 = arith.constant 2.500000e-01 : f32
      %437 = vector.broadcast %cst_170 : f32 to vector<16x128xf32>
      %438 = arith.mulf %424, %437 : vector<16x128xf32>
      %439 = arith.addf %326, %436 : vector<1x128xf32>
      %c0_171 = arith.constant 0 : index
      %c0_172 = arith.constant 0 : index
      %c0_173 = arith.constant 0 : index
      %440 = vector.load %arg30[%c0_171, %c0_172, %c0_173] : memref<1x1x128xf32, #tpu.memory_space<vmem>>, vector<1x1x128xf32>
      %441 = vector.shape_cast %440 : vector<1x1x128xf32> to vector<1x128xf32>
      %442 = vector.shape_cast %439 : vector<1x128xf32> to vector<1x1x128xf32>
      tpu.vector_store %arg30[%c0_171, %c0_172, %c0_173], %442 {strides = array<i32>} : memref<1x1x128xf32, #tpu.memory_space<vmem>>, vector<1x1x128xf32>,
      %c0_174 = arith.constant 0 : index
      %c0_175 = arith.constant 0 : index
      %c0_176 = arith.constant 0 : index
      %443 = vector.load %arg31[%c0_174, %c0_175, %c0_176] : memref<1x1x128xf32, #tpu.memory_space<vmem>>, vector<1x1x128xf32>
      %444 = vector.shape_cast %443 : vector<1x1x128xf32> to vector<1x128xf32>
      %445 = vector.shape_cast %328 : vector<1x128xf32> to vector<1x1x128xf32>
      tpu.vector_store %arg31[%c0_174, %c0_175, %c0_176], %445 {strides = array<i32>} : memref<1x1x128xf32, #tpu.memory_space<vmem>>, vector<1x1x128xf32>,
      %c0_177 = arith.constant 0 : index
      %c0_178 = arith.constant 0 : index
      %c0_179 = arith.constant 0 : index
      %446 = vector.load %arg32[%c0_177, %c0_178, %c0_179] : memref<1x16x128xf32, #tpu.memory_space<vmem>>, vector<1x16x128xf32>
      %447 = vector.shape_cast %446 : vector<1x16x128xf32> to vector<16x128xf32>
      %448 = vector.shape_cast %438 : vector<16x128xf32> to vector<1x16x128xf32>
      tpu.vector_store %arg32[%c0_177, %c0_178, %c0_179], %448 {strides = array<i32>} : memref<1x16x128xf32, #tpu.memory_space<vmem>>, vector<1x16x128xf32>,
    } else {
    }
    return
  }
  func.func @transform_0(%arg0: i32, %arg1: i32) -> (i32, i32, i32) {
    %c0_i32 = arith.constant 0 : i32
    %c0_i32_0 = arith.constant 0 : i32
    %c0_i32_1 = arith.constant 0 : i32
    return %arg0, %c0_i32, %c0_i32_0 : i32, i32, i32
  }
  func.func @transform_1(%arg0: i32, %arg1: i32) -> (i32, i32) {
    %c0_i32 = arith.constant 0 : i32
    %c0_i32_0 = arith.constant 0 : i32
    %c0_i32_1 = arith.constant 0 : i32
    return %c0_i32, %c0_i32_0 : i32, i32
  }
  func.func @transform_2(%arg0: i32, %arg1: i32) -> (i32, i32) {
    %c0_i32 = arith.constant 0 : i32
    %c0_i32_0 = arith.constant 0 : i32
    %c0_i32_1 = arith.constant 0 : i32
    return %c0_i32, %c0_i32_0 : i32, i32
  }
  func.func @transform_3(%arg0: i32, %arg1: i32) -> (i32, i32) {
    %c0_i32 = arith.constant 0 : i32
    %c0_i32_0 = arith.constant 0 : i32
    %c0_i32_1 = arith.constant 0 : i32
    return %c0_i32, %c0_i32_0 : i32, i32
  }
  func.func @transform_4(%arg0: i32, %arg1: i32) -> (i32, i32) {
    %c0_i32 = arith.constant 0 : i32
    %c0_i32_0 = arith.constant 0 : i32
    %c0_i32_1 = arith.constant 0 : i32
    return %c0_i32, %c0_i32_0 : i32, i32
  }
  func.func @transform_5(%arg0: i32, %arg1: i32) -> (i32, i32) {
    %c0_i32 = arith.constant 0 : i32
    %c0_i32_0 = arith.constant 0 : i32
    %c0_i32_1 = arith.constant 0 : i32
    return %c0_i32, %c0_i32_0 : i32, i32
  }
  func.func @transform_6(%arg0: i32, %arg1: i32) -> (i32, i32) {
    %c0_i32 = arith.constant 0 : i32
    %c0_i32_0 = arith.constant 0 : i32
    %c0_i32_1 = arith.constant 0 : i32
    return %c0_i32, %c0_i32_0 : i32, i32
  }
  func.func @transform_7(%arg0: i32, %arg1: i32) -> (i32, i32) {
    %c0_i32 = arith.constant 0 : i32
    %c0_i32_0 = arith.constant 0 : i32
    %c0_i32_1 = arith.constant 0 : i32
    return %c0_i32, %c0_i32_0 : i32, i32
  }
  func.func @transform_8(%arg0: i32, %arg1: i32) -> (i32, i32) {
    %c0_i32 = arith.constant 0 : i32
    %c0_i32_0 = arith.constant 0 : i32
    %c0_i32_1 = arith.constant 0 : i32
    return %c0_i32, %c0_i32_0 : i32, i32
  }
  func.func @transform_9(%arg0: i32, %arg1: i32) -> (i32, i32) {
    %c0_i32 = arith.constant 0 : i32
    %c0_i32_0 = arith.constant 0 : i32
    %c0_i32_1 = arith.constant 0 : i32
    return %c0_i32, %c0_i32_0 : i32, i32
  }
  func.func @transform_10(%arg0: i32, %arg1: i32) -> (i32, i32) {
    %c0_i32 = arith.constant 0 : i32
    %c0_i32_0 = arith.constant 0 : i32
    %c0_i32_1 = arith.constant 0 : i32
    return %c0_i32, %c0_i32_0 : i32, i32
  }
  func.func @transform_11(%arg0: i32, %arg1: i32) -> (i32, i32) {
    %c0_i32 = arith.constant 0 : i32
    %c0_i32_0 = arith.constant 0 : i32
    %c0_i32_1 = arith.constant 0 : i32
    return %c0_i32, %c0_i32_0 : i32, i32
  }
  func.func @transform_12(%arg0: i32, %arg1: i32) -> (i32, i32) {
    %c0_i32 = arith.constant 0 : i32
    %c0_i32_0 = arith.constant 0 : i32
    %c0_i32_1 = arith.constant 0 : i32
    return %c0_i32, %c0_i32_0 : i32, i32
  }
  func.func @transform_13(%arg0: i32, %arg1: i32) -> (i32, i32) {
    %c0_i32 = arith.constant 0 : i32
    %c0_i32_0 = arith.constant 0 : i32
    %c0_i32_1 = arith.constant 0 : i32
    return %c0_i32, %c0_i32_0 : i32, i32
  }
  func.func @transform_14(%arg0: i32, %arg1: i32) -> (i32, i32) {
    %c0_i32 = arith.constant 0 : i32
    %c0_i32_0 = arith.constant 0 : i32
    %c0_i32_1 = arith.constant 0 : i32
    return %c0_i32, %c0_i32_0 : i32, i32
  }
  func.func @transform_15(%arg0: i32, %arg1: i32) -> (i32, i32) {
    %c0_i32 = arith.constant 0 : i32
    %c0_i32_0 = arith.constant 0 : i32
    %c0_i32_1 = arith.constant 0 : i32
    return %c0_i32, %c0_i32_0 : i32, i32
  }
  func.func @transform_16(%arg0: i32, %arg1: i32) -> (i32, i32, i32) {
    %c0_i32 = arith.constant 0 : i32
    %c0_i32_0 = arith.constant 0 : i32
    %c0_i32_1 = arith.constant 0 : i32
    return %arg1, %c0_i32, %c0_i32_0 : i32, i32, i32
  }
  func.func @transform_17(%arg0: i32, %arg1: i32) -> (i32, i32, i32) {
    %c0_i32 = arith.constant 0 : i32
    %c0_i32_0 = arith.constant 0 : i32
    %c0_i32_1 = arith.constant 0 : i32
    return %arg1, %c0_i32, %c0_i32_0 : i32, i32, i32
  }
  func.func @transform_18(%arg0: i32, %arg1: i32) -> (i32, i32, i32) {
    %c0_i32 = arith.constant 0 : i32
    %c0_i32_0 = arith.constant 0 : i32
    %c0_i32_1 = arith.constant 0 : i32
    return %arg1, %c0_i32, %c0_i32_0 : i32, i32, i32
  }
  func.func @transform_19(%arg0: i32, %arg1: i32) -> (i32, i32, i32) {
    %c0_i32 = arith.constant 0 : i32
    %c0_i32_0 = arith.constant 0 : i32
    %c0_i32_1 = arith.constant 0 : i32
    return %arg1, %c0_i32, %c0_i32_0 : i32, i32, i32
  }
  func.func @transform_20(%arg0: i32, %arg1: i32) -> (i32, i32, i32) {
    %c0_i32 = arith.constant 0 : i32
    %c0_i32_0 = arith.constant 0 : i32
    %c0_i32_1 = arith.constant 0 : i32
    return %arg1, %c0_i32, %c0_i32_0 : i32, i32, i32
  }
  func.func @transform_21(%arg0: i32, %arg1: i32) -> (i32, i32, i32) {
    %c0_i32 = arith.constant 0 : i32
    %c0_i32_0 = arith.constant 0 : i32
    %c0_i32_1 = arith.constant 0 : i32
    return %arg1, %c0_i32, %c0_i32_0 : i32, i32, i32
  }
  func.func @transform_22(%arg0: i32, %arg1: i32) -> (i32, i32, i32) {
    %c0_i32 = arith.constant 0 : i32
    %c0_i32_0 = arith.constant 0 : i32
    %c0_i32_1 = arith.constant 0 : i32
    return %arg1, %c0_i32, %c0_i32_0 : i32, i32, i32
  }
  func.func @transform_23(%arg0: i32, %arg1: i32) -> (i32, i32, i32) {
    %c0_i32 = arith.constant 0 : i32
    %c0_i32_0 = arith.constant 0 : i32
    %c0_i32_1 = arith.constant 0 : i32
    return %arg1, %c0_i32, %c0_i32_0 : i32, i32, i32
  }
  func.func @transform_24(%arg0: i32, %arg1: i32) -> (i32, i32, i32) {
    %c0_i32 = arith.constant 0 : i32
    %c0_i32_0 = arith.constant 0 : i32
    %c0_i32_1 = arith.constant 0 : i32
    return %arg1, %c0_i32, %c0_i32_0 : i32, i32, i32
  }
  func.func @transform_25(%arg0: i32, %arg1: i32) -> (i32, i32, i32) {
    %c0_i32 = arith.constant 0 : i32
    %c0_i32_0 = arith.constant 0 : i32
    %c0_i32_1 = arith.constant 0 : i32
    return %arg1, %c0_i32, %c0_i32_0 : i32, i32, i32
  }
  func.func @transform_26(%arg0: i32, %arg1: i32) -> (i32, i32, i32) {
    %c0_i32 = arith.constant 0 : i32
    %c0_i32_0 = arith.constant 0 : i32
    %c0_i32_1 = arith.constant 0 : i32
    return %arg1, %c0_i32, %c0_i32_0 : i32, i32, i32
  }
  func.func @transform_27(%arg0: i32, %arg1: i32) -> (i32, i32, i32) {
    %c0_i32 = arith.constant 0 : i32
    %c0_i32_0 = arith.constant 0 : i32
    %c0_i32_1 = arith.constant 0 : i32
    return %arg1, %c0_i32, %c0_i32_0 : i32, i32, i32
  }
  func.func @transform_28(%arg0: i32, %arg1: i32) -> (i32, i32, i32) {
    %c0_i32 = arith.constant 0 : i32
    %c0_i32_0 = arith.constant 0 : i32
    %c0_i32_1 = arith.constant 0 : i32
    return %arg0, %c0_i32, %c0_i32_0 : i32, i32, i32
  }
  func.func @transform_29(%arg0: i32, %arg1: i32) -> (i32, i32, i32) {
    %c0_i32 = arith.constant 0 : i32
    %c0_i32_0 = arith.constant 0 : i32
    %c0_i32_1 = arith.constant 0 : i32
    return %arg0, %c0_i32, %c0_i32_0 : i32, i32, i32
  }
  func.func @transform_30(%arg0: i32, %arg1: i32) -> (i32, i32, i32) {
    %c0_i32 = arith.constant 0 : i32
    %c0_i32_0 = arith.constant 0 : i32
    %c0_i32_1 = arith.constant 0 : i32
    return %arg0, %c0_i32, %c0_i32_0 : i32, i32, i32
  }
}

</mosaic_0001>

<bundles_post_ra>
// kernel: tpu_custom_call.1
= control target key start
LH: loop header
LB: loop body
LE: loop exit
PB: predicated region body
PF: predicated region fallthrough
CT: control target
= control target key end

     0   :  { %s4860_s6 = smov 1   ;;  %s4861_s10 = smov 2   ;;  %s6101_s0 = inlined_call_operand.smem [shape: u32[31], index: -1, kind: input, shape index: {}] }
   0x1   :  { %s4921_s5 = sld [smem:[%s6101_s0]]   ;;  %s4862_s14 = smov 3  }
   0x2   :  { %s4926_s9 = sld [smem:[%s6101_s0 + %s4860_s6]]   ;;  %s4863_s18 = smov 4  }
   0x3   :  { %s4931_s13 = sld [smem:[%s6101_s0 + %s4861_s10]]   ;;  %s4864_s22 = smov 5  }
   0x4   :  { %s4936_s17 = sld [smem:[%s6101_s0 + %s4862_s14]]   ;;  %s4865_s26 = smov 6  }
   0x5   :  { %s4941_s21 = sld [smem:[%s6101_s0 + %s4863_s18]]   ;;  %s4866_s30 = smov 7  }
   0x6   :  { %s4946_s25 = sld [smem:[%s6101_s0 + %s4864_s22]]   ;;  %s4867_s4 = smov 8  }
   0x7   :  { %6146 = sst [smem:[#allocation10_spill]] %s4921_s5  ;;  %s4868_s10 = smov 9  }
   0x8   :  { %6147 = sst [smem:[#allocation11_spill]] %s4926_s9  ;;  %s4869_s15 = smov 10  }
   0x9   :  { %6148 = sst [smem:[#allocation12_spill]] %s4931_s13  ;;  %s4870_s20 = smov 11  }
   0xa   :  { %6149 = sst [smem:[#allocation13_spill]] %s4936_s17  ;;  %s4872_s1 = smov 13  }
   0xb   :  { %6150 = sst [smem:[#allocation14_spill]] %s4941_s21  ;;  %s4873_s7 = smov 14  }
   0xc   :  { %6151 = sst [smem:[#allocation15_spill]] %s4946_s25  ;;  %s4875_s22 = smov 16  }
   0xd   :  { %s4951_s29 = sld [smem:[%s6101_s0 + %s4865_s26]]   ;;  %s4871_s26 = smov 12  }
   0xe   :  { %s4956_s3 = sld [smem:[%s6101_s0 + %s4866_s30]]   ;;  %s4876_s28 = smov 17  }
   0xf   :  { %s4961_s8 = sld [smem:[%s6101_s0 + %s4867_s4]]  }
  0x10   :  { %s4966_s14 = sld [smem:[%s6101_s0 + %s4868_s10]]  }
  0x11   :  { %s4971_s19 = sld [smem:[%s6101_s0 + %s4869_s15]]   ;;  %s4874_s15 = smov 15  }
  0x12   :  { %s4976_s24 = sld [smem:[%s6101_s0 + %s4870_s20]]  }
  0x13   :  { %6152 = sst [smem:[#allocation16_spill]] %s4951_s29 }
  0x14   :  { %6153 = sst [smem:[#allocation17_spill]] %s4956_s3 }
  0x15   :  { %6154 = sst [smem:[#allocation18_spill]] %s4961_s8 }
  0x16   :  { %6155 = sst [smem:[#allocation19_spill]] %s4966_s14 }
  0x17   :  { %6156 = sst [smem:[#allocation20_spill]] %s4971_s19 }
  0x18   :  { %6157 = sst [smem:[#allocation21_spill]] %s4976_s24 }
  0x19   :  { %s4981_s30 = sld [smem:[%s6101_s0 + %s4871_s26]]  }
  0x1a   :  { %s4986_s6 = sld [smem:[%s6101_s0 + %s4872_s1]]  }
  0x1b   :  { %s4991_s12 = sld [smem:[%s6101_s0 + %s4873_s7]]   ;;  %s4877_s7 = smov 18  }
  0x1c   :  { %s4996_s20 = sld [smem:[%s6101_s0 + %s4874_s15]]   ;;  %s4878_s15 = smov 19  }
  0x1d   :  { %s5001_s27 = sld [smem:[%s6101_s0 + %s4875_s22]]   ;;  %s4879_s22 = smov 20  }
  0x1e   :  { %s5006_s4 = sld [smem:[%s6101_s0 + %s4876_s28]]   ;;  %s4880_s28 = smov 21  }
  0x1f   :  { %6158 = sst [smem:[#allocation22_spill]] %s4981_s30 }
  0x20   :  { %6159 = sst [smem:[#allocation23_spill]] %s4986_s6 }
  0x21   :  { %6160 = sst [smem:[#allocation24_spill]] %s4991_s12 }
  0x22   :  { %6161 = sst [smem:[#allocation25_spill]] %s4996_s20 }
  0x23   :  { %s5011_s19 = sld [smem:[%s6101_s0 + %s4877_s7]]   ;;  %s4881_s7 = smov 22  }
  0x24   :  { %6162 = sst [smem:[#allocation26_spill]] %s5006_s4 }
  0x25   :  { %s5016_s20 = sld [smem:[%s6101_s0 + %s4878_s15]]   ;;  %s4882_s15 = smov 23  }
  0x26   :  { %s5021_s12 = sld [smem:[%s6101_s0 + %s4879_s22]]   ;;  %s4883_s22 = smov 24  }
  0x27   :  { %s5026_s30 = sld [smem:[%s6101_s0 + %s4880_s28]]   ;;  %s4884_s28 = smov 25  }
  0x28   :  { %s5031_s24 = sld [smem:[%s6101_s0 + %s4881_s7]]   ;;  %s4885_s7 = smov 26  }
  0x29   :  { %s5036_s6 = sld [smem:[%s6101_s0 + %s4882_s15]]   ;;  %s4886_s15 = smov 27  }
  0x2a   :  { %s5041_s14 = sld [smem:[%s6101_s0 + %s4883_s22]]   ;;  %s4887_s22 = smov 28  }
  0x2b   :  { %s5046_s3 = sld [smem:[%s6101_s0 + %s4884_s28]]   ;;  %s4888_s28 = smov 29  }
  0x2c   :  { %s5051_s25 = sld [smem:[%s6101_s0 + %s4885_s7]]   ;;  %s4889_s7 = smov 30  }
  0x2d   :  { %s5056_s21 = sld [smem:[%s6101_s0 + %s4886_s15]]  }
  0x2e   :  { %s5061_s29 = sld [smem:[%s6101_s0 + %s4887_s22]]  }
  0x2f   :  { %6163 = sst [smem:[#allocation27_spill]] %s5036_s6 }
  0x30   :  { %s5066_s8 = sld [smem:[%s6101_s0 + %s4888_s28]]  }
  0x31   :  { %6164 = sst [smem:[#allocation28_spill]] %s5046_s3 }
  0x32   :  { %s5071_s13 = sld [smem:[%s6101_s0 + %s4889_s7]]  }
  0x34   :  { %6165 = sst [smem:[#allocation29_spill]] %s5061_s29 }
  0x36   :  { %6166 = sst [smem:[#allocation30_spill]] %s5066_s8 }
  0x38   :  { %6167 = sst [smem:[#allocation31_spill]] %s5071_s13 }
  0x39   :  { %67 = vsyncpa [#allocation4], 0 }
  0x3a   :  { %69 = vsyncpa [#allocation4 + $0x1], 0 }
  0x3b   :  { %70 = vsyncpa [#allocation6], 0 }
  0x3c   :  { %72 = vsyncpa [#allocation6 + $0x1], 0  ;;  %s5073_s15 = smov 0   ;;  %s5075_s16 = smov 0  }
  0x3d   :  { %s5077_s18 = smov 0   ;;  %s5079_s22 = smov 0  }
  0x3e   :  { %s5081_s23 = smov 0   ;;  %s5083_s26 = smov 0  }
  0x3f   :  { %s5085_s28 = smov 0   ;;  %s5087_s0 = smov 0  }
  0x40 LB: > { %s6168_s6 = sld [smem:[#allocation27_spill]]  ;;  %s6111_s1 = sadd.s32 4294967295, %s4858_s0   ;;  %s4838_s18 = sphi %s5077_s18, %s6235_s18   ;;  %s4834_s16 = sphi %s5075_s16, %s6234_s16   ;;  %s4830_s15 = sphi %s5073_s15, %s6233_s15   ;;  %s4858_s0 = sphi %s5087_s0, %s78_s0   ;;  %s4854_s28 = sphi %s5085_s28, %s6239_s28   ;;  %s4850_s26 = sphi %s5083_s26, %s6238_s26   ;;  %s4846_s23 = sphi %s5081_s23, %s6237_s23   ;;  %s4842_s22 = sphi %s5079_s22, %s6236_s22  }
  0x41   : > { %s6169_s4 = sld [smem:[#allocation26_spill]]  ;;  %s6113_s2 = sadd.s32 4294967294, %s4858_s0  }
  0x42   : > { %s6170_s3 = sld [smem:[#allocation28_spill]]  ;;  %s87_s7 = sadd.s32 1, %s4850_s26 }
  0x43   : > { %6171 = sst [smem:[#allocation32_spill]] %s4830_s15  ;;  %p88_p0 = scmp.ge.s32.totalorder %s87_s7, 2 }
  0x44   : > { %6172 = sst [smem:[#allocation33_spill]] %s4834_s16  ;;  %s90_s10 = sadd.s32 1, %s4854_s28 }
  0x45   : > { %6173 = sst [smem:[#allocation34_spill]] %s4838_s18  ;;  %p760_p1 = scmp.ne.s32.totalorder %s4838_s18, %s4834_s16 }
  0x46   : > { %6174 = sst [smem:[#allocation35_spill]] %s4842_s22  ;;  %p761_p2 = scmp.eq.s32.totalorder %s6111_s1, 3 }
  0x47   : > { %6175 = sst [smem:[#allocation36_spill]] %s4846_s23  ;;  %s6241_s7 = smov (%p88_p0, %s87_s7), 0 }
  0x48   : > { %6176 = sst [smem:[#allocation37_spill]] %s4850_s26  ;;  %s6243_s10 = smov (!%p88_p0, %s90_s10), %s4854_s28 }
  0x49   : > { %6177 = sst [smem:[#allocation38_spill]] %s4854_s28  ;;  %p5124_p3 = por %p761_p2, %p760_p1 }
  0x4a   : > { %6178 = sst [smem:[#allocation39_spill]] %s4858_s0  ;;  %p766_p4 = scmp.ne.s32.totalorder %s4834_s16, %s4830_s15 }
  0x4b   : > { %6179 = sst [smem:[#allocation40_spill]] %s6241_s7  ;;  %p92_p5 = scmp.ge.s32.totalorder %s6243_s10, 2 }
  0x4c   : > { %s6180_s11 = scalar_select %p5124_p3, 1, 0 }
  0x4d   : > { %p767_p6 = scmp.eq.s32.totalorder %s6113_s2, 3  ;;  %p4046_p7 = scmp.ge.s32.totalorder %s4858_s0, 1 }
  0x4e   : > { %6181 = sst [smem:[#allocation41_spill]] %s6180_s11  ;;  %p970_p8 = scmp.lt.s32.totalorder %s4858_s0, 5 }
  0x4f   : > { %s6245_s10 = smov (%p92_p5, %s6243_s10), 0  ;;  %p5136_p9 = por %p767_p6, %p766_p4 }
  0x50   : > { %6182 = sst [smem:[#allocation42_spill]] %s6245_s10  ;;  %p971_p10 = pnand %p4046_p7, %p970_p8 }
  0x51   : > { %s6183_s26 = scalar_select %p5136_p9, 1, 0 }
  0x52   : > { %s747_s1 = ssub.s32 %s4854_s28, %s6245_s10  ;;  %s750_s7 = sadd.s32 1, %s4838_s18 }
  0x53   : > { %6184 = sst [smem:[#allocation43_spill]] %s6183_s26  ;;  %p748_p11 = scmp.eq.s32.totalorder %s747_s1, 0 }
  0x54   : > { %974 = sbr.rel (%p971_p10) target bundleno = 5801 (0x16a9), region = 132 }
  0x55   : > { %s5144_s13 = scalar_select %p748_p11, %s4838_s18, %s750_s7  }
  0x57   : > { %6185 = sst [smem:[#allocation44_spill]] %s5144_s13 }
  0x59   : > { %s6186_s5 = sld [smem:[#allocation10_spill]]  ;;  %s5147_s2 = sand.u32 1, %s4834_s16  }
  0x5a   : > { %p1100_p12 = scmp.lt.s32.totalorder %s4846_s23, 1  ;;  %s4047_s1 = sshll.u32 %s5147_s2, 4 }
  0x5b   : > { %p1105_p13 = scmp.lt.s32.totalorder %s4842_s22, 1  ;;  %s5191_s18 = scalar_lea.vmem [#allocation7], %s4047_s1 }
  0x5c   : > { %s1101_s7 = scalar_select %p1100_p12, %s4846_s23, 1 }
  0x5d   : > { %s5154_s10 = scalar_select %p1105_p13, %s4842_s22, 1 }
  0x5e   : > { %s4351_s28 = sshll.u32 %s1101_s7, 3  ;;  %s6188_s16 = sld [smem:[#allocation35_spill]] }
  0x5f   : > { %s5157_s13 = scalar_lea.vmem %s6186_s5, %s4351_s28  ;;  %s4352_s26 = sshll.u32 %s5154_s10, 4 }
  0x60   : > { %6187 = sst [smem:[#allocation45_spill]] %s5157_s13  ;;  %s5165_s15 = scalar_lea.vmem %s5011_s19, %s4352_s26 }
  0x61   : > { %s5170_s11 = scalar_lea.vmem %s5021_s12, %s4352_s26  ;;  %s1126_s8 = scalar_lea.vmem %s5026_s30, %s5154_s10 }
  0x62   : > { %s1129_s23 = scalar_lea.vmem %s5031_s24, %s5154_s10  ;;  %s1132_s0 = scalar_lea.vmem %s6168_s6, %s5154_s10 }
  0x63   : > { %s5179_s17 = scalar_lea.vmem %s5041_s14, %s4352_s26  ;;  %s1140_s9 = scalar_lea.vmem %s6170_s3, %s5154_s10 }
  0x64   : > { %s4355_s22 = sshll.u32 %s5154_s10, 6  ;;  %s6139_s28 = scalar_lea.vmem [#allocation3], %s5147_s2 }
  0x65   : > { %s5187_s5 = scalar_lea.vmem %s5051_s25, %s4355_s22  ;;  %s6132_s13 = scalar_lea.vmem [#allocation5], %s5147_s2 }
  0x66   : > { %p4058_p0 = scmp.ne.s32.totalorder %s6188_s16, 0 }
  0x67   : > { %s6189_s29 = sld [smem:[#allocation11_spill]] (!%p4058_p0) }
  0x68   : > { %1153 = sbr.rel (%p4058_p0) target bundleno = 280 (0x118), region = 136  ;;  %s6190_s26 = sld [smem:[#allocation45_spill]] (!%p4058_p0) }
  0x69   : > { %s6191_s22 = sld [smem:[#allocation13_spill]] (!%p4058_p0) }
  0x6a   : > { %s6193_s1 = sld [smem:[#allocation12_spill]] (!%p4058_p0) }
  0x6d   : > { %v4364_v0 = vld [vmem:[%s6189_s29 + $0x38] sm:$0xff]  ;;  %v4363_v1 = vld [vmem:[%s6189_s29 + $0x30] sm:$0xff]  ;;  %v4362_v2 = vld [vmem:[%s6189_s29 + $0x28] sm:$0xff]  ;;  %vm1248_vm0 = vcmask 261120  }
  0x6e   : > { %1230 = vmatpush.bf16.msra.mxu0 %v4364_v0  ;;  %v4361_v3 = vld [vmem:[%s6189_s29 + $0x20] sm:$0xff]  ;;  %v4360_v4 = vld [vmem:[%s6189_s29 + $0x18] sm:$0xff]  ;;  %v4359_v5 = vld [vmem:[%s6189_s29 + $0x10] sm:$0xff] }
  0x6f   : > { %s6192_s7 = smov %s6191_s22  ;;  %v4358_v6 = vld [vmem:[%s6189_s29 + $0x8] sm:$0xff]  ;;  %v4357_v7 = vld [vmem:[%s6189_s29] sm:$0xff]  ;;  %v1251_v9 = vld [vmem:[%s6191_s22 + $0x10] sm:$0xff] }
  0x70   : > { %v4356_v8 = vld [vmem:[%s6190_s26] sm:$0xff]  ;;  %1252 = vst.msk [vmem:[#allocation2 + $0x10] sm:$0xff] %vm1248_vm0, %v1251_v9  ;;  %v1245_v16 = vld [vmem:[%s6192_s7 + $0x8] sm:$0xff] }
  0x71   : > { %v4554_v10 = vld [vmem:[%s6193_s1] ss:$0 sm:$0xff] }
  0x72   : > { %1231 = vmatpush.bf16.msra.mxu0 %v4363_v1  ;;  %v1244_v12 = vld [vmem:[%s6192_s7] sm:$0xff] }
  0x76   : > { %1232 = vmatpush.bf16.msra.mxu0 %v4362_v2 }
  0x7a   : > { %1233 = vmatpush.bf16.msra.mxu0 %v4361_v3 }
  0x7e   : > { %1234 = vmatpush.bf16.msra.mxu0 %v4360_v4 }
  0x82   : > { %1235 = vmatpush.bf16.msra.mxu0 %v4359_v5 }
  0x86   : > { %1236 = vmatpush.bf16.msra.mxu0 %v4358_v6 }
  0x8a   : > { %1237 = vmatpush.bf16.msra.mxu0 %v4357_v7 }
  0x8d   : > { %1238 = vmatmul.bf16.vlgmr.msra.gmra.mxu0 %v4356_v8 }
 0x10a   : > { %v1239_v11 = vpop.f32.mrf.mxu0 }
 0x10b   : > { %v1240_v13 = vadd.f32 %v4554_v10, %v1239_v11 }
 0x10d   : > { %v1246_v14 = vadd.f32 %v1244_v12, %v1240_v13 }
 0x10f   : > { %1249 = vst.msk [vmem:[#allocation2] sm:$0xff] %vm1248_vm0, %v1246_v14 }
 0x112   : > { %v1241_v15 = vpop.f32.mrf.mxu0 }
 0x113   : > { %v1242_v17 = vadd.f32 %v4554_v10, %v1241_v15 }
 0x115   : > { %v1247_v18 = vadd.f32 %v1245_v16, %v1242_v17 }
 0x117   : > { %1250 = vst.msk [vmem:[#allocation2 + $0x8] sm:$0xff] %vm1248_vm0, %v1247_v18 }
 0x118 PF: > { %v5207_v19 = vld [vmem:[#allocation2] sm:$0xff]  ;;  %vm1261_vm1 = vcmask 261120   ;;  %v5209_v20 = vld [vmem:[#allocation2 + $0x10] sm:$0xff]  ;;  %v4890_v25 = vmov 32.0   ;;  %v4366_v47 = vld [vmem:[%s5165_s15 + $0x8] sm:$0xff]  ;;  %s6195_s16 = scalar_lea.vmem %s6169_s4, %s5154_s10  ;;  %s6196_s26 = scalar_lea.vmem %s5016_s20, %s5154_s10  ;;  %vm1401_vm12 = vcmask 64512  }
 0x119   : > { %v1262_v21 = vsel %vm1261_vm1, %v5207_v19, 0.0  ;;  %v1268_v22 = vsel %vm1261_vm1, %v5209_v20, 0.0  ;;  %4578 = vrcp.f32 %v4890_v25  ;;  %1381 = vmatpush.bf16.msra.mxu0 %v4366_v47  ;;  %v4365_v50 = vld [vmem:[%s5165_s15] sm:$0xff]  ;;  %s6194_s15 = scalar_lea.vmem %s5001_s27, %s5154_s10  ;;  %s4891_s22 = smov 96   ;;  %vm1482_vm13 = vcmask 1043456  }
 0x11a   : > { %1263 = vadd.xlane.f32.xlu0 %v1262_v21  ;;  %1269 = vadd.xlane.f32.xlu1 %v1268_v22  ;;  %v4570_v8 = vld [vmem:[%s6194_s15] ss:$0 sm:$0xff]  ;;  %s4892_s1 = smov 88   ;;  %s4893_s15 = smov 64   ;;  %vm1435_vm15 = vcmask 195584   ;;  %vm1867_vm0 = vcmask 130048  }
 0x11b   : > { %v4571_v15 = vld [vmem:[%s6195_s16] ss:$0 sm:$0xff]  ;;  %s4894_s16 = smov 120  }
 0x11d   : > { %1382 = vmatpush.bf16.msra.mxu0 %v4365_v50 }
 0x11e   : > { %v5215_v23 = vld [vmem:[#allocation2 + $0x8] sm:$0xff] }
 0x11f   : > { %v1265_v24 = vsel %vm1261_vm1, %v5215_v23, 0.0  ;;  %v4579_v26 = vpop.eup %4578 }
 0x120   : > { %v1272_v27 = vmul.f32 32.0, %v4579_v26  ;;  %vm1276_vm2 = vweird.f32 %v4579_v26 }
 0x122   : > { %1266 = vadd.xlane.f32.xlu0 %v1265_v24  ;;  %v1273_v28 = vsub.f32 1.0, %v1272_v27 }
 0x124   : > { %v1274_v29 = vmul.f32 %v4579_v26, %v1273_v28 }
 0x126   : > { %v1275_v30 = vadd.f32 %v4579_v26, %v1274_v29 }
 0x128   : > { %v5219_v31 = vsel %vm1276_vm2, %v4579_v26, %v1275_v30 }
 0x18d   : > { %v1264_v32 = vpop.xlane.xlu0 %1263  ;;  %v1270_v36 = vpop.xlane.xlu1 %1269 }
 0x18e   : > { %v1278_v33 = vmul.f32 %v5219_v31, %v1264_v32  ;;  %v1280_v40 = vmul.f32 %v5219_v31, %v1270_v36 }
 0x190   : > { %v1281_v34 = vsub.f32 %v5207_v19, %v1278_v33  ;;  %v5228_v42 = vsub.f32 %v5209_v20, %v1280_v40  ;;  %v4572_v33 = vld [vmem:[%s6196_s26] ss:$0 sm:$0xff]  ;;  %s4895_s26 = smov 80  }
 0x192   : > { %v1284_v35 = vmul.f32 %v1281_v34, %v1281_v34  ;;  %v1286_v45 = vmul.f32 %v5228_v42, %v5228_v42 }
 0x194   : > { %v1287_v37 = vsel %vm1261_vm1, %v1284_v35, 0.0  ;;  %v1293_v46 = vsel %vm1261_vm1, %v1286_v45, 0.0 }
 0x195   : > { %1288 = vadd.xlane.f32.xlu1 %v1287_v37  ;;  %v1267_v38 = vpop.xlane.xlu0 %1266 }
 0x196   : > { %v1279_v39 = vmul.f32 %v5219_v31, %v1267_v38 }
 0x198   : > { %v1282_v41 = vsub.f32 %v5215_v23, %v1279_v39 }
 0x19a   : > { %v1285_v43 = vmul.f32 %v1282_v41, %v1282_v41 }
 0x19c   : > { %v1290_v44 = vsel %vm1261_vm1, %v1285_v43, 0.0 }
 0x19d   : > { %1291 = vadd.xlane.f32.xlu2 %v1290_v44 }
 0x1a5   : > { %1294 = vadd.xlane.f32.xlu2 %v1293_v46 }
 0x208   : > { %v1289_v48 = vpop.xlane.xlu1 %1288 }
 0x209   : > { %v1296_v49 = vmul.f32 %v1289_v48, %v5219_v31 }
 0x20b   : > { %v1299_v51 = vadd.f32 1e-06, %v1296_v49 }
 0x20d   : > { %4580 = vrsqrt.f32 %v1299_v51  ;;  %vm1308_vm4 = vweird.f32 %v1299_v51 }
 0x210   : > { %v1292_v52 = vpop.xlane.xlu2 %1291 }
 0x211   : > { %v1297_v53 = vmul.f32 %v1292_v52, %v5219_v31 }
 0x213   : > { %v4581_v54 = vpop.eup %4580  ;;  %v1300_v55 = vadd.f32 1e-06, %v1297_v53 }
 0x214   : > { %v1303_v56 = vmul.f32 %v4581_v54, %v1299_v51  ;;  %vm1309_vm3 = vweird.f32 %v4581_v54  ;;  %v1256_v51 = vlaneseq }
 0x215   : > { %4582 = vrsqrt.f32 %v1300_v55  ;;  %vm1310_vm5 = vmor %vm1308_vm4, %vm1309_vm3  ;;  %vm1318_vm7 = vweird.f32 %v1300_v55 }
 0x216   : > { %v1304_v57 = vmul.f32 %v4581_v54, %v1303_v56  ;;  %v5271_v52 = vand.u32 127, %v1256_v51 }
 0x218   : > { %v1305_v58 = vmul.f32 0.5, %v1304_v57  ;;  %v1295_v59 = vpop.xlane.xlu2 %1294  ;;  %vm1258_vm14 = vcmp.lt.s32.totalorder %v5271_v52, 17 }
 0x219   : > { %v1298_v60 = vmul.f32 %v1295_v59, %v5219_v31 }
 0x21a   : > { %v1306_v61 = vsub.f32 1.5, %v1305_v58 }
 0x21b   : > { %v4583_v62 = vpop.eup %4582  ;;  %v1301_v63 = vadd.f32 1e-06, %v1298_v60 }
 0x21c   : > { %v1307_v0 = vmul.f32 %v4581_v54, %v1306_v61  ;;  %v1313_v1 = vmul.f32 %v4583_v62, %v1300_v55  ;;  %vm1319_vm6 = vweird.f32 %v4583_v62 }
 0x21d   : > { %4584 = vrsqrt.f32 %v1301_v63  ;;  %vm1320_vm8 = vmor %vm1318_vm7, %vm1319_vm6  ;;  %vm1328_vm9 = vweird.f32 %v1301_v63 }
 0x21e   : > { %v1314_v2 = vmul.f32 %v4583_v62, %v1313_v1  ;;  %v1311_v3 = vsel %vm1310_vm5, %v4581_v54, %v1307_v0 }
 0x21f   : > { %v1332_v7 = vmul.f32 %v1311_v3, %v1281_v34 }
 0x220   : > { %v1315_v4 = vmul.f32 0.5, %v1314_v2 }
 0x221   : > { %v1338_v14 = vmul.f32 %v4570_v8, %v1332_v7 }
 0x222   : > { %v1316_v5 = vsub.f32 1.5, %v1315_v4 }
 0x223   : > { %v4585_v6 = vpop.eup %4584  ;;  %v1344_v21 = vadd.f32 %v4571_v15, %v1338_v14 }
 0x224   : > { %v1317_v9 = vmul.f32 %v4583_v62, %v1316_v5  ;;  %v1323_v10 = vmul.f32 %v4585_v6, %v1301_v63  ;;  %vm1329_vm10 = vweird.f32 %v4585_v6 }
 0x225   : > { %vm1330_vm11 = vmor %vm1328_vm9, %vm1329_vm10 }
 0x226   : > { %v1321_v11 = vsel %vm1320_vm8, %v4583_v62, %v1317_v9  ;;  %v1324_v12 = vmul.f32 %v4585_v6, %v1323_v10 }
 0x227   : > { %v1333_v13 = vmul.f32 %v1321_v11, %v1282_v41 }
 0x228   : > { %v1325_v16 = vmul.f32 0.5, %v1324_v12 }
 0x229   : > { %v1339_v17 = vmul.f32 %v4570_v8, %v1333_v13 }
 0x22a   : > { %v1326_v18 = vsub.f32 1.5, %v1325_v16 }
 0x22b   : > { %v1345_v22 = vadd.f32 %v4571_v15, %v1339_v17 }
 0x22c   : > { %v1327_v24 = vmul.f32 %v4585_v6, %v1326_v18 }
 0x22d   : > { %v1347_v25 = vpack.c.bf16 %v1345_v22, %v1344_v21 }
 0x22e   : > { %v1331_v26 = vsel %vm1330_vm11, %v4585_v6, %v1327_v24 }
 0x22f   : > { %4103 = vmatmul.msk.bf16.vlgmr.msra.gmra.mxu0 %vm1261_vm1, %v1347_v25  ;;  %v1334_v27 = vmul.f32 %v1331_v26, %v5228_v42 }
 0x231   : > { %v1340_v28 = vmul.f32 %v4570_v8, %v1334_v27 }
 0x233   : > { %v1346_v29 = vadd.f32 %v4571_v15, %v1340_v28 }
 0x235   : > { %v1348_v30 = vpack.c.bf16 %v1346_v29, %v1346_v29 }
 0x23f   : > { %4104 = vmatmul.msk.bf16.gmra.mxu0 %vm1261_vm1, %v1348_v30 }
 0x2ac   : > { %v1384_v32 = vpop.f32.mrf.mxu0 }
 0x2ad   : > { %v1385_v35 = vadd.f32 %v4572_v33, %v1384_v32 }
 0x2b4   : > { %v1386_v34 = vpop.f32.mrf.mxu0 }
 0x2b5   : > { %v1387_v36 = vadd.f32 %v4572_v33, %v1386_v34 }
 0x2b7   : > { %v5251_v37 = vpack.c.bf16 %v1387_v36, %v1385_v35 }
 0x2b9   : > { %1397 = vrot.lane.b32.xlu1 %v5251_v37, %s4891_s22 }
 0x2bc   : > { %v1389_v38 = vpop.f32.mrf.mxu0 }
 0x2bd   : > { %v1390_v39 = vadd.f32 %v4572_v33, %v1389_v38 }
 0x2bf   : > { %v5254_v40 = vpack.c.bf16 %v1390_v39, %v1390_v39 }
 0x2c1   : > { %1399 = vrot.lane.b32.xlu0 %v5254_v40, %s4891_s22  ;;  %s4896_s22 = smov 72  }
 0x2c4   : > { %v1391_v41 = vpop.f32.mrf.mxu0 }
 0x2c9   : > { %1510 = vrot.lane.b32.xlu0 %v5254_v40, %s4892_s1 }
 0x2d1   : > { %1473 = vrot.lane.b32.xlu0 %v5254_v40, %s4893_s15 }
 0x2d9   : > { %1471 = vrot.lane.b32.xlu0 %v5251_v37, %s4893_s15  ;;  %s4898_s15 = smov 112  }
 0x2e1   : > { %1504 = vrot.lane.b32.xlu0 %v5251_v37, %s4894_s16 }
 0x32b   : > { %v1398_v44 = vpop.permute.xlu1 %1397 }
 0x32c   : > { %v1409_v46 = vsel %vm1401_vm12, %v1398_v44, 0 }
 0x333   : > { %v1400_v42 = vpop.permute.xlu0 %1399 }
 0x334   : > { %v1412_v43 = vsel %vm1401_vm12, %v1400_v42, 0 }
 0x335   : > { %1420 = vmatpush.bf16.xpose.msra.mxu1 %v1412_v43 }
 0x33b   : > { %v1511_v45 = vpop.permute.xlu0 %1510 }
 0x33c   : > { %v1522_v47 = vsel %vm1401_vm12, %v1511_v45, 0 }
 0x33d   : > { %1421 = vmatpush.bf16.xpose.msra.mxu1 %v1409_v46  ;;  %1530 = vmatpush.bf16.xpose.msra.mxu3 %v1522_v47 }
 0x343   : > { %v1474_v48 = vpop.permute.xlu0 %1473 }
 0x344   : > { %4105 = vmatmul.msk.bf16.vlgmr.msra.gmra.mxu1 %vm1401_vm12, %v5251_v37  ;;  %v1484_v49 = vsel %vm1482_vm13, %v1474_v48, 0 }
 0x345   : > { %1492 = vmatpush.bf16.msra.mxu2 %v1484_v49 }
 0x34b   : > { %v1472_v50 = vpop.permute.xlu0 %1471 }
 0x34c   : > { %1493 = vmatpush.bf16.msra.mxu2 %v1472_v50 }
 0x353   : > { %v1505_v11 = vpop.permute.xlu0 %1504 }
 0x354   : > { %4106 = vmatmul.msk.bf16.gmra.mxu1 %vm1401_vm12, %v5254_v40 }
 0x3c1   : > { %v1423_v53 = vpop.f32.mrf.mxu1 }
 0x3c2   : > { %v1432_v54 = vsel %vm1258_vm14, %v1423_v53, -1e+30 }
 0x3c3   : > { %v1436_v55 = vsel %vm1435_vm15, %v1432_v54, -inf }
 0x3c4   : > { %1437 = vmax.xlane.f32.xlu2 %v1436_v55 }
 0x3c9   : > { %v1425_v56 = vpop.f32.mrf.mxu1 }
 0x3ca   : > { %v1433_v57 = vsel %vm1258_vm14, %v1425_v56, -1e+30 }
 0x3cb   : > { %v1439_v58 = vsel %vm1435_vm15, %v1433_v57, -inf }
 0x3cc   : > { %1440 = vmax.xlane.f32.xlu2 %v1439_v58 }
 0x3d1   : > { %v1428_v59 = vpop.f32.mrf.mxu1 }
 0x3d2   : > { %v1434_v61 = vsel %vm1258_vm14, %v1428_v59, -1e+30 }
 0x3d3   : > { %v1442_v62 = vsel %vm1435_vm15, %v1434_v61, -inf }
 0x3d9   : > { %v1430_v60 = vpop.f32.mrf.mxu1 }
 0x3e4   : > { %1508 = vrot.lane.b32.xlu2 %v5251_v37, %s4892_s1  ;;  %s4897_s1 = smov 104  }
 0x40d   : > { %1443 = vmax.xlane.f32.xlu2 %v1442_v62 }
 0x437   : > { %v1438_v63 = vpop.xlane.xlu2 %1437 }
 0x438   : > { %v1445_v0 = vsub.f32 %v1432_v54, %v1438_v63 }
 0x43a   : > { %v1448_v1 = vmul.f32 1.442695, %v1445_v0 }
 0x43c   : > { %4586 = vpow2.f32 %v1448_v1 }
 0x43f   : > { %v1441_v2 = vpop.xlane.xlu2 %1440 }
 0x440   : > { %v1446_v3 = vsub.f32 %v1433_v57, %v1441_v2 }
 0x442   : > { %v4587_v4 = vpop.eup %4586  ;;  %v1450_v5 = vmul.f32 1.442695, %v1446_v3 }
 0x443   : > { %v1454_v6 = vsel %vm1435_vm15, %v4587_v4, 0.0 }
 0x444   : > { %4588 = vpow2.f32 %v1450_v5  ;;  %1455 = vadd.xlane.f32.xlu2 %v1454_v6 }
 0x447   : > { %v1509_v7 = vpop.permute.xlu2 %1508 }
 0x448   : > { %v1519_v8 = vsel %vm1401_vm12, %v1509_v7, 0 }
 0x449   : > { %1531 = vmatpush.bf16.xpose.msra.mxu3 %v1519_v8 }
 0x44a   : > { %v4589_v9 = vpop.eup %4588 }
 0x44b   : > { %v1457_v10 = vsel %vm1435_vm15, %v4589_v9, 0.0 }
 0x44c   : > { %1458 = vadd.xlane.f32.xlu1 %v1457_v10 }
 0x450   : > { %4109 = vmatmul.msk.bf16.vlgmr.msra.gmra.mxu3 %vm1401_vm12, %v1505_v11 }
 0x45c   : > { %1618 = vrot.lane.b32.xlu2 %v5254_v40, %s4895_s26 }
 0x464   : > { %1506 = vrot.lane.b32.xlu2 %v5254_v40, %s4894_s16  ;;  %s4899_s16 = smov 56  }
 0x465   : > { %1726 = vrot.lane.b32.xlu1 %v5254_v40, %s4896_s22 }
 0x46c   : > { %1616 = vrot.lane.b32.xlu2 %v5251_v37, %s4895_s26  ;;  %s4900_s26 = smov 48  }
 0x46d   : > { %1720 = vrot.lane.b32.xlu1 %v5251_v37, %s4897_s1 }
 0x474   : > { %1724 = vrot.lane.b32.xlu2 %v5251_v37, %s4896_s22  ;;  %s4901_s22 = smov 40  }
 0x47c   : > { %1612 = vrot.lane.b32.xlu2 %v5251_v37, %s4898_s15 }
 0x480   : > { %v1444_v12 = vpop.xlane.xlu2 %1443 }
 0x481   : > { %v1447_v13 = vsub.f32 %v1434_v61, %v1444_v12 }
 0x483   : > { %v1452_v14 = vmul.f32 1.442695, %v1447_v13 }
 0x484   : > { %1722 = vrot.lane.b32.xlu2 %v5254_v40, %s4897_s1  ;;  %s6131_s1 = smov 8  }
 0x485   : > { %4590 = vpow2.f32 %v1452_v14 }
 0x48b   : > { %v4591_v15 = vpop.eup %4590 }
 0x48c   : > { %v1460_v16 = vsel %vm1435_vm15, %v4591_v15, 0.0 }
 0x48d   : > { %1461 = vadd.xlane.f32.xlu0 %v1460_v16 }
 0x4a1   : > { %1614 = vrot.lane.b32.xlu0 %v5254_v40, %s4898_s15  ;;  %s4903_s15 = smov 16  }
 0x4b7   : > { %v1456_v17 = vpop.xlane.xlu2 %1455 }
 0x4b8   : > { %4592 = vrcp.f32 %v1456_v17 }
 0x4be   : > { %v4593_v24 = vpop.eup %4592 }
 0x4bf   : > { %v1459_v18 = vpop.xlane.xlu1 %1458  ;;  %v1619_v21 = vpop.permute.xlu2 %1618  ;;  %v1466_v27 = vmul.f32 %v4593_v24, %v4587_v4 }
 0x4c0   : > { %4594 = vrcp.f32 %v1459_v18  ;;  %v1630_v22 = vsel %vm1401_vm12, %v1619_v21, 0 }
 0x4c1   : > { %1638 = vmatpush.bf16.xpose.msrb.mxu2 %v1630_v22 }
 0x4c6   : > { %v4595_v25 = vpop.eup %4594 }
 0x4c7   : > { %v1507_v26 = vpop.permute.xlu2 %1506  ;;  %v1467_v28 = vmul.f32 %v4595_v25, %v4589_v9 }
 0x4c8   : > { %4110 = vmatmul.msk.bf16.gmra.mxu3 %vm1401_vm12, %v1507_v26 }
 0x4c9   : > { %v1469_v29 = vpack.c.bf16 %v1467_v28, %v1466_v27 }
 0x4cb   : > { %4107 = vmatmul.msk.bf16.vlgmr.msra.gmra.mxu2 %vm1435_vm15, %v1469_v29 }
 0x4cf   : > { %v1617_v30 = vpop.permute.xlu2 %1616 }
 0x4d0   : > { %v1627_v32 = vsel %vm1401_vm12, %v1617_v30, 0 }
 0x4d1   : > { %1639 = vmatpush.bf16.xpose.msrb.mxu2 %v1627_v32 }
 0x4d3   : > { %v1533_v33 = vpop.f32.mrf.mxu3 }
 0x4d4   : > { %v1542_v34 = vsel %vm1258_vm14, %v1533_v33, -1e+30 }
 0x4d5   : > { %v1545_v35 = vsel %vm1435_vm15, %v1542_v34, -inf }
 0x4d6   : > { %1546 = vmax.xlane.f32.xlu1 %v1545_v35 }
 0x4d7   : > { %v1727_v36 = vpop.permute.xlu1 %1726  ;;  %v1725_v42 = vpop.permute.xlu2 %1724 }
 0x4d8   : > { %v1738_v38 = vsel %vm1401_vm12, %v1727_v36, 0  ;;  %v1735_v44 = vsel %vm1401_vm12, %v1725_v42, 0 }
 0x4d9   : > { %1746 = vmatpush.bf16.xpose.msrb.mxu3 %v1738_v38 }
 0x4db   : > { %v1535_v39 = vpop.f32.mrf.mxu3 }
 0x4dc   : > { %v1543_v41 = vsel %vm1258_vm14, %v1535_v39, -1e+30 }
 0x4dd   : > { %v1548_v43 = vsel %vm1435_vm15, %v1543_v41, -inf }
 0x4de   : > { %1549 = vmax.xlane.f32.xlu2 %v1548_v43 }
 0x4df   : > { %v1721_v45 = vpop.permute.xlu1 %1720  ;;  %v1613_v46 = vpop.permute.xlu2 %1612 }
 0x4e1   : > { %1747 = vmatpush.bf16.xpose.msrb.mxu3 %v1735_v44 }
 0x4e7   : > { %v1723_v47 = vpop.permute.xlu2 %1722 }
 0x4e8   : > { %4117 = vmatmul.msk.bf16.vlgmr.msrb.gmra.mxu3 %vm1401_vm12, %v1721_v45 }
 0x4f8   : > { %4118 = vmatmul.msk.bf16.gmra.mxu3 %vm1401_vm12, %v1723_v47 }
 0x500   : > { %v1462_v48 = vpop.xlane.xlu0 %1461 }
 0x501   : > { %4596 = vrcp.f32 %v1462_v48 }
 0x507   : > { %v4597_v49 = vpop.eup %4596 }
 0x508   : > { %v1468_v50 = vmul.f32 %v4597_v49, %v4591_v15 }
 0x50a   : > { %v1470_v51 = vpack.c.bf16 %v1468_v50, %v1468_v50 }
 0x50c   : > { %4108 = vmatmul.msk.bf16.gmra.mxu2 %vm1435_vm15, %v1470_v51 }
 0x513   : > { %v1615_v53 = vpop.permute.xlu0 %1614 }
 0x51c   : > { %4113 = vmatmul.msk.bf16.vlgmr.msrb.gmra.mxu2 %vm1401_vm12, %v1613_v46 }
 0x52c   : > { %4114 = vmatmul.msk.bf16.gmra.mxu2 %vm1401_vm12, %v1615_v53 }
 0x549   : > { %v1547_v54 = vpop.xlane.xlu1 %1546 }
 0x54a   : > { %v1554_v55 = vsub.f32 %v1542_v34, %v1547_v54 }
 0x54b   : > { %v1538_v56 = vpop.f32.mrf.mxu3 }
 0x54c   : > { %v1557_v57 = vmul.f32 1.442695, %v1554_v55  ;;  %v1544_v58 = vsel %vm1258_vm14, %v1538_v56, -1e+30 }
 0x54d   : > { %v1551_v59 = vsel %vm1435_vm15, %v1544_v58, -inf }
 0x54e   : > { %4598 = vpow2.f32 %v1557_v57  ;;  %1552 = vmax.xlane.f32.xlu0 %v1551_v59  ;;  %v5336_v11 = vpop.f32.mrf.mxu2 }
 0x551   : > { %v1550_v63 = vpop.xlane.xlu2 %1549 }
 0x552   : > { %v1555_v0 = vsub.f32 %v1543_v41, %v1550_v63 }
 0x553   : > { %v1540_v60 = vpop.f32.mrf.mxu3 }
 0x554   : > { %v5320_v61 = vpop.eup %4598  ;;  %v1559_v1 = vmul.f32 1.442695, %v1555_v0 }
 0x555   : > { %v1563_v62 = vsel %vm1435_vm15, %v5320_v61, 0.0 }
 0x556   : > { %1564 = vadd.xlane.f32.xlu0 %v1563_v62  ;;  %4600 = vpow2.f32 %v1559_v1  ;;  %v5338_v13 = vpop.f32.mrf.mxu2 }
 0x55c   : > { %v5329_v5 = vpop.eup %4600 }
 0x55d   : > { %v1566_v8 = vsel %vm1435_vm15, %v5329_v5, 0.0 }
 0x56a   : > { %1580 = vrot.lane.b32.xlu0 %v5251_v37, %s4899_s16 }
 0x56b   : > { %v1749_v2 = vpop.f32.mrf.mxu3 }
 0x56c   : > { %v1758_v3 = vsel %vm1258_vm14, %v1749_v2, -1e+30 }
 0x56d   : > { %v1761_v4 = vsel %vm1435_vm15, %v1758_v3, -inf }
 0x56e   : > { %1762 = vmax.xlane.f32.xlu1 %v1761_v4 }
 0x573   : > { %v1751_v6 = vpop.f32.mrf.mxu3 }
 0x574   : > { %v1759_v7 = vsel %vm1258_vm14, %v1751_v6, -1e+30 }
 0x575   : > { %v1764_v9 = vsel %vm1435_vm15, %v1759_v7, -inf }
 0x576   : > { %1567 = vadd.xlane.f32.xlu1 %v1566_v8  ;;  %1765 = vmax.xlane.f32.xlu2 %v1764_v9 }
 0x57b   : > { %v1754_v10 = vpop.f32.mrf.mxu3 }
 0x57c   : > { %v1760_v33 = vsel %vm1258_vm14, %v1754_v10, -1e+30 }
 0x57d   : > { %v1767_v34 = vsel %vm1435_vm15, %v1760_v33, -inf }
 0x583   : > { %v1756_v12 = vpop.f32.mrf.mxu3 }
 0x58f   : > { %v5340_v14 = vpop.f32.mrf.mxu2 }
 0x597   : > { %v1502_v15 = vpop.f32.mrf.mxu2 }
 0x59f   : > { %v1641_v16 = vpop.f32.mrf.mxu2 }
 0x5a0   : > { %v1650_v17 = vsel %vm1258_vm14, %v1641_v16, -1e+30 }
 0x5a1   : > { %v1653_v18 = vsel %vm1435_vm15, %v1650_v17, -inf }
 0x5a2   : > { %1654 = vmax.xlane.f32.xlu1 %v1653_v18 }
 0x5a7   : > { %v1643_v21 = vpop.f32.mrf.mxu2 }
 0x5a8   : > { %v1651_v22 = vsel %vm1258_vm14, %v1643_v21, -1e+30 }
 0x5a9   : > { %v1656_v24 = vsel %vm1435_vm15, %v1651_v22, -inf }
 0x5aa   : > { %1657 = vmax.xlane.f32.xlu2 %v1656_v24 }
 0x5af   : > { %v1646_v25 = vpop.f32.mrf.mxu2 }
 0x5b0   : > { %v1652_v6 = vsel %vm1258_vm14, %v1646_v25, -1e+30 }
 0x5b7   : > { %v1648_v26 = vpop.f32.mrf.mxu2 }
 0x5c1   : > { %v1553_v27 = vpop.xlane.xlu0 %1552 }
 0x5c2   : > { %v1556_v28 = vsub.f32 %v1544_v58, %v1553_v27  ;;  %1582 = vrot.lane.b32.xlu2 %v5254_v40, %s4899_s16  ;;  %s4904_s16 = smov 24  }
 0x5c4   : > { %v1561_v29 = vmul.f32 1.442695, %v1556_v28 }
 0x5c6   : > { %4602 = vpow2.f32 %v1561_v29 }
 0x5c9   : > { %v1565_v53 = vpop.xlane.xlu0 %1564 }
 0x5cc   : > { %v4603_v30 = vpop.eup %4602 }
 0x5cd   : > { %v1569_v32 = vsel %vm1435_vm15, %v4603_v30, 0.0 }
 0x5ce   : > { %1570 = vadd.xlane.f32.xlu1 %v1569_v32 }
 0x5d6   : > { %1768 = vmax.xlane.f32.xlu1 %v1767_v34 }
 0x5e1   : > { %v1763_v35 = vpop.xlane.xlu1 %1762 }
 0x5e2   : > { %v1770_v36 = vsub.f32 %v1758_v3, %v1763_v35  ;;  %v1581_v3 = vpop.permute.xlu0 %1580 }
 0x5e4   : > { %v1773_v38 = vmul.f32 1.442695, %v1770_v36 }
 0x5e6   : > { %4604 = vpow2.f32 %v1773_v38 }
 0x5e9   : > { %v1766_v39 = vpop.xlane.xlu2 %1765  ;;  %v1568_v47 = vpop.xlane.xlu1 %1567 }
 0x5ea   : > { %v1771_v41 = vsub.f32 %v1759_v7, %v1766_v39  ;;  %v1659_v7 = vsel %vm1435_vm15, %v1652_v6, -inf }
 0x5ec   : > { %v5354_v42 = vpop.eup %4604  ;;  %v1775_v43 = vmul.f32 1.442695, %v1771_v41 }
 0x5ed   : > { %v1779_v44 = vsel %vm1435_vm15, %v5354_v42, 0.0 }
 0x5ee   : > { %4606 = vpow2.f32 %v1775_v43  ;;  %1780 = vadd.xlane.f32.xlu1 %v1779_v44 }
 0x5f4   : > { %v4607_v45 = vpop.eup %4606 }
 0x5f5   : > { %v1782_v46 = vsel %vm1435_vm15, %v4607_v45, 0.0 }
 0x5f6   : > { %1783 = vadd.xlane.f32.xlu1 %v1782_v46 }
 0x60f   : > { %1690 = vrot.lane.b32.xlu1 %v5254_v40, %s4900_s26 }
 0x615   : > { %v1655_v48 = vpop.xlane.xlu1 %1654 }
 0x616   : > { %v1662_v49 = vsub.f32 %v1650_v17, %v1655_v48 }
 0x618   : > { %v1665_v50 = vmul.f32 1.442695, %v1662_v49 }
 0x61a   : > { %4608 = vpow2.f32 %v1665_v50 }
 0x61b   : > { %4610 = vrcp.f32 %v1568_v47 }
 0x61c   : > { %4612 = vrcp.f32 %v1565_v53 }
 0x61d   : > { %v1658_v51 = vpop.xlane.xlu2 %1657 }
 0x61e   : > { %v1663_v54 = vsub.f32 %v1651_v22, %v1658_v51 }
 0x620   : > { %v4609_v55 = vpop.eup %4608  ;;  %v1667_v56 = vmul.f32 1.442695, %v1663_v54 }
 0x621   : > { %v1671_v57 = vsel %vm1435_vm15, %v4609_v55, 0.0  ;;  %v4611_v58 = vpop.eup %4610 }
 0x622   : > { %4614 = vpow2.f32 %v1667_v56  ;;  %1672 = vadd.xlane.f32.xlu0 %v1671_v57  ;;  %v4613_v62 = vpop.eup %4612  ;;  %v1576_v0 = vmul.f32 %v4611_v58, %v5329_v5 }
 0x623   : > { %v1575_v2 = vmul.f32 %v4613_v62, %v5320_v61 }
 0x625   : > { %v1583_v59 = vpop.permute.xlu2 %1582  ;;  %v1578_v4 = vpack.c.bf16 %v1576_v0, %v1575_v2 }
 0x626   : > { %v1592_v60 = vsel %vm1482_vm13, %v1583_v59, 0 }
 0x627   : > { %1600 = vmatpush.bf16.msrb.mxu0 %v1592_v60 }
 0x628   : > { %v4615_v63 = vpop.eup %4614 }
 0x629   : > { %v1674_v1 = vsel %vm1435_vm15, %v4615_v63, 0.0 }
 0x62a   : > { %1675 = vadd.xlane.f32.xlu2 %v1674_v1 }
 0x62b   : > { %1601 = vmatpush.bf16.msrb.mxu0 %v1581_v3 }
 0x62e   : > { %4111 = vmatmul.msk.bf16.vlgmr.msrb.gmra.mxu0 %vm1435_vm15, %v1578_v4 }
 0x636   : > { %1798 = vrot.lane.b32.xlu0 %v5254_v40, %s4901_s22 }
 0x639   : > { %1660 = vmax.xlane.f32.xlu1 %v1659_v7  ;;  %v4368_v7 = vld [vmem:[%s5170_s11 + $0x8] sm:$0xff] }
 0x63a   : > { %1904 = vmatpush.bf16.msra.mxu2 %v4368_v7 }
 0x641   : > { %v1571_v5 = vpop.xlane.xlu1 %1570 }
 0x642   : > { %4616 = vrcp.f32 %v1571_v5  ;;  %1688 = vrot.lane.b32.xlu2 %v5251_v37, %s4900_s26  ;;  %v4367_v5 = vld [vmem:[%s5170_s11] sm:$0xff] }
 0x643   : > { %1905 = vmatpush.bf16.msra.mxu2 %v4367_v5 }
 0x648   : > { %v4617_v61 = vpop.eup %4616 }
 0x649   : > { %v1577_v8 = vmul.f32 %v4617_v61, %v4603_v30  ;;  %v1769_v9 = vpop.xlane.xlu1 %1768 }
 0x64a   : > { %v1772_v12 = vsub.f32 %v1760_v33, %v1769_v9 }
 0x64b   : > { %v1579_v10 = vpack.c.bf16 %v1577_v8, %v1577_v8 }
 0x64c   : > { %v1777_v15 = vmul.f32 1.442695, %v1772_v12 }
 0x64d   : > { %4112 = vmatmul.msk.bf16.gmra.mxu0 %vm1435_vm15, %v1579_v10 }
 0x64e   : > { %4618 = vpow2.f32 %v1777_v15 }
 0x652   : > { %1796 = vrot.lane.b32.xlu1 %v5251_v37, %s4901_s22 }
 0x654   : > { %v4619_v40 = vpop.eup %4618 }
 0x655   : > { %v1785_v16 = vsel %vm1435_vm15, %v4619_v40, 0.0 }
 0x660   : > { %1786 = vadd.xlane.f32.xlu0 %v1785_v16 }
 0x661   : > { %v1781_v17 = vpop.xlane.xlu1 %1780 }
 0x662   : > { %4620 = vrcp.f32 %v1781_v17 }
 0x668   : > { %v4621_v21 = vpop.eup %4620 }
 0x669   : > { %v1784_v18 = vpop.xlane.xlu1 %1783  ;;  %v1791_v24 = vmul.f32 %v4621_v21, %v5354_v42 }
 0x66a   : > { %4622 = vrcp.f32 %v1784_v18 }
 0x670   : > { %v4623_v22 = vpop.eup %4622 }
 0x671   : > { %v1792_v25 = vmul.f32 %v4623_v22, %v4607_v45 }
 0x673   : > { %v1794_v26 = vpack.c.bf16 %v1792_v25, %v1791_v24 }
 0x681   : > { %v1691_v27 = vpop.permute.xlu1 %1690 }
 0x682   : > { %v1700_v28 = vsel %vm1482_vm13, %v1691_v27, 0 }
 0x683   : > { %1708 = vmatpush.bf16.msrb.mxu1 %v1700_v28 }
 0x695   : > { %v1673_v37 = vpop.xlane.xlu0 %1672 }
 0x696   : > { %4624 = vrcp.f32 %v1673_v37 }
 0x69c   : > { %v4625_v30 = vpop.eup %4624 }
 0x69d   : > { %v1676_v29 = vpop.xlane.xlu2 %1675  ;;  %v1683_v33 = vmul.f32 %v4625_v30, %v4609_v55 }
 0x69e   : > { %4626 = vrcp.f32 %v1676_v29 }
 0x6a4   : > { %v4627_v32 = vpop.eup %4626 }
 0x6a5   : > { %v1684_v34 = vmul.f32 %v4627_v32, %v4615_v63  ;;  %v1689_v35 = vpop.permute.xlu2 %1688 }
 0x6a6   : > { %1709 = vmatpush.bf16.msrb.mxu1 %v1689_v35  ;;  %v4573_v35 = vld [vmem:[%s1126_s8] ss:$0 sm:$0xff] }
 0x6a7   : > { %v1686_v36 = vpack.c.bf16 %v1684_v34, %v1683_v33 }
 0x6a8   : > { %v1799_v38 = vpop.permute.xlu0 %1798 }
 0x6a9   : > { %v1808_v39 = vsel %vm1482_vm13, %v1799_v38, 0  ;;  %4115 = vmatmul.msk.bf16.vlgmr.msrb.gmra.mxu1 %vm1435_vm15, %v1686_v36 }
 0x6aa   : > { %1816 = vmatpush.bf16.msra.mxu0 %v1808_v39 }
 0x6ab   : > { %v1603_v41 = vpop.f32.mrf.mxu0 }
 0x6ac   : > { %v1661_v42 = vpop.xlane.xlu1 %1660 }
 0x6ad   : > { %v1664_v43 = vsub.f32 %v1652_v6, %v1661_v42 }
 0x6af   : > { %v1669_v44 = vmul.f32 1.442695, %v1664_v43 }
 0x6b1   : > { %4628 = vpow2.f32 %v1669_v44 }
 0x6b3   : > { %v1605_v45 = vpop.f32.mrf.mxu0 }
 0x6b4   : > { %v4555_v46 = vpack.i.bf16 %v1605_v45, %v1603_v41 }
 0x6b6   : > { %4556 = vrot.lane.b32.xlu2 %v4555_v46, %s6131_s1 }
 0x6b7   : > { %v4629_v47 = vpop.eup %4628 }
 0x6b8   : > { %v1677_v48 = vsel %vm1435_vm15, %v4629_v47, 0.0 }
 0x6b9   : > { %1678 = vadd.xlane.f32.xlu1 %v1677_v48 }
 0x6c4   : > { %v1797_v49 = vpop.permute.xlu1 %1796 }
 0x6c5   : > { %1817 = vmatpush.bf16.msra.mxu0 %v1797_v49 }
 0x6c8   : > { %4119 = vmatmul.msk.bf16.vlgmr.msra.gmra.mxu0 %vm1435_vm15, %v1794_v26 }
 0x6ca   : > { %v1608_v50 = vpop.f32.mrf.mxu0 }
 0x6d2   : > { %v1610_v51 = vpop.f32.mrf.mxu0 }
 0x6d3   : > { %v1787_v53 = vpop.xlane.xlu0 %1786 }
 0x6d4   : > { %4630 = vrcp.f32 %v1787_v53 }
 0x6da   : > { %v4631_v54 = vpop.eup %4630 }
 0x6db   : > { %v1793_v55 = vmul.f32 %v4631_v54, %v4619_v40 }
 0x6dd   : > { %v1795_v56 = vpack.c.bf16 %v1793_v55, %v1793_v55 }
 0x6df   : > { %4120 = vmatmul.msk.bf16.gmra.mxu0 %vm1435_vm15, %v1795_v56 }
 0x710   : > { %v4557_v61 = vpop.permute.xlu2 %4556 }
 0x711   : > { %v4559_v9 = vunpack.i.h.bf16 %v4557_v61  ;;  %v4558_v10 = vunpack.i.l.bf16 %v4557_v61 }
 0x713   : > { %v1865_v16 = vsel %vm1401_vm12, %v5338_v13, %v4559_v9  ;;  %v1864_v17 = vsel %vm1401_vm12, %v5336_v11, %v4558_v10 }
 0x726   : > { %v1711_v57 = vpop.f32.mrf.mxu1 }
 0x72c   : > { %v1679_v58 = vpop.xlane.xlu1 %1678 }
 0x72d   : > { %4632 = vrcp.f32 %v1679_v58  ;;  %v4370_v58 = vld [vmem:[%s5179_s17 + $0x8] sm:$0xff] }
 0x72e   : > { %v1713_v59 = vpop.f32.mrf.mxu1  ;;  %2040 = vmatpush.bf16.msra.mxu1 %v4370_v58 }
 0x72f   : > { %v4560_v60 = vpack.i.bf16 %v1713_v59, %v1711_v57 }
 0x731   : > { %4561 = vrot.lane.b32.xlu2 %v4560_v60, %s4903_s15 }
 0x733   : > { %v4633_v62 = vpop.eup %4632 }
 0x734   : > { %v1685_v63 = vmul.f32 %v4633_v62, %v4629_v47  ;;  %v4369_v62 = vld [vmem:[%s5179_s17] sm:$0xff] }
 0x735   : > { %2041 = vmatpush.bf16.msra.mxu1 %v4369_v62 }
 0x736   : > { %v1687_v0 = vpack.c.bf16 %v1685_v63, %v1685_v63 }
 0x738   : > { %4116 = vmatmul.msk.bf16.gmra.mxu1 %vm1435_vm15, %v1687_v0 }
 0x745   : > { %v1819_v1 = vpop.f32.mrf.mxu0 }
 0x74d   : > { %v1821_v2 = vpop.f32.mrf.mxu0 }
 0x74e   : > { %v4565_v3 = vpack.i.bf16 %v1821_v2, %v1819_v1 }
 0x750   : > { %4566 = vrot.lane.b32.xlu2 %v4565_v3, %s4904_s16 }
 0x758   : > { %1835 = vrot.lane.b32.xlu2 %v1608_v50, %s6131_s1 }
 0x75c   : > { %v1824_v4 = vpop.f32.mrf.mxu0 }
 0x760   : > { %1859 = vrot.lane.b32.xlu2 %v1824_v4, %s4904_s16 }
 0x764   : > { %v1826_v6 = vpop.f32.mrf.mxu0 }
 0x78b   : > { %v4562_v8 = vpop.permute.xlu2 %4561 }
 0x78c   : > { %v4564_v12 = vunpack.i.h.bf16 %v4562_v8  ;;  %v4563_v15 = vunpack.i.l.bf16 %v4562_v8 }
 0x78e   : > { %v1869_v22 = vsel %vm1867_vm0, %v1865_v16, %v4564_v12  ;;  %v1868_v24 = vsel %vm1867_vm0, %v1864_v17, %v4563_v15 }
 0x7aa   : > { %v4567_v40 = vpop.permute.xlu2 %4566 }
 0x7ab   : > { %v4569_v18 = vunpack.i.h.bf16 %v4567_v40  ;;  %v4568_v21 = vunpack.i.l.bf16 %v4567_v40 }
 0x7ad   : > { %v1872_v25 = vsel %vm1435_vm15, %v1869_v22, %v4569_v18  ;;  %v1871_v26 = vsel %vm1435_vm15, %v1868_v24, %v4568_v21  ;;  %v4574_v22 = vld [vmem:[%s1129_s23] ss:$0 sm:$0xff] }
 0x7ae   : > { %v1874_v27 = vpack.c.bf16 %v1872_v25, %v1871_v26 }
 0x7b0   : > { %4129 = vmatmul.msk.bf16.vlgmr.msra.gmra.mxu2 %vm1261_vm1, %v1874_v27 }
 0x7b2   : > { %v1836_v11 = vpop.permute.xlu2 %1835 }
 0x7b3   : > { %v1866_v37 = vsel %vm1401_vm12, %v5340_v14, %v1836_v11 }
 0x7b5   : > { %v1716_v28 = vpop.f32.mrf.mxu1 }
 0x7b6   : > { %1847 = vrot.lane.b32.xlu1 %v1716_v28, %s4903_s15  ;;  %v4575_v28 = vld [vmem:[%s1132_s0] ss:$0 sm:$0xff] }
 0x7ba   : > { %v1860_v30 = vpop.permute.xlu2 %1859 }
 0x7bd   : > { %v1718_v13 = vpop.f32.mrf.mxu1 }
 0x828   : > { %v1848_v29 = vpop.permute.xlu1 %1847 }
 0x829   : > { %v1870_v32 = vsel %vm1867_vm0, %v1866_v37, %v1848_v29 }
 0x82a   : > { %v1873_v33 = vsel %vm1435_vm15, %v1870_v32, %v1860_v30 }
 0x82b   : > { %v1875_v34 = vpack.c.bf16 %v1873_v33, %v1873_v33 }
 0x82d   : > { %4130 = vmatmul.msk.bf16.gmra.mxu2 %vm1261_vm1, %v1875_v34 }
 0x833   : > { %v1907_v36 = vpop.f32.mrf.mxu2 }
 0x834   : > { %v1916_v38 = vadd.f32 %v1907_v36, %v5207_v19 }
 0x836   : > { %v5408_v39 = vadd.f32 %v4573_v35, %v1916_v38 }
 0x838   : > { %v1928_v41 = vsel %vm1261_vm1, %v5408_v39, 0.0 }
 0x839   : > { %1929 = vadd.xlane.f32.xlu0 %v1928_v41  ;;  %v4378_v41 = vld [vmem:[%s5187_s5 + $0x38] sm:$0xff] }
 0x83a   : > { %2149 = vmatpush.bf16.msra.mxu3 %v4378_v41 }
 0x83b   : > { %v1909_v14 = vpop.f32.mrf.mxu2 }
 0x83c   : > { %v1917_v42 = vadd.f32 %v1909_v14, %v5215_v23 }
 0x83e   : > { %v5413_v43 = vadd.f32 %v4573_v35, %v1917_v42 }
 0x840   : > { %v1931_v44 = vsel %vm1261_vm1, %v5413_v43, 0.0 }
 0x841   : > { %1932 = vadd.xlane.f32.xlu2 %v1931_v44  ;;  %v4377_v44 = vld [vmem:[%s5187_s5 + $0x30] sm:$0xff] }
 0x842   : > { %2150 = vmatpush.bf16.msra.mxu3 %v4377_v44 }
 0x8ac   : > { %v1930_v45 = vpop.xlane.xlu0 %1929 }
 0x8ad   : > { %v1937_v47 = vmul.f32 %v1930_v45, %v5219_v31 }
 0x8af   : > { %v1940_v50 = vsub.f32 %v5408_v39, %v1937_v47  ;;  %v4376_v47 = vld [vmem:[%s5187_s5 + $0x28] sm:$0xff] }
 0x8b0   : > { %v1912_v46 = vpop.f32.mrf.mxu2  ;;  %2151 = vmatpush.bf16.msra.mxu3 %v4376_v47 }
 0x8b1   : > { %v1918_v19 = vadd.f32 %v1912_v46, %v5209_v20  ;;  %v1943_v56 = vmul.f32 %v1940_v50, %v1940_v50 }
 0x8b3   : > { %v5419_v48 = vadd.f32 %v4573_v35, %v1918_v19  ;;  %v1946_v20 = vsel %vm1261_vm1, %v1943_v56, 0.0  ;;  %v4372_v56 = vld [vmem:[%s5187_s5 + $0x8] sm:$0xff] }
 0x8b4   : > { %v1933_v49 = vpop.xlane.xlu2 %1932 }
 0x8b5   : > { %v1938_v23 = vmul.f32 %v1933_v49, %v5219_v31  ;;  %v1934_v51 = vsel %vm1261_vm1, %v5419_v48, 0.0 }
 0x8b6   : > { %1935 = vadd.xlane.f32.xlu0 %v1934_v51 }
 0x8b7   : > { %v1941_v53 = vsub.f32 %v5413_v43, %v1938_v23 }
 0x8b8   : > { %v1914_v54 = vpop.f32.mrf.mxu2 }
 0x8b9   : > { %v1944_v55 = vmul.f32 %v1941_v53, %v1941_v53 }
 0x8bb   : > { %v1949_v57 = vsel %vm1261_vm1, %v1944_v55, 0.0  ;;  %v4373_v55 = vld [vmem:[%s5187_s5 + $0x10] sm:$0xff] }
 0x8bc   : > { %1950 = vadd.xlane.f32.xlu1 %v1949_v57  ;;  %v4576_v57 = vld [vmem:[%s1140_s9] ss:$0 sm:$0xff]  ;;  %s6198_s9 = sld [smem:[#allocation35_spill]] }
 0x8be   : > { %1947 = vadd.xlane.f32.xlu0 %v1946_v20  ;;  %v4371_v20 = vld [vmem:[%s5187_s5] sm:$0xff] }
 0x8c2   : > { %p4173_p1 = scmp.ne.s32.totalorder %s6198_s9, 1 }
 0x8c3   : > { %s6199_s17 = sld [smem:[#allocation18_spill]] (!%p4173_p1)  ;;  %s4905_s23 = smov (!%p4173_p1), 120  }
 0x8c4   : > { %s6200_s8 = sld [smem:[#allocation16_spill]] (!%p4173_p1)  ;;  %s4906_s0 = smov (!%p4173_p1), 112  }
 0x8c5   : > { %s6201_s11 = sld [smem:[#allocation14_spill]] (!%p4173_p1)  ;;  %s4908_s15 = smov (!%p4173_p1), 8  }
 0x8c6   : > { %s6202_s26 = sld [smem:[#allocation15_spill]] (!%p4173_p1) }
 0x8c7   : > { %s6203_s22 = sld [smem:[#allocation17_spill]] (!%p4173_p1) }
 0x8c8   : > { %s6205_s16 = sld [smem:[#allocation19_spill]] (!%p4173_p1) }
 0x8ce   : > { %s6206_s9 = smov (!%p4173_p1), %s6205_s16 }
 0x929   : > { %v1936_v59 = vpop.xlane.xlu0 %1935 }
 0x92a   : > { %v1939_v60 = vmul.f32 %v1936_v59, %v5219_v31 }
 0x92c   : > { %v5432_v63 = vsub.f32 %v5419_v48, %v1939_v60 }
 0x92e   : > { %v1945_v0 = vmul.f32 %v5432_v63, %v5432_v63 }
 0x92f   : > { %v1951_v1 = vpop.xlane.xlu1 %1950 }
 0x930   : > { %v1956_v2 = vmul.f32 %v1951_v1, %v5219_v31  ;;  %v1952_v3 = vsel %vm1261_vm1, %v1945_v0, 0.0 }
 0x931   : > { %1953 = vadd.xlane.f32.xlu0 %v1952_v3  ;;  %v1948_v4 = vpop.xlane.xlu0 %1947 }
 0x932   : > { %v1959_v6 = vadd.f32 1e-06, %v1956_v2  ;;  %v1955_v7 = vmul.f32 %v1948_v4, %v5219_v31 }
 0x934   : > { %4634 = vrsqrt.f32 %v1959_v6  ;;  %v1958_v5 = vadd.f32 1e-06, %v1955_v7  ;;  %vm1977_vm3 = vweird.f32 %v1959_v6 }
 0x936   : > { %4636 = vrsqrt.f32 %v1958_v5  ;;  %vm1967_vm6 = vweird.f32 %v1958_v5 }
 0x93a   : > { %v4635_v61 = vpop.eup %4634 }
 0x93b   : > { %v1972_v8 = vmul.f32 %v4635_v61, %v1959_v6  ;;  %vm1978_vm2 = vweird.f32 %v4635_v61 }
 0x93c   : > { %v4637_v9 = vpop.eup %4636  ;;  %vm1979_vm5 = vmor %vm1977_vm3, %vm1978_vm2 }
 0x93d   : > { %v1973_v10 = vmul.f32 %v4635_v61, %v1972_v8  ;;  %v1962_v12 = vmul.f32 %v4637_v9, %v1958_v5  ;;  %vm1968_vm4 = vweird.f32 %v4637_v9 }
 0x93e   : > { %vm1969_vm7 = vmor %vm1967_vm6, %vm1968_vm4 }
 0x93f   : > { %v1974_v15 = vmul.f32 0.5, %v1973_v10  ;;  %v1963_v40 = vmul.f32 %v4637_v9, %v1962_v12 }
 0x941   : > { %v1975_v16 = vsub.f32 1.5, %v1974_v15  ;;  %v1964_v17 = vmul.f32 0.5, %v1963_v40 }
 0x943   : > { %v1976_v18 = vmul.f32 %v4635_v61, %v1975_v16  ;;  %v1965_v21 = vsub.f32 1.5, %v1964_v17 }
 0x945   : > { %v1980_v24 = vsel %vm1979_vm5, %v4635_v61, %v1976_v18  ;;  %v1966_v25 = vmul.f32 %v4637_v9, %v1965_v21 }
 0x946   : > { %v1992_v26 = vmul.f32 %v1980_v24, %v1941_v53  ;;  %v4374_v53 = vld [vmem:[%s5187_s5 + $0x18] sm:$0xff] }
 0x947   : > { %v1970_v27 = vsel %vm1969_vm7, %v4637_v9, %v1966_v25 }
 0x948   : > { %v1998_v13 = vmul.f32 %v4574_v22, %v1992_v26  ;;  %v1991_v11 = vmul.f32 %v1970_v27, %v1940_v50  ;;  %v4375_v50 = vld [vmem:[%s5187_s5 + $0x20] sm:$0xff]  ;;  %s6197_s5 = scalar_lea.vmem %s5056_s21, %s5154_s10  ;;  %s4907_s10 = smov (!%p4173_p1), 104  }
 0x949   : > { %2152 = vmatpush.bf16.msra.mxu3 %v4375_v50 }
 0x94a   : > { %v1997_v37 = vmul.f32 %v4574_v22, %v1991_v11  ;;  %v2004_v29 = vadd.f32 %v4575_v28, %v1998_v13 }
 0x94c   : > { %v2003_v30 = vadd.f32 %v4575_v28, %v1997_v37 }
 0x94d   : > { %2153 = vmatpush.bf16.msra.mxu3 %v4374_v53 }
 0x94e   : > { %v2006_v32 = vpack.c.bf16 %v2004_v29, %v2003_v30 }
 0x950   : > { %4139 = vmatmul.msk.bf16.vlgmr.msra.gmra.mxu1 %vm1261_vm1, %v2006_v32 }
 0x951   : > { %2154 = vmatpush.bf16.msra.mxu3 %v4373_v55 }
 0x955   : > { %2155 = vmatpush.bf16.msra.mxu3 %v4372_v56 }
 0x959   : > { %2156 = vmatpush.bf16.msra.mxu3 %v4371_v20 }
 0x9a4   : > { %v1954_v33 = vpop.xlane.xlu0 %1953 }
 0x9a5   : > { %v1957_v34 = vmul.f32 %v1954_v33, %v5219_v31  ;;  %v4577_v33 = vld [vmem:[%s6197_s5] ss:$0 sm:$0xff]  ;;  %s6204_s5 = smov (!%p4173_p1), %s6203_s22 }
 0x9a7   : > { %v1960_v35 = vadd.f32 1e-06, %v1957_v34 }
 0x9a9   : > { %4638 = vrsqrt.f32 %v1960_v35  ;;  %vm1987_vm9 = vweird.f32 %v1960_v35 }
 0x9af   : > { %v4639_v36 = vpop.eup %4638 }
 0x9b0   : > { %v1982_v38 = vmul.f32 %v4639_v36, %v1960_v35  ;;  %vm1988_vm8 = vweird.f32 %v4639_v36 }
 0x9b1   : > { %vm1989_vm10 = vmor %vm1987_vm9, %vm1988_vm8 }
 0x9b2   : > { %v1983_v14 = vmul.f32 %v4639_v36, %v1982_v38 }
 0x9b4   : > { %v1984_v42 = vmul.f32 0.5, %v1983_v14 }
 0x9b6   : > { %v1985_v45 = vsub.f32 1.5, %v1984_v42 }
 0x9b8   : > { %v1986_v46 = vmul.f32 %v4639_v36, %v1985_v45 }
 0x9ba   : > { %v1990_v19 = vsel %vm1989_vm10, %v4639_v36, %v1986_v46 }
 0x9bb   : > { %v1993_v49 = vmul.f32 %v1990_v19, %v5432_v63 }
 0x9bd   : > { %v1999_v23 = vmul.f32 %v4574_v22, %v1993_v49 }
 0x9bf   : > { %v2005_v51 = vadd.f32 %v4575_v28, %v1999_v23 }
 0x9c1   : > { %v2007_v54 = vpack.c.bf16 %v2005_v51, %v2005_v51 }
 0x9c3   : > { %4140 = vmatmul.msk.bf16.gmra.mxu1 %vm1261_vm1, %v2007_v54 }
 0x9cd   : > { %v2043_v58 = vpop.f32.mrf.mxu1 }
 0x9ce   : > { %v2044_v59 = vadd.f32 %v4576_v57, %v2043_v58 }
 0x9d0   : > { %v2052_v60 = vmul.f32 %v2044_v59, %v2044_v59 }
 0x9d2   : > { %v2055_v62 = vmul.f32 %v2052_v60, %v2044_v59 }
 0x9d4   : > { %v2058_v63 = vmul.f32 0.044715, %v2055_v62 }
 0x9d5   : > { %v2045_v0 = vpop.f32.mrf.mxu1 }
 0x9d6   : > { %v2061_v1 = vadd.f32 %v2058_v63, %v2044_v59  ;;  %v2046_v2 = vadd.f32 %v4576_v57, %v2045_v0 }
 0x9d8   : > { %v2064_v3 = vmul.f32 0.7978846, %v2061_v1  ;;  %v2053_v4 = vmul.f32 %v2046_v2, %v2046_v2 }
 0x9da   : > { %v2056_v6 = vmul.f32 %v2053_v4, %v2046_v2  ;;  %4640 = vtanh.f32 %v2064_v3 }
 0x9dc   : > { %v2059_v7 = vmul.f32 0.044715, %v2056_v6 }
 0x9de   : > { %v2062_v5 = vadd.f32 %v2059_v7, %v2046_v2 }
 0x9e0   : > { %v2065_v61 = vmul.f32 0.7978846, %v2062_v5  ;;  %v4641_v8 = vpop.eup %4640 }
 0x9e1   : > { %v2070_v9 = vadd.f32 1.0, %v4641_v8 }
 0x9e2   : > { %4642 = vtanh.f32 %v2065_v61 }
 0x9e3   : > { %v2073_v12 = vmul.f32 0.5, %v2070_v9 }
 0x9e5   : > { %v2076_v16 = vmul.f32 %v2073_v12, %v2044_v59 }
 0x9e8   : > { %v4643_v10 = vpop.eup %4642 }
 0x9e9   : > { %v2071_v15 = vadd.f32 1.0, %v4643_v10 }
 0x9eb   : > { %v2074_v40 = vmul.f32 0.5, %v2071_v15 }
 0x9ed   : > { %v2077_v17 = vmul.f32 %v2074_v40, %v2046_v2 }
 0x9ef   : > { %v2079_v18 = vpack.c.bf16 %v2077_v17, %v2076_v16 }
 0x9f1   : > { %2157 = vmatmul.bf16.vlgmr.msra.gmra.mxu3 %v2079_v18 }
 0xa40   : > { %v2048_v21 = vpop.f32.mrf.mxu1 }
 0xa41   : > { %v2049_v22 = vadd.f32 %v4576_v57, %v2048_v21 }
 0xa43   : > { %v2054_v24 = vmul.f32 %v2049_v22, %v2049_v22 }
 0xa45   : > { %v2057_v25 = vmul.f32 %v2054_v24, %v2049_v22 }
 0xa47   : > { %v2060_v26 = vmul.f32 0.044715, %v2057_v25 }
 0xa48   : > { %v2050_v27 = vpop.f32.mrf.mxu1 }
 0xa49   : > { %v2063_v28 = vadd.f32 %v2060_v26, %v2049_v22 }
 0xa4b   : > { %v2066_v13 = vmul.f32 0.7978846, %v2063_v28 }
 0xa4d   : > { %4644 = vtanh.f32 %v2066_v13 }
 0xa53   : > { %v4645_v11 = vpop.eup %4644 }
 0xa54   : > { %v2072_v37 = vadd.f32 1.0, %v4645_v11 }
 0xa56   : > { %v2075_v29 = vmul.f32 0.5, %v2072_v37 }
 0xa58   : > { %v2078_v30 = vmul.f32 %v2075_v29, %v2049_v22 }
 0xa5a   : > { %v2080_v32 = vpack.c.bf16 %v2078_v30, %v2078_v30 }
 0xa5c   : > { %2162 = vmatmul.bf16.gmra.mxu3 %v2080_v32 }
 0xa74   : > { %v2158_v34 = vpop.f32.mrf.mxu3 }
 0xa75   : > { %v2159_v35 = vadd.f32 %v4577_v33, %v2158_v34 }
 0xa77   : > { %v5464_v36 = vadd.f32 %v2159_v35, %v5408_v39 }
 0xa79   : > { %2170 = vst.msk [vmem:[#allocation2] sm:$0xff] %vm1261_vm1, %v5464_v36 }
 0xa7c   : > { %v2160_v38 = vpop.f32.mrf.mxu3 }
 0xa7d   : > { %v2161_v41 = vadd.f32 %v4577_v33, %v2160_v38 }
 0xa7f   : > { %v5469_v14 = vadd.f32 %v2161_v41, %v5413_v43 }
 0xa81   : > { %2171 = vst.msk [vmem:[#allocation2 + $0x8] sm:$0xff] %vm1261_vm1, %v5469_v14 }
 0xadf   : > { %v2163_v42 = vpop.f32.mrf.mxu3 }
 0xae0   : > { %v2164_v44 = vadd.f32 %v4577_v33, %v2163_v42 }
 0xae2   : > { %v2169_v45 = vadd.f32 %v2164_v44, %v5419_v48 }
 0xae3   : > { %2176 = sbr.rel (%p4173_p1) target bundleno = 5740 (0x166c), region = 140 }
 0xae4   : > { %2172 = vst.msk [vmem:[#allocation2 + $0x10] sm:$0xff] %vm1261_vm1, %v2169_v45 }
 0xae7   : > { %v2165_v46 = vpop.f32.mrf.mxu3 }
 0xae8   : > { %v2185_v39 = vsel %vm1261_vm1, %v2169_v45, 0.0  ;;  %v4396_v50 = vld [vmem:[%s6199_s17 + $0x8] sm:$0xff]  ;;  %v4395_v23 = vld [vmem:[%s6199_s17] sm:$0xff]  ;;  %v4385_v51 = vld [vmem:[%s6200_s8 + $0x30] sm:$0xff]  ;;  %vm2322_vm2 = vcmp.lt.s32.totalorder %v5271_v52, 8  ;;  %vm2405_vm3 = vcmask 1040384  }
 0xae9   : > { %2186 = vadd.xlane.f32.xlu0 %v2185_v39  ;;  %2315 = vmatpush.bf16.msra.mxu0 %v4396_v50  ;;  %v4386_v53 = vld [vmem:[%s6200_s8 + $0x38] sm:$0xff]  ;;  %v4384_v20 = vld [vmem:[%s6200_s8 + $0x28] sm:$0xff]  ;;  %v2386_v58 = vsel %vm1401_vm12, %v4385_v51, 0  ;;  %v5498_v4 = vld [vmem:[%s6201_s11] ss:$0 sm:$0xff]  ;;  %s6133_s11 = smov 16  }
 0xaea   : > { %2509 = vrot.lane.b32.xlu2 %v4385_v51, %s4905_s23  ;;  %v2389_v56 = vsel %vm1401_vm12, %v4386_v53, 0  ;;  %2511 = vrot.lane.b32.xlu1 %v4386_v53, %s4905_s23  ;;  %v2383_v63 = vsel %vm1401_vm12, %v4384_v20, 0  ;;  %v4382_v1 = vld [vmem:[%s6200_s8 + $0x18] sm:$0xff]  ;;  %v4383_v6 = vld [vmem:[%s6200_s8 + $0x20] sm:$0xff] }
 0xaeb   : > { %2391 = vmatpush.bf16.xpose.msra.mxu1 %v2389_v56  ;;  %v5502_v61 = vld [vmem:[%s6202_s26] ss:$0 sm:$0xff]  ;;  %v2380_v8 = vsel %vm1401_vm12, %v4383_v6, 0  ;;  %v4381_v10 = vld [vmem:[%s6200_s8 + $0x10] sm:$0xff]  ;;  %v2377_v40 = vsel %vm1401_vm12, %v4382_v1, 0  ;;  %v4380_v17 = vld [vmem:[%s6200_s8 + $0x8] sm:$0xff] }
 0xaec   : > { %v2374_v16 = vsel %vm1401_vm12, %v4381_v10, 0  ;;  %v2371_v18 = vsel %vm1401_vm12, %v4380_v17, 0  ;;  %v5519_v21 = vld [vmem:[%s6200_s8] sm:$0xff]  ;;  %s6207_s26 = sld [smem:[#allocation23_spill]] }
 0xaed   : > { %2316 = vmatpush.bf16.msra.mxu0 %v4395_v23  ;;  %v2368_v22 = vsel %vm1401_vm12, %v5519_v21, 0 }
 0xaf2   : > { %2507 = vrot.lane.b32.xlu2 %v4384_v20, %s4905_s23  ;;  %2755 = vrot.lane.b32.xlu1 %v4385_v51, %s4907_s10  ;;  %s6208_s1 = smov %s6207_s26 }
 0xaf3   : > { %2392 = vmatpush.bf16.xpose.msra.mxu1 %v2386_v58  ;;  %v5558_v58 = vld [vmem:[%s6204_s5 + $0x30] sm:$0xff] }
 0xafa   : > { %2757 = vrot.lane.b32.xlu2 %v4386_v53, %s4907_s10  ;;  %2753 = vrot.lane.b32.xlu1 %v4384_v20, %s4907_s10 }
 0xafb   : > { %2393 = vmatpush.bf16.xpose.msra.mxu1 %v2383_v63  ;;  %v5570_v63 = vld [vmem:[%s6204_s5 + $0x20] sm:$0xff] }
 0xb02   : > { %2505 = vrot.lane.b32.xlu2 %v4383_v6, %s4905_s23 }
 0xb03   : > { %2394 = vmatpush.bf16.xpose.msra.mxu1 %v2380_v8 }
 0xb0a   : > { %2632 = vrot.lane.b32.xlu2 %v4385_v51, %s4906_s0 }
 0xb0b   : > { %2395 = vmatpush.bf16.xpose.msra.mxu1 %v2377_v40 }
 0xb12   : > { %2630 = vrot.lane.b32.xlu2 %v4384_v20, %s4906_s0  ;;  %v5554_v20 = vld [vmem:[%s6203_s22 + $0x38] sm:$0xff]  ;;  %s4910_s22 = smov 24  }
 0xb13   : > { %2396 = vmatpush.bf16.xpose.msra.mxu1 %v2374_v16  ;;  %2480 = vmatpush.bf16.msra.mxu2 %v5554_v20 }
 0xb17   : > { %2481 = vmatpush.bf16.msra.mxu2 %v5558_v58 }
 0xb1a   : > { %2628 = vrot.lane.b32.xlu2 %v4383_v6, %s4906_s0 }
 0xb1b   : > { %2397 = vmatpush.bf16.xpose.msra.mxu1 %v2371_v18 }
 0xb22   : > { %2499 = vrot.lane.b32.xlu2 %v4380_v17, %s4905_s23 }
 0xb23   : > { %2398 = vmatpush.bf16.xpose.msra.mxu1 %v2368_v22 }
 0xb2a   : > { %2749 = vrot.lane.b32.xlu2 %v4382_v1, %s4907_s10 }
 0xb32   : > { %2624 = vrot.lane.b32.xlu2 %v4381_v10, %s4906_s0 }
 0xb44   : > { %v2510_v11 = vpop.permute.xlu2 %2509 }
 0xb45   : > { %v2535_v44 = vsel %vm1401_vm12, %v2510_v11, 0 }
 0xb4c   : > { %v2508_v29 = vpop.permute.xlu2 %2507 }
 0xb4d   : > { %v2532_v46 = vsel %vm1401_vm12, %v2508_v29, 0 }
 0xb54   : > { %v2758_v32 = vpop.permute.xlu2 %2757 }
 0xb55   : > { %v2784_v34 = vsel %vm1401_vm12, %v2758_v32, 0 }
 0xb56   : > { %2786 = vmatpush.bf16.xpose.msrb.mxu1 %v2784_v34 }
 0xb5c   : > { %v2187_v43 = vpop.xlane.xlu0 %2186  ;;  %v2512_v30 = vpop.permute.xlu1 %2511 }
 0xb5d   : > { %v2190_v47 = vmul.f32 %v2187_v43, %v5219_v31  ;;  %v2538_v33 = vsel %vm1401_vm12, %v2512_v30, 0 }
 0xb5e   : > { %2540 = vmatpush.bf16.xpose.msra.mxu3 %v2538_v33 }
 0xb5f   : > { %v2193_v19 = vsub.f32 %v2169_v45, %v2190_v47  ;;  %v2506_v45 = vpop.permute.xlu2 %2505 }
 0xb60   : > { %v2529_v47 = vsel %vm1401_vm12, %v2506_v45, 0 }
 0xb61   : > { %v2196_v49 = vmul.f32 %v2193_v19, %v2193_v19 }
 0xb63   : > { %v2203_v48 = vsel %vm1261_vm1, %v2196_v49, 0.0 }
 0xb64   : > { %2204 = vadd.xlane.f32.xlu0 %v2203_v48  ;;  %v2756_v35 = vpop.permute.xlu1 %2755 }
 0xb65   : > { %v2781_v38 = vsel %vm1401_vm12, %v2756_v35, 0 }
 0xb66   : > { %2787 = vmatpush.bf16.xpose.msrb.mxu1 %v2781_v38  ;;  %2541 = vmatpush.bf16.xpose.msra.mxu3 %v2535_v44 }
 0xb67   : > { %v2633_v39 = vpop.permute.xlu2 %2632 }
 0xb68   : > { %v2658_v40 = vsel %vm1401_vm12, %v2633_v39, 0 }
 0xb6c   : > { %v2754_v41 = vpop.permute.xlu1 %2753 }
 0xb6d   : > { %v2778_v42 = vsel %vm1401_vm12, %v2754_v41, 0 }
 0xb6e   : > { %2788 = vmatpush.bf16.xpose.msrb.mxu1 %v2778_v42  ;;  %2542 = vmatpush.bf16.xpose.msra.mxu3 %v2532_v46 }
 0xb76   : > { %2543 = vmatpush.bf16.xpose.msra.mxu3 %v2529_v47 }
 0xb78   : > { %2634 = vrot.lane.b32.xlu0 %v4386_v53, %s4906_s0 }
 0xb80   : > { %2503 = vrot.lane.b32.xlu0 %v4382_v1, %s4905_s23 }
 0xb88   : > { %2501 = vrot.lane.b32.xlu0 %v4381_v10, %s4905_s23 }
 0xbd7   : > { %v2205_v54 = vpop.xlane.xlu0 %2204 }
 0xbd8   : > { %v2208_v55 = vmul.f32 %v2205_v54, %v5219_v31 }
 0xbda   : > { %v2211_v57 = vadd.f32 1e-06, %v2208_v55 }
 0xbdc   : > { %4648 = vrsqrt.f32 %v2211_v57  ;;  %vm2238_vm13 = vweird.f32 %v2211_v57 }
 0xbe2   : > { %v4649_v59 = vpop.eup %4648 }
 0xbe3   : > { %v2233_v60 = vmul.f32 %v4649_v59, %v2211_v57  ;;  %vm2239_vm11 = vweird.f32 %v4649_v59 }
 0xbe4   : > { %vm2240_vm14 = vmor %vm2238_vm13, %vm2239_vm11 }
 0xbe5   : > { %v2234_v62 = vmul.f32 %v4649_v59, %v2233_v60 }
 0xbe7   : > { %v2235_v0 = vmul.f32 0.5, %v2234_v62  ;;  %v5566_v62 = vld [vmem:[%s6204_s5 + $0x28] sm:$0xff] }
 0xbe8   : > { %2482 = vmatpush.bf16.msra.mxu2 %v5566_v62 }
 0xbe9   : > { %v2236_v2 = vsub.f32 1.5, %v2235_v0 }
 0xbea   : > { %v2635_v43 = vpop.permute.xlu0 %2634 }
 0xbeb   : > { %v2237_v3 = vmul.f32 %v4649_v59, %v2236_v2  ;;  %v5578_v2 = vld [vmem:[%s6204_s5 + $0x10] sm:$0xff]  ;;  %v2661_v8 = vsel %vm1401_vm12, %v2635_v43, 0 }
 0xbec   : > { %2483 = vmatpush.bf16.msra.mxu2 %v5570_v63 }
 0xbed   : > { %v2241_v7 = vsel %vm2240_vm14, %v4649_v59, %v2237_v3 }
 0xbee   : > { %v2244_v5 = vmul.f32 %v2241_v7, %v2193_v19  ;;  %v2631_v19 = vpop.permute.xlu2 %2630  ;;  %v5582_v7 = vld [vmem:[%s6204_s5 + $0x8] sm:$0xff] }
 0xbef   : > { %v2655_v18 = vsel %vm1401_vm12, %v2631_v19, 0 }
 0xbf0   : > { %v2250_v9 = vmul.f32 %v5498_v4, %v2244_v5  ;;  %v5588_v5 = vld [vmem:[%s6204_s5] sm:$0xff] }
 0xbf2   : > { %v2256_v12 = vadd.f32 %v5502_v61, %v2250_v9  ;;  %v2504_v49 = vpop.permute.xlu0 %2503 }
 0xbf3   : > { %v2526_v48 = vsel %vm1401_vm12, %v2504_v49, 0 }
 0xbf4   : > { %v2289_v15 = vpack.c.bf16 %v2256_v12, %v2256_v12  ;;  %2544 = vmatpush.bf16.xpose.msra.mxu3 %v2526_v48 }
 0xbf6   : > { %4182 = vmatmul.msk.bf16.vlgmr.msra.gmra.mxu0 %vm1261_vm1, %v2289_v15  ;;  %v2629_v23 = vpop.permute.xlu2 %2628 }
 0xbfa   : > { %v2502_v50 = vpop.permute.xlu0 %2501 }
 0xbfb   : > { %v2523_v51 = vsel %vm1401_vm12, %v2502_v50, 0 }
 0xbfc   : > { %2545 = vmatpush.bf16.xpose.msra.mxu3 %v2523_v51 }
 0xbfe   : > { %v2500_v53 = vpop.permute.xlu2 %2499 }
 0xbff   : > { %v2520_v56 = vsel %vm1401_vm12, %v2500_v53, 0 }
 0xc04   : > { %2546 = vmatpush.bf16.xpose.msra.mxu3 %v2520_v56 }
 0xc06   : > { %v2750_v3 = vpop.permute.xlu2 %2749 }
 0xc07   : > { %v2772_v16 = vsel %vm1401_vm12, %v2750_v3, 0 }
 0xc0e   : > { %v2625_v9 = vpop.permute.xlu2 %2624 }
 0xc73   : > { %v2318_v24 = vpop.f32.mrf.mxu0 }
 0xc74   : > { %v2323_v25 = vpack.c.bf16 %v2318_v24, %v2318_v24  ;;  %v2646_v24 = vsel %vm1401_vm12, %v2625_v9, 0 }
 0xc76   : > { %2495 = vrot.lane.b32.xlu2 %v2323_v25, %s4905_s23  ;;  %4215 = vmatmul.msk.bf16.vlgmr.msra.gmra.mxu1 %vm1401_vm12, %v2323_v25 }
 0xc7b   : > { %v2320_v26 = vpop.f32.mrf.mxu0 }
 0xc7e   : > { %2745 = vrot.lane.b32.xlu2 %v4380_v17, %s4907_s10 }
 0xc86   : > { %2618 = vrot.lane.b32.xlu2 %v2323_v25, %s4906_s0 }
 0xcf3   : > { %v2400_v27 = vpop.f32.mrf.mxu1 }
 0xcf4   : > { %v2404_v28 = vsel %vm2322_vm2, %v2400_v27, -1e+30 }
 0xcf5   : > { %v2406_v13 = vsel %vm2405_vm3, %v2404_v28, -inf }
 0xcf6   : > { %2407 = vmax.xlane.f32.xlu1 %v2406_v13 }
 0xcfb   : > { %v2402_v37 = vpop.f32.mrf.mxu1 }
 0xd0f   : > { %2751 = vrot.lane.b32.xlu1 %v4383_v6, %s4907_s10 }
 0xd17   : > { %2626 = vrot.lane.b32.xlu1 %v4382_v1, %s4906_s0  ;;  %v5574_v1 = vld [vmem:[%s6204_s5 + $0x18] sm:$0xff] }
 0xd18   : > { %2484 = vmatpush.bf16.msra.mxu2 %v5574_v1 }
 0xd1c   : > { %2485 = vmatpush.bf16.msra.mxu2 %v5578_v2 }
 0xd1f   : > { %2497 = vrot.lane.b32.xlu1 %v5519_v21, %s4905_s23 }
 0xd20   : > { %2486 = vmatpush.bf16.msra.mxu2 %v5582_v7 }
 0xd24   : > { %2487 = vmatpush.bf16.msra.mxu2 %v5588_v5 }
 0xd27   : > { %2747 = vrot.lane.b32.xlu1 %v4381_v10, %s4907_s10 }
 0xd28   : > { %2663 = vmatpush.bf16.xpose.msrb.mxu2 %v2661_v8 }
 0xd2f   : > { %2622 = vrot.lane.b32.xlu1 %v4380_v17, %s4906_s0  ;;  %v2496_v17 = vpop.permute.xlu2 %2495 }
 0xd30   : > { %2664 = vmatpush.bf16.xpose.msrb.mxu2 %v2658_v40 }
 0xd37   : > { %2620 = vrot.lane.b32.xlu1 %v5519_v21, %s4906_s0 }
 0xd38   : > { %2665 = vmatpush.bf16.xpose.msrb.mxu2 %v2655_v18 }
 0xd3f   : > { %2741 = vrot.lane.b32.xlu1 %v2323_v25, %s4907_s10 }
 0xd69   : > { %v2408_v54 = vpop.xlane.xlu1 %2407 }
 0xd6a   : > { %v2409_v55 = vsub.f32 %v2404_v28, %v2408_v54  ;;  %v2746_v28 = vpop.permute.xlu2 %2745 }
 0xd6b   : > { %v2766_v11 = vsel %vm1401_vm12, %v2746_v28, 0 }
 0xd6c   : > { %v2410_v57 = vmul.f32 1.442695, %v2409_v55 }
 0xd6e   : > { %4650 = vpow2.f32 %v2410_v57 }
 0xd72   : > { %v2619_v48 = vpop.permute.xlu2 %2618 }
 0xd74   : > { %v5560_v59 = vpop.eup %4650 }
 0xd75   : > { %v2412_v60 = vsel %vm2405_vm3, %v5560_v59, 0.0 }
 0xd76   : > { %2413 = vadd.xlane.f32.xlu0 %v2412_v60 }
 0xd81   : > { %v2752_v0 = vpop.permute.xlu1 %2751 }
 0xd82   : > { %v2775_v12 = vsel %vm1401_vm12, %v2752_v0, 0 }
 0xd83   : > { %2789 = vmatpush.bf16.xpose.msrb.mxu1 %v2775_v12 }
 0xd89   : > { %v2627_v6 = vpop.permute.xlu1 %2626 }
 0xd8a   : > { %2743 = vrot.lane.b32.xlu0 %v5519_v21, %s4907_s10  ;;  %v2652_v21 = vsel %vm1401_vm12, %v2629_v23, 0  ;;  %v2649_v22 = vsel %vm1401_vm12, %v2627_v6, 0 }
 0xd8b   : > { %2790 = vmatpush.bf16.xpose.msrb.mxu1 %v2772_v16  ;;  %2666 = vmatpush.bf16.xpose.msrb.mxu2 %v2652_v21 }
 0xd91   : > { %v2498_v10 = vpop.permute.xlu1 %2497 }
 0xd92   : > { %v2517_v15 = vsel %vm1401_vm12, %v2498_v10, 0  ;;  %2590 = vrot.lane.b32.xlu0 %v5566_v62, %s4905_s23 }
 0xd93   : > { %2547 = vmatpush.bf16.xpose.msra.mxu3 %v2517_v15  ;;  %2667 = vmatpush.bf16.xpose.msrb.mxu2 %v2649_v22 }
 0xd99   : > { %v2748_v25 = vpop.permute.xlu1 %2747 }
 0xd9a   : > { %4248 = vmatmul.msk.bf16.vlgmr.msra.gmra.mxu3 %vm1401_vm12, %v2496_v17  ;;  %2588 = vrot.lane.b32.xlu0 %v5570_v63, %s4905_s23  ;;  %v2769_v26 = vsel %vm1401_vm12, %v2748_v25, 0 }
 0xd9b   : > { %2668 = vmatpush.bf16.xpose.msrb.mxu2 %v2646_v24  ;;  %2791 = vmatpush.bf16.xpose.msrb.mxu1 %v2769_v26 }
 0xda1   : > { %v2623_v27 = vpop.permute.xlu1 %2622 }
 0xda2   : > { %2586 = vrot.lane.b32.xlu0 %v5574_v1, %s4905_s23  ;;  %v2643_v13 = vsel %vm1401_vm12, %v2623_v27, 0 }
 0xda3   : > { %2669 = vmatpush.bf16.xpose.msrb.mxu2 %v2643_v13  ;;  %2792 = vmatpush.bf16.xpose.msrb.mxu1 %v2766_v11 }
 0xda9   : > { %v2621_v37 = vpop.permute.xlu1 %2620 }
 0xdaa   : > { %2836 = vrot.lane.b32.xlu0 %v5566_v62, %s4907_s10  ;;  %v2640_v29 = vsel %vm1401_vm12, %v2621_v37, 0 }
 0xdab   : > { %2670 = vmatpush.bf16.xpose.msrb.mxu2 %v2640_v29 }
 0xdb1   : > { %v2742_v49 = vpop.permute.xlu1 %2741 }
 0xdb2   : > { %2715 = vrot.lane.b32.xlu0 %v5558_v58, %s4906_s0 }
 0xdba   : > { %2834 = vrot.lane.b32.xlu0 %v5570_v63, %s4907_s10 }
 0xde9   : > { %v2414_v30 = vpop.xlane.xlu0 %2413 }
 0xdea   : > { %4652 = vrcp.f32 %v2414_v30  ;;  %v2426_v35 = vand.u32 2147483648, %v2414_v30  ;;  %v2424_v41 = vand.u32 2147483647, %v2414_v30  ;;  %vm2420_vm5 = vweird.f32 %v2414_v30 }
 0xdec   : > { %v2427_v44 = vor.u32 1.1754944e-38, %v2426_v35  ;;  %vm2425_vm7 = vcmp.eq.f32.partialorder %v2424_v41, 8.507059e+37 }
 0xdf0   : > { %v4653_v32 = vpop.eup %4652 }
 0xdf1   : > { %v2416_v33 = vmul.f32 %v4653_v32, %v2414_v30  ;;  %vm2421_vm4 = vweird.f32 %v4653_v32 }
 0xdf2   : > { %vm2422_vm6 = vmor %vm2420_vm5, %vm2421_vm4 }
 0xdf3   : > { %v2417_v34 = vsub.f32 1.0, %v2416_v33 }
 0xdf5   : > { %v2418_v38 = vmul.f32 %v4653_v32, %v2417_v34 }
 0xdf7   : > { %v2419_v42 = vadd.f32 %v4653_v32, %v2418_v38 }
 0xdf9   : > { %v2423_v45 = vsel %vm2422_vm6, %v4653_v32, %v2419_v42 }
 0xdfa   : > { %v2428_v46 = vsel %vm2425_vm7, %v2427_v44, %v2423_v45 }
 0xdfb   : > { %v5618_v39 = vmul.f32 %v5560_v59, %v2428_v46 }
 0xdfc   : > { %v2744_v43 = vpop.permute.xlu0 %2743 }
 0xdfd   : > { %v2763_v47 = vsel %vm1401_vm12, %v2744_v43, 0  ;;  %v2431_v19 = vpack.c.bf16 %v5618_v39, %v5618_v39 }
 0xdfe   : > { %2793 = vmatpush.bf16.xpose.msrb.mxu1 %v2763_v47 }
 0xdff   : > { %2488 = vmatmul.bf16.vlgmr.msra.gmra.mxu2 %v2431_v19 }
 0xe04   : > { %v2591_v16 = vpop.permute.xlu0 %2590 }
 0xe05   : > { %4250 = vmatmul.msk.bf16.vlgmr.msrb.gmra.mxu1 %vm1401_vm12, %v2742_v49 }
 0xe0f   : > { %4249 = vmatmul.msk.bf16.vlgmr.msrb.gmra.mxu2 %vm1401_vm12, %v2619_v48 }
 0xe1d   : > { %v2549_v50 = vpop.f32.mrf.mxu3 }
 0xe1e   : > { %v2553_v23 = vsel %vm2322_vm2, %v2549_v50, -1e+30 }
 0xe1f   : > { %v2554_v51 = vsel %vm2405_vm3, %v2553_v23, -inf }
 0xe20   : > { %2555 = vmax.xlane.f32.xlu2 %v2554_v51 }
 0xe25   : > { %v2551_v53 = vpop.f32.mrf.mxu3 }
 0xe38   : > { %2594 = vrot.lane.b32.xlu2 %v5554_v20, %s4905_s23 }
 0xe40   : > { %2582 = vrot.lane.b32.xlu2 %v5582_v7, %s4905_s23 }
 0xe82   : > { %v5632_v54 = vpop.f32.mrf.mxu2  ;;  %v2795_v55 = vpop.f32.mrf.mxu1 }
 0xe83   : > { %v2799_v56 = vsel %vm2322_vm2, %v2795_v55, -1e+30 }
 0xe84   : > { %v2800_v57 = vsel %vm2405_vm3, %v2799_v56, -inf }
 0xe85   : > { %2801 = vmax.xlane.f32.xlu1 %v2800_v57 }
 0xe8a   : > { %v2491_v59 = vpop.f32.mrf.mxu2  ;;  %v2797_v60 = vpop.f32.mrf.mxu1 }
 0xe92   : > { %v2672_v0 = vpop.f32.mrf.mxu2 }
 0xe93   : > { %v2676_v3 = vsel %vm2322_vm2, %v2672_v0, -1e+30  ;;  %v2556_v6 = vpop.xlane.xlu2 %2555 }
 0xe94   : > { %v2557_v8 = vsub.f32 %v2553_v23, %v2556_v6  ;;  %v2677_v9 = vsel %vm2405_vm3, %v2676_v3, -inf }
 0xe95   : > { %2678 = vmax.xlane.f32.xlu0 %v2677_v9 }
 0xe96   : > { %v2558_v10 = vmul.f32 1.442695, %v2557_v8 }
 0xe98   : > { %4654 = vpow2.f32 %v2558_v10 }
 0xe9a   : > { %v2674_v12 = vpop.f32.mrf.mxu2 }
 0xe9e   : > { %v5640_v15 = vpop.eup %4654  ;;  %2592 = vrot.lane.b32.xlu1 %v5558_v58, %s4905_s23 }
 0xe9f   : > { %v2560_v40 = vsel %vm2405_vm3, %v5640_v15, 0.0 }
 0xea0   : > { %2561 = vadd.xlane.f32.xlu2 %v2560_v40 }
 0xea6   : > { %2840 = vrot.lane.b32.xlu1 %v5554_v20, %s4907_s10 }
 0xea9   : > { %2713 = vrot.lane.b32.xlu0 %v5566_v62, %s4906_s0 }
 0xeae   : > { %2838 = vrot.lane.b32.xlu1 %v5558_v58, %s4907_s10  ;;  %v2589_v58 = vpop.permute.xlu0 %2588 }
 0xeb6   : > { %2717 = vrot.lane.b32.xlu1 %v5554_v20, %s4906_s0  ;;  %v2595_v20 = vpop.permute.xlu2 %2594  ;;  %v2587_v62 = vpop.permute.xlu0 %2586 }
 0xeb7   : > { %2604 = vmatpush.bf16.msrb.mxu0 %v2595_v20 }
 0xeb8   : > { %2832 = vrot.lane.b32.xlu2 %v5574_v1, %s4907_s10 }
 0xebe   : > { %2584 = vrot.lane.b32.xlu1 %v5578_v2, %s4905_s23  ;;  %v2837_v17 = vpop.permute.xlu0 %2836  ;;  %v2583_v13 = vpop.permute.xlu2 %2582 }
 0xec0   : > { %2580 = vrot.lane.b32.xlu2 %v5588_v5, %s4905_s23 }
 0xec6   : > { %v5668_v18 = vpop.permute.xlu0 %2715 }
 0xec8   : > { %2830 = vrot.lane.b32.xlu2 %v5578_v2, %s4907_s10 }
 0xece   : > { %v2835_v25 = vpop.permute.xlu0 %2834 }
 0xed0   : > { %2709 = vrot.lane.b32.xlu2 %v5574_v1, %s4906_s0 }
 0xed8   : > { %2707 = vrot.lane.b32.xlu2 %v5578_v2, %s4906_s0  ;;  %v2179_v2 = vsel %vm1261_vm1, %v5464_v36, 0.0 }
 0xee0   : > { %2705 = vrot.lane.b32.xlu2 %v5582_v7, %s4906_s0 }
 0xef8   : > { %v2802_v21 = vpop.xlane.xlu1 %2801 }
 0xef9   : > { %v2803_v22 = vsub.f32 %v2799_v56, %v2802_v21 }
 0xefb   : > { %v2804_v24 = vmul.f32 1.442695, %v2803_v22 }
 0xefd   : > { %4656 = vpow2.f32 %v2804_v24 }
 0xf03   : > { %v5670_v26 = vpop.eup %4656 }
 0xf04   : > { %v2806_v1 = vsel %vm2405_vm3, %v5670_v26, 0.0 }
 0xf05   : > { %2807 = vadd.xlane.f32.xlu1 %v2806_v1 }
 0xf08   : > { %v2679_v27 = vpop.xlane.xlu0 %2678 }
 0xf09   : > { %v2680_v28 = vsub.f32 %v2676_v3, %v2679_v27  ;;  %2180 = vadd.xlane.f32.xlu2 %v2179_v2 }
 0xf0b   : > { %v2681_v11 = vmul.f32 1.442695, %v2680_v28 }
 0xf0d   : > { %4658 = vpow2.f32 %v2681_v11 }
 0xf10   : > { %v2593_v37 = vpop.permute.xlu1 %2592 }
 0xf11   : > { %2605 = vmatpush.bf16.msrb.mxu0 %v2593_v37 }
 0xf13   : > { %v5676_v29 = vpop.eup %4658  ;;  %v2562_v30 = vpop.xlane.xlu2 %2561 }
 0xf14   : > { %v2683_v32 = vsel %vm2405_vm3, %v5676_v29, 0.0  ;;  %4660 = vrcp.f32 %v2562_v30  ;;  %v2574_v47 = vand.u32 2147483648, %v2562_v30  ;;  %vm2568_vm9 = vweird.f32 %v2562_v30 }
 0xf15   : > { %2606 = vmatpush.bf16.msrb.mxu0 %v2591_v16  ;;  %2684 = vadd.xlane.f32.xlu0 %v2683_v32 }
 0xf16   : > { %v2575_v48 = vor.u32 1.1754944e-38, %v2574_v47 }
 0xf18   : > { %v2841_v33 = vpop.permute.xlu1 %2840 }
 0xf19   : > { %2607 = vmatpush.bf16.msrb.mxu0 %v2589_v58  ;;  %2850 = vmatpush.bf16.msrb.mxu3 %v2841_v33 }
 0xf1a   : > { %v4661_v34 = vpop.eup %4660 }
 0xf1b   : > { %v2564_v35 = vmul.f32 %v4661_v34, %v2562_v30  ;;  %v2833_v41 = vpop.permute.xlu2 %2832  ;;  %vm2569_vm8 = vweird.f32 %v4661_v34  ;;  %v2714_v53 = vpop.permute.xlu0 %2713 }
 0xf1c   : > { %vm2570_vm10 = vmor %vm2568_vm9, %vm2569_vm8 }
 0xf1d   : > { %2608 = vmatpush.bf16.msrb.mxu0 %v2587_v62  ;;  %v2565_v42 = vsub.f32 1.0, %v2564_v35 }
 0xf1e   : > { %2711 = vrot.lane.b32.xlu1 %v5570_v63, %s4906_s0  ;;  %v2572_v63 = vand.u32 2147483647, %v2562_v30 }
 0xf1f   : > { %v2566_v44 = vmul.f32 %v4661_v34, %v2565_v42 }
 0xf20   : > { %v2839_v38 = vpop.permute.xlu1 %2838  ;;  %vm2573_vm11 = vcmp.eq.f32.partialorder %v2572_v63, 8.507059e+37 }
 0xf21   : > { %2851 = vmatpush.bf16.msrb.mxu3 %v2839_v38  ;;  %v2567_v46 = vadd.f32 %v4661_v34, %v2566_v44 }
 0xf23   : > { %v2581_v43 = vpop.permute.xlu2 %2580  ;;  %v2571_v49 = vsel %vm2570_vm10, %v4661_v34, %v2567_v46 }
 0xf24   : > { %v2576_v50 = vsel %vm2573_vm11, %v2575_v48, %v2571_v49 }
 0xf25   : > { %2852 = vmatpush.bf16.msrb.mxu3 %v2837_v17 }
 0xf26   : > { %2826 = vrot.lane.b32.xlu1 %v5588_v5, %s4907_s10 }
 0xf28   : > { %v2718_v45 = vpop.permute.xlu1 %2717 }
 0xf29   : > { %2853 = vmatpush.bf16.msrb.mxu3 %v2835_v25  ;;  %2828 = vrot.lane.b32.xlu0 %v5582_v7, %s4907_s10  ;;  %v2577_v7 = vmul.f32 %v5640_v15, %v2576_v50 }
 0xf2b   : > { %v2831_v23 = vpop.permute.xlu2 %2830  ;;  %v2579_v51 = vpack.c.bf16 %v2577_v7, %v2577_v7  ;;  %v2578_v30 = vadd.f32 %v2577_v7, %v5618_v39 }
 0xf2d   : > { %2854 = vmatpush.bf16.msrb.mxu3 %v2833_v41 }
 0xf2e   : > { %2703 = vrot.lane.b32.xlu1 %v5588_v5, %s4906_s0  ;;  %v2182_v5 = vsel %vm1261_vm1, %v5469_v14, 0.0 }
 0xf30   : > { %v2585_v19 = vpop.permute.xlu1 %2584 }
 0xf31   : > { %2609 = vmatpush.bf16.msrb.mxu0 %v2585_v19  ;;  %2855 = vmatpush.bf16.msrb.mxu3 %v2831_v23  ;;  %v4397_v23 = vld [vmem:[%s6206_s9] sm:$0xff] }
 0xf33   : > { %v2710_v55 = vpop.permute.xlu2 %2709 }
 0xf35   : > { %2610 = vmatpush.bf16.msrb.mxu0 %v2583_v13 }
 0xf39   : > { %2611 = vmatpush.bf16.msrb.mxu0 %v2581_v43 }
 0xf3b   : > { %v2708_v56 = vpop.permute.xlu2 %2707 }
 0xf3c   : > { %2612 = vmatmul.bf16.vlgmr.msrb.gmra.mxu0 %v2579_v51 }
 0xf3d   : > { %2727 = vmatpush.bf16.msra.mxu0 %v2718_v45 }
 0xf41   : > { %2728 = vmatpush.bf16.msra.mxu0 %v5668_v18 }
 0xf43   : > { %v2706_v57 = vpop.permute.xlu2 %2705 }
 0xf45   : > { %2729 = vmatpush.bf16.msra.mxu0 %v2714_v53 }
 0xf53   : > { %2183 = vadd.xlane.f32.xlu0 %v2182_v5 }
 0xf78   : > { %v2808_v59 = vpop.xlane.xlu1 %2807 }
 0xf79   : > { %4662 = vrcp.f32 %v2808_v59  ;;  %vm2814_vm14 = vweird.f32 %v2808_v59  ;;  %v2820_v17 = vand.u32 2147483648, %v2808_v59  ;;  %v2818_v21 = vand.u32 2147483647, %v2808_v59 }
 0xf7b   : > { %v2821_v2 = vor.u32 1.1754944e-38, %v2820_v17  ;;  %vm2819_vm6 = vcmp.eq.f32.partialorder %v2818_v21, 8.507059e+37 }
 0xf7c   : > { %v2181_v60 = vpop.xlane.xlu2 %2180 }
 0xf7d   : > { %v2188_v0 = vmul.f32 %v2181_v60, %v5219_v31 }
 0xf7f   : > { %v5694_v3 = vsub.f32 %v5464_v36, %v2188_v0  ;;  %v4663_v9 = vpop.eup %4662 }
 0xf80   : > { %v2810_v10 = vmul.f32 %v4663_v9, %v2808_v59  ;;  %vm2815_vm13 = vweird.f32 %v4663_v9  ;;  %v4415_v59 = vld [vmem:[%s6208_s1] sm:$0xff] }
 0xf81   : > { %v2194_v6 = vmul.f32 %v5694_v3, %v5694_v3  ;;  %vm2816_vm3 = vmor %vm2814_vm14, %vm2815_vm13 }
 0xf82   : > { %v2811_v15 = vsub.f32 1.0, %v2810_v10 }
 0xf83   : > { %v2197_v8 = vsel %vm1261_vm1, %v2194_v6, 0.0 }
 0xf84   : > { %2198 = vadd.xlane.f32.xlu1 %v2197_v8  ;;  %v2812_v40 = vmul.f32 %v4663_v9, %v2811_v15 }
 0xf86   : > { %v2813_v62 = vadd.f32 %v4663_v9, %v2812_v40 }
 0xf88   : > { %v2685_v12 = vpop.xlane.xlu0 %2684  ;;  %v2817_v1 = vsel %vm2816_vm3, %v4663_v9, %v2813_v62 }
 0xf89   : > { %4664 = vrcp.f32 %v2685_v12  ;;  %v2697_v18 = vand.u32 2147483648, %v2685_v12  ;;  %v2695_v24 = vand.u32 2147483647, %v2685_v12  ;;  %vm2691_vm4 = vweird.f32 %v2685_v12 }
 0xf8a   : > { %v2822_v37 = vsel %vm2819_vm6, %v2821_v2, %v2817_v1 }
 0xf8b   : > { %v2698_v27 = vor.u32 1.1754944e-38, %v2697_v18  ;;  %vm2696_vm7 = vcmp.eq.f32.partialorder %v2695_v24, 8.507059e+37  ;;  %v2823_v35 = vmul.f32 %v5670_v26, %v2822_v37 }
 0xf8d   : > { %v2825_v44 = vpack.c.bf16 %v2823_v35, %v2823_v35 }
 0xf8f   : > { %v4665_v16 = vpop.eup %4664 }
 0xf90   : > { %v2712_v58 = vpop.permute.xlu1 %2711  ;;  %v2687_v20 = vmul.f32 %v4665_v16, %v2685_v12  ;;  %vm2692_vm2 = vweird.f32 %v4665_v16 }
 0xf91   : > { %2730 = vmatpush.bf16.msra.mxu0 %v2712_v58  ;;  %vm2693_vm5 = vmor %vm2691_vm4, %vm2692_vm2  ;;  %vm2980_vm2 = vcmp.lt.s32.totalorder %v5271_v52, 16 }
 0xf92   : > { %v2688_v36 = vsub.f32 1.0, %v2687_v20 }
 0xf94   : > { %v2689_v22 = vmul.f32 %v4665_v16, %v2688_v36 }
 0xf95   : > { %2731 = vmatpush.bf16.msra.mxu0 %v2710_v55 }
 0xf96   : > { %v2690_v25 = vadd.f32 %v4665_v16, %v2689_v22 }
 0xf98   : > { %v2827_v28 = vpop.permute.xlu1 %2826  ;;  %v2694_v13 = vsel %vm2693_vm5, %v4665_v16, %v2690_v25 }
 0xf99   : > { %2732 = vmatpush.bf16.msra.mxu0 %v2708_v56  ;;  %v2699_v11 = vsel %vm2696_vm7, %v2698_v27, %v2694_v13 }
 0xf9a   : > { %v2700_v32 = vmul.f32 %v5676_v29, %v2699_v11 }
 0xf9b   : > { %v2829_v33 = vpop.permute.xlu0 %2828 }
 0xf9c   : > { %2856 = vmatpush.bf16.msrb.mxu3 %v2829_v33  ;;  %v2701_v34 = vadd.f32 %v2700_v32, %v2578_v30  ;;  %v2702_v45 = vpack.c.bf16 %v2700_v32, %v2700_v32 }
 0xf9d   : > { %2733 = vmatpush.bf16.msra.mxu0 %v2706_v57  ;;  %v4416_v57 = vld [vmem:[%s6207_s26 + $0x8] sm:$0xff]  ;;  %s6216_s26 = sld [smem:[#allocation25_spill]] }
 0xf9e   : > { %v2824_v38 = vadd.f32 %v2823_v35, %v2701_v34 }
 0xfa0   : > { %v2704_v41 = vpop.permute.xlu1 %2703  ;;  %2857 = vmatpush.bf16.msrb.mxu3 %v2827_v28  ;;  %v2913_v42 = vmul.f32 0.25, %v2824_v38 }
 0xfa1   : > { %2734 = vmatpush.bf16.msra.mxu0 %v2704_v41 }
 0xfa2   : > { %3713 = vst [vmem:[%s6132_s13] sm:$0x1] %v2913_v42  ;;  %s6209_s13 = sld [smem:[#allocation21_spill]] }
 0xfa3   : > { %2858 = vmatmul.bf16.vlgmr.msrb.gmra.mxu3 %v2825_v44 }
 0xfa4   : > { %2735 = vmatmul.bf16.vlgmr.msra.gmra.mxu0 %v2702_v45 }
 0xfa8   : > { %v4406_v10 = vld [vmem:[%s6209_s13 + $0x38] sm:$0xff]  ;;  %v4405_v12 = vld [vmem:[%s6209_s13 + $0x30] sm:$0xff]  ;;  %v4404_v20 = vld [vmem:[%s6209_s13 + $0x28] sm:$0xff] }
 0xfa9   : > { %v4403_v30 = vld [vmem:[%s6209_s13 + $0x20] sm:$0xff]  ;;  %v4402_v34 = vld [vmem:[%s6209_s13 + $0x18] sm:$0xff]  ;;  %v5756_v41 = vld [vmem:[%s6209_s13 + $0x10] sm:$0xff] }
 0xfaa   : > { %v3038_v35 = vsel %vm1401_vm12, %v4403_v30, 0  ;;  %v3035_v38 = vsel %vm1401_vm12, %v4402_v34, 0  ;;  %v5764_v45 = vld [vmem:[%s6209_s13 + $0x8] sm:$0xff] }
 0xfb9   : > { %v2613_v39 = vpop.f32.mrf.mxu0 }
 0xfba   : > { %2865 = vrot.lane.b32.xlu0 %v2613_v39, %s4908_s15 }
 0xfc1   : > { %v2615_v29 = vpop.f32.mrf.mxu0 }
 0xfc2   : > { %3362 = vrot.lane.b32.xlu0 %v4405_v12, %s4906_s0 }
 0xfc6   : > { %v2184_v46 = vpop.xlane.xlu0 %2183 }
 0xfc7   : > { %v2189_v26 = vmul.f32 %v2184_v46, %v5219_v31  ;;  %v3032_v46 = vsel %vm1401_vm12, %v5756_v41, 0 }
 0xfc9   : > { %v5707_v43 = vsub.f32 %v5469_v14, %v2189_v26  ;;  %v4398_v14 = vld [vmem:[%s6205_s16 + $0x8] sm:$0xff]  ;;  %s6210_s16 = sld [smem:[#allocation22_spill]] }
 0xfca   : > { %2906 = vmatpush.bf16.msrb.mxu0 %v4398_v14  ;;  %3516 = vrot.lane.b32.xlu0 %v4404_v20, %s4907_s10 }
 0xfcb   : > { %v2195_v47 = vmul.f32 %v5707_v43, %v5707_v43 }
 0xfcd   : > { %v2200_v63 = vsel %vm1261_vm1, %v2195_v47, 0.0  ;;  %v3029_v47 = vsel %vm1401_vm12, %v5764_v45, 0 }
 0xfce   : > { %2201 = vadd.xlane.f32.xlu2 %v2200_v63  ;;  %2907 = vmatpush.bf16.msrb.mxu0 %v4397_v23 }
 0xfd2   : > { %2972 = vmatpush.bf16.msra.mxu0 %v4416_v57  ;;  %3358 = vrot.lane.b32.xlu0 %v4403_v30, %s4906_s0 }
 0xfd6   : > { %2973 = vmatpush.bf16.msra.mxu0 %v4415_v59 }
 0xff7   : > { %v2199_v51 = vpop.xlane.xlu1 %2198 }
 0xff8   : > { %v2206_v5 = vmul.f32 %v2199_v51, %v5219_v31 }
 0xffa   : > { %v2209_v56 = vadd.f32 1e-06, %v2206_v5 }
 0xffc   : > { %vm2218_vm10 = vweird.f32 %v2209_v56 }
0x1021   : > { %v2736_v19 = vpop.f32.mrf.mxu0 }
0x1022   : > { %2869 = vrot.lane.b32.xlu1 %v2736_v19, %s6133_s11  ;;  %s6211_s11 = smov %s6210_s16 }
0x1026   : > { %v2859_v49 = vpop.f32.mrf.mxu3 }
0x1027   : > { %2873 = vrot.lane.b32.xlu2 %v2859_v49, %s4910_s22 }
0x1029   : > { %v2738_v48 = vpop.f32.mrf.mxu0 }
0x102a   : > { %3202 = vrot.lane.b32.xlu1 %v4403_v30, %s4905_s23 }
0x102c   : > { %v2866_v58 = vpop.permute.xlu0 %2865 }
0x102d   : > { %v2876_v36 = vsel %vm1401_vm12, %v5632_v54, %v2866_v58 }
0x102e   : > { %v2861_v50 = vpop.f32.mrf.mxu3 }
0x102f   : > { %3208 = vrot.lane.b32.xlu2 %v4406_v10, %s4905_s23 }
0x1037   : > { %3206 = vrot.lane.b32.xlu2 %v4405_v12, %s4905_s23 }
0x103f   : > { %3364 = vrot.lane.b32.xlu2 %v4406_v10, %s4906_s0 }
0x1041   : > { %v2202_v7 = vpop.xlane.xlu2 %2201 }
0x1042   : > { %v2207_v53 = vmul.f32 %v2202_v7, %v5219_v31 }
0x1044   : > { %v2210_v55 = vadd.f32 1e-06, %v2207_v53 }
0x1046   : > { %4666 = vrsqrt.f32 %v2210_v55  ;;  %vm2228_vm8 = vweird.f32 %v2210_v55 }
0x1047   : > { %4668 = vrsqrt.f32 %v2209_v56  ;;  %3520 = vrot.lane.b32.xlu2 %v4406_v10, %s4907_s10 }
0x104c   : > { %v4667_v60 = vpop.eup %4666 }
0x104d   : > { %v4669_v0 = vpop.eup %4668  ;;  %v2223_v6 = vmul.f32 %v4667_v60, %v2210_v55  ;;  %vm2229_vm9 = vweird.f32 %v4667_v60 }
0x104e   : > { %v2213_v8 = vmul.f32 %v4669_v0, %v2209_v56  ;;  %vm2219_vm11 = vweird.f32 %v4669_v0  ;;  %vm2230_vm13 = vmor %vm2228_vm8, %vm2229_vm9 }
0x104f   : > { %v2224_v9 = vmul.f32 %v4667_v60, %v2223_v6  ;;  %vm2220_vm14 = vmor %vm2218_vm10, %vm2219_vm11  ;;  %3204 = vrot.lane.b32.xlu2 %v4404_v20, %s4905_s23 }
0x1050   : > { %v2214_v15 = vmul.f32 %v4669_v0, %v2213_v8 }
0x1051   : > { %v2225_v31 = vmul.f32 0.5, %v2224_v9 }
0x1052   : > { %v2215_v40 = vmul.f32 0.5, %v2214_v15 }
0x1053   : > { %v2226_v16 = vsub.f32 1.5, %v2225_v31 }
0x1054   : > { %v2216_v62 = vsub.f32 1.5, %v2215_v40 }
0x1055   : > { %v2227_v17 = vmul.f32 %v4667_v60, %v2226_v16 }
0x1056   : > { %v2217_v24 = vmul.f32 %v4669_v0, %v2216_v62 }
0x1057   : > { %v2231_v2 = vsel %vm2230_vm13, %v4667_v60, %v2227_v17  ;;  %3518 = vrot.lane.b32.xlu2 %v4405_v12, %s4907_s10  ;;  %v3363_v17 = vpop.permute.xlu0 %3362 }
0x1058   : > { %v2221_v27 = vsel %vm2220_vm14, %v4669_v0, %v2217_v24  ;;  %v2243_v28 = vmul.f32 %v2231_v2, %v5707_v43  ;;  %v5776_v43 = vld [vmem:[%s6209_s13] sm:$0xff] }
0x1059   : > { %v2242_v54 = vmul.f32 %v2221_v27, %v5694_v3  ;;  %v3044_v3 = vsel %vm1401_vm12, %v4405_v12, 0  ;;  %v3026_v49 = vsel %vm1401_vm12, %v5776_v43, 0  ;;  %v5832_v27 = vld [vmem:[%s6211_s11 + $0x10] sm:$0xff] }
0x105a   : > { %v2249_v13 = vmul.f32 %v5498_v4, %v2243_v28 }
0x105b   : > { %v2248_v11 = vmul.f32 %v5498_v4, %v2242_v54  ;;  %v3047_v4 = vsel %vm1401_vm12, %v4406_v10, 0  ;;  %v5837_v54 = vld [vmem:[%s6211_s11 + $0x8] sm:$0xff] }
0x105c   : > { %v2255_v37 = vadd.f32 %v5502_v61, %v2249_v13  ;;  %3049 = vmatpush.bf16.xpose.msra.mxu2 %v3047_v4  ;;  %v3388_v4 = vsel %vm1401_vm12, %v3363_v17, 0 }
0x105d   : > { %v2254_v32 = vadd.f32 %v5502_v61, %v2248_v11  ;;  %v3041_v61 = vsel %vm1401_vm12, %v4404_v20, 0 }
0x105f   : > { %v2946_v33 = vpack.c.bf16 %v2255_v37, %v2254_v32  ;;  %3360 = vrot.lane.b32.xlu2 %v4404_v20, %s4906_s0  ;;  %v5844_v37 = vld [vmem:[%s6211_s11] sm:$0xff] }
0x1064   : > { %3050 = vmatpush.bf16.xpose.msra.mxu2 %v3044_v3 }
0x1067   : > { %3200 = vrot.lane.b32.xlu2 %v4402_v34, %s4905_s23 }
0x106c   : > { %3051 = vmatpush.bf16.xpose.msra.mxu2 %v3041_v61 }
0x106f   : > { %3514 = vrot.lane.b32.xlu2 %v4403_v30, %s4907_s10 }
0x1074   : > { %3052 = vmatpush.bf16.xpose.msra.mxu2 %v3038_v35 }
0x1077   : > { %3198 = vrot.lane.b32.xlu2 %v5756_v41, %s4905_s23 }
0x107c   : > { %3053 = vmatpush.bf16.xpose.msra.mxu2 %v3035_v38 }
0x107f   : > { %3356 = vrot.lane.b32.xlu2 %v4402_v34, %s4906_s0 }
0x1081   : > { %v2874_v21 = vpop.permute.xlu2 %2873 }
0x1084   : > { %3054 = vmatpush.bf16.xpose.msra.mxu2 %v3032_v46 }
0x1087   : > { %3512 = vrot.lane.b32.xlu2 %v4402_v34, %s4907_s10 }
0x1089   : > { %v3209_v42 = vpop.permute.xlu2 %3208 }
0x108a   : > { %v3235_v44 = vsel %vm1401_vm12, %v3209_v42, 0 }
0x108c   : > { %3055 = vmatpush.bf16.xpose.msra.mxu2 %v3029_v47 }
0x108f   : > { %3196 = vrot.lane.b32.xlu2 %v5764_v45, %s4905_s23 }
0x1091   : > { %v3207_v39 = vpop.permute.xlu2 %3206 }
0x1092   : > { %v3232_v29 = vsel %vm1401_vm12, %v3207_v39, 0 }
0x1094   : > { %v2870_v18 = vpop.permute.xlu1 %2869  ;;  %3056 = vmatpush.bf16.xpose.msra.mxu2 %v3026_v49 }
0x1095   : > { %v2877_v22 = vsel %vm1867_vm0, %v2876_v36, %v2870_v18  ;;  %v5810_v36 = vld [vmem:[%s6210_s16 + $0x38] sm:$0xff]  ;;  %v5814_v18 = vld [vmem:[%s6211_s11 + $0x30] sm:$0xff] }
0x1096   : > { %v2878_v25 = vsel %vm1435_vm15, %v2877_v22, %v2874_v21  ;;  %3160 = vmatpush.bf16.msra.mxu3 %v5810_v36  ;;  %v5818_v21 = vld [vmem:[%s6211_s11 + $0x28] sm:$0xff]  ;;  %v3517_v22 = vpop.permute.xlu0 %3516 }
0x1097   : > { %v2879_v1 = vpack.c.bf16 %v2878_v25, %v2878_v25  ;;  %3354 = vrot.lane.b32.xlu2 %v5756_v41, %s4906_s0  ;;  %v3541_v24 = vsel %vm1401_vm12, %v3517_v22, 0  ;;  %v5823_v25 = vld [vmem:[%s6211_s11 + $0x20] sm:$0xff] }
0x1099   : > { %4259 = vmatmul.msk.bf16.vlgmr.msrb.gmra.mxu0 %vm1261_vm1, %v2879_v1  ;;  %v5773_v26 = vpop.permute.xlu2 %3364  ;;  %v5827_v1 = vld [vmem:[%s6211_s11 + $0x18] sm:$0xff] }
0x109a   : > { %3237 = vmatpush.bf16.xpose.msrb.mxu0 %v3235_v44  ;;  %3161 = vmatpush.bf16.msra.mxu3 %v5814_v18  ;;  %v3391_v30 = vsel %vm1401_vm12, %v5773_v26, 0 }
0x109c   : > { %v3203_v55 = vpop.permute.xlu1 %3202 }
0x109d   : > { %v3226_v56 = vsel %vm1401_vm12, %v3203_v55, 0 }
0x109e   : > { %3162 = vmatpush.bf16.msra.mxu3 %v5818_v21  ;;  %v3359_v61 = vpop.permute.xlu0 %3358 }
0x109f   : > { %3194 = vrot.lane.b32.xlu2 %v5776_v43, %s4905_s23  ;;  %v3382_v34 = vsel %vm1401_vm12, %v3359_v61, 0 }
0x10a1   : > { %v3521_v63 = vpop.permute.xlu2 %3520 }
0x10a2   : > { %3238 = vmatpush.bf16.xpose.msrb.mxu0 %v3232_v29  ;;  %v3547_v19 = vsel %vm1401_vm12, %v3521_v63, 0  ;;  %3163 = vmatpush.bf16.msra.mxu3 %v5823_v25 }
0x10a3   : > { %3549 = vmatpush.bf16.xpose.msrb.mxu2 %v3547_v19 }
0x10a6   : > { %3164 = vmatpush.bf16.msra.mxu3 %v5827_v1 }
0x10a7   : > { %3508 = vrot.lane.b32.xlu2 %v5764_v45, %s4907_s10 }
0x10a9   : > { %4268 = vmatmul.msk.bf16.vlgmr.msra.gmra.mxu0 %vm1261_vm1, %v2946_v33  ;;  %v3205_v48 = vpop.permute.xlu2 %3204 }
0x10aa   : > { %v3229_v50 = vsel %vm1401_vm12, %v3205_v48, 0  ;;  %3165 = vmatpush.bf16.msra.mxu3 %v5832_v27 }
0x10ab   : > { %3239 = vmatpush.bf16.xpose.msrb.mxu0 %v3229_v50 }
0x10ae   : > { %3166 = vmatpush.bf16.msra.mxu3 %v5837_v54 }
0x10b1   : > { %v3519_v14 = vpop.permute.xlu2 %3518 }
0x10b2   : > { %v3544_v23 = vsel %vm1401_vm12, %v3519_v14, 0  ;;  %3167 = vmatpush.bf16.msra.mxu3 %v5844_v37 }
0x10b3   : > { %3550 = vmatpush.bf16.xpose.msrb.mxu2 %v3544_v23  ;;  %3240 = vmatpush.bf16.xpose.msrb.mxu0 %v3226_v56 }
0x10b6   : > { %3393 = vmatpush.bf16.xpose.msrb.mxu3 %v3391_v30 }
0x10b9   : > { %v5791_v51 = vpop.permute.xlu2 %3360 }
0x10ba   : > { %v3385_v3 = vsel %vm1401_vm12, %v5791_v51, 0 }
0x10bb   : > { %3551 = vmatpush.bf16.xpose.msrb.mxu2 %v3541_v24 }
0x10be   : > { %3394 = vmatpush.bf16.xpose.msrb.mxu3 %v3388_v4 }
0x10c1   : > { %v3201_v5 = vpop.permute.xlu2 %3200 }
0x10c2   : > { %v3223_v59 = vsel %vm1401_vm12, %v3201_v5, 0 }
0x10c3   : > { %3241 = vmatpush.bf16.xpose.msrb.mxu0 %v3223_v59 }
0x10c6   : > { %3395 = vmatpush.bf16.xpose.msrb.mxu3 %v3385_v3 }
0x10c9   : > { %v3515_v60 = vpop.permute.xlu2 %3514 }
0x10ca   : > { %v3538_v2 = vsel %vm1401_vm12, %v3515_v60, 0 }
0x10cb   : > { %3552 = vmatpush.bf16.xpose.msrb.mxu2 %v3538_v2 }
0x10ce   : > { %3396 = vmatpush.bf16.xpose.msrb.mxu3 %v3382_v34 }
0x10d1   : > { %v3199_v8 = vpop.permute.xlu2 %3198 }
0x10d2   : > { %v3220_v9 = vsel %vm1401_vm12, %v3199_v8, 0 }
0x10d3   : > { %3242 = vmatpush.bf16.xpose.msrb.mxu0 %v3220_v9 }
0x10d9   : > { %v3357_v10 = vpop.permute.xlu2 %3356 }
0x10da   : > { %v3379_v35 = vsel %vm1401_vm12, %v3357_v10, 0 }
0x10db   : > { %3397 = vmatpush.bf16.xpose.msrb.mxu3 %v3379_v35 }
0x10e1   : > { %v3513_v12 = vpop.permute.xlu2 %3512 }
0x10e2   : > { %v3535_v13 = vsel %vm1401_vm12, %v3513_v12, 0 }
0x10e3   : > { %3553 = vmatpush.bf16.xpose.msrb.mxu2 %v3535_v13 }
0x10e9   : > { %v3197_v15 = vpop.permute.xlu2 %3196 }
0x10ea   : > { %v3217_v31 = vsel %vm1401_vm12, %v3197_v15, 0 }
0x10eb   : > { %3243 = vmatpush.bf16.xpose.msrb.mxu0 %v3217_v31 }
0x10f1   : > { %v3355_v40 = vpop.permute.xlu2 %3354 }
0x10f2   : > { %v3376_v38 = vsel %vm1401_vm12, %v3355_v40, 0 }
0x10f3   : > { %3398 = vmatpush.bf16.xpose.msrb.mxu3 %v3376_v38 }
0x10f9   : > { %v3195_v16 = vpop.permute.xlu2 %3194 }
0x10fa   : > { %v3214_v58 = vsel %vm1401_vm12, %v3195_v16, 0 }
0x10fb   : > { %3244 = vmatpush.bf16.xpose.msrb.mxu0 %v3214_v58 }
0x1101   : > { %v5806_v20 = vpop.permute.xlu2 %3508 }
0x1102   : > { %v3529_v23 = vsel %vm1401_vm12, %v5806_v20, 0 }
0x1116   : > { %v5789_v7 = vpop.f32.mrf.mxu0 }
0x111e   : > { %v2911_v53 = vpop.f32.mrf.mxu0 }
0x1126   : > { %v2975_v57 = vpop.f32.mrf.mxu0 }
0x112e   : > { %v2977_v0 = vpop.f32.mrf.mxu0 }
0x112f   : > { %v5795_v6 = vpack.c.bf16 %v2977_v0, %v2975_v57 }
0x1131   : > { %3192 = vrot.lane.b32.xlu2 %v5795_v6, %s4905_s23  ;;  %4301 = vmatmul.msk.bf16.vlgmr.msra.gmra.mxu2 %vm1401_vm12, %v5795_v6 }
0x1139   : > { %3348 = vrot.lane.b32.xlu2 %v5795_v6, %s4906_s0 }
0x118b   : > { %v3193_v62 = vpop.permute.xlu2 %3192 }
0x118c   : > { %4334 = vmatmul.msk.bf16.vlgmr.msrb.gmra.mxu0 %vm1401_vm12, %v3193_v62 }
0x11b4   : > { %v3058_v28 = vpop.f32.mrf.mxu2 }
0x11b5   : > { %v3063_v11 = vsel %vm2980_vm2, %v3058_v28, -1e+30 }
0x11b6   : > { %3065 = vmax.xlane.f32.xlu0 %v3063_v11 }
0x11bc   : > { %v3060_v32 = vpop.f32.mrf.mxu2 }
0x11bd   : > { %v3064_v33 = vsel %vm2980_vm2, %v3060_v32, -1e+30 }
0x11be   : > { %3067 = vmax.xlane.f32.xlu1 %v3064_v33 }
0x11ca   : > { %3352 = vrot.lane.b32.xlu0 %v5764_v45, %s4906_s0 }
0x11d2   : > { %3350 = vrot.lane.b32.xlu0 %v5776_v43, %s4906_s0 }
0x11d7   : > { %3510 = vrot.lane.b32.xlu1 %v5756_v41, %s4907_s10 }
0x1209   : > { %v3246_v42 = vpop.f32.mrf.mxu0 }
0x1211   : > { %v3248_v44 = vpop.f32.mrf.mxu0 }
0x1212   : > { %v5865_v45 = vsel %vm2980_vm2, %v3248_v44, -1e+30 }
0x1213   : > { %3255 = vmax.xlane.f32.xlu2 %v5865_v45 }
0x1229   : > { %v3066_v39 = vpop.xlane.xlu0 %3065 }
0x122a   : > { %v3069_v29 = vsub.f32 %v3063_v11, %v3066_v39 }
0x122c   : > { %v3071_v46 = vmul.f32 1.442695, %v3069_v29 }
0x122e   : > { %4670 = vpow2.f32 %v3071_v46 }
0x1231   : > { %v3068_v26 = vpop.xlane.xlu1 %3067 }
0x1232   : > { %v3070_v41 = vsub.f32 %v3064_v33, %v3068_v26  ;;  %v3349_v33 = vpop.permute.xlu2 %3348 }
0x1234   : > { %v4671_v47 = vpop.eup %4670  ;;  %v3073_v63 = vmul.f32 1.442695, %v3070_v41 }
0x1235   : > { %3075 = vadd.xlane.f32.xlu1 %v4671_v47 }
0x1236   : > { %4672 = vpow2.f32 %v3073_v63 }
0x123c   : > { %v4673_v19 = vpop.eup %4672  ;;  %v3353_v48 = vpop.permute.xlu0 %3352 }
0x123d   : > { %3077 = vadd.xlane.f32.xlu0 %v4673_v19  ;;  %v3373_v14 = vsel %vm1401_vm12, %v3353_v48, 0 }
0x123e   : > { %3399 = vmatpush.bf16.xpose.msrb.mxu3 %v3373_v14 }
0x1244   : > { %v3351_v51 = vpop.permute.xlu0 %3350 }
0x1245   : > { %v3370_v53 = vsel %vm1401_vm12, %v3351_v51, 0 }
0x1246   : > { %3400 = vmatpush.bf16.xpose.msrb.mxu3 %v3370_v53 }
0x1249   : > { %v3511_v49 = vpop.permute.xlu1 %3510 }
0x124a   : > { %v3532_v50 = vsel %vm1401_vm12, %v3511_v49, 0 }
0x124b   : > { %3554 = vmatpush.bf16.xpose.msrb.mxu2 %v3532_v50 }
0x124e   : > { %3506 = vrot.lane.b32.xlu1 %v5776_v43, %s4907_s10  ;;  %v3251_v43 = vsel %vm2980_vm2, %v3246_v42, -1e+30 }
0x1251   : > { %3504 = vrot.lane.b32.xlu0 %v5795_v6, %s4907_s10 }
0x1253   : > { %3555 = vmatpush.bf16.xpose.msrb.mxu2 %v3529_v23 }
0x1278   : > { %3253 = vmax.xlane.f32.xlu1 %v3251_v43 }
0x1286   : > { %v3256_v48 = vpop.xlane.xlu2 %3255 }
0x1287   : > { %v3258_v50 = vsub.f32 %v5865_v45, %v3256_v48 }
0x1289   : > { %v3261_v14 = vmul.f32 1.442695, %v3258_v50 }
0x1291   : > { %3314 = vrot.lane.b32.xlu1 %v5810_v36, %s4905_s23 }
0x1299   : > { %3468 = vrot.lane.b32.xlu1 %v5814_v18, %s4906_s0 }
0x12a8   : > { %v3076_v5 = vpop.xlane.xlu1 %3075 }
0x12a9   : > { %4674 = vrcp.f32 %v3076_v5  ;;  %v3090_v9 = vand.u32 2147483648, %v3076_v5  ;;  %vm3084_vm4 = vweird.f32 %v3076_v5  ;;  %v3088_v10 = vand.u32 2147483647, %v3076_v5 }
0x12ab   : > { %v3091_v58 = vor.u32 1.1754944e-38, %v3090_v9  ;;  %vm3089_vm7 = vcmp.eq.f32.partialorder %v3088_v10, 8.507059e+37 }
0x12af   : > { %v4675_v55 = vpop.eup %4674 }
0x12b0   : > { %v3080_v56 = vmul.f32 %v4675_v55, %v3076_v5  ;;  %v3078_v57 = vpop.xlane.xlu0 %3077  ;;  %vm3085_vm3 = vweird.f32 %v4675_v55 }
0x12b1   : > { %4676 = vrcp.f32 %v3078_v57  ;;  %vm3086_vm5 = vmor %vm3084_vm4, %vm3085_vm3  ;;  %v3105_v15 = vand.u32 2147483648, %v3078_v57  ;;  %v3103_v16 = vand.u32 2147483647, %v3078_v57  ;;  %vm3099_vm8 = vweird.f32 %v3078_v57 }
0x12b2   : > { %v3081_v59 = vsub.f32 1.0, %v3080_v56 }
0x12b3   : > { %v3106_v62 = vor.u32 1.1754944e-38, %v3105_v15  ;;  %vm3104_vm10 = vcmp.eq.f32.partialorder %v3103_v16, 8.507059e+37 }
0x12b4   : > { %v3082_v60 = vmul.f32 %v4675_v55, %v3081_v59 }
0x12b6   : > { %v3083_v6 = vadd.f32 %v4675_v55, %v3082_v60 }
0x12b7   : > { %v4677_v0 = vpop.eup %4676 }
0x12b8   : > { %v3095_v8 = vmul.f32 %v4677_v0, %v3078_v57  ;;  %v3087_v31 = vsel %vm3086_vm5, %v4675_v55, %v3083_v6  ;;  %vm3100_vm6 = vweird.f32 %v4677_v0 }
0x12b9   : > { %vm3101_vm9 = vmor %vm3099_vm8, %vm3100_vm6  ;;  %v3092_v17 = vsel %vm3089_vm7, %v3091_v58, %v3087_v31 }
0x12ba   : > { %v3096_v12 = vsub.f32 1.0, %v3095_v8  ;;  %v5884_v13 = vmul.f32 %v4671_v47, %v3092_v17 }
0x12bc   : > { %v3097_v40 = vmul.f32 %v4677_v0, %v3096_v12 }
0x12be   : > { %v3098_v20 = vadd.f32 %v4677_v0, %v3097_v40 }
0x12c0   : > { %v3102_v22 = vsel %vm3101_vm9, %v4677_v0, %v3098_v20  ;;  %v3507_v24 = vpop.permute.xlu1 %3506 }
0x12c1   : > { %v3526_v2 = vsel %vm1401_vm12, %v3507_v24, 0  ;;  %v3107_v28 = vsel %vm3104_vm10, %v3106_v62, %v3102_v22 }
0x12c2   : > { %3556 = vmatpush.bf16.xpose.msrb.mxu2 %v3526_v2  ;;  %v5886_v11 = vmul.f32 %v4673_v19, %v3107_v28 }
0x12c3   : > { %v3505_v32 = vpop.permute.xlu0 %3504 }
0x12c4   : > { %v3111_v30 = vpack.c.bf16 %v5886_v11, %v5884_v13 }
0x12c6   : > { %3168 = vmatmul.bf16.vlgmr.msra.gmra.mxu3 %v3111_v30 }
0x12c9   : > { %4336 = vmatmul.msk.bf16.vlgmr.msrb.gmra.mxu2 %vm1401_vm12, %v3505_v32 }
0x12d6   : > { %4335 = vmatmul.msk.bf16.vlgmr.msrb.gmra.mxu3 %vm1401_vm12, %v3349_v33 }
0x12eb   : > { %v3254_v4 = vpop.xlane.xlu1 %3253 }
0x12ec   : > { %v3257_v3 = vsub.f32 %v3251_v43, %v3254_v4 }
0x12ee   : > { %v3259_v61 = vmul.f32 1.442695, %v3257_v3 }
0x12f0   : > { %4678 = vpow2.f32 %v3259_v61 }
0x12f1   : > { %4680 = vpow2.f32 %v3261_v14 }
0x12f6   : > { %v5892_v34 = vpop.eup %4678 }
0x12f7   : > { %3263 = vadd.xlane.f32.xlu1 %v5892_v34 }
0x1303   : > { %v3315_v35 = vpop.permute.xlu1 %3314 }
0x1304   : > { %3324 = vmatpush.bf16.msra.mxu1 %v3315_v35 }
0x130b   : > { %v5937_v23 = vpop.permute.xlu1 %3468 }
0x1349   : > { %v3169_v38 = vpop.f32.mrf.mxu3 }
0x134a   : > { %v3174_v29 = vsel %vm1401_vm12, %v3169_v38, 0.0 }
0x134c   : > { %v3558_v42 = vpop.f32.mrf.mxu2 }
0x134d   : > { %v3563_v44 = vsel %vm2980_vm2, %v3558_v42, -1e+30 }
0x134e   : > { %3565 = vmax.xlane.f32.xlu2 %v3563_v44 }
0x1351   : > { %v3171_v39 = vpop.f32.mrf.mxu3 }
0x1352   : > { %v3175_v46 = vsel %vm1401_vm12, %v3171_v39, 0.0 }
0x1353   : > { %v5899_v26 = vadd.f32 %v3175_v46, %v3174_v29 }
0x1354   : > { %v3560_v41 = vpop.f32.mrf.mxu2 }
0x1355   : > { %v3564_v47 = vsel %vm2980_vm2, %v3560_v41, -1e+30 }
0x1356   : > { %3567 = vmax.xlane.f32.xlu0 %v3564_v47 }
0x1359   : > { %v3402_v63 = vpop.f32.mrf.mxu3 }
0x1361   : > { %v3404_v19 = vpop.f32.mrf.mxu3 }
0x1362   : > { %v3408_v49 = vsel %vm2980_vm2, %v3404_v19, -1e+30 }
0x1363   : > { %3411 = vmax.xlane.f32.xlu1 %v3408_v49 }
0x1366   : > { %3312 = vrot.lane.b32.xlu2 %v5814_v18, %s4905_s23 }
0x136a   : > { %3310 = vrot.lane.b32.xlu0 %v5818_v21, %s4905_s23  ;;  %v3264_v57 = vpop.xlane.xlu1 %3263 }
0x136b   : > { %v3278_v28 = vand.u32 2147483648, %v3264_v57  ;;  %vm3272_vm13 = vweird.f32 %v3264_v57 }
0x136d   : > { %v3279_v61 = vor.u32 1.1754944e-38, %v3278_v28 }
0x136e   : > { %3624 = vrot.lane.b32.xlu2 %v5814_v18, %s4907_s10  ;;  %v5924_v18 = vpop.eup %4680 }
0x1372   : > { %3308 = vrot.lane.b32.xlu0 %v5823_v25, %s4905_s23 }
0x137a   : > { %3306 = vrot.lane.b32.xlu0 %v5827_v1, %s4905_s23 }
0x137c   : > { %3622 = vrot.lane.b32.xlu1 %v5818_v21, %s4907_s10 }
0x1382   : > { %3470 = vrot.lane.b32.xlu0 %v5810_v36, %s4906_s0 }
0x138a   : > { %3626 = vrot.lane.b32.xlu0 %v5810_v36, %s4907_s10 }
0x1392   : > { %3304 = vrot.lane.b32.xlu0 %v5832_v27, %s4905_s23 }
0x1397   : > { %3265 = vadd.xlane.f32.xlu2 %v5924_v18 }
0x139a   : > { %3302 = vrot.lane.b32.xlu0 %v5837_v54, %s4905_s23 }
0x13a2   : > { %3466 = vrot.lane.b32.xlu0 %v5818_v21, %s4906_s0  ;;  %v5941_v21 = vsel %vm2980_vm2, %v3402_v63, -1e+30 }
0x13af   : > { %3300 = vrot.lane.b32.xlu2 %v5844_v37, %s4905_s23  ;;  %s6212_s23 = sld [smem:[#allocation24_spill]] }
0x13b7   : > { %3618 = vrot.lane.b32.xlu2 %v5827_v1, %s4907_s10 }
0x13bf   : > { %3616 = vrot.lane.b32.xlu2 %v5832_v27, %s4907_s10 }
0x13c1   : > { %v3566_v36 = vpop.xlane.xlu2 %3565 }
0x13c2   : > { %v3569_v45 = vsub.f32 %v3563_v44, %v3566_v36 }
0x13c4   : > { %v3571_v51 = vmul.f32 1.442695, %v3569_v45 }
0x13c6   : > { %4682 = vpow2.f32 %v3571_v51 }
0x13c9   : > { %v3568_v53 = vpop.xlane.xlu0 %3567  ;;  %v3313_v43 = vpop.permute.xlu2 %3312 }
0x13ca   : > { %v3570_v5 = vsub.f32 %v3564_v47, %v3568_v53  ;;  %3325 = vmatpush.bf16.msra.mxu1 %v3313_v43 }
0x13cc   : > { %v5943_v55 = vpop.eup %4682  ;;  %v3573_v56 = vmul.f32 1.442695, %v3570_v5  ;;  %3409 = vmax.xlane.f32.xlu0 %v5941_v21 }
0x13cd   : > { %3575 = vadd.xlane.f32.xlu1 %v5943_v55 }
0x13ce   : > { %4684 = vpow2.f32 %v3573_v56 }
0x13d1   : > { %v3625_v31 = vpop.permute.xlu2 %3624 }
0x13d4   : > { %v5947_v59 = vpop.eup %4684 }
0x13d5   : > { %3577 = vadd.xlane.f32.xlu0 %v5947_v59 }
0x13d6   : > { %v3412_v60 = vpop.xlane.xlu1 %3411 }
0x13d7   : > { %v3414_v0 = vsub.f32 %v3408_v49, %v3412_v60 }
0x13d9   : > { %v3417_v8 = vmul.f32 1.442695, %v3414_v0 }
0x13db   : > { %4686 = vpow2.f32 %v3417_v8 }
0x13dc   : > { %v3311_v6 = vpop.permute.xlu0 %3310  ;;  %4688 = vrcp.f32 %v3264_v57 }
0x13dd   : > { %3326 = vmatpush.bf16.msra.mxu1 %v3311_v6 }
0x13e1   : > { %v5952_v9 = vpop.eup %4686 }
0x13e4   : > { %v3309_v52 = vpop.permute.xlu0 %3308 }
0x13e5   : > { %3327 = vmatpush.bf16.msra.mxu1 %v3309_v52 }
0x13e6   : > { %3620 = vrot.lane.b32.xlu1 %v5823_v25, %s4907_s10 }
0x13e8   : > { %3421 = vadd.xlane.f32.xlu2 %v5952_v9 }
0x13e9   : > { %3464 = vrot.lane.b32.xlu0 %v5823_v25, %s4906_s0  ;;  %v4689_v25 = vpop.eup %4688 }
0x13ea   : > { %vm3273_vm11 = vweird.f32 %v4689_v25 }
0x13eb   : > { %vm3274_vm14 = vmor %vm3272_vm13, %vm3273_vm11 }
0x13ec   : > { %v3307_v10 = vpop.permute.xlu0 %3306 }
0x13ed   : > { %3328 = vmatpush.bf16.msra.mxu1 %v3307_v10 }
0x13ee   : > { %3458 = vrot.lane.b32.xlu1 %v5837_v54, %s4906_s0  ;;  %v3623_v16 = vpop.permute.xlu1 %3622 }
0x13f1   : > { %3462 = vrot.lane.b32.xlu0 %v5827_v1, %s4906_s0  ;;  %v3268_v1 = vmul.f32 %v4689_v25, %v3264_v57 }
0x13f3   : > { %v3269_v58 = vsub.f32 1.0, %v3268_v1 }
0x13f4   : > { %v3471_v12 = vpop.permute.xlu0 %3470 }
0x13f6   : > { %3612 = vrot.lane.b32.xlu1 %v5844_v37, %s4907_s10 }
0x13f9   : > { %3460 = vrot.lane.b32.xlu0 %v5832_v27, %s4906_s0  ;;  %v3270_v27 = vmul.f32 %v4689_v25, %v3269_v58 }
0x13fb   : > { %v3271_v22 = vadd.f32 %v4689_v25, %v3270_v27 }
0x13fc   : > { %v3627_v15 = vpop.permute.xlu0 %3626 }
0x13fd   : > { %3636 = vmatpush.bf16.msra.mxu0 %v3627_v15  ;;  %v3275_v33 = vsel %vm3274_vm14, %v4689_v25, %v3271_v22 }
0x1400   : > { %3456 = vrot.lane.b32.xlu2 %v5844_v37, %s4906_s0  ;;  %v3276_v37 = vand.u32 2147483647, %v3264_v57  ;;  %s6214_s0 = smov 16  }
0x1401   : > { %3637 = vmatpush.bf16.msra.mxu0 %v3625_v31 }
0x1402   : > { %vm3277_vm3 = vcmp.eq.f32.partialorder %v3276_v37, 8.507059e+37 }
0x1403   : > { %v3280_v42 = vsel %vm3277_vm3, %v3279_v61, %v3275_v33 }
0x1404   : > { %v3305_v40 = vpop.permute.xlu0 %3304  ;;  %v5969_v46 = vmul.f32 %v5892_v34, %v3280_v42 }
0x1405   : > { %3329 = vmatpush.bf16.msra.mxu1 %v3305_v40  ;;  %3638 = vmatpush.bf16.msra.mxu0 %v3623_v16 }
0x140a   : > { %v3266_v20 = vpop.xlane.xlu2 %3265 }
0x140b   : > { %4690 = vrcp.f32 %v3266_v20  ;;  %v3293_v32 = vand.u32 2147483648, %v3266_v20  ;;  %v3291_v3 = vand.u32 2147483647, %v3266_v20  ;;  %vm3287_vm4 = vweird.f32 %v3266_v20 }
0x140c   : > { %v3303_v62 = vpop.permute.xlu0 %3302 }
0x140d   : > { %3330 = vmatpush.bf16.msra.mxu1 %v3303_v62  ;;  %v3294_v38 = vor.u32 1.1754944e-38, %v3293_v32  ;;  %vm3292_vm6 = vcmp.eq.f32.partialorder %v3291_v3, 8.507059e+37 }
0x1411   : > { %v4691_v17 = vpop.eup %4690 }
0x1412   : > { %v3283_v24 = vmul.f32 %v4691_v17, %v3266_v20  ;;  %v3301_v2 = vpop.permute.xlu2 %3300  ;;  %vm3288_vm2 = vweird.f32 %v4691_v17 }
0x1413   : > { %3331 = vmatpush.bf16.msra.mxu1 %v3301_v2  ;;  %vm3289_vm5 = vmor %vm3287_vm4, %vm3288_vm2 }
0x1414   : > { %v3284_v30 = vsub.f32 1.0, %v3283_v24  ;;  %v3467_v39 = vpop.permute.xlu0 %3466 }
0x1416   : > { %v3285_v4 = vmul.f32 %v4691_v17, %v3284_v30 }
0x1417   : > { %3480 = vmatpush.bf16.msrb.mxu1 %v3471_v12 }
0x1418   : > { %v3286_v35 = vadd.f32 %v4691_v17, %v3285_v4 }
0x141a   : > { %v3290_v44 = vsel %vm3289_vm5, %v4691_v17, %v3286_v35  ;;  %v3619_v14 = vpop.permute.xlu2 %3618 }
0x141b   : > { %3481 = vmatpush.bf16.msrb.mxu1 %v5937_v23  ;;  %v3295_v29 = vsel %vm3292_vm6, %v3294_v38, %v3290_v44  ;;  %v4911_v38 = vmov 16.0  }
0x141c   : > { %v5972_v41 = vmul.f32 %v5924_v18, %v3295_v29 }
0x141e   : > { %v3299_v47 = vpack.c.bf16 %v5972_v41, %v5969_v46  ;;  %v3298_v33 = vadd.f32 %v5972_v41, %v5886_v11 }
0x141f   : > { %3482 = vmatpush.bf16.msrb.mxu1 %v3467_v39 }
0x1420   : > { %3332 = vmatmul.bf16.vlgmr.msra.gmra.mxu1 %v3299_v47 }
0x1422   : > { %v3617_v5 = vpop.permute.xlu2 %3616 }
0x143f   : > { %v3410_v63 = vpop.xlane.xlu0 %3409 }
0x1440   : > { %v3413_v19 = vsub.f32 %v5941_v21, %v3410_v63  ;;  %v3576_v49 = vpop.xlane.xlu1 %3575 }
0x1441   : > { %4692 = vrcp.f32 %v3576_v49  ;;  %v3590_v21 = vand.u32 2147483648, %v3576_v49  ;;  %vm3584_vm8 = vweird.f32 %v3576_v49  ;;  %v3588_v57 = vand.u32 2147483647, %v3576_v49 }
0x1442   : > { %v3415_v48 = vmul.f32 1.442695, %v3413_v19 }
0x1443   : > { %v3591_v52 = vor.u32 1.1754944e-38, %v3590_v21  ;;  %vm3589_vm13 = vcmp.eq.f32.partialorder %v3588_v57, 8.507059e+37 }
0x1444   : > { %4694 = vpow2.f32 %v3415_v48 }
0x1447   : > { %v4693_v50 = vpop.eup %4692 }
0x1448   : > { %v3580_v36 = vmul.f32 %v4693_v50, %v3576_v49  ;;  %v3578_v45 = vpop.xlane.xlu0 %3577  ;;  %vm3585_vm7 = vweird.f32 %v4693_v50 }
0x1449   : > { %4696 = vrcp.f32 %v3578_v45  ;;  %v3605_v60 = vand.u32 2147483648, %v3578_v45  ;;  %vm3586_vm9 = vmor %vm3584_vm8, %vm3585_vm7  ;;  %v3603_v6 = vand.u32 2147483647, %v3578_v45  ;;  %vm3599_vm11 = vweird.f32 %v3578_v45 }
0x144a   : > { %v5977_v34 = vpop.eup %4694  ;;  %v3581_v18 = vsub.f32 1.0, %v3580_v36 }
0x144b   : > { %3419 = vadd.xlane.f32.xlu0 %v5977_v34  ;;  %v3606_v12 = vor.u32 1.1754944e-38, %v3605_v60  ;;  %vm3604_vm2 = vcmp.eq.f32.partialorder %v3603_v6, 8.507059e+37 }
0x144c   : > { %v3582_v23 = vmul.f32 %v4693_v50, %v3581_v18 }
0x144e   : > { %v3583_v43 = vadd.f32 %v4693_v50, %v3582_v23 }
0x144f   : > { %v4697_v51 = vpop.eup %4696 }
0x1450   : > { %v3595_v53 = vmul.f32 %v4697_v51, %v3578_v45  ;;  %vm3600_vm10 = vweird.f32 %v4697_v51  ;;  %v3587_v8 = vsel %vm3586_vm9, %v4693_v50, %v3583_v43 }
0x1451   : > { %vm3601_vm14 = vmor %vm3599_vm11, %vm3600_vm10  ;;  %v3592_v25 = vsel %vm3589_vm13, %v3591_v52, %v3587_v8 }
0x1452   : > { %v3596_v56 = vsub.f32 1.0, %v3595_v53  ;;  %v5984_v20 = vmul.f32 %v5943_v55, %v3592_v25 }
0x1454   : > { %v3597_v0 = vmul.f32 %v4697_v51, %v3596_v56 }
0x1456   : > { %v3598_v10 = vadd.f32 %v4697_v51, %v3597_v0 }
0x1458   : > { %v3602_v15 = vsel %vm3601_vm14, %v4697_v51, %v3598_v10  ;;  %v3621_v31 = vpop.permute.xlu1 %3620 }
0x1459   : > { %3639 = vmatpush.bf16.msra.mxu0 %v3621_v31  ;;  %v3607_v40 = vsel %vm3604_vm2, %v3606_v12, %v3602_v15  ;;  %v3297_v12 = vadd.f32 %v5969_v46, %v5884_v13 }
0x145a   : > { %v5981_v16 = vmul.f32 %v5947_v59, %v3607_v40 }
0x145b   : > { %v3422_v1 = vpop.xlane.xlu2 %3421  ;;  %v3465_v58 = vpop.permute.xlu0 %3464 }
0x145c   : > { %4698 = vrcp.f32 %v3422_v1  ;;  %3483 = vmatpush.bf16.msrb.mxu1 %v3465_v58  ;;  %v3611_v62 = vpack.c.bf16 %v5981_v16, %v5984_v20  ;;  %v3449_v24 = vand.u32 2147483648, %v3422_v1  ;;  %v3447_v55 = vand.u32 2147483647, %v3422_v1 }
0x145d   : > { %3640 = vmatpush.bf16.msra.mxu0 %v3619_v14  ;;  %vm3443_vm4 = vweird.f32 %v3422_v1  ;;  %4700 = vrcp.f32 %v4911_v38 }
0x145e   : > { %v3450_v37 = vor.u32 1.1754944e-38, %v3449_v24  ;;  %vm3448_vm6 = vcmp.eq.f32.partialorder %v3447_v55, 8.507059e+37 }
0x145f   : > { %3614 = vrot.lane.b32.xlu0 %v5837_v54, %s4907_s10  ;;  %s6213_s10 = smov %s6212_s23 }
0x1460   : > { %v3459_v50 = vpop.permute.xlu1 %3458 }
0x1461   : > { %3641 = vmatpush.bf16.msra.mxu0 %v3617_v5 }
0x1462   : > { %v4699_v27 = vpop.eup %4698 }
0x1463   : > { %v3439_v17 = vmul.f32 %v4699_v27, %v3422_v1  ;;  %v3463_v22 = vpop.permute.xlu0 %3462  ;;  %vm3444_vm3 = vweird.f32 %v4699_v27  ;;  %v4701_v44 = vpop.eup %4700 }
0x1464   : > { %3484 = vmatpush.bf16.msrb.mxu1 %v3463_v22  ;;  %vm3445_vm5 = vmor %vm3443_vm4, %vm3444_vm3  ;;  %v3184_v39 = vmul.f32 16.0, %v4701_v44  ;;  %v3457_v36 = vpop.permute.xlu2 %3456  ;;  %vm3188_vm7 = vweird.f32 %v4701_v44 }
0x1465   : > { %v3440_v59 = vsub.f32 1.0, %v3439_v17 }
0x1466   : > { %v3185_v49 = vsub.f32 1.0, %v3184_v39  ;;  %v4417_v39 = vld [vmem:[%s6213_s10] sm:$0xff] }
0x1467   : > { %v3441_v2 = vmul.f32 %v4699_v27, %v3440_v59 }
0x1468   : > { %v3613_v1 = vpop.permute.xlu1 %3612 }
0x1469   : > { %v3442_v28 = vadd.f32 %v4699_v27, %v3441_v2 }
0x146b   : > { %v3446_v30 = vsel %vm3445_vm5, %v4699_v27, %v3442_v28  ;;  %v3461_v32 = vpop.permute.xlu0 %3460 }
0x146c   : > { %3485 = vmatpush.bf16.msrb.mxu1 %v3461_v32  ;;  %v3451_v54 = vsel %vm3448_vm6, %v3450_v37, %v3446_v30 }
0x146d   : > { %v3452_v4 = vmul.f32 %v5952_v9, %v3451_v54  ;;  %v3186_v9 = vmul.f32 %v4701_v44, %v3185_v49 }
0x146f   : > { %v3454_v3 = vadd.f32 %v3452_v4, %v3298_v33  ;;  %v3187_v45 = vadd.f32 %v4701_v44, %v3186_v9 }
0x1470   : > { %3486 = vmatpush.bf16.msrb.mxu1 %v3459_v50 }
0x1471   : > { %v3610_v61 = vadd.f32 %v5981_v16, %v3454_v3  ;;  %v5997_v51 = vsel %vm3188_vm7, %v4701_v44, %v3187_v45  ;;  %v4418_v44 = vld [vmem:[%s6212_s23 + $0x8] sm:$0xff] }
0x1473   : > { %v3710_v35 = vmul.f32 0.25, %v3610_v61 }
0x1474   : > { %3487 = vmatpush.bf16.msrb.mxu1 %v3457_v36 }
0x1475   : > { %3715 = vst [vmem:[%s5191_s18 + $0x8] sm:$0xff] %v3710_v35 }
0x1478   : > { %3702 = vmatpush.bf16.msra.mxu1 %v4418_v44 }
0x147c   : > { %3703 = vmatpush.bf16.msra.mxu1 %v4417_v39 }
0x149d   : > { %v3333_v42 = vpop.f32.mrf.mxu1 }
0x149e   : > { %v3338_v47 = vsel %vm1401_vm12, %v3333_v42, 0.0 }
0x14a5   : > { %v3335_v29 = vpop.f32.mrf.mxu1 }
0x14a6   : > { %v3339_v63 = vsel %vm1401_vm12, %v3335_v29, 0.0  ;;  %v3177_v29 = vrot.slane %v5899_v26, 4 }
0x14a7   : > { %v3340_v19 = vadd.f32 %v3339_v63, %v3338_v47 }
0x14a8   : > { %v3178_v47 = vadd.f32 %v3177_v29, %v5899_v26 }
0x14a9   : > { %v3341_v11 = vrot.slane %v3340_v19, 4 }
0x14aa   : > { %v3179_v63 = vrot.slane %v3178_v47, 2 }
0x14ab   : > { %v3342_v41 = vadd.f32 %v3341_v11, %v3340_v19 }
0x14ac   : > { %v3180_v19 = vadd.f32 %v3179_v63, %v3178_v47 }
0x14ad   : > { %v3343_v48 = vrot.slane %v3342_v41, 2 }
0x14ae   : > { %v3181_v49 = vrot.slane %v3180_v19, 1 }
0x14af   : > { %v3344_v14 = vadd.f32 %v3343_v48, %v3342_v41 }
0x14b0   : > { %v3182_v11 = vadd.f32 %v3181_v49, %v3180_v19 }
0x14b1   : > { %v3345_v18 = vrot.slane %v3344_v14, 1 }
0x14b2   : > { %v3190_v9 = vmul.f32 %v5997_v51, %v3182_v11 }
0x14b3   : > { %v3346_v23 = vadd.f32 %v3345_v18, %v3344_v14 }
0x14b5   : > { %v3347_v53 = vmul.f32 %v3346_v23, %v5997_v51  ;;  %v3680_v23 = vld [vmem:[%s6216_s26] sm:$0x1] }
0x14b7   : > { %3661 = vrot.lane.b32.xlu0 %v3347_v53, %s4908_s15  ;;  %s6215_s15 = sld [smem:[#allocation20_spill]] }
0x14bd   : > { %v2884_v26 = vld [vmem:[%s6215_s15] sm:$0x1] }
0x14be   : > { %v3420_v43 = vpop.xlane.xlu0 %3419 }
0x14bf   : > { %4702 = vrcp.f32 %v3420_v43  ;;  %v3434_v57 = vand.u32 2147483648, %v3420_v43  ;;  %v3432_v0 = vand.u32 2147483647, %v3420_v43  ;;  %vm3428_vm9 = vweird.f32 %v3420_v43 }
0x14c1   : > { %v3435_v8 = vor.u32 1.1754944e-38, %v3434_v57  ;;  %vm3433_vm11 = vcmp.eq.f32.partialorder %v3432_v0, 8.507059e+37 }
0x14c5   : > { %v4703_v5 = vpop.eup %4702 }
0x14c6   : > { %v3424_v21 = vmul.f32 %v4703_v5, %v3420_v43  ;;  %vm3429_vm8 = vweird.f32 %v4703_v5  ;;  %v2910_v43 = vadd.f32 %v5789_v7, %v2884_v26 }
0x14c7   : > { %vm3430_vm10 = vmor %vm3428_vm9, %vm3429_vm8 }
0x14c8   : > { %v3425_v56 = vsub.f32 1.0, %v3424_v21 }
0x14ca   : > { %v3426_v60 = vmul.f32 %v4703_v5, %v3425_v56 }
0x14cc   : > { %v3427_v6 = vadd.f32 %v4703_v5, %v3426_v60 }
0x14ce   : > { %v3431_v52 = vsel %vm3430_vm10, %v4703_v5, %v3427_v6 }
0x14cf   : > { %v3436_v10 = vsel %vm3433_vm11, %v3435_v8, %v3431_v52 }
0x14d0   : > { %v3437_v15 = vmul.f32 %v5977_v34, %v3436_v10 }
0x14d1   : > { %v3615_v31 = vpop.permute.xlu0 %3614 }
0x14d2   : > { %3642 = vmatpush.bf16.msra.mxu0 %v3615_v31  ;;  %v3453_v25 = vadd.f32 %v3437_v15, %v3297_v12  ;;  %v3455_v40 = vpack.c.bf16 %v3452_v4, %v3437_v15 }
0x14d4   : > { %3488 = vmatmul.bf16.vlgmr.msrb.gmra.mxu1 %v3455_v40  ;;  %v3609_v58 = vadd.f32 %v5984_v20, %v3453_v25 }
0x14d6   : > { %3643 = vmatpush.bf16.msra.mxu0 %v3613_v1  ;;  %v3709_v27 = vmul.f32 0.25, %v3609_v58 }
0x14d8   : > { %3714 = vst [vmem:[%s5191_s18] sm:$0xff] %v3709_v27 }
0x14d9   : > { %3644 = vmatmul.bf16.vlgmr.msra.gmra.mxu0 %v3611_v62 }
0x1529   : > { %v3662_v41 = vpop.permute.xlu0 %3661 }
0x152a   : > { %v3672_v50 = vsel %vm1401_vm12, %v3190_v9, %v3662_v41 }
0x1551   : > { %v3489_v17 = vpop.f32.mrf.mxu1 }
0x1552   : > { %v3494_v46 = vsel %vm1401_vm12, %v3489_v17, 0.0 }
0x1556   : > { %v3645_v22 = vpop.f32.mrf.mxu0 }
0x1557   : > { %v3650_v55 = vsel %vm1401_vm12, %v3645_v22, 0.0 }
0x1559   : > { %v3491_v13 = vpop.f32.mrf.mxu1 }
0x155a   : > { %v3495_v34 = vsel %vm1401_vm12, %v3491_v13, 0.0 }
0x155b   : > { %v3496_v59 = vadd.f32 %v3495_v34, %v3494_v46 }
0x155d   : > { %v3497_v24 = vrot.slane %v3496_v59, 4 }
0x155e   : > { %v3647_v2 = vpop.f32.mrf.mxu0 }
0x155f   : > { %v3498_v28 = vadd.f32 %v3497_v24, %v3496_v59  ;;  %v3651_v37 = vsel %vm1401_vm12, %v3647_v2, 0.0 }
0x1560   : > { %v3652_v30 = vadd.f32 %v3651_v37, %v3650_v55 }
0x1561   : > { %v3499_v32 = vrot.slane %v3498_v28, 2 }
0x1562   : > { %v3653_v16 = vrot.slane %v3652_v30, 4 }
0x1563   : > { %v3500_v20 = vadd.f32 %v3499_v32, %v3498_v28 }
0x1564   : > { %v3654_v62 = vadd.f32 %v3653_v16, %v3652_v30 }
0x1565   : > { %v3501_v54 = vrot.slane %v3500_v20, 1 }
0x1566   : > { %v3655_v33 = vrot.slane %v3654_v62, 2 }
0x1567   : > { %v3502_v4 = vadd.f32 %v3501_v54, %v3500_v20 }
0x1568   : > { %v3656_v3 = vadd.f32 %v3655_v33, %v3654_v62 }
0x1569   : > { %v3503_v61 = vmul.f32 %v3502_v4, %v5997_v51 }
0x156a   : > { %v3657_v35 = vrot.slane %v3656_v3, 1 }
0x156b   : > { %3665 = vrot.lane.b32.xlu2 %v3503_v61, %s6214_s0 }
0x156c   : > { %v3658_v38 = vadd.f32 %v3657_v35, %v3656_v3 }
0x156e   : > { %v3659_v42 = vmul.f32 %v3658_v38, %v5997_v51 }
0x1570   : > { %3669 = vrot.lane.b32.xlu1 %v3659_v42, %s4910_s22 }
0x15c5   : > { %v3666_v48 = vpop.permute.xlu2 %3665 }
0x15c6   : > { %v3673_v14 = vsel %vm1867_vm0, %v3672_v50, %v3666_v48 }
0x15e2   : > { %v3670_v36 = vpop.permute.xlu1 %3669 }
0x15e3   : > { %v3674_v45 = vsel %vm1435_vm15, %v3673_v14, %v3670_v36 }
0x15e4   : > { %v3675_v18 = vpack.c.bf16 %v3674_v45, %v3674_v45 }
0x15e6   : > { %4345 = vmatmul.msk.bf16.vlgmr.msra.gmra.mxu1 %vm1261_vm1, %v3675_v18 }
0x1663   : > { %v3705_v53 = vpop.f32.mrf.mxu1 }
0x1664   : > { %v3706_v5 = vadd.f32 %v3705_v53, %v3680_v23 }
0x1666   : > { %v3711_v21 = vadd.f32 %v3706_v5, %v2910_v43 }
0x1668   : > { %3712 = vst [vmem:[%s6139_s28] sm:$0x1] %v3711_v21 }
0x166b   : > { %v3707_v51 = vpop.f32.mrf.mxu1 }
0x166c PF: > { %s6217_s22 = sld [smem:[#allocation39_spill]]  ;;  %s6223_s26 = scalar_lea.vmem [#allocation5], %s5147_s2 }
0x166d   : > { %s6219_s23 = sld [smem:[#allocation36_spill]]  ;;  %s3749_s5 = sshll.u32 %s6223_s26, 4  ;;  %s3750_s5 = int_to_ptr.vmem [resolvable:$true] %s3749_s5 }
0x166e   : > { %s6220_s0 = sld [smem:[#allocation30_spill]] }
0x1672   : > { %s6218_s16 = sadd.s32 4294967295, %s6217_s22  }
0x1673   : > { %s6033_s4 = sand.u32 1, %s6218_s16  }
0x1674   : > { %s6221_s1 = smov %s6220_s0  ;;  %s3747_s15 = scalar_lea.hbm %s6220_s0, %s6219_s23 }
0x1675   : > { %s3751_s6 = sshll.u32 %s3747_s15, 4  ;;  %s3721_s28 = scalar_lea.sflag [#allocation6], %s6033_s4  ;;  %s3752_s6 = int_to_ptr.hbm [resolvable:$true] %s3751_s6 }
0x1676   : > { %s4718_s7 = sshra.s32 %s3752_s6, 4  ;;  %s4724_s22 = scalar_lea.hbm %s6221_s1, 2  ;;  %s4719_s7 = int_to_ptr.hbm [resolvable:$true] %s4718_s7 }
0x1677   : > { %s4720_s8 = scalar_lea.hbm %s4719_s7, 1  ;;  %p4725_p6 = scmp.lt.s32.totalorder %s4719_s7, %s6221_s1 }
0x1678   : > { %p4721_p2 = scmp.ne.s32.totalorder %s4719_s7, %s4720_s8  ;;  %p4726_p7 = scmp.lt.s32.totalorder %s4724_s22, %s4720_s8 }
0x167a   : > { %p4722_p4 = pnand %p4721_p2, %p5124_p3  ;;  %p4727_p8 = por %p4726_p7, %p4725_p6 }
0x167c   : > { %p4723_p5 = pneg %p4722_p4 }
0x167e   : > { %p4728_p10 = pnand %p4727_p8, %p4723_p5 }
0x1680   : > { %4731 = shalt.err (!%p4728_p10)
}
0x1681   : > { %s6224_s16 = sld [smem:[#allocation29_spill]]  ;;  %s6226_s15 = scalar_lea.vmem [#allocation3], %s5147_s2 }
0x1682   : > { %4421 = dma.vmem_to_hbm [thread:$0]  (%p5124_p3), %s3750_s5, 16, %s3752_s6, %s3721_s28  }
0x1683   : > { %s3736_s7 = sshll.u32 %s6226_s15, 4  ;;  %s4419_s26 = sshll.u32 %s6219_s23, 4  ;;  %s3737_s7 = int_to_ptr.vmem [resolvable:$true] %s3736_s7 }
0x1684   : > { %s3717_s22 = scalar_lea.sflag [#allocation4], %s5147_s2 }
0x1687   : > { %s6225_s9 = smov %s6224_s16  ;;  %s3734_s0 = scalar_lea.hbm %s6224_s16, %s6219_s23 }
0x1688   : > { %s3738_s8 = sshll.u32 %s3734_s0, 4  ;;  %s4752_s11 = scalar_lea.hbm %s6225_s9, 2  ;;  %s3739_s8 = int_to_ptr.hbm [resolvable:$true] %s3738_s8 }
0x1689   : > { %s4746_s1 = sshra.s32 %s3739_s8, 4  ;;  %s4747_s1 = int_to_ptr.hbm [resolvable:$true] %s4746_s1 }
0x168a   : > { %s4748_s10 = scalar_lea.hbm %s4747_s1, 1  ;;  %p4753_p0 = scmp.lt.s32.totalorder %s4747_s1, %s6225_s9 }
0x168b   : > { %p4749_p11 = scmp.ne.s32.totalorder %s4747_s1, %s4748_s10  ;;  %p4754_p1 = scmp.lt.s32.totalorder %s4752_s11, %s4748_s10 }
0x168d   : > { %p4750_p12 = pnand %p4749_p11, %p5124_p3  ;;  %p4755_p2 = por %p4754_p1, %p4753_p0 }
0x168f   : > { %p4751_p13 = pneg %p4750_p12 }
0x1691   : > { %p4756_p4 = pnand %p4755_p2, %p4751_p13 }
0x1693   : > { %4759 = shalt.err (!%p4756_p4)
}
0x1694   : > { %s6227_s6 = sld [smem:[#allocation31_spill]]  ;;  %s3763_s5 = sshll.u32 %s5191_s18, 4  ;;  %s3764_s5 = int_to_ptr.vmem [resolvable:$true] %s3763_s5 }
0x1695   : > { %4420 = dma.vmem_to_hbm [thread:$0]  (%p5124_p3), %s3737_s7, 16, %s3739_s8, %s3717_s22  }
0x169a   : > { %s3762_s2 = scalar_lea.hbm %s6227_s6, %s4419_s26  ;;  %s4780_s11 = scalar_lea.hbm %s6227_s6, 32 }
0x169b   : > { %s3765_s23 = sshll.u32 %s3762_s2, 4  ;;  %s3766_s23 = int_to_ptr.hbm [resolvable:$true] %s3765_s23 }
0x169c   : > { %s4774_s16 = sshra.s32 %s3766_s23, 4  ;;  %s4775_s16 = int_to_ptr.hbm [resolvable:$true] %s4774_s16 }
0x169d   : > { %s4776_s1 = scalar_lea.hbm %s4775_s16, 16  ;;  %p4781_p8 = scmp.lt.s32.totalorder %s4775_s16, %s6227_s6 }
0x169e   : > { %p4777_p5 = scmp.ne.s32.totalorder %s4775_s16, %s4776_s1  ;;  %p4782_p10 = scmp.lt.s32.totalorder %s4780_s11, %s4776_s1 }
0x16a0   : > { %p4778_p6 = pnand %p4777_p5, %p5124_p3  ;;  %p4783_p11 = por %p4782_p10, %p4781_p8 }
0x16a2   : > { %p4779_p7 = pneg %p4778_p6 }
0x16a4   : > { %p4784_p12 = pnand %p4783_p11, %p4779_p7 }
0x16a6   : > { %4787 = shalt.err (!%p4784_p12)
}
0x16a7   : > { %s4912_s10 = smov 128   ;;  %s6228_s18 = smov 8  }
0x16a8   : > { %4422 = dma.vmem_to_hbm [thread:$0]  (%p5124_p3), %s3764_s5, 256, %s3766_s23, %s3721_s28, %s4912_s10, %s4912_s10, %s6228_s18  }
0x16a9 PF: > { %s6229_s0 = sld [smem:[#allocation39_spill]] }
0x16aa   : > { %s6230_s15 = sld [smem:[#allocation32_spill]] }
0x16af   : > { %p4436_p13 = scmp.ge.s32.totalorder %s6229_s0, 2 }
0x16b0   : > { %s3780_s8 = sand.u32 1, %s6230_s15  }
0x16b1   : > { %p4427_p0 = pnand %p4436_p13, %p5136_p9  ;;  %s3781_s26 = scalar_lea.sflag [#allocation4], %s3780_s8 }
0x16b3   : > { %p4428_p1 = pneg %p4427_p0 }
0x16b5   : > { %4821 = dma.done.wait (%p4428_p1), %s3781_s26, 16  }
0x16b6   : > { %4823 = vsyncadd (%p4428_p1), %s3781_s26, 4294967280  ;;  %s6232_s22 = sadd.s32 4294967294, %s6229_s0  }
0x16b7   : > { %s3789_s2 = sand.u32 1, %s6232_s22  }
0x16b8   : > { %s3790_s3 = scalar_lea.sflag [#allocation6], %s3789_s2 }
0x16b9   : > { %4825 = dma.done.wait (%p4428_p1), %s3790_s3, 272  }
0x16ba   : > { %4827 = vsyncadd (%p4428_p1), %s3790_s3, 4294967024  ;;  %s78_s0 = sadd.s32 1, %s6229_s0   ;;  %s6233_s15 = sld [smem:[#allocation33_spill]] }
0x16bb   : > { %p75_p3 = scmp.ge.s32.totalorder %s78_s0, 6   ;;  %s6234_s16 = sld [smem:[#allocation34_spill]] }
0x16bc   : > { %s6235_s18 = sld [smem:[#allocation44_spill]] }
0x16bd   : > { %s6236_s22 = sld [smem:[#allocation37_spill]]  ;;  %77 = sbr.rel (!%p75_p3) target bundleno = 64 (0x40), region = 273 }
0x16be   : > { %s6237_s23 = sld [smem:[#allocation38_spill]] }
0x16bf   : > { %s6238_s26 = sld [smem:[#allocation40_spill]] }
0x16c0   : > { %s6239_s28 = sld [smem:[#allocation42_spill]] }
0x16c2   :  { %3805 = vsyncpa [#allocation4], 1 }
0x16c3   :  { %3807 = vsyncpa [#allocation4 + $0x1], 1 }
0x16c4   :  { %3808 = vsyncpa [#allocation6], 1 }
0x16c5   :  { %3810 = vsyncpa [#allocation6 + $0x1], 1 }

// kernel: tpu_custom_call.1
= control target key start
LH: loop header
LB: loop body
LE: loop exit
PB: predicated region body
PF: predicated region fallthrough
CT: control target
= control target key end

     0   :  { %s4860_s6 = smov 1   ;;  %s4861_s10 = smov 2   ;;  %s6101_s0 = inlined_call_operand.smem [shape: u32[31], index: -1, kind: input, shape index: {}] }
   0x1   :  { %s4921_s5 = sld [smem:[%s6101_s0]]   ;;  %s4862_s14 = smov 3  }
   0x2   :  { %s4926_s9 = sld [smem:[%s6101_s0 + %s4860_s6]]   ;;  %s4863_s18 = smov 4  }
   0x3   :  { %s4931_s13 = sld [smem:[%s6101_s0 + %s4861_s10]]   ;;  %s4864_s22 = smov 5  }
   0x4   :  { %s4936_s17 = sld [smem:[%s6101_s0 + %s4862_s14]]   ;;  %s4865_s26 = smov 6  }
   0x5   :  { %s4941_s21 = sld [smem:[%s6101_s0 + %s4863_s18]]   ;;  %s4866_s30 = smov 7  }
   0x6   :  { %s4946_s25 = sld [smem:[%s6101_s0 + %s4864_s22]]   ;;  %s4867_s4 = smov 8  }
   0x7   :  { %6146 = sst [smem:[#allocation10_spill]] %s4921_s5  ;;  %s4868_s10 = smov 9  }
   0x8   :  { %6147 = sst [smem:[#allocation11_spill]] %s4926_s9  ;;  %s4869_s15 = smov 10  }
   0x9   :  { %6148 = sst [smem:[#allocation12_spill]] %s4931_s13  ;;  %s4870_s20 = smov 11  }
   0xa   :  { %6149 = sst [smem:[#allocation13_spill]] %s4936_s17  ;;  %s4872_s1 = smov 13  }
   0xb   :  { %6150 = sst [smem:[#allocation14_spill]] %s4941_s21  ;;  %s4873_s7 = smov 14  }
   0xc   :  { %6151 = sst [smem:[#allocation15_spill]] %s4946_s25  ;;  %s4875_s22 = smov 16  }
   0xd   :  { %s4951_s29 = sld [smem:[%s6101_s0 + %s4865_s26]]   ;;  %s4871_s26 = smov 12  }
   0xe   :  { %s4956_s3 = sld [smem:[%s6101_s0 + %s4866_s30]]   ;;  %s4876_s28 = smov 17  }
   0xf   :  { %s4961_s8 = sld [smem:[%s6101_s0 + %s4867_s4]]  }
  0x10   :  { %s4966_s14 = sld [smem:[%s6101_s0 + %s4868_s10]]  }
  0x11   :  { %s4971_s19 = sld [smem:[%s6101_s0 + %s4869_s15]]   ;;  %s4874_s15 = smov 15  }
  0x12   :  { %s4976_s24 = sld [smem:[%s6101_s0 + %s4870_s20]]  }
  0x13   :  { %6152 = sst [smem:[#allocation16_spill]] %s4951_s29 }
  0x14   :  { %6153 = sst [smem:[#allocation17_spill]] %s4956_s3 }
  0x15   :  { %6154 = sst [smem:[#allocation18_spill]] %s4961_s8 }
  0x16   :  { %6155 = sst [smem:[#allocation19_spill]] %s4966_s14 }
  0x17   :  { %6156 = sst [smem:[#allocation20_spill]] %s4971_s19 }
  0x18   :  { %6157 = sst [smem:[#allocation21_spill]] %s4976_s24 }
  0x19   :  { %s4981_s30 = sld [smem:[%s6101_s0 + %s4871_s26]]  }
  0x1a   :  { %s4986_s6 = sld [smem:[%s6101_s0 + %s4872_s1]]  }
  0x1b   :  { %s4991_s12 = sld [smem:[%s6101_s0 + %s4873_s7]]   ;;  %s4877_s7 = smov 18  }
  0x1c   :  { %s4996_s20 = sld [smem:[%s6101_s0 + %s4874_s15]]   ;;  %s4878_s15 = smov 19  }
  0x1d   :  { %s5001_s27 = sld [smem:[%s6101_s0 + %s4875_s22]]   ;;  %s4879_s22 = smov 20  }
  0x1e   :  { %s5006_s4 = sld [smem:[%s6101_s0 + %s4876_s28]]   ;;  %s4880_s28 = smov 21  }
  0x1f   :  { %6158 = sst [smem:[#allocation22_spill]] %s4981_s30 }
  0x20   :  { %6159 = sst [smem:[#allocation23_spill]] %s4986_s6 }
  0x21   :  { %6160 = sst [smem:[#allocation24_spill]] %s4991_s12 }
  0x22   :  { %6161 = sst [smem:[#allocation25_spill]] %s4996_s20 }
  0x23   :  { %s5011_s19 = sld [smem:[%s6101_s0 + %s4877_s7]]   ;;  %s4881_s7 = smov 22  }
  0x24   :  { %6162 = sst [smem:[#allocation26_spill]] %s5006_s4 }
  0x25   :  { %s5016_s20 = sld [smem:[%s6101_s0 + %s4878_s15]]   ;;  %s4882_s15 = smov 23  }
  0x26   :  { %s5021_s12 = sld [smem:[%s6101_s0 + %s4879_s22]]   ;;  %s4883_s22 = smov 24  }
  0x27   :  { %s5026_s30 = sld [smem:[%s6101_s0 + %s4880_s28]]   ;;  %s4884_s28 = smov 25  }
  0x28   :  { %s5031_s24 = sld [smem:[%s6101_s0 + %s4881_s7]]   ;;  %s4885_s7 = smov 26  }
  0x29   :  { %s5036_s6 = sld [smem:[%s6101_s0 + %s4882_s15]]   ;;  %s4886_s15 = smov 27  }
  0x2a   :  { %s5041_s14 = sld [smem:[%s6101_s0 + %s4883_s22]]   ;;  %s4887_s22 = smov 28  }
  0x2b   :  { %s5046_s3 = sld [smem:[%s6101_s0 + %s4884_s28]]   ;;  %s4888_s28 = smov 29  }
  0x2c   :  { %s5051_s25 = sld [smem:[%s6101_s0 + %s4885_s7]]   ;;  %s4889_s7 = smov 30  }
  0x2d   :  { %s5056_s21 = sld [smem:[%s6101_s0 + %s4886_s15]]  }
  0x2e   :  { %s5061_s29 = sld [smem:[%s6101_s0 + %s4887_s22]]  }
  0x2f   :  { %6163 = sst [smem:[#allocation27_spill]] %s5036_s6 }
  0x30   :  { %s5066_s8 = sld [smem:[%s6101_s0 + %s4888_s28]]  }
  0x31   :  { %6164 = sst [smem:[#allocation28_spill]] %s5046_s3 }
  0x32   :  { %s5071_s13 = sld [smem:[%s6101_s0 + %s4889_s7]]  }
  0x34   :  { %6165 = sst [smem:[#allocation29_spill]] %s5061_s29 }
  0x36   :  { %6166 = sst [smem:[#allocation30_spill]] %s5066_s8 }
  0x38   :  { %6167 = sst [smem:[#allocation31_spill]] %s5071_s13 }
  0x39   :  { %67 = vsyncpa [#allocation4], 0 }
  0x3a   :  { %69 = vsyncpa [#allocation4 + $0x1], 0 }
  0x3b   :  { %70 = vsyncpa [#allocation6], 0 }
  0x3c   :  { %72 = vsyncpa [#allocation6 + $0x1], 0  ;;  %s5073_s15 = smov 0   ;;  %s5075_s16 = smov 0  }
  0x3d   :  { %s5077_s18 = smov 0   ;;  %s5079_s22 = smov 0  }
  0x3e   :  { %s5081_s23 = smov 0   ;;  %s5083_s26 = smov 0  }
  0x3f   :  { %s5085_s28 = smov 0   ;;  %s5087_s0 = smov 0  }
  0x40 LB: > { %s6168_s6 = sld [smem:[#allocation27_spill]]  ;;  %s6111_s1 = sadd.s32 4294967295, %s4858_s0   ;;  %s4838_s18 = sphi %s5077_s18, %s6235_s18   ;;  %s4834_s16 = sphi %s5075_s16, %s6234_s16   ;;  %s4830_s15 = sphi %s5073_s15, %s6233_s15   ;;  %s4858_s0 = sphi %s5087_s0, %s78_s0   ;;  %s4854_s28 = sphi %s5085_s28, %s6239_s28   ;;  %s4850_s26 = sphi %s5083_s26, %s6238_s26   ;;  %s4846_s23 = sphi %s5081_s23, %s6237_s23   ;;  %s4842_s22 = sphi %s5079_s22, %s6236_s22  }
  0x41   : > { %s6169_s4 = sld [smem:[#allocation26_spill]]  ;;  %s6113_s2 = sadd.s32 4294967294, %s4858_s0  }
  0x42   : > { %s6170_s3 = sld [smem:[#allocation28_spill]]  ;;  %s87_s7 = sadd.s32 1, %s4850_s26 }
  0x43   : > { %6171 = sst [smem:[#allocation32_spill]] %s4830_s15  ;;  %p88_p0 = scmp.ge.s32.totalorder %s87_s7, 2 }
  0x44   : > { %6172 = sst [smem:[#allocation33_spill]] %s4834_s16  ;;  %s90_s10 = sadd.s32 1, %s4854_s28 }
  0x45   : > { %6173 = sst [smem:[#allocation34_spill]] %s4838_s18  ;;  %p760_p1 = scmp.ne.s32.totalorder %s4838_s18, %s4834_s16 }
  0x46   : > { %6174 = sst [smem:[#allocation35_spill]] %s4842_s22  ;;  %p761_p2 = scmp.eq.s32.totalorder %s6111_s1, 3 }
  0x47   : > { %6175 = sst [smem:[#allocation36_spill]] %s4846_s23  ;;  %s6241_s7 = smov (%p88_p0, %s87_s7), 0 }
  0x48   : > { %6176 = sst [smem:[#allocation37_spill]] %s4850_s26  ;;  %s6243_s10 = smov (!%p88_p0, %s90_s10), %s4854_s28 }
  0x49   : > { %6177 = sst [smem:[#allocation38_spill]] %s4854_s28  ;;  %p5124_p3 = por %p761_p2, %p760_p1 }
  0x4a   : > { %6178 = sst [smem:[#allocation39_spill]] %s4858_s0  ;;  %p766_p4 = scmp.ne.s32.totalorder %s4834_s16, %s4830_s15 }
  0x4b   : > { %6179 = sst [smem:[#allocation40_spill]] %s6241_s7  ;;  %p92_p5 = scmp.ge.s32.totalorder %s6243_s10, 2 }
  0x4c   : > { %s6180_s11 = scalar_select %p5124_p3, 1, 0 }
  0x4d   : > { %p767_p6 = scmp.eq.s32.totalorder %s6113_s2, 3  ;;  %p4046_p7 = scmp.ge.s32.totalorder %s4858_s0, 1 }
  0x4e   : > { %6181 = sst [smem:[#allocation41_spill]] %s6180_s11  ;;  %p970_p8 = scmp.lt.s32.totalorder %s4858_s0, 5 }
  0x4f   : > { %s6245_s10 = smov (%p92_p5, %s6243_s10), 0  ;;  %p5136_p9 = por %p767_p6, %p766_p4 }
  0x50   : > { %6182 = sst [smem:[#allocation42_spill]] %s6245_s10  ;;  %p971_p10 = pnand %p4046_p7, %p970_p8 }
  0x51   : > { %s6183_s26 = scalar_select %p5136_p9, 1, 0 }
  0x52   : > { %s747_s1 = ssub.s32 %s4854_s28, %s6245_s10  ;;  %s750_s7 = sadd.s32 1, %s4838_s18 }
  0x53   : > { %6184 = sst [smem:[#allocation43_spill]] %s6183_s26  ;;  %p748_p11 = scmp.eq.s32.totalorder %s747_s1, 0 }
  0x54   : > { %974 = sbr.rel (%p971_p10) target bundleno = 5801 (0x16a9), region = 132 }
  0x55   : > { %s5144_s13 = scalar_select %p748_p11, %s4838_s18, %s750_s7  }
  0x57   : > { %6185 = sst [smem:[#allocation44_spill]] %s5144_s13 }
  0x59   : > { %s6186_s5 = sld [smem:[#allocation10_spill]]  ;;  %s5147_s2 = sand.u32 1, %s4834_s16  }
  0x5a   : > { %p1100_p12 = scmp.lt.s32.totalorder %s4846_s23, 1  ;;  %s4047_s1 = sshll.u32 %s5147_s2, 4 }
  0x5b   : > { %p1105_p13 = scmp.lt.s32.totalorder %s4842_s22, 1  ;;  %s5191_s18 = scalar_lea.vmem [#allocation7], %s4047_s1 }
  0x5c   : > { %s1101_s7 = scalar_select %p1100_p12, %s4846_s23, 1 }
  0x5d   : > { %s5154_s10 = scalar_select %p1105_p13, %s4842_s22, 1 }
  0x5e   : > { %s4351_s28 = sshll.u32 %s1101_s7, 3  ;;  %s6188_s16 = sld [smem:[#allocation35_spill]] }
  0x5f   : > { %s5157_s13 = scalar_lea.vmem %s6186_s5, %s4351_s28  ;;  %s4352_s26 = sshll.u32 %s5154_s10, 4 }
  0x60   : > { %6187 = sst [smem:[#allocation45_spill]] %s5157_s13  ;;  %s5165_s15 = scalar_lea.vmem %s5011_s19, %s4352_s26 }
  0x61   : > { %s5170_s11 = scalar_lea.vmem %s5021_s12, %s4352_s26  ;;  %s1126_s8 = scalar_lea.vmem %s5026_s30, %s5154_s10 }
  0x62   : > { %s1129_s23 = scalar_lea.vmem %s5031_s24, %s5154_s10  ;;  %s1132_s0 = scalar_lea.vmem %s6168_s6, %s5154_s10 }
  0x63   : > { %s5179_s17 = scalar_lea.vmem %s5041_s14, %s4352_s26  ;;  %s1140_s9 = scalar_lea.vmem %s6170_s3, %s5154_s10 }
  0x64   : > { %s4355_s22 = sshll.u32 %s5154_s10, 6  ;;  %s6139_s28 = scalar_lea.vmem [#allocation3], %s5147_s2 }
  0x65   : > { %s5187_s5 = scalar_lea.vmem %s5051_s25, %s4355_s22  ;;  %s6132_s13 = scalar_lea.vmem [#allocation5], %s5147_s2 }
  0x66   : > { %p4058_p0 = scmp.ne.s32.totalorder %s6188_s16, 0 }
  0x67   : > { %s6189_s29 = sld [smem:[#allocation11_spill]] (!%p4058_p0) }
  0x68   : > { %1153 = sbr.rel (%p4058_p0) target bundleno = 280 (0x118), region = 136  ;;  %s6190_s26 = sld [smem:[#allocation45_spill]] (!%p4058_p0) }
  0x69   : > { %s6191_s22 = sld [smem:[#allocation13_spill]] (!%p4058_p0) }
  0x6a   : > { %s6193_s1 = sld [smem:[#allocation12_spill]] (!%p4058_p0) }
  0x6d   : > { %v4364_v0 = vld [vmem:[%s6189_s29 + $0x38] sm:$0xff]  ;;  %v4363_v1 = vld [vmem:[%s6189_s29 + $0x30] sm:$0xff]  ;;  %v4362_v2 = vld [vmem:[%s6189_s29 + $0x28] sm:$0xff]  ;;  %vm1248_vm0 = vcmask 261120  }
  0x6e   : > { %1230 = vmatpush.bf16.msra.mxu0 %v4364_v0  ;;  %v4361_v3 = vld [vmem:[%s6189_s29 + $0x20] sm:$0xff]  ;;  %v4360_v4 = vld [vmem:[%s6189_s29 + $0x18] sm:$0xff]  ;;  %v4359_v5 = vld [vmem:[%s6189_s29 + $0x10] sm:$0xff] }
  0x6f   : > { %s6192_s7 = smov %s6191_s22  ;;  %v4358_v6 = vld [vmem:[%s6189_s29 + $0x8] sm:$0xff]  ;;  %v4357_v7 = vld [vmem:[%s6189_s29] sm:$0xff]  ;;  %v1251_v9 = vld [vmem:[%s6191_s22 + $0x10] sm:$0xff] }
  0x70   : > { %v4356_v8 = vld [vmem:[%s6190_s26] sm:$0xff]  ;;  %1252 = vst.msk [vmem:[#allocation2 + $0x10] sm:$0xff] %vm1248_vm0, %v1251_v9  ;;  %v1245_v16 = vld [vmem:[%s6192_s7 + $0x8] sm:$0xff] }
  0x71   : > { %v4554_v10 = vld [vmem:[%s6193_s1] ss:$0 sm:$0xff] }
  0x72   : > { %1231 = vmatpush.bf16.msra.mxu0 %v4363_v1  ;;  %v1244_v12 = vld [vmem:[%s6192_s7] sm:$0xff] }
  0x76   : > { %1232 = vmatpush.bf16.msra.mxu0 %v4362_v2 }
  0x7a   : > { %1233 = vmatpush.bf16.msra.mxu0 %v4361_v3 }
  0x7e   : > { %1234 = vmatpush.bf16.msra.mxu0 %v4360_v4 }
  0x82   : > { %1235 = vmatpush.bf16.msra.mxu0 %v4359_v5 }
  0x86   : > { %1236 = vmatpush.bf16.msra.mxu0 %v4358_v6 }
  0x8a   : > { %1237 = vmatpush.bf16.msra.mxu0 %v4357_v7 }
  0x8d   : > { %1238 = vmatmul.bf16.vlgmr.msra.gmra.mxu0 %v4356_v8 }
 0x10a   : > { %v1239_v11 = vpop.f32.mrf.mxu0 }
 0x10b   : > { %v1240_v13 = vadd.f32 %v4554_v10, %v1239_v11 }
 0x10d   : > { %v1246_v14 = vadd.f32 %v1244_v12, %v1240_v13 }
 0x10f   : > { %1249 = vst.msk [vmem:[#allocation2] sm:$0xff] %vm1248_vm0, %v1246_v14 }
 0x112   : > { %v1241_v15 = vpop.f32.mrf.mxu0 }
 0x113   : > { %v1242_v17 = vadd.f32 %v4554_v10, %v1241_v15 }
 0x115   : > { %v1247_v18 = vadd.f32 %v1245_v16, %v1242_v17 }
 0x117   : > { %1250 = vst.msk [vmem:[#allocation2 + $0x8] sm:$0xff] %vm1248_vm0, %v1247_v18 }
 0x118 PF: > { %v5207_v19 = vld [vmem:[#allocation2] sm:$0xff]  ;;  %vm1261_vm1 = vcmask 261120   ;;  %v5209_v20 = vld [vmem:[#allocation2 + $0x10] sm:$0xff]  ;;  %v4890_v25 = vmov 32.0   ;;  %v4366_v47 = vld [vmem:[%s5165_s15 + $0x8] sm:$0xff]  ;;  %s6195_s16 = scalar_lea.vmem %s6169_s4, %s5154_s10  ;;  %s6196_s26 = scalar_lea.vmem %s5016_s20, %s5154_s10  ;;  %vm1401_vm12 = vcmask 64512  }
 0x119   : > { %v1262_v21 = vsel %vm1261_vm1, %v5207_v19, 0.0  ;;  %v1268_v22 = vsel %vm1261_vm1, %v5209_v20, 0.0  ;;  %4578 = vrcp.f32 %v4890_v25  ;;  %1381 = vmatpush.bf16.msra.mxu0 %v4366_v47  ;;  %v4365_v50 = vld [vmem:[%s5165_s15] sm:$0xff]  ;;  %s6194_s15 = scalar_lea.vmem %s5001_s27, %s5154_s10  ;;  %s4891_s22 = smov 96   ;;  %vm1482_vm13 = vcmask 1043456  }
 0x11a   : > { %1263 = vadd.xlane.f32.xlu0 %v1262_v21  ;;  %1269 = vadd.xlane.f32.xlu1 %v1268_v22  ;;  %v4570_v8 = vld [vmem:[%s6194_s15] ss:$0 sm:$0xff]  ;;  %s4892_s1 = smov 88   ;;  %s4893_s15 = smov 64   ;;  %vm1435_vm15 = vcmask 195584   ;;  %vm1867_vm0 = vcmask 130048  }
 0x11b   : > { %v4571_v15 = vld [vmem:[%s6195_s16] ss:$0 sm:$0xff]  ;;  %s4894_s16 = smov 120  }
 0x11d   : > { %1382 = vmatpush.bf16.msra.mxu0 %v4365_v50 }
 0x11e   : > { %v5215_v23 = vld [vmem:[#allocation2 + $0x8] sm:$0xff] }
 0x11f   : > { %v1265_v24 = vsel %vm1261_vm1, %v5215_v23, 0.0  ;;  %v4579_v26 = vpop.eup %4578 }
 0x120   : > { %v1272_v27 = vmul.f32 32.0, %v4579_v26  ;;  %vm1276_vm2 = vweird.f32 %v4579_v26 }
 0x122   : > { %1266 = vadd.xlane.f32.xlu0 %v1265_v24  ;;  %v1273_v28 = vsub.f32 1.0, %v1272_v27 }
 0x124   : > { %v1274_v29 = vmul.f32 %v4579_v26, %v1273_v28 }
 0x126   : > { %v1275_v30 = vadd.f32 %v4579_v26, %v1274_v29 }
 0x128   : > { %v5219_v31 = vsel %vm1276_vm2, %v4579_v26, %v1275_v30 }
 0x18d   : > { %v1264_v32 = vpop.xlane.xlu0 %1263  ;;  %v1270_v36 = vpop.xlane.xlu1 %1269 }
 0x18e   : > { %v1278_v33 = vmul.f32 %v5219_v31, %v1264_v32  ;;  %v1280_v40 = vmul.f32 %v5219_v31, %v1270_v36 }
 0x190   : > { %v1281_v34 = vsub.f32 %v5207_v19, %v1278_v33  ;;  %v5228_v42 = vsub.f32 %v5209_v20, %v1280_v40  ;;  %v4572_v33 = vld [vmem:[%s6196_s26] ss:$0 sm:$0xff]  ;;  %s4895_s26 = smov 80  }
 0x192   : > { %v1284_v35 = vmul.f32 %v1281_v34, %v1281_v34  ;;  %v1286_v45 = vmul.f32 %v5228_v42, %v5228_v42 }
 0x194   : > { %v1287_v37 = vsel %vm1261_vm1, %v1284_v35, 0.0  ;;  %v1293_v46 = vsel %vm1261_vm1, %v1286_v45, 0.0 }
 0x195   : > { %1288 = vadd.xlane.f32.xlu1 %v1287_v37  ;;  %v1267_v38 = vpop.xlane.xlu0 %1266 }
 0x196   : > { %v1279_v39 = vmul.f32 %v5219_v31, %v1267_v38 }
 0x198   : > { %v1282_v41 = vsub.f32 %v5215_v23, %v1279_v39 }
 0x19a   : > { %v1285_v43 = vmul.f32 %v1282_v41, %v1282_v41 }
 0x19c   : > { %v1290_v44 = vsel %vm1261_vm1, %v1285_v43, 0.0 }
 0x19d   : > { %1291 = vadd.xlane.f32.xlu2 %v1290_v44 }
 0x1a5   : > { %1294 = vadd.xlane.f32.xlu2 %v1293_v46 }
 0x208   : > { %v1289_v48 = vpop.xlane.xlu1 %1288 }
 0x209   : > { %v1296_v49 = vmul.f32 %v1289_v48, %v5219_v31 }
 0x20b   : > { %v1299_v51 = vadd.f32 1e-06, %v1296_v49 }
 0x20d   : > { %4580 = vrsqrt.f32 %v1299_v51  ;;  %vm1308_vm4 = vweird.f32 %v1299_v51 }
 0x210   : > { %v1292_v52 = vpop.xlane.xlu2 %1291 }
 0x211   : > { %v1297_v53 = vmul.f32 %v1292_v52, %v5219_v31 }
 0x213   : > { %v4581_v54 = vpop.eup %4580  ;;  %v1300_v55 = vadd.f32 1e-06, %v1297_v53 }
 0x214   : > { %v1303_v56 = vmul.f32 %v4581_v54, %v1299_v51  ;;  %vm1309_vm3 = vweird.f32 %v4581_v54  ;;  %v1256_v51 = vlaneseq }
 0x215   : > { %4582 = vrsqrt.f32 %v1300_v55  ;;  %vm1310_vm5 = vmor %vm1308_vm4, %vm1309_vm3  ;;  %vm1318_vm7 = vweird.f32 %v1300_v55 }
 0x216   : > { %v1304_v57 = vmul.f32 %v4581_v54, %v1303_v56  ;;  %v5271_v52 = vand.u32 127, %v1256_v51 }
 0x218   : > { %v1305_v58 = vmul.f32 0.5, %v1304_v57  ;;  %v1295_v59 = vpop.xlane.xlu2 %1294  ;;  %vm1258_vm14 = vcmp.lt.s32.totalorder %v5271_v52, 17 }
 0x219   : > { %v1298_v60 = vmul.f32 %v1295_v59, %v5219_v31 }
 0x21a   : > { %v1306_v61 = vsub.f32 1.5, %v1305_v58 }
 0x21b   : > { %v4583_v62 = vpop.eup %4582  ;;  %v1301_v63 = vadd.f32 1e-06, %v1298_v60 }
 0x21c   : > { %v1307_v0 = vmul.f32 %v4581_v54, %v1306_v61  ;;  %v1313_v1 = vmul.f32 %v4583_v62, %v1300_v55  ;;  %vm1319_vm6 = vweird.f32 %v4583_v62 }
 0x21d   : > { %4584 = vrsqrt.f32 %v1301_v63  ;;  %vm1320_vm8 = vmor %vm1318_vm7, %vm1319_vm6  ;;  %vm1328_vm9 = vweird.f32 %v1301_v63 }
 0x21e   : > { %v1314_v2 = vmul.f32 %v4583_v62, %v1313_v1  ;;  %v1311_v3 = vsel %vm1310_vm5, %v4581_v54, %v1307_v0 }
 0x21f   : > { %v1332_v7 = vmul.f32 %v1311_v3, %v1281_v34 }
 0x220   : > { %v1315_v4 = vmul.f32 0.5, %v1314_v2 }
 0x221   : > { %v1338_v14 = vmul.f32 %v4570_v8, %v1332_v7 }
 0x222   : > { %v1316_v5 = vsub.f32 1.5, %v1315_v4 }
 0x223   : > { %v4585_v6 = vpop.eup %4584  ;;  %v1344_v21 = vadd.f32 %v4571_v15, %v1338_v14 }
 0x224   : > { %v1317_v9 = vmul.f32 %v4583_v62, %v1316_v5  ;;  %v1323_v10 = vmul.f32 %v4585_v6, %v1301_v63  ;;  %vm1329_vm10 = vweird.f32 %v4585_v6 }
 0x225   : > { %vm1330_vm11 = vmor %vm1328_vm9, %vm1329_vm10 }
 0x226   : > { %v1321_v11 = vsel %vm1320_vm8, %v4583_v62, %v1317_v9  ;;  %v1324_v12 = vmul.f32 %v4585_v6, %v1323_v10 }
 0x227   : > { %v1333_v13 = vmul.f32 %v1321_v11, %v1282_v41 }
 0x228   : > { %v1325_v16 = vmul.f32 0.5, %v1324_v12 }
 0x229   : > { %v1339_v17 = vmul.f32 %v4570_v8, %v1333_v13 }
 0x22a   : > { %v1326_v18 = vsub.f32 1.5, %v1325_v16 }
 0x22b   : > { %v1345_v22 = vadd.f32 %v4571_v15, %v1339_v17 }
 0x22c   : > { %v1327_v24 = vmul.f32 %v4585_v6, %v1326_v18 }
 0x22d   : > { %v1347_v25 = vpack.c.bf16 %v1345_v22, %v1344_v21 }
 0x22e   : > { %v1331_v26 = vsel %vm1330_vm11, %v4585_v6, %v1327_v24 }
 0x22f   : > { %4103 = vmatmul.msk.bf16.vlgmr.msra.gmra.mxu0 %vm1261_vm1, %v1347_v25  ;;  %v1334_v27 = vmul.f32 %v1331_v26, %v5228_v42 }
 0x231   : > { %v1340_v28 = vmul.f32 %v4570_v8, %v1334_v27 }
 0x233   : > { %v1346_v29 = vadd.f32 %v4571_v15, %v1340_v28 }
 0x235   : > { %v1348_v30 = vpack.c.bf16 %v1346_v29, %v1346_v29 }
 0x23f   : > { %4104 = vmatmul.msk.bf16.gmra.mxu0 %vm1261_vm1, %v1348_v30 }
 0x2ac   : > { %v1384_v32 = vpop.f32.mrf.mxu0 }
 0x2ad   : > { %v1385_v35 = vadd.f32 %v4572_v33, %v1384_v32 }
 0x2b4   : > { %v1386_v34 = vpop.f32.mrf.mxu0 }
 0x2b5   : > { %v1387_v36 = vadd.f32 %v4572_v33, %v1386_v34 }
 0x2b7   : > { %v5251_v37 = vpack.c.bf16 %v1387_v36, %v1385_v35 }
 0x2b9   : > { %1397 = vrot.lane.b32.xlu1 %v5251_v37, %s4891_s22 }
 0x2bc   : > { %v1389_v38 = vpop.f32.mrf.mxu0 }
 0x2bd   : > { %v1390_v39 = vadd.f32 %v4572_v33, %v1389_v38 }
 0x2bf   : > { %v5254_v40 = vpack.c.bf16 %v1390_v39, %v1390_v39 }
 0x2c1   : > { %1399 = vrot.lane.b32.xlu0 %v5254_v40, %s4891_s22  ;;  %s4896_s22 = smov 72  }
 0x2c4   : > { %v1391_v41 = vpop.f32.mrf.mxu0 }
 0x2c9   : > { %1510 = vrot.lane.b32.xlu0 %v5254_v40, %s4892_s1 }
 0x2d1   : > { %1473 = vrot.lane.b32.xlu0 %v5254_v40, %s4893_s15 }
 0x2d9   : > { %1471 = vrot.lane.b32.xlu0 %v5251_v37, %s4893_s15  ;;  %s4898_s15 = smov 112  }
 0x2e1   : > { %1504 = vrot.lane.b32.xlu0 %v5251_v37, %s4894_s16 }
 0x32b   : > { %v1398_v44 = vpop.permute.xlu1 %1397 }
 0x32c   : > { %v1409_v46 = vsel %vm1401_vm12, %v1398_v44, 0 }
 0x333   : > { %v1400_v42 = vpop.permute.xlu0 %1399 }
 0x334   : > { %v1412_v43 = vsel %vm1401_vm12, %v1400_v42, 0 }
 0x335   : > { %1420 = vmatpush.bf16.xpose.msra.mxu1 %v1412_v43 }
 0x33b   : > { %v1511_v45 = vpop.permute.xlu0 %1510 }
 0x33c   : > { %v1522_v47 = vsel %vm1401_vm12, %v1511_v45, 0 }
 0x33d   : > { %1421 = vmatpush.bf16.xpose.msra.mxu1 %v1409_v46  ;;  %1530 = vmatpush.bf16.xpose.msra.mxu3 %v1522_v47 }
 0x343   : > { %v1474_v48 = vpop.permute.xlu0 %1473 }
 0x344   : > { %4105 = vmatmul.msk.bf16.vlgmr.msra.gmra.mxu1 %vm1401_vm12, %v5251_v37  ;;  %v1484_v49 = vsel %vm1482_vm13, %v1474_v48, 0 }
 0x345   : > { %1492 = vmatpush.bf16.msra.mxu2 %v1484_v49 }
 0x34b   : > { %v1472_v50 = vpop.permute.xlu0 %1471 }
 0x34c   : > { %1493 = vmatpush.bf16.msra.mxu2 %v1472_v50 }
 0x353   : > { %v1505_v11 = vpop.permute.xlu0 %1504 }
 0x354   : > { %4106 = vmatmul.msk.bf16.gmra.mxu1 %vm1401_vm12, %v5254_v40 }
 0x3c1   : > { %v1423_v53 = vpop.f32.mrf.mxu1 }
 0x3c2   : > { %v1432_v54 = vsel %vm1258_vm14, %v1423_v53, -1e+30 }
 0x3c3   : > { %v1436_v55 = vsel %vm1435_vm15, %v1432_v54, -inf }
 0x3c4   : > { %1437 = vmax.xlane.f32.xlu2 %v1436_v55 }
 0x3c9   : > { %v1425_v56 = vpop.f32.mrf.mxu1 }
 0x3ca   : > { %v1433_v57 = vsel %vm1258_vm14, %v1425_v56, -1e+30 }
 0x3cb   : > { %v1439_v58 = vsel %vm1435_vm15, %v1433_v57, -inf }
 0x3cc   : > { %1440 = vmax.xlane.f32.xlu2 %v1439_v58 }
 0x3d1   : > { %v1428_v59 = vpop.f32.mrf.mxu1 }
 0x3d2   : > { %v1434_v61 = vsel %vm1258_vm14, %v1428_v59, -1e+30 }
 0x3d3   : > { %v1442_v62 = vsel %vm1435_vm15, %v1434_v61, -inf }
 0x3d9   : > { %v1430_v60 = vpop.f32.mrf.mxu1 }
 0x3e4   : > { %1508 = vrot.lane.b32.xlu2 %v5251_v37, %s4892_s1  ;;  %s4897_s1 = smov 104  }
 0x40d   : > { %1443 = vmax.xlane.f32.xlu2 %v1442_v62 }
 0x437   : > { %v1438_v63 = vpop.xlane.xlu2 %1437 }
 0x438   : > { %v1445_v0 = vsub.f32 %v1432_v54, %v1438_v63 }
 0x43a   : > { %v1448_v1 = vmul.f32 1.442695, %v1445_v0 }
 0x43c   : > { %4586 = vpow2.f32 %v1448_v1 }
 0x43f   : > { %v1441_v2 = vpop.xlane.xlu2 %1440 }
 0x440   : > { %v1446_v3 = vsub.f32 %v1433_v57, %v1441_v2 }
 0x442   : > { %v4587_v4 = vpop.eup %4586  ;;  %v1450_v5 = vmul.f32 1.442695, %v1446_v3 }
 0x443   : > { %v1454_v6 = vsel %vm1435_vm15, %v4587_v4, 0.0 }
 0x444   : > { %4588 = vpow2.f32 %v1450_v5  ;;  %1455 = vadd.xlane.f32.xlu2 %v1454_v6 }
 0x447   : > { %v1509_v7 = vpop.permute.xlu2 %1508 }
 0x448   : > { %v1519_v8 = vsel %vm1401_vm12, %v1509_v7, 0 }
 0x449   : > { %1531 = vmatpush.bf16.xpose.msra.mxu3 %v1519_v8 }
 0x44a   : > { %v4589_v9 = vpop.eup %4588 }
 0x44b   : > { %v1457_v10 = vsel %vm1435_vm15, %v4589_v9, 0.0 }
 0x44c   : > { %1458 = vadd.xlane.f32.xlu1 %v1457_v10 }
 0x450   : > { %4109 = vmatmul.msk.bf16.vlgmr.msra.gmra.mxu3 %vm1401_vm12, %v1505_v11 }
 0x45c   : > { %1618 = vrot.lane.b32.xlu2 %v5254_v40, %s4895_s26 }
 0x464   : > { %1506 = vrot.lane.b32.xlu2 %v5254_v40, %s4894_s16  ;;  %s4899_s16 = smov 56  }
 0x465   : > { %1726 = vrot.lane.b32.xlu1 %v5254_v40, %s4896_s22 }
 0x46c   : > { %1616 = vrot.lane.b32.xlu2 %v5251_v37, %s4895_s26  ;;  %s4900_s26 = smov 48  }
 0x46d   : > { %1720 = vrot.lane.b32.xlu1 %v5251_v37, %s4897_s1 }
 0x474   : > { %1724 = vrot.lane.b32.xlu2 %v5251_v37, %s4896_s22  ;;  %s4901_s22 = smov 40  }
 0x47c   : > { %1612 = vrot.lane.b32.xlu2 %v5251_v37, %s4898_s15 }
 0x480   : > { %v1444_v12 = vpop.xlane.xlu2 %1443 }
 0x481   : > { %v1447_v13 = vsub.f32 %v1434_v61, %v1444_v12 }
 0x483   : > { %v1452_v14 = vmul.f32 1.442695, %v1447_v13 }
 0x484   : > { %1722 = vrot.lane.b32.xlu2 %v5254_v40, %s4897_s1  ;;  %s6131_s1 = smov 8  }
 0x485   : > { %4590 = vpow2.f32 %v1452_v14 }
 0x48b   : > { %v4591_v15 = vpop.eup %4590 }
 0x48c   : > { %v1460_v16 = vsel %vm1435_vm15, %v4591_v15, 0.0 }
 0x48d   : > { %1461 = vadd.xlane.f32.xlu0 %v1460_v16 }
 0x4a1   : > { %1614 = vrot.lane.b32.xlu0 %v5254_v40, %s4898_s15  ;;  %s4903_s15 = smov 16  }
 0x4b7   : > { %v1456_v17 = vpop.xlane.xlu2 %1455 }
 0x4b8   : > { %4592 = vrcp.f32 %v1456_v17 }
 0x4be   : > { %v4593_v24 = vpop.eup %4592 }
 0x4bf   : > { %v1459_v18 = vpop.xlane.xlu1 %1458  ;;  %v1619_v21 = vpop.permute.xlu2 %1618  ;;  %v1466_v27 = vmul.f32 %v4593_v24, %v4587_v4 }
 0x4c0   : > { %4594 = vrcp.f32 %v1459_v18  ;;  %v1630_v22 = vsel %vm1401_vm12, %v1619_v21, 0 }
 0x4c1   : > { %1638 = vmatpush.bf16.xpose.msrb.mxu2 %v1630_v22 }
 0x4c6   : > { %v4595_v25 = vpop.eup %4594 }
 0x4c7   : > { %v1507_v26 = vpop.permute.xlu2 %1506  ;;  %v1467_v28 = vmul.f32 %v4595_v25, %v4589_v9 }
 0x4c8   : > { %4110 = vmatmul.msk.bf16.gmra.mxu3 %vm1401_vm12, %v1507_v26 }
 0x4c9   : > { %v1469_v29 = vpack.c.bf16 %v1467_v28, %v1466_v27 }
 0x4cb   : > { %4107 = vmatmul.msk.bf16.vlgmr.msra.gmra.mxu2 %vm1435_vm15, %v1469_v29 }
 0x4cf   : > { %v1617_v30 = vpop.permute.xlu2 %1616 }
 0x4d0   : > { %v1627_v32 = vsel %vm1401_vm12, %v1617_v30, 0 }
 0x4d1   : > { %1639 = vmatpush.bf16.xpose.msrb.mxu2 %v1627_v32 }
 0x4d3   : > { %v1533_v33 = vpop.f32.mrf.mxu3 }
 0x4d4   : > { %v1542_v34 = vsel %vm1258_vm14, %v1533_v33, -1e+30 }
 0x4d5   : > { %v1545_v35 = vsel %vm1435_vm15, %v1542_v34, -inf }
 0x4d6   : > { %1546 = vmax.xlane.f32.xlu1 %v1545_v35 }
 0x4d7   : > { %v1727_v36 = vpop.permute.xlu1 %1726  ;;  %v1725_v42 = vpop.permute.xlu2 %1724 }
 0x4d8   : > { %v1738_v38 = vsel %vm1401_vm12, %v1727_v36, 0  ;;  %v1735_v44 = vsel %vm1401_vm12, %v1725_v42, 0 }
 0x4d9   : > { %1746 = vmatpush.bf16.xpose.msrb.mxu3 %v1738_v38 }
 0x4db   : > { %v1535_v39 = vpop.f32.mrf.mxu3 }
 0x4dc   : > { %v1543_v41 = vsel %vm1258_vm14, %v1535_v39, -1e+30 }
 0x4dd   : > { %v1548_v43 = vsel %vm1435_vm15, %v1543_v41, -inf }
 0x4de   : > { %1549 = vmax.xlane.f32.xlu2 %v1548_v43 }
 0x4df   : > { %v1721_v45 = vpop.permute.xlu1 %1720  ;;  %v1613_v46 = vpop.permute.xlu2 %1612 }
 0x4e1   : > { %1747 = vmatpush.bf16.xpose.msrb.mxu3 %v1735_v44 }
 0x4e7   : > { %v1723_v47 = vpop.permute.xlu2 %1722 }
 0x4e8   : > { %4117 = vmatmul.msk.bf16.vlgmr.msrb.gmra.mxu3 %vm1401_vm12, %v1721_v45 }
 0x4f8   : > { %4118 = vmatmul.msk.bf16.gmra.mxu3 %vm1401_vm12, %v1723_v47 }
 0x500   : > { %v1462_v48 = vpop.xlane.xlu0 %1461 }
 0x501   : > { %4596 = vrcp.f32 %v1462_v48 }
 0x507   : > { %v4597_v49 = vpop.eup %4596 }
 0x508   : > { %v1468_v50 = vmul.f32 %v4597_v49, %v4591_v15 }
 0x50a   : > { %v1470_v51 = vpack.c.bf16 %v1468_v50, %v1468_v50 }
 0x50c   : > { %4108 = vmatmul.msk.bf16.gmra.mxu2 %vm1435_vm15, %v1470_v51 }
 0x513   : > { %v1615_v53 = vpop.permute.xlu0 %1614 }
 0x51c   : > { %4113 = vmatmul.msk.bf16.vlgmr.msrb.gmra.mxu2 %vm1401_vm12, %v1613_v46 }
 0x52c   : > { %4114 = vmatmul.msk.bf16.gmra.mxu2 %vm1401_vm12, %v1615_v53 }
 0x549   : > { %v1547_v54 = vpop.xlane.xlu1 %1546 }
 0x54a   : > { %v1554_v55 = vsub.f32 %v1542_v34, %v1547_v54 }
 0x54b   : > { %v1538_v56 = vpop.f32.mrf.mxu3 }
 0x54c   : > { %v1557_v57 = vmul.f32 1.442695, %v1554_v55  ;;  %v1544_v58 = vsel %vm1258_vm14, %v1538_v56, -1e+30 }
 0x54d   : > { %v1551_v59 = vsel %vm1435_vm15, %v1544_v58, -inf }
 0x54e   : > { %4598 = vpow2.f32 %v1557_v57  ;;  %1552 = vmax.xlane.f32.xlu0 %v1551_v59  ;;  %v5336_v11 = vpop.f32.mrf.mxu2 }
 0x551   : > { %v1550_v63 = vpop.xlane.xlu2 %1549 }
 0x552   : > { %v1555_v0 = vsub.f32 %v1543_v41, %v1550_v63 }
 0x553   : > { %v1540_v60 = vpop.f32.mrf.mxu3 }
 0x554   : > { %v5320_v61 = vpop.eup %4598  ;;  %v1559_v1 = vmul.f32 1.442695, %v1555_v0 }
 0x555   : > { %v1563_v62 = vsel %vm1435_vm15, %v5320_v61, 0.0 }
 0x556   : > { %1564 = vadd.xlane.f32.xlu0 %v1563_v62  ;;  %4600 = vpow2.f32 %v1559_v1  ;;  %v5338_v13 = vpop.f32.mrf.mxu2 }
 0x55c   : > { %v5329_v5 = vpop.eup %4600 }
 0x55d   : > { %v1566_v8 = vsel %vm1435_vm15, %v5329_v5, 0.0 }
 0x56a   : > { %1580 = vrot.lane.b32.xlu0 %v5251_v37, %s4899_s16 }
 0x56b   : > { %v1749_v2 = vpop.f32.mrf.mxu3 }
 0x56c   : > { %v1758_v3 = vsel %vm1258_vm14, %v1749_v2, -1e+30 }
 0x56d   : > { %v1761_v4 = vsel %vm1435_vm15, %v1758_v3, -inf }
 0x56e   : > { %1762 = vmax.xlane.f32.xlu1 %v1761_v4 }
 0x573   : > { %v1751_v6 = vpop.f32.mrf.mxu3 }
 0x574   : > { %v1759_v7 = vsel %vm1258_vm14, %v1751_v6, -1e+30 }
 0x575   : > { %v1764_v9 = vsel %vm1435_vm15, %v1759_v7, -inf }
 0x576   : > { %1567 = vadd.xlane.f32.xlu1 %v1566_v8  ;;  %1765 = vmax.xlane.f32.xlu2 %v1764_v9 }
 0x57b   : > { %v1754_v10 = vpop.f32.mrf.mxu3 }
 0x57c   : > { %v1760_v33 = vsel %vm1258_vm14, %v1754_v10, -1e+30 }
 0x57d   : > { %v1767_v34 = vsel %vm1435_vm15, %v1760_v33, -inf }
 0x583   : > { %v1756_v12 = vpop.f32.mrf.mxu3 }
 0x58f   : > { %v5340_v14 = vpop.f32.mrf.mxu2 }
 0x597   : > { %v1502_v15 = vpop.f32.mrf.mxu2 }
 0x59f   : > { %v1641_v16 = vpop.f32.mrf.mxu2 }
 0x5a0   : > { %v1650_v17 = vsel %vm1258_vm14, %v1641_v16, -1e+30 }
 0x5a1   : > { %v1653_v18 = vsel %vm1435_vm15, %v1650_v17, -inf }
 0x5a2   : > { %1654 = vmax.xlane.f32.xlu1 %v1653_v18 }
 0x5a7   : > { %v1643_v21 = vpop.f32.mrf.mxu2 }
 0x5a8   : > { %v1651_v22 = vsel %vm1258_vm14, %v1643_v21, -1e+30 }
 0x5a9   : > { %v1656_v24 = vsel %vm1435_vm15, %v1651_v22, -inf }
 0x5aa   : > { %1657 = vmax.xlane.f32.xlu2 %v1656_v24 }
 0x5af   : > { %v1646_v25 = vpop.f32.mrf.mxu2 }
 0x5b0   : > { %v1652_v6 = vsel %vm1258_vm14, %v1646_v25, -1e+30 }
 0x5b7   : > { %v1648_v26 = vpop.f32.mrf.mxu2 }
 0x5c1   : > { %v1553_v27 = vpop.xlane.xlu0 %1552 }
 0x5c2   : > { %v1556_v28 = vsub.f32 %v1544_v58, %v1553_v27  ;;  %1582 = vrot.lane.b32.xlu2 %v5254_v40, %s4899_s16  ;;  %s4904_s16 = smov 24  }
 0x5c4   : > { %v1561_v29 = vmul.f32 1.442695, %v1556_v28 }
 0x5c6   : > { %4602 = vpow2.f32 %v1561_v29 }
 0x5c9   : > { %v1565_v53 = vpop.xlane.xlu0 %1564 }
 0x5cc   : > { %v4603_v30 = vpop.eup %4602 }
 0x5cd   : > { %v1569_v32 = vsel %vm1435_vm15, %v4603_v30, 0.0 }
 0x5ce   : > { %1570 = vadd.xlane.f32.xlu1 %v1569_v32 }
 0x5d6   : > { %1768 = vmax.xlane.f32.xlu1 %v1767_v34 }
 0x5e1   : > { %v1763_v35 = vpop.xlane.xlu1 %1762 }
 0x5e2   : > { %v1770_v36 = vsub.f32 %v1758_v3, %v1763_v35  ;;  %v1581_v3 = vpop.permute.xlu0 %1580 }
 0x5e4   : > { %v1773_v38 = vmul.f32 1.442695, %v1770_v36 }
 0x5e6   : > { %4604 = vpow2.f32 %v1773_v38 }
 0x5e9   : > { %v1766_v39 = vpop.xlane.xlu2 %1765  ;;  %v1568_v47 = vpop.xlane.xlu1 %1567 }
 0x5ea   : > { %v1771_v41 = vsub.f32 %v1759_v7, %v1766_v39  ;;  %v1659_v7 = vsel %vm1435_vm15, %v1652_v6, -inf }
 0x5ec   : > { %v5354_v42 = vpop.eup %4604  ;;  %v1775_v43 = vmul.f32 1.442695, %v1771_v41 }
 0x5ed   : > { %v1779_v44 = vsel %vm1435_vm15, %v5354_v42, 0.0 }
 0x5ee   : > { %4606 = vpow2.f32 %v1775_v43  ;;  %1780 = vadd.xlane.f32.xlu1 %v1779_v44 }
 0x5f4   : > { %v4607_v45 = vpop.eup %4606 }
 0x5f5   : > { %v1782_v46 = vsel %vm1435_vm15, %v4607_v45, 0.0 }
 0x5f6   : > { %1783 = vadd.xlane.f32.xlu1 %v1782_v46 }
 0x60f   : > { %1690 = vrot.lane.b32.xlu1 %v5254_v40, %s4900_s26 }
 0x615   : > { %v1655_v48 = vpop.xlane.xlu1 %1654 }
 0x616   : > { %v1662_v49 = vsub.f32 %v1650_v17, %v1655_v48 }
 0x618   : > { %v1665_v50 = vmul.f32 1.442695, %v1662_v49 }
 0x61a   : > { %4608 = vpow2.f32 %v1665_v50 }
 0x61b   : > { %4610 = vrcp.f32 %v1568_v47 }
 0x61c   : > { %4612 = vrcp.f32 %v1565_v53 }
 0x61d   : > { %v1658_v51 = vpop.xlane.xlu2 %1657 }
 0x61e   : > { %v1663_v54 = vsub.f32 %v1651_v22, %v1658_v51 }
 0x620   : > { %v4609_v55 = vpop.eup %4608  ;;  %v1667_v56 = vmul.f32 1.442695, %v1663_v54 }
 0x621   : > { %v1671_v57 = vsel %vm1435_vm15, %v4609_v55, 0.0  ;;  %v4611_v58 = vpop.eup %4610 }
 0x622   : > { %4614 = vpow2.f32 %v1667_v56  ;;  %1672 = vadd.xlane.f32.xlu0 %v1671_v57  ;;  %v4613_v62 = vpop.eup %4612  ;;  %v1576_v0 = vmul.f32 %v4611_v58, %v5329_v5 }
 0x623   : > { %v1575_v2 = vmul.f32 %v4613_v62, %v5320_v61 }
 0x625   : > { %v1583_v59 = vpop.permute.xlu2 %1582  ;;  %v1578_v4 = vpack.c.bf16 %v1576_v0, %v1575_v2 }
 0x626   : > { %v1592_v60 = vsel %vm1482_vm13, %v1583_v59, 0 }
 0x627   : > { %1600 = vmatpush.bf16.msrb.mxu0 %v1592_v60 }
 0x628   : > { %v4615_v63 = vpop.eup %4614 }
 0x629   : > { %v1674_v1 = vsel %vm1435_vm15, %v4615_v63, 0.0 }
 0x62a   : > { %1675 = vadd.xlane.f32.xlu2 %v1674_v1 }
 0x62b   : > { %1601 = vmatpush.bf16.msrb.mxu0 %v1581_v3 }
 0x62e   : > { %4111 = vmatmul.msk.bf16.vlgmr.msrb.gmra.mxu0 %vm1435_vm15, %v1578_v4 }
 0x636   : > { %1798 = vrot.lane.b32.xlu0 %v5254_v40, %s4901_s22 }
 0x639   : > { %1660 = vmax.xlane.f32.xlu1 %v1659_v7  ;;  %v4368_v7 = vld [vmem:[%s5170_s11 + $0x8] sm:$0xff] }
 0x63a   : > { %1904 = vmatpush.bf16.msra.mxu2 %v4368_v7 }
 0x641   : > { %v1571_v5 = vpop.xlane.xlu1 %1570 }
 0x642   : > { %4616 = vrcp.f32 %v1571_v5  ;;  %1688 = vrot.lane.b32.xlu2 %v5251_v37, %s4900_s26  ;;  %v4367_v5 = vld [vmem:[%s5170_s11] sm:$0xff] }
 0x643   : > { %1905 = vmatpush.bf16.msra.mxu2 %v4367_v5 }
 0x648   : > { %v4617_v61 = vpop.eup %4616 }
 0x649   : > { %v1577_v8 = vmul.f32 %v4617_v61, %v4603_v30  ;;  %v1769_v9 = vpop.xlane.xlu1 %1768 }
 0x64a   : > { %v1772_v12 = vsub.f32 %v1760_v33, %v1769_v9 }
 0x64b   : > { %v1579_v10 = vpack.c.bf16 %v1577_v8, %v1577_v8 }
 0x64c   : > { %v1777_v15 = vmul.f32 1.442695, %v1772_v12 }
 0x64d   : > { %4112 = vmatmul.msk.bf16.gmra.mxu0 %vm1435_vm15, %v1579_v10 }
 0x64e   : > { %4618 = vpow2.f32 %v1777_v15 }
 0x652   : > { %1796 = vrot.lane.b32.xlu1 %v5251_v37, %s4901_s22 }
 0x654   : > { %v4619_v40 = vpop.eup %4618 }
 0x655   : > { %v1785_v16 = vsel %vm1435_vm15, %v4619_v40, 0.0 }
 0x660   : > { %1786 = vadd.xlane.f32.xlu0 %v1785_v16 }
 0x661   : > { %v1781_v17 = vpop.xlane.xlu1 %1780 }
 0x662   : > { %4620 = vrcp.f32 %v1781_v17 }
 0x668   : > { %v4621_v21 = vpop.eup %4620 }
 0x669   : > { %v1784_v18 = vpop.xlane.xlu1 %1783  ;;  %v1791_v24 = vmul.f32 %v4621_v21, %v5354_v42 }
 0x66a   : > { %4622 = vrcp.f32 %v1784_v18 }
 0x670   : > { %v4623_v22 = vpop.eup %4622 }
 0x671   : > { %v1792_v25 = vmul.f32 %v4623_v22, %v4607_v45 }
 0x673   : > { %v1794_v26 = vpack.c.bf16 %v1792_v25, %v1791_v24 }
 0x681   : > { %v1691_v27 = vpop.permute.xlu1 %1690 }
 0x682   : > { %v1700_v28 = vsel %vm1482_vm13, %v1691_v27, 0 }
 0x683   : > { %1708 = vmatpush.bf16.msrb.mxu1 %v1700_v28 }
 0x695   : > { %v1673_v37 = vpop.xlane.xlu0 %1672 }
 0x696   : > { %4624 = vrcp.f32 %v1673_v37 }
 0x69c   : > { %v4625_v30 = vpop.eup %4624 }
 0x69d   : > { %v1676_v29 = vpop.xlane.xlu2 %1675  ;;  %v1683_v33 = vmul.f32 %v4625_v30, %v4609_v55 }
 0x69e   : > { %4626 = vrcp.f32 %v1676_v29 }
 0x6a4   : > { %v4627_v32 = vpop.eup %4626 }
 0x6a5   : > { %v1684_v34 = vmul.f32 %v4627_v32, %v4615_v63  ;;  %v1689_v35 = vpop.permute.xlu2 %1688 }
 0x6a6   : > { %1709 = vmatpush.bf16.msrb.mxu1 %v1689_v35  ;;  %v4573_v35 = vld [vmem:[%s1126_s8] ss:$0 sm:$0xff] }
 0x6a7   : > { %v1686_v36 = vpack.c.bf16 %v1684_v34, %v1683_v33 }
 0x6a8   : > { %v1799_v38 = vpop.permute.xlu0 %1798 }
 0x6a9   : > { %v1808_v39 = vsel %vm1482_vm13, %v1799_v38, 0  ;;  %4115 = vmatmul.msk.bf16.vlgmr.msrb.gmra.mxu1 %vm1435_vm15, %v1686_v36 }
 0x6aa   : > { %1816 = vmatpush.bf16.msra.mxu0 %v1808_v39 }
 0x6ab   : > { %v1603_v41 = vpop.f32.mrf.mxu0 }
 0x6ac   : > { %v1661_v42 = vpop.xlane.xlu1 %1660 }
 0x6ad   : > { %v1664_v43 = vsub.f32 %v1652_v6, %v1661_v42 }
 0x6af   : > { %v1669_v44 = vmul.f32 1.442695, %v1664_v43 }
 0x6b1   : > { %4628 = vpow2.f32 %v1669_v44 }
 0x6b3   : > { %v1605_v45 = vpop.f32.mrf.mxu0 }
 0x6b4   : > { %v4555_v46 = vpack.i.bf16 %v1605_v45, %v1603_v41 }
 0x6b6   : > { %4556 = vrot.lane.b32.xlu2 %v4555_v46, %s6131_s1 }
 0x6b7   : > { %v4629_v47 = vpop.eup %4628 }
 0x6b8   : > { %v1677_v48 = vsel %vm1435_vm15, %v4629_v47, 0.0 }
 0x6b9   : > { %1678 = vadd.xlane.f32.xlu1 %v1677_v48 }
 0x6c4   : > { %v1797_v49 = vpop.permute.xlu1 %1796 }
 0x6c5   : > { %1817 = vmatpush.bf16.msra.mxu0 %v1797_v49 }
 0x6c8   : > { %4119 = vmatmul.msk.bf16.vlgmr.msra.gmra.mxu0 %vm1435_vm15, %v1794_v26 }
 0x6ca   : > { %v1608_v50 = vpop.f32.mrf.mxu0 }
 0x6d2   : > { %v1610_v51 = vpop.f32.mrf.mxu0 }
 0x6d3   : > { %v1787_v53 = vpop.xlane.xlu0 %1786 }
 0x6d4   : > { %4630 = vrcp.f32 %v1787_v53 }
 0x6da   : > { %v4631_v54 = vpop.eup %4630 }
 0x6db   : > { %v1793_v55 = vmul.f32 %v4631_v54, %v4619_v40 }
 0x6dd   : > { %v1795_v56 = vpack.c.bf16 %v1793_v55, %v1793_v55 }
 0x6df   : > { %4120 = vmatmul.msk.bf16.gmra.mxu0 %vm1435_vm15, %v1795_v56 }
 0x710   : > { %v4557_v61 = vpop.permute.xlu2 %4556 }
 0x711   : > { %v4559_v9 = vunpack.i.h.bf16 %v4557_v61  ;;  %v4558_v10 = vunpack.i.l.bf16 %v4557_v61 }
 0x713   : > { %v1865_v16 = vsel %vm1401_vm12, %v5338_v13, %v4559_v9  ;;  %v1864_v17 = vsel %vm1401_vm12, %v5336_v11, %v4558_v10 }
 0x726   : > { %v1711_v57 = vpop.f32.mrf.mxu1 }
 0x72c   : > { %v1679_v58 = vpop.xlane.xlu1 %1678 }
 0x72d   : > { %4632 = vrcp.f32 %v1679_v58  ;;  %v4370_v58 = vld [vmem:[%s5179_s17 + $0x8] sm:$0xff] }
 0x72e   : > { %v1713_v59 = vpop.f32.mrf.mxu1  ;;  %2040 = vmatpush.bf16.msra.mxu1 %v4370_v58 }
 0x72f   : > { %v4560_v60 = vpack.i.bf16 %v1713_v59, %v1711_v57 }
 0x731   : > { %4561 = vrot.lane.b32.xlu2 %v4560_v60, %s4903_s15 }
 0x733   : > { %v4633_v62 = vpop.eup %4632 }
 0x734   : > { %v1685_v63 = vmul.f32 %v4633_v62, %v4629_v47  ;;  %v4369_v62 = vld [vmem:[%s5179_s17] sm:$0xff] }
 0x735   : > { %2041 = vmatpush.bf16.msra.mxu1 %v4369_v62 }
 0x736   : > { %v1687_v0 = vpack.c.bf16 %v1685_v63, %v1685_v63 }
 0x738   : > { %4116 = vmatmul.msk.bf16.gmra.mxu1 %vm1435_vm15, %v1687_v0 }
 0x745   : > { %v1819_v1 = vpop.f32.mrf.mxu0 }
 0x74d   : > { %v1821_v2 = vpop.f32.mrf.mxu0 }
 0x74e   : > { %v4565_v3 = vpack.i.bf16 %v1821_v2, %v1819_v1 }
 0x750   : > { %4566 = vrot.lane.b32.xlu2 %v4565_v3, %s4904_s16 }
 0x758   : > { %1835 = vrot.lane.b32.xlu2 %v1608_v50, %s6131_s1 }
 0x75c   : > { %v1824_v4 = vpop.f32.mrf.mxu0 }
 0x760   : > { %1859 = vrot.lane.b32.xlu2 %v1824_v4, %s4904_s16 }
 0x764   : > { %v1826_v6 = vpop.f32.mrf.mxu0 }
 0x78b   : > { %v4562_v8 = vpop.permute.xlu2 %4561 }
 0x78c   : > { %v4564_v12 = vunpack.i.h.bf16 %v4562_v8  ;;  %v4563_v15 = vunpack.i.l.bf16 %v4562_v8 }
 0x78e   : > { %v1869_v22 = vsel %vm1867_vm0, %v1865_v16, %v4564_v12  ;;  %v1868_v24 = vsel %vm1867_vm0, %v1864_v17, %v4563_v15 }
 0x7aa   : > { %v4567_v40 = vpop.permute.xlu2 %4566 }
 0x7ab   : > { %v4569_v18 = vunpack.i.h.bf16 %v4567_v40  ;;  %v4568_v21 = vunpack.i.l.bf16 %v4567_v40 }
 0x7ad   : > { %v1872_v25 = vsel %vm1435_vm15, %v1869_v22, %v4569_v18  ;;  %v1871_v26 = vsel %vm1435_vm15, %v1868_v24, %v4568_v21  ;;  %v4574_v22 = vld [vmem:[%s1129_s23] ss:$0 sm:$0xff] }
 0x7ae   : > { %v1874_v27 = vpack.c.bf16 %v1872_v25, %v1871_v26 }
 0x7b0   : > { %4129 = vmatmul.msk.bf16.vlgmr.msra.gmra.mxu2 %vm1261_vm1, %v1874_v27 }
 0x7b2   : > { %v1836_v11 = vpop.permute.xlu2 %1835 }
 0x7b3   : > { %v1866_v37 = vsel %vm1401_vm12, %v5340_v14, %v1836_v11 }
 0x7b5   : > { %v1716_v28 = vpop.f32.mrf.mxu1 }
 0x7b6   : > { %1847 = vrot.lane.b32.xlu1 %v1716_v28, %s4903_s15  ;;  %v4575_v28 = vld [vmem:[%s1132_s0] ss:$0 sm:$0xff] }
 0x7ba   : > { %v1860_v30 = vpop.permute.xlu2 %1859 }
 0x7bd   : > { %v1718_v13 = vpop.f32.mrf.mxu1 }
 0x828   : > { %v1848_v29 = vpop.permute.xlu1 %1847 }
 0x829   : > { %v1870_v32 = vsel %vm1867_vm0, %v1866_v37, %v1848_v29 }
 0x82a   : > { %v1873_v33 = vsel %vm1435_vm15, %v1870_v32, %v1860_v30 }
 0x82b   : > { %v1875_v34 = vpack.c.bf16 %v1873_v33, %v1873_v33 }
 0x82d   : > { %4130 = vmatmul.msk.bf16.gmra.mxu2 %vm1261_vm1, %v1875_v34 }
 0x833   : > { %v1907_v36 = vpop.f32.mrf.mxu2 }
 0x834   : > { %v1916_v38 = vadd.f32 %v1907_v36, %v5207_v19 }
 0x836   : > { %v5408_v39 = vadd.f32 %v4573_v35, %v1916_v38 }
 0x838   : > { %v1928_v41 = vsel %vm1261_vm1, %v5408_v39, 0.0 }
 0x839   : > { %1929 = vadd.xlane.f32.xlu0 %v1928_v41  ;;  %v4378_v41 = vld [vmem:[%s5187_s5 + $0x38] sm:$0xff] }
 0x83a   : > { %2149 = vmatpush.bf16.msra.mxu3 %v4378_v41 }
 0x83b   : > { %v1909_v14 = vpop.f32.mrf.mxu2 }
 0x83c   : > { %v1917_v42 = vadd.f32 %v1909_v14, %v5215_v23 }
 0x83e   : > { %v5413_v43 = vadd.f32 %v4573_v35, %v1917_v42 }
 0x840   : > { %v1931_v44 = vsel %vm1261_vm1, %v5413_v43, 0.0 }
 0x841   : > { %1932 = vadd.xlane.f32.xlu2 %v1931_v44  ;;  %v4377_v44 = vld [vmem:[%s5187_s5 + $0x30] sm:$0xff] }
 0x842   : > { %2150 = vmatpush.bf16.msra.mxu3 %v4377_v44 }
 0x8ac   : > { %v1930_v45 = vpop.xlane.xlu0 %1929 }
 0x8ad   : > { %v1937_v47 = vmul.f32 %v1930_v45, %v5219_v31 }
 0x8af   : > { %v1940_v50 = vsub.f32 %v5408_v39, %v1937_v47  ;;  %v4376_v47 = vld [vmem:[%s5187_s5 + $0x28] sm:$0xff] }
 0x8b0   : > { %v1912_v46 = vpop.f32.mrf.mxu2  ;;  %2151 = vmatpush.bf16.msra.mxu3 %v4376_v47 }
 0x8b1   : > { %v1918_v19 = vadd.f32 %v1912_v46, %v5209_v20  ;;  %v1943_v56 = vmul.f32 %v1940_v50, %v1940_v50 }
 0x8b3   : > { %v5419_v48 = vadd.f32 %v4573_v35, %v1918_v19  ;;  %v1946_v20 = vsel %vm1261_vm1, %v1943_v56, 0.0  ;;  %v4372_v56 = vld [vmem:[%s5187_s5 + $0x8] sm:$0xff] }
 0x8b4   : > { %v1933_v49 = vpop.xlane.xlu2 %1932 }
 0x8b5   : > { %v1938_v23 = vmul.f32 %v1933_v49, %v5219_v31  ;;  %v1934_v51 = vsel %vm1261_vm1, %v5419_v48, 0.0 }
 0x8b6   : > { %1935 = vadd.xlane.f32.xlu0 %v1934_v51 }
 0x8b7   : > { %v1941_v53 = vsub.f32 %v5413_v43, %v1938_v23 }
 0x8b8   : > { %v1914_v54 = vpop.f32.mrf.mxu2 }
 0x8b9   : > { %v1944_v55 = vmul.f32 %v1941_v53, %v1941_v53 }
 0x8bb   : > { %v1949_v57 = vsel %vm1261_vm1, %v1944_v55, 0.0  ;;  %v4373_v55 = vld [vmem:[%s5187_s5 + $0x10] sm:$0xff] }
 0x8bc   : > { %1950 = vadd.xlane.f32.xlu1 %v1949_v57  ;;  %v4576_v57 = vld [vmem:[%s1140_s9] ss:$0 sm:$0xff]  ;;  %s6198_s9 = sld [smem:[#allocation35_spill]] }
 0x8be   : > { %1947 = vadd.xlane.f32.xlu0 %v1946_v20  ;;  %v4371_v20 = vld [vmem:[%s5187_s5] sm:$0xff] }
 0x8c2   : > { %p4173_p1 = scmp.ne.s32.totalorder %s6198_s9, 1 }
 0x8c3   : > { %s6199_s17 = sld [smem:[#allocation18_spill]] (!%p4173_p1)  ;;  %s4905_s23 = smov (!%p4173_p1), 120  }
 0x8c4   : > { %s6200_s8 = sld [smem:[#allocation16_spill]] (!%p4173_p1)  ;;  %s4906_s0 = smov (!%p4173_p1), 112  }
 0x8c5   : > { %s6201_s11 = sld [smem:[#allocation14_spill]] (!%p4173_p1)  ;;  %s4908_s15 = smov (!%p4173_p1), 8  }
 0x8c6   : > { %s6202_s26 = sld [smem:[#allocation15_spill]] (!%p4173_p1) }
 0x8c7   : > { %s6203_s22 = sld [smem:[#allocation17_spill]] (!%p4173_p1) }
 0x8c8   : > { %s6205_s16 = sld [smem:[#allocation19_spill]] (!%p4173_p1) }
 0x8ce   : > { %s6206_s9 = smov (!%p4173_p1), %s6205_s16 }
 0x929   : > { %v1936_v59 = vpop.xlane.xlu0 %1935 }
 0x92a   : > { %v1939_v60 = vmul.f32 %v1936_v59, %v5219_v31 }
 0x92c   : > { %v5432_v63 = vsub.f32 %v5419_v48, %v1939_v60 }
 0x92e   : > { %v1945_v0 = vmul.f32 %v5432_v63, %v5432_v63 }
 0x92f   : > { %v1951_v1 = vpop.xlane.xlu1 %1950 }
 0x930   : > { %v1956_v2 = vmul.f32 %v1951_v1, %v5219_v31  ;;  %v1952_v3 = vsel %vm1261_vm1, %v1945_v0, 0.0 }
 0x931   : > { %1953 = vadd.xlane.f32.xlu0 %v1952_v3  ;;  %v1948_v4 = vpop.xlane.xlu0 %1947 }
 0x932   : > { %v1959_v6 = vadd.f32 1e-06, %v1956_v2  ;;  %v1955_v7 = vmul.f32 %v1948_v4, %v5219_v31 }
 0x934   : > { %4634 = vrsqrt.f32 %v1959_v6  ;;  %v1958_v5 = vadd.f32 1e-06, %v1955_v7  ;;  %vm1977_vm3 = vweird.f32 %v1959_v6 }
 0x936   : > { %4636 = vrsqrt.f32 %v1958_v5  ;;  %vm1967_vm6 = vweird.f32 %v1958_v5 }
 0x93a   : > { %v4635_v61 = vpop.eup %4634 }
 0x93b   : > { %v1972_v8 = vmul.f32 %v4635_v61, %v1959_v6  ;;  %vm1978_vm2 = vweird.f32 %v4635_v61 }
 0x93c   : > { %v4637_v9 = vpop.eup %4636  ;;  %vm1979_vm5 = vmor %vm1977_vm3, %vm1978_vm2 }
 0x93d   : > { %v1973_v10 = vmul.f32 %v4635_v61, %v1972_v8  ;;  %v1962_v12 = vmul.f32 %v4637_v9, %v1958_v5  ;;  %vm1968_vm4 = vweird.f32 %v4637_v9 }
 0x93e   : > { %vm1969_vm7 = vmor %vm1967_vm6, %vm1968_vm4 }
 0x93f   : > { %v1974_v15 = vmul.f32 0.5, %v1973_v10  ;;  %v1963_v40 = vmul.f32 %v4637_v9, %v1962_v12 }
 0x941   : > { %v1975_v16 = vsub.f32 1.5, %v1974_v15  ;;  %v1964_v17 = vmul.f32 0.5, %v1963_v40 }
 0x943   : > { %v1976_v18 = vmul.f32 %v4635_v61, %v1975_v16  ;;  %v1965_v21 = vsub.f32 1.5, %v1964_v17 }
 0x945   : > { %v1980_v24 = vsel %vm1979_vm5, %v4635_v61, %v1976_v18  ;;  %v1966_v25 = vmul.f32 %v4637_v9, %v1965_v21 }
 0x946   : > { %v1992_v26 = vmul.f32 %v1980_v24, %v1941_v53  ;;  %v4374_v53 = vld [vmem:[%s5187_s5 + $0x18] sm:$0xff] }
 0x947   : > { %v1970_v27 = vsel %vm1969_vm7, %v4637_v9, %v1966_v25 }
 0x948   : > { %v1998_v13 = vmul.f32 %v4574_v22, %v1992_v26  ;;  %v1991_v11 = vmul.f32 %v1970_v27, %v1940_v50  ;;  %v4375_v50 = vld [vmem:[%s5187_s5 + $0x20] sm:$0xff]  ;;  %s6197_s5 = scalar_lea.vmem %s5056_s21, %s5154_s10  ;;  %s4907_s10 = smov (!%p4173_p1), 104  }
 0x949   : > { %2152 = vmatpush.bf16.msra.mxu3 %v4375_v50 }
 0x94a   : > { %v1997_v37 = vmul.f32 %v4574_v22, %v1991_v11  ;;  %v2004_v29 = vadd.f32 %v4575_v28, %v1998_v13 }
 0x94c   : > { %v2003_v30 = vadd.f32 %v4575_v28, %v1997_v37 }
 0x94d   : > { %2153 = vmatpush.bf16.msra.mxu3 %v4374_v53 }
 0x94e   : > { %v2006_v32 = vpack.c.bf16 %v2004_v29, %v2003_v30 }
 0x950   : > { %4139 = vmatmul.msk.bf16.vlgmr.msra.gmra.mxu1 %vm1261_vm1, %v2006_v32 }
 0x951   : > { %2154 = vmatpush.bf16.msra.mxu3 %v4373_v55 }
 0x955   : > { %2155 = vmatpush.bf16.msra.mxu3 %v4372_v56 }
 0x959   : > { %2156 = vmatpush.bf16.msra.mxu3 %v4371_v20 }
 0x9a4   : > { %v1954_v33 = vpop.xlane.xlu0 %1953 }
 0x9a5   : > { %v1957_v34 = vmul.f32 %v1954_v33, %v5219_v31  ;;  %v4577_v33 = vld [vmem:[%s6197_s5] ss:$0 sm:$0xff]  ;;  %s6204_s5 = smov (!%p4173_p1), %s6203_s22 }
 0x9a7   : > { %v1960_v35 = vadd.f32 1e-06, %v1957_v34 }
 0x9a9   : > { %4638 = vrsqrt.f32 %v1960_v35  ;;  %vm1987_vm9 = vweird.f32 %v1960_v35 }
 0x9af   : > { %v4639_v36 = vpop.eup %4638 }
 0x9b0   : > { %v1982_v38 = vmul.f32 %v4639_v36, %v1960_v35  ;;  %vm1988_vm8 = vweird.f32 %v4639_v36 }
 0x9b1   : > { %vm1989_vm10 = vmor %vm1987_vm9, %vm1988_vm8 }
 0x9b2   : > { %v1983_v14 = vmul.f32 %v4639_v36, %v1982_v38 }
 0x9b4   : > { %v1984_v42 = vmul.f32 0.5, %v1983_v14 }
 0x9b6   : > { %v1985_v45 = vsub.f32 1.5, %v1984_v42 }
 0x9b8   : > { %v1986_v46 = vmul.f32 %v4639_v36, %v1985_v45 }
 0x9ba   : > { %v1990_v19 = vsel %vm1989_vm10, %v4639_v36, %v1986_v46 }
 0x9bb   : > { %v1993_v49 = vmul.f32 %v1990_v19, %v5432_v63 }
 0x9bd   : > { %v1999_v23 = vmul.f32 %v4574_v22, %v1993_v49 }
 0x9bf   : > { %v2005_v51 = vadd.f32 %v4575_v28, %v1999_v23 }
 0x9c1   : > { %v2007_v54 = vpack.c.bf16 %v2005_v51, %v2005_v51 }
 0x9c3   : > { %4140 = vmatmul.msk.bf16.gmra.mxu1 %vm1261_vm1, %v2007_v54 }
 0x9cd   : > { %v2043_v58 = vpop.f32.mrf.mxu1 }
 0x9ce   : > { %v2044_v59 = vadd.f32 %v4576_v57, %v2043_v58 }
 0x9d0   : > { %v2052_v60 = vmul.f32 %v2044_v59, %v2044_v59 }
 0x9d2   : > { %v2055_v62 = vmul.f32 %v2052_v60, %v2044_v59 }
 0x9d4   : > { %v2058_v63 = vmul.f32 0.044715, %v2055_v62 }
 0x9d5   : > { %v2045_v0 = vpop.f32.mrf.mxu1 }
 0x9d6   : > { %v2061_v1 = vadd.f32 %v2058_v63, %v2044_v59  ;;  %v2046_v2 = vadd.f32 %v4576_v57, %v2045_v0 }
 0x9d8   : > { %v2064_v3 = vmul.f32 0.7978846, %v2061_v1  ;;  %v2053_v4 = vmul.f32 %v2046_v2, %v2046_v2 }
 0x9da   : > { %v2056_v6 = vmul.f32 %v2053_v4, %v2046_v2  ;;  %4640 = vtanh.f32 %v2064_v3 }
 0x9dc   : > { %v2059_v7 = vmul.f32 0.044715, %v2056_v6 }
 0x9de   : > { %v2062_v5 = vadd.f32 %v2059_v7, %v2046_v2 }
 0x9e0   : > { %v2065_v61 = vmul.f32 0.7978846, %v2062_v5  ;;  %v4641_v8 = vpop.eup %4640 }
 0x9e1   : > { %v2070_v9 = vadd.f32 1.0, %v4641_v8 }
 0x9e2   : > { %4642 = vtanh.f32 %v2065_v61 }
 0x9e3   : > { %v2073_v12 = vmul.f32 0.5, %v2070_v9 }
 0x9e5   : > { %v2076_v16 = vmul.f32 %v2073_v12, %v2044_v59 }
 0x9e8   : > { %v4643_v10 = vpop.eup %4642 }
 0x9e9   : > { %v2071_v15 = vadd.f32 1.0, %v4643_v10 }
 0x9eb   : > { %v2074_v40 = vmul.f32 0.5, %v2071_v15 }
 0x9ed   : > { %v2077_v17 = vmul.f32 %v2074_v40, %v2046_v2 }
 0x9ef   : > { %v2079_v18 = vpack.c.bf16 %v2077_v17, %v2076_v16 }
 0x9f1   : > { %2157 = vmatmul.bf16.vlgmr.msra.gmra.mxu3 %v2079_v18 }
 0xa40   : > { %v2048_v21 = vpop.f32.mrf.mxu1 }
 0xa41   : > { %v2049_v22 = vadd.f32 %v4576_v57, %v2048_v21 }
 0xa43   : > { %v2054_v24 = vmul.f32 %v2049_v22, %v2049_v22 }
 0xa45   : > { %v2057_v25 = vmul.f32 %v2054_v24, %v2049_v22 }
 0xa47   : > { %v2060_v26 = vmul.f32 0.044715, %v2057_v25 }
 0xa48   : > { %v2050_v27 = vpop.f32.mrf.mxu1 }
 0xa49   : > { %v2063_v28 = vadd.f32 %v2060_v26, %v2049_v22 }
 0xa4b   : > { %v2066_v13 = vmul.f32 0.7978846, %v2063_v28 }
 0xa4d   : > { %4644 = vtanh.f32 %v2066_v13 }
 0xa53   : > { %v4645_v11 = vpop.eup %4644 }
 0xa54   : > { %v2072_v37 = vadd.f32 1.0, %v4645_v11 }
 0xa56   : > { %v2075_v29 = vmul.f32 0.5, %v2072_v37 }
 0xa58   : > { %v2078_v30 = vmul.f32 %v2075_v29, %v2049_v22 }
 0xa5a   : > { %v2080_v32 = vpack.c.bf16 %v2078_v30, %v2078_v30 }
 0xa5c   : > { %2162 = vmatmul.bf16.gmra.mxu3 %v2080_v32 }
 0xa74   : > { %v2158_v34 = vpop.f32.mrf.mxu3 }
 0xa75   : > { %v2159_v35 = vadd.f32 %v4577_v33, %v2158_v34 }
 0xa77   : > { %v5464_v36 = vadd.f32 %v2159_v35, %v5408_v39 }
 0xa79   : > { %2170 = vst.msk [vmem:[#allocation2] sm:$0xff] %vm1261_vm1, %v5464_v36 }
 0xa7c   : > { %v2160_v38 = vpop.f32.mrf.mxu3 }
 0xa7d   : > { %v2161_v41 = vadd.f32 %v4577_v33, %v2160_v38 }
 0xa7f   : > { %v5469_v14 = vadd.f32 %v2161_v41, %v5413_v43 }
 0xa81   : > { %2171 = vst.msk [vmem:[#allocation2 + $0x8] sm:$0xff] %vm1261_vm1, %v5469_v14 }
 0xadf   : > { %v2163_v42 = vpop.f32.mrf.mxu3 }
 0xae0   : > { %v2164_v44 = vadd.f32 %v4577_v33, %v2163_v42 }
 0xae2   : > { %v2169_v45 = vadd.f32 %v2164_v44, %v5419_v48 }
 0xae3   : > { %2176 = sbr.rel (%p4173_p1) target bundleno = 5740 (0x166c), region = 140 }
 0xae4   : > { %2172 = vst.msk [vmem:[#allocation2 + $0x10] sm:$0xff] %vm1261_vm1, %v2169_v45 }
 0xae7   : > { %v2165_v46 = vpop.f32.mrf.mxu3 }
 0xae8   : > { %v2185_v39 = vsel %vm1261_vm1, %v2169_v45, 0.0  ;;  %v4396_v50 = vld [vmem:[%s6199_s17 + $0x8] sm:$0xff]  ;;  %v4395_v23 = vld [vmem:[%s6199_s17] sm:$0xff]  ;;  %v4385_v51 = vld [vmem:[%s6200_s8 + $0x30] sm:$0xff]  ;;  %vm2322_vm2 = vcmp.lt.s32.totalorder %v5271_v52, 8  ;;  %vm2405_vm3 = vcmask 1040384  }
 0xae9   : > { %2186 = vadd.xlane.f32.xlu0 %v2185_v39  ;;  %2315 = vmatpush.bf16.msra.mxu0 %v4396_v50  ;;  %v4386_v53 = vld [vmem:[%s6200_s8 + $0x38] sm:$0xff]  ;;  %v4384_v20 = vld [vmem:[%s6200_s8 + $0x28] sm:$0xff]  ;;  %v2386_v58 = vsel %vm1401_vm12, %v4385_v51, 0  ;;  %v5498_v4 = vld [vmem:[%s6201_s11] ss:$0 sm:$0xff]  ;;  %s6133_s11 = smov 16  }
 0xaea   : > { %2509 = vrot.lane.b32.xlu2 %v4385_v51, %s4905_s23  ;;  %v2389_v56 = vsel %vm1401_vm12, %v4386_v53, 0  ;;  %2511 = vrot.lane.b32.xlu1 %v4386_v53, %s4905_s23  ;;  %v2383_v63 = vsel %vm1401_vm12, %v4384_v20, 0  ;;  %v4382_v1 = vld [vmem:[%s6200_s8 + $0x18] sm:$0xff]  ;;  %v4383_v6 = vld [vmem:[%s6200_s8 + $0x20] sm:$0xff] }
 0xaeb   : > { %2391 = vmatpush.bf16.xpose.msra.mxu1 %v2389_v56  ;;  %v5502_v61 = vld [vmem:[%s6202_s26] ss:$0 sm:$0xff]  ;;  %v2380_v8 = vsel %vm1401_vm12, %v4383_v6, 0  ;;  %v4381_v10 = vld [vmem:[%s6200_s8 + $0x10] sm:$0xff]  ;;  %v2377_v40 = vsel %vm1401_vm12, %v4382_v1, 0  ;;  %v4380_v17 = vld [vmem:[%s6200_s8 + $0x8] sm:$0xff] }
 0xaec   : > { %v2374_v16 = vsel %vm1401_vm12, %v4381_v10, 0  ;;  %v2371_v18 = vsel %vm1401_vm12, %v4380_v17, 0  ;;  %v5519_v21 = vld [vmem:[%s6200_s8] sm:$0xff]  ;;  %s6207_s26 = sld [smem:[#allocation23_spill]] }
 0xaed   : > { %2316 = vmatpush.bf16.msra.mxu0 %v4395_v23  ;;  %v2368_v22 = vsel %vm1401_vm12, %v5519_v21, 0 }
 0xaf2   : > { %2507 = vrot.lane.b32.xlu2 %v4384_v20, %s4905_s23  ;;  %2755 = vrot.lane.b32.xlu1 %v4385_v51, %s4907_s10  ;;  %s6208_s1 = smov %s6207_s26 }
 0xaf3   : > { %2392 = vmatpush.bf16.xpose.msra.mxu1 %v2386_v58  ;;  %v5558_v58 = vld [vmem:[%s6204_s5 + $0x30] sm:$0xff] }
 0xafa   : > { %2757 = vrot.lane.b32.xlu2 %v4386_v53, %s4907_s10  ;;  %2753 = vrot.lane.b32.xlu1 %v4384_v20, %s4907_s10 }
 0xafb   : > { %2393 = vmatpush.bf16.xpose.msra.mxu1 %v2383_v63  ;;  %v5570_v63 = vld [vmem:[%s6204_s5 + $0x20] sm:$0xff] }
 0xb02   : > { %2505 = vrot.lane.b32.xlu2 %v4383_v6, %s4905_s23 }
 0xb03   : > { %2394 = vmatpush.bf16.xpose.msra.mxu1 %v2380_v8 }
 0xb0a   : > { %2632 = vrot.lane.b32.xlu2 %v4385_v51, %s4906_s0 }
 0xb0b   : > { %2395 = vmatpush.bf16.xpose.msra.mxu1 %v2377_v40 }
 0xb12   : > { %2630 = vrot.lane.b32.xlu2 %v4384_v20, %s4906_s0  ;;  %v5554_v20 = vld [vmem:[%s6203_s22 + $0x38] sm:$0xff]  ;;  %s4910_s22 = smov 24  }
 0xb13   : > { %2396 = vmatpush.bf16.xpose.msra.mxu1 %v2374_v16  ;;  %2480 = vmatpush.bf16.msra.mxu2 %v5554_v20 }
 0xb17   : > { %2481 = vmatpush.bf16.msra.mxu2 %v5558_v58 }
 0xb1a   : > { %2628 = vrot.lane.b32.xlu2 %v4383_v6, %s4906_s0 }
 0xb1b   : > { %2397 = vmatpush.bf16.xpose.msra.mxu1 %v2371_v18 }
 0xb22   : > { %2499 = vrot.lane.b32.xlu2 %v4380_v17, %s4905_s23 }
 0xb23   : > { %2398 = vmatpush.bf16.xpose.msra.mxu1 %v2368_v22 }
 0xb2a   : > { %2749 = vrot.lane.b32.xlu2 %v4382_v1, %s4907_s10 }
 0xb32   : > { %2624 = vrot.lane.b32.xlu2 %v4381_v10, %s4906_s0 }
 0xb44   : > { %v2510_v11 = vpop.permute.xlu2 %2509 }
 0xb45   : > { %v2535_v44 = vsel %vm1401_vm12, %v2510_v11, 0 }
 0xb4c   : > { %v2508_v29 = vpop.permute.xlu2 %2507 }
 0xb4d   : > { %v2532_v46 = vsel %vm1401_vm12, %v2508_v29, 0 }
 0xb54   : > { %v2758_v32 = vpop.permute.xlu2 %2757 }
 0xb55   : > { %v2784_v34 = vsel %vm1401_vm12, %v2758_v32, 0 }
 0xb56   : > { %2786 = vmatpush.bf16.xpose.msrb.mxu1 %v2784_v34 }
 0xb5c   : > { %v2187_v43 = vpop.xlane.xlu0 %2186  ;;  %v2512_v30 = vpop.permute.xlu1 %2511 }
 0xb5d   : > { %v2190_v47 = vmul.f32 %v2187_v43, %v5219_v31  ;;  %v2538_v33 = vsel %vm1401_vm12, %v2512_v30, 0 }
 0xb5e   : > { %2540 = vmatpush.bf16.xpose.msra.mxu3 %v2538_v33 }
 0xb5f   : > { %v2193_v19 = vsub.f32 %v2169_v45, %v2190_v47  ;;  %v2506_v45 = vpop.permute.xlu2 %2505 }
 0xb60   : > { %v2529_v47 = vsel %vm1401_vm12, %v2506_v45, 0 }
 0xb61   : > { %v2196_v49 = vmul.f32 %v2193_v19, %v2193_v19 }
 0xb63   : > { %v2203_v48 = vsel %vm1261_vm1, %v2196_v49, 0.0 }
 0xb64   : > { %2204 = vadd.xlane.f32.xlu0 %v2203_v48  ;;  %v2756_v35 = vpop.permute.xlu1 %2755 }
 0xb65   : > { %v2781_v38 = vsel %vm1401_vm12, %v2756_v35, 0 }
 0xb66   : > { %2787 = vmatpush.bf16.xpose.msrb.mxu1 %v2781_v38  ;;  %2541 = vmatpush.bf16.xpose.msra.mxu3 %v2535_v44 }
 0xb67   : > { %v2633_v39 = vpop.permute.xlu2 %2632 }
 0xb68   : > { %v2658_v40 = vsel %vm1401_vm12, %v2633_v39, 0 }
 0xb6c   : > { %v2754_v41 = vpop.permute.xlu1 %2753 }
 0xb6d   : > { %v2778_v42 = vsel %vm1401_vm12, %v2754_v41, 0 }
 0xb6e   : > { %2788 = vmatpush.bf16.xpose.msrb.mxu1 %v2778_v42  ;;  %2542 = vmatpush.bf16.xpose.msra.mxu3 %v2532_v46 }
 0xb76   : > { %2543 = vmatpush.bf16.xpose.msra.mxu3 %v2529_v47 }
 0xb78   : > { %2634 = vrot.lane.b32.xlu0 %v4386_v53, %s4906_s0 }
 0xb80   : > { %2503 = vrot.lane.b32.xlu0 %v4382_v1, %s4905_s23 }
 0xb88   : > { %2501 = vrot.lane.b32.xlu0 %v4381_v10, %s4905_s23 }
 0xbd7   : > { %v2205_v54 = vpop.xlane.xlu0 %2204 }
 0xbd8   : > { %v2208_v55 = vmul.f32 %v2205_v54, %v5219_v31 }
 0xbda   : > { %v2211_v57 = vadd.f32 1e-06, %v2208_v55 }
 0xbdc   : > { %4648 = vrsqrt.f32 %v2211_v57  ;;  %vm2238_vm13 = vweird.f32 %v2211_v57 }
 0xbe2   : > { %v4649_v59 = vpop.eup %4648 }
 0xbe3   : > { %v2233_v60 = vmul.f32 %v4649_v59, %v2211_v57  ;;  %vm2239_vm11 = vweird.f32 %v4649_v59 }
 0xbe4   : > { %vm2240_vm14 = vmor %vm2238_vm13, %vm2239_vm11 }
 0xbe5   : > { %v2234_v62 = vmul.f32 %v4649_v59, %v2233_v60 }
 0xbe7   : > { %v2235_v0 = vmul.f32 0.5, %v2234_v62  ;;  %v5566_v62 = vld [vmem:[%s6204_s5 + $0x28] sm:$0xff] }
 0xbe8   : > { %2482 = vmatpush.bf16.msra.mxu2 %v5566_v62 }
 0xbe9   : > { %v2236_v2 = vsub.f32 1.5, %v2235_v0 }
 0xbea   : > { %v2635_v43 = vpop.permute.xlu0 %2634 }
 0xbeb   : > { %v2237_v3 = vmul.f32 %v4649_v59, %v2236_v2  ;;  %v5578_v2 = vld [vmem:[%s6204_s5 + $0x10] sm:$0xff]  ;;  %v2661_v8 = vsel %vm1401_vm12, %v2635_v43, 0 }
 0xbec   : > { %2483 = vmatpush.bf16.msra.mxu2 %v5570_v63 }
 0xbed   : > { %v2241_v7 = vsel %vm2240_vm14, %v4649_v59, %v2237_v3 }
 0xbee   : > { %v2244_v5 = vmul.f32 %v2241_v7, %v2193_v19  ;;  %v2631_v19 = vpop.permute.xlu2 %2630  ;;  %v5582_v7 = vld [vmem:[%s6204_s5 + $0x8] sm:$0xff] }
 0xbef   : > { %v2655_v18 = vsel %vm1401_vm12, %v2631_v19, 0 }
 0xbf0   : > { %v2250_v9 = vmul.f32 %v5498_v4, %v2244_v5  ;;  %v5588_v5 = vld [vmem:[%s6204_s5] sm:$0xff] }
 0xbf2   : > { %v2256_v12 = vadd.f32 %v5502_v61, %v2250_v9  ;;  %v2504_v49 = vpop.permute.xlu0 %2503 }
 0xbf3   : > { %v2526_v48 = vsel %vm1401_vm12, %v2504_v49, 0 }
 0xbf4   : > { %v2289_v15 = vpack.c.bf16 %v2256_v12, %v2256_v12  ;;  %2544 = vmatpush.bf16.xpose.msra.mxu3 %v2526_v48 }
 0xbf6   : > { %4182 = vmatmul.msk.bf16.vlgmr.msra.gmra.mxu0 %vm1261_vm1, %v2289_v15  ;;  %v2629_v23 = vpop.permute.xlu2 %2628 }
 0xbfa   : > { %v2502_v50 = vpop.permute.xlu0 %2501 }
 0xbfb   : > { %v2523_v51 = vsel %vm1401_vm12, %v2502_v50, 0 }
 0xbfc   : > { %2545 = vmatpush.bf16.xpose.msra.mxu3 %v2523_v51 }
 0xbfe   : > { %v2500_v53 = vpop.permute.xlu2 %2499 }
 0xbff   : > { %v2520_v56 = vsel %vm1401_vm12, %v2500_v53, 0 }
 0xc04   : > { %2546 = vmatpush.bf16.xpose.msra.mxu3 %v2520_v56 }
 0xc06   : > { %v2750_v3 = vpop.permute.xlu2 %2749 }
 0xc07   : > { %v2772_v16 = vsel %vm1401_vm12, %v2750_v3, 0 }
 0xc0e   : > { %v2625_v9 = vpop.permute.xlu2 %2624 }
 0xc73   : > { %v2318_v24 = vpop.f32.mrf.mxu0 }
 0xc74   : > { %v2323_v25 = vpack.c.bf16 %v2318_v24, %v2318_v24  ;;  %v2646_v24 = vsel %vm1401_vm12, %v2625_v9, 0 }
 0xc76   : > { %2495 = vrot.lane.b32.xlu2 %v2323_v25, %s4905_s23  ;;  %4215 = vmatmul.msk.bf16.vlgmr.msra.gmra.mxu1 %vm1401_vm12, %v2323_v25 }
 0xc7b   : > { %v2320_v26 = vpop.f32.mrf.mxu0 }
 0xc7e   : > { %2745 = vrot.lane.b32.xlu2 %v4380_v17, %s4907_s10 }
 0xc86   : > { %2618 = vrot.lane.b32.xlu2 %v2323_v25, %s4906_s0 }
 0xcf3   : > { %v2400_v27 = vpop.f32.mrf.mxu1 }
 0xcf4   : > { %v2404_v28 = vsel %vm2322_vm2, %v2400_v27, -1e+30 }
 0xcf5   : > { %v2406_v13 = vsel %vm2405_vm3, %v2404_v28, -inf }
 0xcf6   : > { %2407 = vmax.xlane.f32.xlu1 %v2406_v13 }
 0xcfb   : > { %v2402_v37 = vpop.f32.mrf.mxu1 }
 0xd0f   : > { %2751 = vrot.lane.b32.xlu1 %v4383_v6, %s4907_s10 }
 0xd17   : > { %2626 = vrot.lane.b32.xlu1 %v4382_v1, %s4906_s0  ;;  %v5574_v1 = vld [vmem:[%s6204_s5 + $0x18] sm:$0xff] }
 0xd18   : > { %2484 = vmatpush.bf16.msra.mxu2 %v5574_v1 }
 0xd1c   : > { %2485 = vmatpush.bf16.msra.mxu2 %v5578_v2 }
 0xd1f   : > { %2497 = vrot.lane.b32.xlu1 %v5519_v21, %s4905_s23 }
 0xd20   : > { %2486 = vmatpush.bf16.msra.mxu2 %v5582_v7 }
 0xd24   : > { %2487 = vmatpush.bf16.msra.mxu2 %v5588_v5 }
 0xd27   : > { %2747 = vrot.lane.b32.xlu1 %v4381_v10, %s4907_s10 }
 0xd28   : > { %2663 = vmatpush.bf16.xpose.msrb.mxu2 %v2661_v8 }
 0xd2f   : > { %2622 = vrot.lane.b32.xlu1 %v4380_v17, %s4906_s0  ;;  %v2496_v17 = vpop.permute.xlu2 %2495 }
 0xd30   : > { %2664 = vmatpush.bf16.xpose.msrb.mxu2 %v2658_v40 }
 0xd37   : > { %2620 = vrot.lane.b32.xlu1 %v5519_v21, %s4906_s0 }
 0xd38   : > { %2665 = vmatpush.bf16.xpose.msrb.mxu2 %v2655_v18 }
 0xd3f   : > { %2741 = vrot.lane.b32.xlu1 %v2323_v25, %s4907_s10 }
 0xd69   : > { %v2408_v54 = vpop.xlane.xlu1 %2407 }
 0xd6a   : > { %v2409_v55 = vsub.f32 %v2404_v28, %v2408_v54  ;;  %v2746_v28 = vpop.permute.xlu2 %2745 }
 0xd6b   : > { %v2766_v11 = vsel %vm1401_vm12, %v2746_v28, 0 }
 0xd6c   : > { %v2410_v57 = vmul.f32 1.442695, %v2409_v55 }
 0xd6e   : > { %4650 = vpow2.f32 %v2410_v57 }
 0xd72   : > { %v2619_v48 = vpop.permute.xlu2 %2618 }
 0xd74   : > { %v5560_v59 = vpop.eup %4650 }
 0xd75   : > { %v2412_v60 = vsel %vm2405_vm3, %v5560_v59, 0.0 }
 0xd76   : > { %2413 = vadd.xlane.f32.xlu0 %v2412_v60 }
 0xd81   : > { %v2752_v0 = vpop.permute.xlu1 %2751 }
 0xd82   : > { %v2775_v12 = vsel %vm1401_vm12, %v2752_v0, 0 }
 0xd83   : > { %2789 = vmatpush.bf16.xpose.msrb.mxu1 %v2775_v12 }
 0xd89   : > { %v2627_v6 = vpop.permute.xlu1 %2626 }
 0xd8a   : > { %2743 = vrot.lane.b32.xlu0 %v5519_v21, %s4907_s10  ;;  %v2652_v21 = vsel %vm1401_vm12, %v2629_v23, 0  ;;  %v2649_v22 = vsel %vm1401_vm12, %v2627_v6, 0 }
 0xd8b   : > { %2790 = vmatpush.bf16.xpose.msrb.mxu1 %v2772_v16  ;;  %2666 = vmatpush.bf16.xpose.msrb.mxu2 %v2652_v21 }
 0xd91   : > { %v2498_v10 = vpop.permute.xlu1 %2497 }
 0xd92   : > { %v2517_v15 = vsel %vm1401_vm12, %v2498_v10, 0  ;;  %2590 = vrot.lane.b32.xlu0 %v5566_v62, %s4905_s23 }
 0xd93   : > { %2547 = vmatpush.bf16.xpose.msra.mxu3 %v2517_v15  ;;  %2667 = vmatpush.bf16.xpose.msrb.mxu2 %v2649_v22 }
 0xd99   : > { %v2748_v25 = vpop.permute.xlu1 %2747 }
 0xd9a   : > { %4248 = vmatmul.msk.bf16.vlgmr.msra.gmra.mxu3 %vm1401_vm12, %v2496_v17  ;;  %2588 = vrot.lane.b32.xlu0 %v5570_v63, %s4905_s23  ;;  %v2769_v26 = vsel %vm1401_vm12, %v2748_v25, 0 }
 0xd9b   : > { %2668 = vmatpush.bf16.xpose.msrb.mxu2 %v2646_v24  ;;  %2791 = vmatpush.bf16.xpose.msrb.mxu1 %v2769_v26 }
 0xda1   : > { %v2623_v27 = vpop.permute.xlu1 %2622 }
 0xda2   : > { %2586 = vrot.lane.b32.xlu0 %v5574_v1, %s4905_s23  ;;  %v2643_v13 = vsel %vm1401_vm12, %v2623_v27, 0 }
 0xda3   : > { %2669 = vmatpush.bf16.xpose.msrb.mxu2 %v2643_v13  ;;  %2792 = vmatpush.bf16.xpose.msrb.mxu1 %v2766_v11 }
 0xda9   : > { %v2621_v37 = vpop.permute.xlu1 %2620 }
 0xdaa   : > { %2836 = vrot.lane.b32.xlu0 %v5566_v62, %s4907_s10  ;;  %v2640_v29 = vsel %vm1401_vm12, %v2621_v37, 0 }
 0xdab   : > { %2670 = vmatpush.bf16.xpose.msrb.mxu2 %v2640_v29 }
 0xdb1   : > { %v2742_v49 = vpop.permute.xlu1 %2741 }
 0xdb2   : > { %2715 = vrot.lane.b32.xlu0 %v5558_v58, %s4906_s0 }
 0xdba   : > { %2834 = vrot.lane.b32.xlu0 %v5570_v63, %s4907_s10 }
 0xde9   : > { %v2414_v30 = vpop.xlane.xlu0 %2413 }
 0xdea   : > { %4652 = vrcp.f32 %v2414_v30  ;;  %v2426_v35 = vand.u32 2147483648, %v2414_v30  ;;  %v2424_v41 = vand.u32 2147483647, %v2414_v30  ;;  %vm2420_vm5 = vweird.f32 %v2414_v30 }
 0xdec   : > { %v2427_v44 = vor.u32 1.1754944e-38, %v2426_v35  ;;  %vm2425_vm7 = vcmp.eq.f32.partialorder %v2424_v41, 8.507059e+37 }
 0xdf0   : > { %v4653_v32 = vpop.eup %4652 }
 0xdf1   : > { %v2416_v33 = vmul.f32 %v4653_v32, %v2414_v30  ;;  %vm2421_vm4 = vweird.f32 %v4653_v32 }
 0xdf2   : > { %vm2422_vm6 = vmor %vm2420_vm5, %vm2421_vm4 }
 0xdf3   : > { %v2417_v34 = vsub.f32 1.0, %v2416_v33 }
 0xdf5   : > { %v2418_v38 = vmul.f32 %v4653_v32, %v2417_v34 }
 0xdf7   : > { %v2419_v42 = vadd.f32 %v4653_v32, %v2418_v38 }
 0xdf9   : > { %v2423_v45 = vsel %vm2422_vm6, %v4653_v32, %v2419_v42 }
 0xdfa   : > { %v2428_v46 = vsel %vm2425_vm7, %v2427_v44, %v2423_v45 }
 0xdfb   : > { %v5618_v39 = vmul.f32 %v5560_v59, %v2428_v46 }
 0xdfc   : > { %v2744_v43 = vpop.permute.xlu0 %2743 }
 0xdfd   : > { %v2763_v47 = vsel %vm1401_vm12, %v2744_v43, 0  ;;  %v2431_v19 = vpack.c.bf16 %v5618_v39, %v5618_v39 }
 0xdfe   : > { %2793 = vmatpush.bf16.xpose.msrb.mxu1 %v2763_v47 }
 0xdff   : > { %2488 = vmatmul.bf16.vlgmr.msra.gmra.mxu2 %v2431_v19 }
 0xe04   : > { %v2591_v16 = vpop.permute.xlu0 %2590 }
 0xe05   : > { %4250 = vmatmul.msk.bf16.vlgmr.msrb.gmra.mxu1 %vm1401_vm12, %v2742_v49 }
 0xe0f   : > { %4249 = vmatmul.msk.bf16.vlgmr.msrb.gmra.mxu2 %vm1401_vm12, %v2619_v48 }
 0xe1d   : > { %v2549_v50 = vpop.f32.mrf.mxu3 }
 0xe1e   : > { %v2553_v23 = vsel %vm2322_vm2, %v2549_v50, -1e+30 }
 0xe1f   : > { %v2554_v51 = vsel %vm2405_vm3, %v2553_v23, -inf }
 0xe20   : > { %2555 = vmax.xlane.f32.xlu2 %v2554_v51 }
 0xe25   : > { %v2551_v53 = vpop.f32.mrf.mxu3 }
 0xe38   : > { %2594 = vrot.lane.b32.xlu2 %v5554_v20, %s4905_s23 }
 0xe40   : > { %2582 = vrot.lane.b32.xlu2 %v5582_v7, %s4905_s23 }
 0xe82   : > { %v5632_v54 = vpop.f32.mrf.mxu2  ;;  %v2795_v55 = vpop.f32.mrf.mxu1 }
 0xe83   : > { %v2799_v56 = vsel %vm2322_vm2, %v2795_v55, -1e+30 }
 0xe84   : > { %v2800_v57 = vsel %vm2405_vm3, %v2799_v56, -inf }
 0xe85   : > { %2801 = vmax.xlane.f32.xlu1 %v2800_v57 }
 0xe8a   : > { %v2491_v59 = vpop.f32.mrf.mxu2  ;;  %v2797_v60 = vpop.f32.mrf.mxu1 }
 0xe92   : > { %v2672_v0 = vpop.f32.mrf.mxu2 }
 0xe93   : > { %v2676_v3 = vsel %vm2322_vm2, %v2672_v0, -1e+30  ;;  %v2556_v6 = vpop.xlane.xlu2 %2555 }
 0xe94   : > { %v2557_v8 = vsub.f32 %v2553_v23, %v2556_v6  ;;  %v2677_v9 = vsel %vm2405_vm3, %v2676_v3, -inf }
 0xe95   : > { %2678 = vmax.xlane.f32.xlu0 %v2677_v9 }
 0xe96   : > { %v2558_v10 = vmul.f32 1.442695, %v2557_v8 }
 0xe98   : > { %4654 = vpow2.f32 %v2558_v10 }
 0xe9a   : > { %v2674_v12 = vpop.f32.mrf.mxu2 }
 0xe9e   : > { %v5640_v15 = vpop.eup %4654  ;;  %2592 = vrot.lane.b32.xlu1 %v5558_v58, %s4905_s23 }
 0xe9f   : > { %v2560_v40 = vsel %vm2405_vm3, %v5640_v15, 0.0 }
 0xea0   : > { %2561 = vadd.xlane.f32.xlu2 %v2560_v40 }
 0xea6   : > { %2840 = vrot.lane.b32.xlu1 %v5554_v20, %s4907_s10 }
 0xea9   : > { %2713 = vrot.lane.b32.xlu0 %v5566_v62, %s4906_s0 }
 0xeae   : > { %2838 = vrot.lane.b32.xlu1 %v5558_v58, %s4907_s10  ;;  %v2589_v58 = vpop.permute.xlu0 %2588 }
 0xeb6   : > { %2717 = vrot.lane.b32.xlu1 %v5554_v20, %s4906_s0  ;;  %v2595_v20 = vpop.permute.xlu2 %2594  ;;  %v2587_v62 = vpop.permute.xlu0 %2586 }
 0xeb7   : > { %2604 = vmatpush.bf16.msrb.mxu0 %v2595_v20 }
 0xeb8   : > { %2832 = vrot.lane.b32.xlu2 %v5574_v1, %s4907_s10 }
 0xebe   : > { %2584 = vrot.lane.b32.xlu1 %v5578_v2, %s4905_s23  ;;  %v2837_v17 = vpop.permute.xlu0 %2836  ;;  %v2583_v13 = vpop.permute.xlu2 %2582 }
 0xec0   : > { %2580 = vrot.lane.b32.xlu2 %v5588_v5, %s4905_s23 }
 0xec6   : > { %v5668_v18 = vpop.permute.xlu0 %2715 }
 0xec8   : > { %2830 = vrot.lane.b32.xlu2 %v5578_v2, %s4907_s10 }
 0xece   : > { %v2835_v25 = vpop.permute.xlu0 %2834 }
 0xed0   : > { %2709 = vrot.lane.b32.xlu2 %v5574_v1, %s4906_s0 }
 0xed8   : > { %2707 = vrot.lane.b32.xlu2 %v5578_v2, %s4906_s0  ;;  %v2179_v2 = vsel %vm1261_vm1, %v5464_v36, 0.0 }
 0xee0   : > { %2705 = vrot.lane.b32.xlu2 %v5582_v7, %s4906_s0 }
 0xef8   : > { %v2802_v21 = vpop.xlane.xlu1 %2801 }
 0xef9   : > { %v2803_v22 = vsub.f32 %v2799_v56, %v2802_v21 }
 0xefb   : > { %v2804_v24 = vmul.f32 1.442695, %v2803_v22 }
 0xefd   : > { %4656 = vpow2.f32 %v2804_v24 }
 0xf03   : > { %v5670_v26 = vpop.eup %4656 }
 0xf04   : > { %v2806_v1 = vsel %vm2405_vm3, %v5670_v26, 0.0 }
 0xf05   : > { %2807 = vadd.xlane.f32.xlu1 %v2806_v1 }
 0xf08   : > { %v2679_v27 = vpop.xlane.xlu0 %2678 }
 0xf09   : > { %v2680_v28 = vsub.f32 %v2676_v3, %v2679_v27  ;;  %2180 = vadd.xlane.f32.xlu2 %v2179_v2 }
 0xf0b   : > { %v2681_v11 = vmul.f32 1.442695, %v2680_v28 }
 0xf0d   : > { %4658 = vpow2.f32 %v2681_v11 }
 0xf10   : > { %v2593_v37 = vpop.permute.xlu1 %2592 }
 0xf11   : > { %2605 = vmatpush.bf16.msrb.mxu0 %v2593_v37 }
 0xf13   : > { %v5676_v29 = vpop.eup %4658  ;;  %v2562_v30 = vpop.xlane.xlu2 %2561 }
 0xf14   : > { %v2683_v32 = vsel %vm2405_vm3, %v5676_v29, 0.0  ;;  %4660 = vrcp.f32 %v2562_v30  ;;  %v2574_v47 = vand.u32 2147483648, %v2562_v30  ;;  %vm2568_vm9 = vweird.f32 %v2562_v30 }
 0xf15   : > { %2606 = vmatpush.bf16.msrb.mxu0 %v2591_v16  ;;  %2684 = vadd.xlane.f32.xlu0 %v2683_v32 }
 0xf16   : > { %v2575_v48 = vor.u32 1.1754944e-38, %v2574_v47 }
 0xf18   : > { %v2841_v33 = vpop.permute.xlu1 %2840 }
 0xf19   : > { %2607 = vmatpush.bf16.msrb.mxu0 %v2589_v58  ;;  %2850 = vmatpush.bf16.msrb.mxu3 %v2841_v33 }
 0xf1a   : > { %v4661_v34 = vpop.eup %4660 }
 0xf1b   : > { %v2564_v35 = vmul.f32 %v4661_v34, %v2562_v30  ;;  %v2833_v41 = vpop.permute.xlu2 %2832  ;;  %vm2569_vm8 = vweird.f32 %v4661_v34  ;;  %v2714_v53 = vpop.permute.xlu0 %2713 }
 0xf1c   : > { %vm2570_vm10 = vmor %vm2568_vm9, %vm2569_vm8 }
 0xf1d   : > { %2608 = vmatpush.bf16.msrb.mxu0 %v2587_v62  ;;  %v2565_v42 = vsub.f32 1.0, %v2564_v35 }
 0xf1e   : > { %2711 = vrot.lane.b32.xlu1 %v5570_v63, %s4906_s0  ;;  %v2572_v63 = vand.u32 2147483647, %v2562_v30 }
 0xf1f   : > { %v2566_v44 = vmul.f32 %v4661_v34, %v2565_v42 }
 0xf20   : > { %v2839_v38 = vpop.permute.xlu1 %2838  ;;  %vm2573_vm11 = vcmp.eq.f32.partialorder %v2572_v63, 8.507059e+37 }
 0xf21   : > { %2851 = vmatpush.bf16.msrb.mxu3 %v2839_v38  ;;  %v2567_v46 = vadd.f32 %v4661_v34, %v2566_v44 }
 0xf23   : > { %v2581_v43 = vpop.permute.xlu2 %2580  ;;  %v2571_v49 = vsel %vm2570_vm10, %v4661_v34, %v2567_v46 }
 0xf24   : > { %v2576_v50 = vsel %vm2573_vm11, %v2575_v48, %v2571_v49 }
 0xf25   : > { %2852 = vmatpush.bf16.msrb.mxu3 %v2837_v17 }
 0xf26   : > { %2826 = vrot.lane.b32.xlu1 %v5588_v5, %s4907_s10 }
 0xf28   : > { %v2718_v45 = vpop.permute.xlu1 %2717 }
 0xf29   : > { %2853 = vmatpush.bf16.msrb.mxu3 %v2835_v25  ;;  %2828 = vrot.lane.b32.xlu0 %v5582_v7, %s4907_s10  ;;  %v2577_v7 = vmul.f32 %v5640_v15, %v2576_v50 }
 0xf2b   : > { %v2831_v23 = vpop.permute.xlu2 %2830  ;;  %v2579_v51 = vpack.c.bf16 %v2577_v7, %v2577_v7  ;;  %v2578_v30 = vadd.f32 %v2577_v7, %v5618_v39 }
 0xf2d   : > { %2854 = vmatpush.bf16.msrb.mxu3 %v2833_v41 }
 0xf2e   : > { %2703 = vrot.lane.b32.xlu1 %v5588_v5, %s4906_s0  ;;  %v2182_v5 = vsel %vm1261_vm1, %v5469_v14, 0.0 }
 0xf30   : > { %v2585_v19 = vpop.permute.xlu1 %2584 }
 0xf31   : > { %2609 = vmatpush.bf16.msrb.mxu0 %v2585_v19  ;;  %2855 = vmatpush.bf16.msrb.mxu3 %v2831_v23  ;;  %v4397_v23 = vld [vmem:[%s6206_s9] sm:$0xff] }
 0xf33   : > { %v2710_v55 = vpop.permute.xlu2 %2709 }
 0xf35   : > { %2610 = vmatpush.bf16.msrb.mxu0 %v2583_v13 }
 0xf39   : > { %2611 = vmatpush.bf16.msrb.mxu0 %v2581_v43 }
 0xf3b   : > { %v2708_v56 = vpop.permute.xlu2 %2707 }
 0xf3c   : > { %2612 = vmatmul.bf16.vlgmr.msrb.gmra.mxu0 %v2579_v51 }
 0xf3d   : > { %2727 = vmatpush.bf16.msra.mxu0 %v2718_v45 }
 0xf41   : > { %2728 = vmatpush.bf16.msra.mxu0 %v5668_v18 }
 0xf43   : > { %v2706_v57 = vpop.permute.xlu2 %2705 }
 0xf45   : > { %2729 = vmatpush.bf16.msra.mxu0 %v2714_v53 }
 0xf53   : > { %2183 = vadd.xlane.f32.xlu0 %v2182_v5 }
 0xf78   : > { %v2808_v59 = vpop.xlane.xlu1 %2807 }
 0xf79   : > { %4662 = vrcp.f32 %v2808_v59  ;;  %vm2814_vm14 = vweird.f32 %v2808_v59  ;;  %v2820_v17 = vand.u32 2147483648, %v2808_v59  ;;  %v2818_v21 = vand.u32 2147483647, %v2808_v59 }
 0xf7b   : > { %v2821_v2 = vor.u32 1.1754944e-38, %v2820_v17  ;;  %vm2819_vm6 = vcmp.eq.f32.partialorder %v2818_v21, 8.507059e+37 }
 0xf7c   : > { %v2181_v60 = vpop.xlane.xlu2 %2180 }
 0xf7d   : > { %v2188_v0 = vmul.f32 %v2181_v60, %v5219_v31 }
 0xf7f   : > { %v5694_v3 = vsub.f32 %v5464_v36, %v2188_v0  ;;  %v4663_v9 = vpop.eup %4662 }
 0xf80   : > { %v2810_v10 = vmul.f32 %v4663_v9, %v2808_v59  ;;  %vm2815_vm13 = vweird.f32 %v4663_v9  ;;  %v4415_v59 = vld [vmem:[%s6208_s1] sm:$0xff] }
 0xf81   : > { %v2194_v6 = vmul.f32 %v5694_v3, %v5694_v3  ;;  %vm2816_vm3 = vmor %vm2814_vm14, %vm2815_vm13 }
 0xf82   : > { %v2811_v15 = vsub.f32 1.0, %v2810_v10 }
 0xf83   : > { %v2197_v8 = vsel %vm1261_vm1, %v2194_v6, 0.0 }
 0xf84   : > { %2198 = vadd.xlane.f32.xlu1 %v2197_v8  ;;  %v2812_v40 = vmul.f32 %v4663_v9, %v2811_v15 }
 0xf86   : > { %v2813_v62 = vadd.f32 %v4663_v9, %v2812_v40 }
 0xf88   : > { %v2685_v12 = vpop.xlane.xlu0 %2684  ;;  %v2817_v1 = vsel %vm2816_vm3, %v4663_v9, %v2813_v62 }
 0xf89   : > { %4664 = vrcp.f32 %v2685_v12  ;;  %v2697_v18 = vand.u32 2147483648, %v2685_v12  ;;  %v2695_v24 = vand.u32 2147483647, %v2685_v12  ;;  %vm2691_vm4 = vweird.f32 %v2685_v12 }
 0xf8a   : > { %v2822_v37 = vsel %vm2819_vm6, %v2821_v2, %v2817_v1 }
 0xf8b   : > { %v2698_v27 = vor.u32 1.1754944e-38, %v2697_v18  ;;  %vm2696_vm7 = vcmp.eq.f32.partialorder %v2695_v24, 8.507059e+37  ;;  %v2823_v35 = vmul.f32 %v5670_v26, %v2822_v37 }
 0xf8d   : > { %v2825_v44 = vpack.c.bf16 %v2823_v35, %v2823_v35 }
 0xf8f   : > { %v4665_v16 = vpop.eup %4664 }
 0xf90   : > { %v2712_v58 = vpop.permute.xlu1 %2711  ;;  %v2687_v20 = vmul.f32 %v4665_v16, %v2685_v12  ;;  %vm2692_vm2 = vweird.f32 %v4665_v16 }
 0xf91   : > { %2730 = vmatpush.bf16.msra.mxu0 %v2712_v58  ;;  %vm2693_vm5 = vmor %vm2691_vm4, %vm2692_vm2  ;;  %vm2980_vm2 = vcmp.lt.s32.totalorder %v5271_v52, 16 }
 0xf92   : > { %v2688_v36 = vsub.f32 1.0, %v2687_v20 }
 0xf94   : > { %v2689_v22 = vmul.f32 %v4665_v16, %v2688_v36 }
 0xf95   : > { %2731 = vmatpush.bf16.msra.mxu0 %v2710_v55 }
 0xf96   : > { %v2690_v25 = vadd.f32 %v4665_v16, %v2689_v22 }
 0xf98   : > { %v2827_v28 = vpop.permute.xlu1 %2826  ;;  %v2694_v13 = vsel %vm2693_vm5, %v4665_v16, %v2690_v25 }
 0xf99   : > { %2732 = vmatpush.bf16.msra.mxu0 %v2708_v56  ;;  %v2699_v11 = vsel %vm2696_vm7, %v2698_v27, %v2694_v13 }
 0xf9a   : > { %v2700_v32 = vmul.f32 %v5676_v29, %v2699_v11 }
 0xf9b   : > { %v2829_v33 = vpop.permute.xlu0 %2828 }
 0xf9c   : > { %2856 = vmatpush.bf16.msrb.mxu3 %v2829_v33  ;;  %v2701_v34 = vadd.f32 %v2700_v32, %v2578_v30  ;;  %v2702_v45 = vpack.c.bf16 %v2700_v32, %v2700_v32 }
 0xf9d   : > { %2733 = vmatpush.bf16.msra.mxu0 %v2706_v57  ;;  %v4416_v57 = vld [vmem:[%s6207_s26 + $0x8] sm:$0xff]  ;;  %s6216_s26 = sld [smem:[#allocation25_spill]] }
 0xf9e   : > { %v2824_v38 = vadd.f32 %v2823_v35, %v2701_v34 }
 0xfa0   : > { %v2704_v41 = vpop.permute.xlu1 %2703  ;;  %2857 = vmatpush.bf16.msrb.mxu3 %v2827_v28  ;;  %v2913_v42 = vmul.f32 0.25, %v2824_v38 }
 0xfa1   : > { %2734 = vmatpush.bf16.msra.mxu0 %v2704_v41 }
 0xfa2   : > { %3713 = vst [vmem:[%s6132_s13] sm:$0x1] %v2913_v42  ;;  %s6209_s13 = sld [smem:[#allocation21_spill]] }
 0xfa3   : > { %2858 = vmatmul.bf16.vlgmr.msrb.gmra.mxu3 %v2825_v44 }
 0xfa4   : > { %2735 = vmatmul.bf16.vlgmr.msra.gmra.mxu0 %v2702_v45 }
 0xfa8   : > { %v4406_v10 = vld [vmem:[%s6209_s13 + $0x38] sm:$0xff]  ;;  %v4405_v12 = vld [vmem:[%s6209_s13 + $0x30] sm:$0xff]  ;;  %v4404_v20 = vld [vmem:[%s6209_s13 + $0x28] sm:$0xff] }
 0xfa9   : > { %v4403_v30 = vld [vmem:[%s6209_s13 + $0x20] sm:$0xff]  ;;  %v4402_v34 = vld [vmem:[%s6209_s13 + $0x18] sm:$0xff]  ;;  %v5756_v41 = vld [vmem:[%s6209_s13 + $0x10] sm:$0xff] }
 0xfaa   : > { %v3038_v35 = vsel %vm1401_vm12, %v4403_v30, 0  ;;  %v3035_v38 = vsel %vm1401_vm12, %v4402_v34, 0  ;;  %v5764_v45 = vld [vmem:[%s6209_s13 + $0x8] sm:$0xff] }
 0xfb9   : > { %v2613_v39 = vpop.f32.mrf.mxu0 }
 0xfba   : > { %2865 = vrot.lane.b32.xlu0 %v2613_v39, %s4908_s15 }
 0xfc1   : > { %v2615_v29 = vpop.f32.mrf.mxu0 }
 0xfc2   : > { %3362 = vrot.lane.b32.xlu0 %v4405_v12, %s4906_s0 }
 0xfc6   : > { %v2184_v46 = vpop.xlane.xlu0 %2183 }
 0xfc7   : > { %v2189_v26 = vmul.f32 %v2184_v46, %v5219_v31  ;;  %v3032_v46 = vsel %vm1401_vm12, %v5756_v41, 0 }
 0xfc9   : > { %v5707_v43 = vsub.f32 %v5469_v14, %v2189_v26  ;;  %v4398_v14 = vld [vmem:[%s6205_s16 + $0x8] sm:$0xff]  ;;  %s6210_s16 = sld [smem:[#allocation22_spill]] }
 0xfca   : > { %2906 = vmatpush.bf16.msrb.mxu0 %v4398_v14  ;;  %3516 = vrot.lane.b32.xlu0 %v4404_v20, %s4907_s10 }
 0xfcb   : > { %v2195_v47 = vmul.f32 %v5707_v43, %v5707_v43 }
 0xfcd   : > { %v2200_v63 = vsel %vm1261_vm1, %v2195_v47, 0.0  ;;  %v3029_v47 = vsel %vm1401_vm12, %v5764_v45, 0 }
 0xfce   : > { %2201 = vadd.xlane.f32.xlu2 %v2200_v63  ;;  %2907 = vmatpush.bf16.msrb.mxu0 %v4397_v23 }
 0xfd2   : > { %2972 = vmatpush.bf16.msra.mxu0 %v4416_v57  ;;  %3358 = vrot.lane.b32.xlu0 %v4403_v30, %s4906_s0 }
 0xfd6   : > { %2973 = vmatpush.bf16.msra.mxu0 %v4415_v59 }
 0xff7   : > { %v2199_v51 = vpop.xlane.xlu1 %2198 }
 0xff8   : > { %v2206_v5 = vmul.f32 %v2199_v51, %v5219_v31 }
 0xffa   : > { %v2209_v56 = vadd.f32 1e-06, %v2206_v5 }
 0xffc   : > { %vm2218_vm10 = vweird.f32 %v2209_v56 }
0x1021   : > { %v2736_v19 = vpop.f32.mrf.mxu0 }
0x1022   : > { %2869 = vrot.lane.b32.xlu1 %v2736_v19, %s6133_s11  ;;  %s6211_s11 = smov %s6210_s16 }
0x1026   : > { %v2859_v49 = vpop.f32.mrf.mxu3 }
0x1027   : > { %2873 = vrot.lane.b32.xlu2 %v2859_v49, %s4910_s22 }
0x1029   : > { %v2738_v48 = vpop.f32.mrf.mxu0 }
0x102a   : > { %3202 = vrot.lane.b32.xlu1 %v4403_v30, %s4905_s23 }
0x102c   : > { %v2866_v58 = vpop.permute.xlu0 %2865 }
0x102d   : > { %v2876_v36 = vsel %vm1401_vm12, %v5632_v54, %v2866_v58 }
0x102e   : > { %v2861_v50 = vpop.f32.mrf.mxu3 }
0x102f   : > { %3208 = vrot.lane.b32.xlu2 %v4406_v10, %s4905_s23 }
0x1037   : > { %3206 = vrot.lane.b32.xlu2 %v4405_v12, %s4905_s23 }
0x103f   : > { %3364 = vrot.lane.b32.xlu2 %v4406_v10, %s4906_s0 }
0x1041   : > { %v2202_v7 = vpop.xlane.xlu2 %2201 }
0x1042   : > { %v2207_v53 = vmul.f32 %v2202_v7, %v5219_v31 }
0x1044   : > { %v2210_v55 = vadd.f32 1e-06, %v2207_v53 }
0x1046   : > { %4666 = vrsqrt.f32 %v2210_v55  ;;  %vm2228_vm8 = vweird.f32 %v2210_v55 }
0x1047   : > { %4668 = vrsqrt.f32 %v2209_v56  ;;  %3520 = vrot.lane.b32.xlu2 %v4406_v10, %s4907_s10 }
0x104c   : > { %v4667_v60 = vpop.eup %4666 }
0x104d   : > { %v4669_v0 = vpop.eup %4668  ;;  %v2223_v6 = vmul.f32 %v4667_v60, %v2210_v55  ;;  %vm2229_vm9 = vweird.f32 %v4667_v60 }
0x104e   : > { %v2213_v8 = vmul.f32 %v4669_v0, %v2209_v56  ;;  %vm2219_vm11 = vweird.f32 %v4669_v0  ;;  %vm2230_vm13 = vmor %vm2228_vm8, %vm2229_vm9 }
0x104f   : > { %v2224_v9 = vmul.f32 %v4667_v60, %v2223_v6  ;;  %vm2220_vm14 = vmor %vm2218_vm10, %vm2219_vm11  ;;  %3204 = vrot.lane.b32.xlu2 %v4404_v20, %s4905_s23 }
0x1050   : > { %v2214_v15 = vmul.f32 %v4669_v0, %v2213_v8 }
0x1051   : > { %v2225_v31 = vmul.f32 0.5, %v2224_v9 }
0x1052   : > { %v2215_v40 = vmul.f32 0.5, %v2214_v15 }
0x1053   : > { %v2226_v16 = vsub.f32 1.5, %v2225_v31 }
0x1054   : > { %v2216_v62 = vsub.f32 1.5, %v2215_v40 }
0x1055   : > { %v2227_v17 = vmul.f32 %v4667_v60, %v2226_v16 }
0x1056   : > { %v2217_v24 = vmul.f32 %v4669_v0, %v2216_v62 }
0x1057   : > { %v2231_v2 = vsel %vm2230_vm13, %v4667_v60, %v2227_v17  ;;  %3518 = vrot.lane.b32.xlu2 %v4405_v12, %s4907_s10  ;;  %v3363_v17 = vpop.permute.xlu0 %3362 }
0x1058   : > { %v2221_v27 = vsel %vm2220_vm14, %v4669_v0, %v2217_v24  ;;  %v2243_v28 = vmul.f32 %v2231_v2, %v5707_v43  ;;  %v5776_v43 = vld [vmem:[%s6209_s13] sm:$0xff] }
0x1059   : > { %v2242_v54 = vmul.f32 %v2221_v27, %v5694_v3  ;;  %v3044_v3 = vsel %vm1401_vm12, %v4405_v12, 0  ;;  %v3026_v49 = vsel %vm1401_vm12, %v5776_v43, 0  ;;  %v5832_v27 = vld [vmem:[%s6211_s11 + $0x10] sm:$0xff] }
0x105a   : > { %v2249_v13 = vmul.f32 %v5498_v4, %v2243_v28 }
0x105b   : > { %v2248_v11 = vmul.f32 %v5498_v4, %v2242_v54  ;;  %v3047_v4 = vsel %vm1401_vm12, %v4406_v10, 0  ;;  %v5837_v54 = vld [vmem:[%s6211_s11 + $0x8] sm:$0xff] }
0x105c   : > { %v2255_v37 = vadd.f32 %v5502_v61, %v2249_v13  ;;  %3049 = vmatpush.bf16.xpose.msra.mxu2 %v3047_v4  ;;  %v3388_v4 = vsel %vm1401_vm12, %v3363_v17, 0 }
0x105d   : > { %v2254_v32 = vadd.f32 %v5502_v61, %v2248_v11  ;;  %v3041_v61 = vsel %vm1401_vm12, %v4404_v20, 0 }
0x105f   : > { %v2946_v33 = vpack.c.bf16 %v2255_v37, %v2254_v32  ;;  %3360 = vrot.lane.b32.xlu2 %v4404_v20, %s4906_s0  ;;  %v5844_v37 = vld [vmem:[%s6211_s11] sm:$0xff] }
0x1064   : > { %3050 = vmatpush.bf16.xpose.msra.mxu2 %v3044_v3 }
0x1067   : > { %3200 = vrot.lane.b32.xlu2 %v4402_v34, %s4905_s23 }
0x106c   : > { %3051 = vmatpush.bf16.xpose.msra.mxu2 %v3041_v61 }
0x106f   : > { %3514 = vrot.lane.b32.xlu2 %v4403_v30, %s4907_s10 }
0x1074   : > { %3052 = vmatpush.bf16.xpose.msra.mxu2 %v3038_v35 }
0x1077   : > { %3198 = vrot.lane.b32.xlu2 %v5756_v41, %s4905_s23 }
0x107c   : > { %3053 = vmatpush.bf16.xpose.msra.mxu2 %v3035_v38 }
0x107f   : > { %3356 = vrot.lane.b32.xlu2 %v4402_v34, %s4906_s0 }
0x1081   : > { %v2874_v21 = vpop.permute.xlu2 %2873 }
0x1084   : > { %3054 = vmatpush.bf16.xpose.msra.mxu2 %v3032_v46 }
0x1087   : > { %3512 = vrot.lane.b32.xlu2 %v4402_v34, %s4907_s10 }
0x1089   : > { %v3209_v42 = vpop.permute.xlu2 %3208 }
0x108a   : > { %v3235_v44 = vsel %vm1401_vm12, %v3209_v42, 0 }
0x108c   : > { %3055 = vmatpush.bf16.xpose.msra.mxu2 %v3029_v47 }
0x108f   : > { %3196 = vrot.lane.b32.xlu2 %v5764_v45, %s4905_s23 }
0x1091   : > { %v3207_v39 = vpop.permute.xlu2 %3206 }
0x1092   : > { %v3232_v29 = vsel %vm1401_vm12, %v3207_v39, 0 }
0x1094   : > { %v2870_v18 = vpop.permute.xlu1 %2869  ;;  %3056 = vmatpush.bf16.xpose.msra.mxu2 %v3026_v49 }
0x1095   : > { %v2877_v22 = vsel %vm1867_vm0, %v2876_v36, %v2870_v18  ;;  %v5810_v36 = vld [vmem:[%s6210_s16 + $0x38] sm:$0xff]  ;;  %v5814_v18 = vld [vmem:[%s6211_s11 + $0x30] sm:$0xff] }
0x1096   : > { %v2878_v25 = vsel %vm1435_vm15, %v2877_v22, %v2874_v21  ;;  %3160 = vmatpush.bf16.msra.mxu3 %v5810_v36  ;;  %v5818_v21 = vld [vmem:[%s6211_s11 + $0x28] sm:$0xff]  ;;  %v3517_v22 = vpop.permute.xlu0 %3516 }
0x1097   : > { %v2879_v1 = vpack.c.bf16 %v2878_v25, %v2878_v25  ;;  %3354 = vrot.lane.b32.xlu2 %v5756_v41, %s4906_s0  ;;  %v3541_v24 = vsel %vm1401_vm12, %v3517_v22, 0  ;;  %v5823_v25 = vld [vmem:[%s6211_s11 + $0x20] sm:$0xff] }
0x1099   : > { %4259 = vmatmul.msk.bf16.vlgmr.msrb.gmra.mxu0 %vm1261_vm1, %v2879_v1  ;;  %v5773_v26 = vpop.permute.xlu2 %3364  ;;  %v5827_v1 = vld [vmem:[%s6211_s11 + $0x18] sm:$0xff] }
0x109a   : > { %3237 = vmatpush.bf16.xpose.msrb.mxu0 %v3235_v44  ;;  %3161 = vmatpush.bf16.msra.mxu3 %v5814_v18  ;;  %v3391_v30 = vsel %vm1401_vm12, %v5773_v26, 0 }
0x109c   : > { %v3203_v55 = vpop.permute.xlu1 %3202 }
0x109d   : > { %v3226_v56 = vsel %vm1401_vm12, %v3203_v55, 0 }
0x109e   : > { %3162 = vmatpush.bf16.msra.mxu3 %v5818_v21  ;;  %v3359_v61 = vpop.permute.xlu0 %3358 }
0x109f   : > { %3194 = vrot.lane.b32.xlu2 %v5776_v43, %s4905_s23  ;;  %v3382_v34 = vsel %vm1401_vm12, %v3359_v61, 0 }
0x10a1   : > { %v3521_v63 = vpop.permute.xlu2 %3520 }
0x10a2   : > { %3238 = vmatpush.bf16.xpose.msrb.mxu0 %v3232_v29  ;;  %v3547_v19 = vsel %vm1401_vm12, %v3521_v63, 0  ;;  %3163 = vmatpush.bf16.msra.mxu3 %v5823_v25 }
0x10a3   : > { %3549 = vmatpush.bf16.xpose.msrb.mxu2 %v3547_v19 }
0x10a6   : > { %3164 = vmatpush.bf16.msra.mxu3 %v5827_v1 }
0x10a7   : > { %3508 = vrot.lane.b32.xlu2 %v5764_v45, %s4907_s10 }
0x10a9   : > { %4268 = vmatmul.msk.bf16.vlgmr.msra.gmra.mxu0 %vm1261_vm1, %v2946_v33  ;;  %v3205_v48 = vpop.permute.xlu2 %3204 }
0x10aa   : > { %v3229_v50 = vsel %vm1401_vm12, %v3205_v48, 0  ;;  %3165 = vmatpush.bf16.msra.mxu3 %v5832_v27 }
0x10ab   : > { %3239 = vmatpush.bf16.xpose.msrb.mxu0 %v3229_v50 }
0x10ae   : > { %3166 = vmatpush.bf16.msra.mxu3 %v5837_v54 }
0x10b1   : > { %v3519_v14 = vpop.permute.xlu2 %3518 }
0x10b2   : > { %v3544_v23 = vsel %vm1401_vm12, %v3519_v14, 0  ;;  %3167 = vmatpush.bf16.msra.mxu3 %v5844_v37 }
0x10b3   : > { %3550 = vmatpush.bf16.xpose.msrb.mxu2 %v3544_v23  ;;  %3240 = vmatpush.bf16.xpose.msrb.mxu0 %v3226_v56 }
0x10b6   : > { %3393 = vmatpush.bf16.xpose.msrb.mxu3 %v3391_v30 }
0x10b9   : > { %v5791_v51 = vpop.permute.xlu2 %3360 }
0x10ba   : > { %v3385_v3 = vsel %vm1401_vm12, %v5791_v51, 0 }
0x10bb   : > { %3551 = vmatpush.bf16.xpose.msrb.mxu2 %v3541_v24 }
0x10be   : > { %3394 = vmatpush.bf16.xpose.msrb.mxu3 %v3388_v4 }
0x10c1   : > { %v3201_v5 = vpop.permute.xlu2 %3200 }
0x10c2   : > { %v3223_v59 = vsel %vm1401_vm12, %v3201_v5, 0 }
0x10c3   : > { %3241 = vmatpush.bf16.xpose.msrb.mxu0 %v3223_v59 }
0x10c6   : > { %3395 = vmatpush.bf16.xpose.msrb.mxu3 %v3385_v3 }
0x10c9   : > { %v3515_v60 = vpop.permute.xlu2 %3514 }
0x10ca   : > { %v3538_v2 = vsel %vm1401_vm12, %v3515_v60, 0 }
0x10cb   : > { %3552 = vmatpush.bf16.xpose.msrb.mxu2 %v3538_v2 }
0x10ce   : > { %3396 = vmatpush.bf16.xpose.msrb.mxu3 %v3382_v34 }
0x10d1   : > { %v3199_v8 = vpop.permute.xlu2 %3198 }
0x10d2   : > { %v3220_v9 = vsel %vm1401_vm12, %v3199_v8, 0 }
0x10d3   : > { %3242 = vmatpush.bf16.xpose.msrb.mxu0 %v3220_v9 }
0x10d9   : > { %v3357_v10 = vpop.permute.xlu2 %3356 }
0x10da   : > { %v3379_v35 = vsel %vm1401_vm12, %v3357_v10, 0 }
0x10db   : > { %3397 = vmatpush.bf16.xpose.msrb.mxu3 %v3379_v35 }
0x10e1   : > { %v3513_v12 = vpop.permute.xlu2 %3512 }
0x10e2   : > { %v3535_v13 = vsel %vm1401_vm12, %v3513_v12, 0 }
0x10e3   : > { %3553 = vmatpush.bf16.xpose.msrb.mxu2 %v3535_v13 }
0x10e9   : > { %v3197_v15 = vpop.permute.xlu2 %3196 }
0x10ea   : > { %v3217_v31 = vsel %vm1401_vm12, %v3197_v15, 0 }
0x10eb   : > { %3243 = vmatpush.bf16.xpose.msrb.mxu0 %v3217_v31 }
0x10f1   : > { %v3355_v40 = vpop.permute.xlu2 %3354 }
0x10f2   : > { %v3376_v38 = vsel %vm1401_vm12, %v3355_v40, 0 }
0x10f3   : > { %3398 = vmatpush.bf16.xpose.msrb.mxu3 %v3376_v38 }
0x10f9   : > { %v3195_v16 = vpop.permute.xlu2 %3194 }
0x10fa   : > { %v3214_v58 = vsel %vm1401_vm12, %v3195_v16, 0 }
0x10fb   : > { %3244 = vmatpush.bf16.xpose.msrb.mxu0 %v3214_v58 }
0x1101   : > { %v5806_v20 = vpop.permute.xlu2 %3508 }
0x1102   : > { %v3529_v23 = vsel %vm1401_vm12, %v5806_v20, 0 }
0x1116   : > { %v5789_v7 = vpop.f32.mrf.mxu0 }
0x111e   : > { %v2911_v53 = vpop.f32.mrf.mxu0 }
0x1126   : > { %v2975_v57 = vpop.f32.mrf.mxu0 }
0x112e   : > { %v2977_v0 = vpop.f32.mrf.mxu0 }
0x112f   : > { %v5795_v6 = vpack.c.bf16 %v2977_v0, %v2975_v57 }
0x1131   : > { %3192 = vrot.lane.b32.xlu2 %v5795_v6, %s4905_s23  ;;  %4301 = vmatmul.msk.bf16.vlgmr.msra.gmra.mxu2 %vm1401_vm12, %v5795_v6 }
0x1139   : > { %3348 = vrot.lane.b32.xlu2 %v5795_v6, %s4906_s0 }
0x118b   : > { %v3193_v62 = vpop.permute.xlu2 %3192 }
0x118c   : > { %4334 = vmatmul.msk.bf16.vlgmr.msrb.gmra.mxu0 %vm1401_vm12, %v3193_v62 }
0x11b4   : > { %v3058_v28 = vpop.f32.mrf.mxu2 }
0x11b5   : > { %v3063_v11 = vsel %vm2980_vm2, %v3058_v28, -1e+30 }
0x11b6   : > { %3065 = vmax.xlane.f32.xlu0 %v3063_v11 }
0x11bc   : > { %v3060_v32 = vpop.f32.mrf.mxu2 }
0x11bd   : > { %v3064_v33 = vsel %vm2980_vm2, %v3060_v32, -1e+30 }
0x11be   : > { %3067 = vmax.xlane.f32.xlu1 %v3064_v33 }
0x11ca   : > { %3352 = vrot.lane.b32.xlu0 %v5764_v45, %s4906_s0 }
0x11d2   : > { %3350 = vrot.lane.b32.xlu0 %v5776_v43, %s4906_s0 }
0x11d7   : > { %3510 = vrot.lane.b32.xlu1 %v5756_v41, %s4907_s10 }
0x1209   : > { %v3246_v42 = vpop.f32.mrf.mxu0 }
0x1211   : > { %v3248_v44 = vpop.f32.mrf.mxu0 }
0x1212   : > { %v5865_v45 = vsel %vm2980_vm2, %v3248_v44, -1e+30 }
0x1213   : > { %3255 = vmax.xlane.f32.xlu2 %v5865_v45 }
0x1229   : > { %v3066_v39 = vpop.xlane.xlu0 %3065 }
0x122a   : > { %v3069_v29 = vsub.f32 %v3063_v11, %v3066_v39 }
0x122c   : > { %v3071_v46 = vmul.f32 1.442695, %v3069_v29 }
0x122e   : > { %4670 = vpow2.f32 %v3071_v46 }
0x1231   : > { %v3068_v26 = vpop.xlane.xlu1 %3067 }
0x1232   : > { %v3070_v41 = vsub.f32 %v3064_v33, %v3068_v26  ;;  %v3349_v33 = vpop.permute.xlu2 %3348 }
0x1234   : > { %v4671_v47 = vpop.eup %4670  ;;  %v3073_v63 = vmul.f32 1.442695, %v3070_v41 }
0x1235   : > { %3075 = vadd.xlane.f32.xlu1 %v4671_v47 }
0x1236   : > { %4672 = vpow2.f32 %v3073_v63 }
0x123c   : > { %v4673_v19 = vpop.eup %4672  ;;  %v3353_v48 = vpop.permute.xlu0 %3352 }
0x123d   : > { %3077 = vadd.xlane.f32.xlu0 %v4673_v19  ;;  %v3373_v14 = vsel %vm1401_vm12, %v3353_v48, 0 }
0x123e   : > { %3399 = vmatpush.bf16.xpose.msrb.mxu3 %v3373_v14 }
0x1244   : > { %v3351_v51 = vpop.permute.xlu0 %3350 }
0x1245   : > { %v3370_v53 = vsel %vm1401_vm12, %v3351_v51, 0 }
0x1246   : > { %3400 = vmatpush.bf16.xpose.msrb.mxu3 %v3370_v53 }
0x1249   : > { %v3511_v49 = vpop.permute.xlu1 %3510 }
0x124a   : > { %v3532_v50 = vsel %vm1401_vm12, %v3511_v49, 0 }
0x124b   : > { %3554 = vmatpush.bf16.xpose.msrb.mxu2 %v3532_v50 }
0x124e   : > { %3506 = vrot.lane.b32.xlu1 %v5776_v43, %s4907_s10  ;;  %v3251_v43 = vsel %vm2980_vm2, %v3246_v42, -1e+30 }
0x1251   : > { %3504 = vrot.lane.b32.xlu0 %v5795_v6, %s4907_s10 }
0x1253   : > { %3555 = vmatpush.bf16.xpose.msrb.mxu2 %v3529_v23 }
0x1278   : > { %3253 = vmax.xlane.f32.xlu1 %v3251_v43 }
0x1286   : > { %v3256_v48 = vpop.xlane.xlu2 %3255 }
0x1287   : > { %v3258_v50 = vsub.f32 %v5865_v45, %v3256_v48 }
0x1289   : > { %v3261_v14 = vmul.f32 1.442695, %v3258_v50 }
0x1291   : > { %3314 = vrot.lane.b32.xlu1 %v5810_v36, %s4905_s23 }
0x1299   : > { %3468 = vrot.lane.b32.xlu1 %v5814_v18, %s4906_s0 }
0x12a8   : > { %v3076_v5 = vpop.xlane.xlu1 %3075 }
0x12a9   : > { %4674 = vrcp.f32 %v3076_v5  ;;  %v3090_v9 = vand.u32 2147483648, %v3076_v5  ;;  %vm3084_vm4 = vweird.f32 %v3076_v5  ;;  %v3088_v10 = vand.u32 2147483647, %v3076_v5 }
0x12ab   : > { %v3091_v58 = vor.u32 1.1754944e-38, %v3090_v9  ;;  %vm3089_vm7 = vcmp.eq.f32.partialorder %v3088_v10, 8.507059e+37 }
0x12af   : > { %v4675_v55 = vpop.eup %4674 }
0x12b0   : > { %v3080_v56 = vmul.f32 %v4675_v55, %v3076_v5  ;;  %v3078_v57 = vpop.xlane.xlu0 %3077  ;;  %vm3085_vm3 = vweird.f32 %v4675_v55 }
0x12b1   : > { %4676 = vrcp.f32 %v3078_v57  ;;  %vm3086_vm5 = vmor %vm3084_vm4, %vm3085_vm3  ;;  %v3105_v15 = vand.u32 2147483648, %v3078_v57  ;;  %v3103_v16 = vand.u32 2147483647, %v3078_v57  ;;  %vm3099_vm8 = vweird.f32 %v3078_v57 }
0x12b2   : > { %v3081_v59 = vsub.f32 1.0, %v3080_v56 }
0x12b3   : > { %v3106_v62 = vor.u32 1.1754944e-38, %v3105_v15  ;;  %vm3104_vm10 = vcmp.eq.f32.partialorder %v3103_v16, 8.507059e+37 }
0x12b4   : > { %v3082_v60 = vmul.f32 %v4675_v55, %v3081_v59 }
0x12b6   : > { %v3083_v6 = vadd.f32 %v4675_v55, %v3082_v60 }
0x12b7   : > { %v4677_v0 = vpop.eup %4676 }
0x12b8   : > { %v3095_v8 = vmul.f32 %v4677_v0, %v3078_v57  ;;  %v3087_v31 = vsel %vm3086_vm5, %v4675_v55, %v3083_v6  ;;  %vm3100_vm6 = vweird.f32 %v4677_v0 }
0x12b9   : > { %vm3101_vm9 = vmor %vm3099_vm8, %vm3100_vm6  ;;  %v3092_v17 = vsel %vm3089_vm7, %v3091_v58, %v3087_v31 }
0x12ba   : > { %v3096_v12 = vsub.f32 1.0, %v3095_v8  ;;  %v5884_v13 = vmul.f32 %v4671_v47, %v3092_v17 }
0x12bc   : > { %v3097_v40 = vmul.f32 %v4677_v0, %v3096_v12 }
0x12be   : > { %v3098_v20 = vadd.f32 %v4677_v0, %v3097_v40 }
0x12c0   : > { %v3102_v22 = vsel %vm3101_vm9, %v4677_v0, %v3098_v20  ;;  %v3507_v24 = vpop.permute.xlu1 %3506 }
0x12c1   : > { %v3526_v2 = vsel %vm1401_vm12, %v3507_v24, 0  ;;  %v3107_v28 = vsel %vm3104_vm10, %v3106_v62, %v3102_v22 }
0x12c2   : > { %3556 = vmatpush.bf16.xpose.msrb.mxu2 %v3526_v2  ;;  %v5886_v11 = vmul.f32 %v4673_v19, %v3107_v28 }
0x12c3   : > { %v3505_v32 = vpop.permute.xlu0 %3504 }
0x12c4   : > { %v3111_v30 = vpack.c.bf16 %v5886_v11, %v5884_v13 }
0x12c6   : > { %3168 = vmatmul.bf16.vlgmr.msra.gmra.mxu3 %v3111_v30 }
0x12c9   : > { %4336 = vmatmul.msk.bf16.vlgmr.msrb.gmra.mxu2 %vm1401_vm12, %v3505_v32 }
0x12d6   : > { %4335 = vmatmul.msk.bf16.vlgmr.msrb.gmra.mxu3 %vm1401_vm12, %v3349_v33 }
0x12eb   : > { %v3254_v4 = vpop.xlane.xlu1 %3253 }
0x12ec   : > { %v3257_v3 = vsub.f32 %v3251_v43, %v3254_v4 }
0x12ee   : > { %v3259_v61 = vmul.f32 1.442695, %v3257_v3 }
0x12f0   : > { %4678 = vpow2.f32 %v3259_v61 }
0x12f1   : > { %4680 = vpow2.f32 %v3261_v14 }
0x12f6   : > { %v5892_v34 = vpop.eup %4678 }
0x12f7   : > { %3263 = vadd.xlane.f32.xlu1 %v5892_v34 }
0x1303   : > { %v3315_v35 = vpop.permute.xlu1 %3314 }
0x1304   : > { %3324 = vmatpush.bf16.msra.mxu1 %v3315_v35 }
0x130b   : > { %v5937_v23 = vpop.permute.xlu1 %3468 }
0x1349   : > { %v3169_v38 = vpop.f32.mrf.mxu3 }
0x134a   : > { %v3174_v29 = vsel %vm1401_vm12, %v3169_v38, 0.0 }
0x134c   : > { %v3558_v42 = vpop.f32.mrf.mxu2 }
0x134d   : > { %v3563_v44 = vsel %vm2980_vm2, %v3558_v42, -1e+30 }
0x134e   : > { %3565 = vmax.xlane.f32.xlu2 %v3563_v44 }
0x1351   : > { %v3171_v39 = vpop.f32.mrf.mxu3 }
0x1352   : > { %v3175_v46 = vsel %vm1401_vm12, %v3171_v39, 0.0 }
0x1353   : > { %v5899_v26 = vadd.f32 %v3175_v46, %v3174_v29 }
0x1354   : > { %v3560_v41 = vpop.f32.mrf.mxu2 }
0x1355   : > { %v3564_v47 = vsel %vm2980_vm2, %v3560_v41, -1e+30 }
0x1356   : > { %3567 = vmax.xlane.f32.xlu0 %v3564_v47 }
0x1359   : > { %v3402_v63 = vpop.f32.mrf.mxu3 }
0x1361   : > { %v3404_v19 = vpop.f32.mrf.mxu3 }
0x1362   : > { %v3408_v49 = vsel %vm2980_vm2, %v3404_v19, -1e+30 }
0x1363   : > { %3411 = vmax.xlane.f32.xlu1 %v3408_v49 }
0x1366   : > { %3312 = vrot.lane.b32.xlu2 %v5814_v18, %s4905_s23 }
0x136a   : > { %3310 = vrot.lane.b32.xlu0 %v5818_v21, %s4905_s23  ;;  %v3264_v57 = vpop.xlane.xlu1 %3263 }
0x136b   : > { %v3278_v28 = vand.u32 2147483648, %v3264_v57  ;;  %vm3272_vm13 = vweird.f32 %v3264_v57 }
0x136d   : > { %v3279_v61 = vor.u32 1.1754944e-38, %v3278_v28 }
0x136e   : > { %3624 = vrot.lane.b32.xlu2 %v5814_v18, %s4907_s10  ;;  %v5924_v18 = vpop.eup %4680 }
0x1372   : > { %3308 = vrot.lane.b32.xlu0 %v5823_v25, %s4905_s23 }
0x137a   : > { %3306 = vrot.lane.b32.xlu0 %v5827_v1, %s4905_s23 }
0x137c   : > { %3622 = vrot.lane.b32.xlu1 %v5818_v21, %s4907_s10 }
0x1382   : > { %3470 = vrot.lane.b32.xlu0 %v5810_v36, %s4906_s0 }
0x138a   : > { %3626 = vrot.lane.b32.xlu0 %v5810_v36, %s4907_s10 }
0x1392   : > { %3304 = vrot.lane.b32.xlu0 %v5832_v27, %s4905_s23 }
0x1397   : > { %3265 = vadd.xlane.f32.xlu2 %v5924_v18 }
0x139a   : > { %3302 = vrot.lane.b32.xlu0 %v5837_v54, %s4905_s23 }
0x13a2   : > { %3466 = vrot.lane.b32.xlu0 %v5818_v21, %s4906_s0  ;;  %v5941_v21 = vsel %vm2980_vm2, %v3402_v63, -1e+30 }
0x13af   : > { %3300 = vrot.lane.b32.xlu2 %v5844_v37, %s4905_s23  ;;  %s6212_s23 = sld [smem:[#allocation24_spill]] }
0x13b7   : > { %3618 = vrot.lane.b32.xlu2 %v5827_v1, %s4907_s10 }
0x13bf   : > { %3616 = vrot.lane.b32.xlu2 %v5832_v27, %s4907_s10 }
0x13c1   : > { %v3566_v36 = vpop.xlane.xlu2 %3565 }
0x13c2   : > { %v3569_v45 = vsub.f32 %v3563_v44, %v3566_v36 }
0x13c4   : > { %v3571_v51 = vmul.f32 1.442695, %v3569_v45 }
0x13c6   : > { %4682 = vpow2.f32 %v3571_v51 }
0x13c9   : > { %v3568_v53 = vpop.xlane.xlu0 %3567  ;;  %v3313_v43 = vpop.permute.xlu2 %3312 }
0x13ca   : > { %v3570_v5 = vsub.f32 %v3564_v47, %v3568_v53  ;;  %3325 = vmatpush.bf16.msra.mxu1 %v3313_v43 }
0x13cc   : > { %v5943_v55 = vpop.eup %4682  ;;  %v3573_v56 = vmul.f32 1.442695, %v3570_v5  ;;  %3409 = vmax.xlane.f32.xlu0 %v5941_v21 }
0x13cd   : > { %3575 = vadd.xlane.f32.xlu1 %v5943_v55 }
0x13ce   : > { %4684 = vpow2.f32 %v3573_v56 }
0x13d1   : > { %v3625_v31 = vpop.permute.xlu2 %3624 }
0x13d4   : > { %v5947_v59 = vpop.eup %4684 }
0x13d5   : > { %3577 = vadd.xlane.f32.xlu0 %v5947_v59 }
0x13d6   : > { %v3412_v60 = vpop.xlane.xlu1 %3411 }
0x13d7   : > { %v3414_v0 = vsub.f32 %v3408_v49, %v3412_v60 }
0x13d9   : > { %v3417_v8 = vmul.f32 1.442695, %v3414_v0 }
0x13db   : > { %4686 = vpow2.f32 %v3417_v8 }
0x13dc   : > { %v3311_v6 = vpop.permute.xlu0 %3310  ;;  %4688 = vrcp.f32 %v3264_v57 }
0x13dd   : > { %3326 = vmatpush.bf16.msra.mxu1 %v3311_v6 }
0x13e1   : > { %v5952_v9 = vpop.eup %4686 }
0x13e4   : > { %v3309_v52 = vpop.permute.xlu0 %3308 }
0x13e5   : > { %3327 = vmatpush.bf16.msra.mxu1 %v3309_v52 }
0x13e6   : > { %3620 = vrot.lane.b32.xlu1 %v5823_v25, %s4907_s10 }
0x13e8   : > { %3421 = vadd.xlane.f32.xlu2 %v5952_v9 }
0x13e9   : > { %3464 = vrot.lane.b32.xlu0 %v5823_v25, %s4906_s0  ;;  %v4689_v25 = vpop.eup %4688 }
0x13ea   : > { %vm3273_vm11 = vweird.f32 %v4689_v25 }
0x13eb   : > { %vm3274_vm14 = vmor %vm3272_vm13, %vm3273_vm11 }
0x13ec   : > { %v3307_v10 = vpop.permute.xlu0 %3306 }
0x13ed   : > { %3328 = vmatpush.bf16.msra.mxu1 %v3307_v10 }
0x13ee   : > { %3458 = vrot.lane.b32.xlu1 %v5837_v54, %s4906_s0  ;;  %v3623_v16 = vpop.permute.xlu1 %3622 }
0x13f1   : > { %3462 = vrot.lane.b32.xlu0 %v5827_v1, %s4906_s0  ;;  %v3268_v1 = vmul.f32 %v4689_v25, %v3264_v57 }
0x13f3   : > { %v3269_v58 = vsub.f32 1.0, %v3268_v1 }
0x13f4   : > { %v3471_v12 = vpop.permute.xlu0 %3470 }
0x13f6   : > { %3612 = vrot.lane.b32.xlu1 %v5844_v37, %s4907_s10 }
0x13f9   : > { %3460 = vrot.lane.b32.xlu0 %v5832_v27, %s4906_s0  ;;  %v3270_v27 = vmul.f32 %v4689_v25, %v3269_v58 }
0x13fb   : > { %v3271_v22 = vadd.f32 %v4689_v25, %v3270_v27 }
0x13fc   : > { %v3627_v15 = vpop.permute.xlu0 %3626 }
0x13fd   : > { %3636 = vmatpush.bf16.msra.mxu0 %v3627_v15  ;;  %v3275_v33 = vsel %vm3274_vm14, %v4689_v25, %v3271_v22 }
0x1400   : > { %3456 = vrot.lane.b32.xlu2 %v5844_v37, %s4906_s0  ;;  %v3276_v37 = vand.u32 2147483647, %v3264_v57  ;;  %s6214_s0 = smov 16  }
0x1401   : > { %3637 = vmatpush.bf16.msra.mxu0 %v3625_v31 }
0x1402   : > { %vm3277_vm3 = vcmp.eq.f32.partialorder %v3276_v37, 8.507059e+37 }
0x1403   : > { %v3280_v42 = vsel %vm3277_vm3, %v3279_v61, %v3275_v33 }
0x1404   : > { %v3305_v40 = vpop.permute.xlu0 %3304  ;;  %v5969_v46 = vmul.f32 %v5892_v34, %v3280_v42 }
0x1405   : > { %3329 = vmatpush.bf16.msra.mxu1 %v3305_v40  ;;  %3638 = vmatpush.bf16.msra.mxu0 %v3623_v16 }
0x140a   : > { %v3266_v20 = vpop.xlane.xlu2 %3265 }
0x140b   : > { %4690 = vrcp.f32 %v3266_v20  ;;  %v3293_v32 = vand.u32 2147483648, %v3266_v20  ;;  %v3291_v3 = vand.u32 2147483647, %v3266_v20  ;;  %vm3287_vm4 = vweird.f32 %v3266_v20 }
0x140c   : > { %v3303_v62 = vpop.permute.xlu0 %3302 }
0x140d   : > { %3330 = vmatpush.bf16.msra.mxu1 %v3303_v62  ;;  %v3294_v38 = vor.u32 1.1754944e-38, %v3293_v32  ;;  %vm3292_vm6 = vcmp.eq.f32.partialorder %v3291_v3, 8.507059e+37 }
0x1411   : > { %v4691_v17 = vpop.eup %4690 }
0x1412   : > { %v3283_v24 = vmul.f32 %v4691_v17, %v3266_v20  ;;  %v3301_v2 = vpop.permute.xlu2 %3300  ;;  %vm3288_vm2 = vweird.f32 %v4691_v17 }
0x1413   : > { %3331 = vmatpush.bf16.msra.mxu1 %v3301_v2  ;;  %vm3289_vm5 = vmor %vm3287_vm4, %vm3288_vm2 }
0x1414   : > { %v3284_v30 = vsub.f32 1.0, %v3283_v24  ;;  %v3467_v39 = vpop.permute.xlu0 %3466 }
0x1416   : > { %v3285_v4 = vmul.f32 %v4691_v17, %v3284_v30 }
0x1417   : > { %3480 = vmatpush.bf16.msrb.mxu1 %v3471_v12 }
0x1418   : > { %v3286_v35 = vadd.f32 %v4691_v17, %v3285_v4 }
0x141a   : > { %v3290_v44 = vsel %vm3289_vm5, %v4691_v17, %v3286_v35  ;;  %v3619_v14 = vpop.permute.xlu2 %3618 }
0x141b   : > { %3481 = vmatpush.bf16.msrb.mxu1 %v5937_v23  ;;  %v3295_v29 = vsel %vm3292_vm6, %v3294_v38, %v3290_v44  ;;  %v4911_v38 = vmov 16.0  }
0x141c   : > { %v5972_v41 = vmul.f32 %v5924_v18, %v3295_v29 }
0x141e   : > { %v3299_v47 = vpack.c.bf16 %v5972_v41, %v5969_v46  ;;  %v3298_v33 = vadd.f32 %v5972_v41, %v5886_v11 }
0x141f   : > { %3482 = vmatpush.bf16.msrb.mxu1 %v3467_v39 }
0x1420   : > { %3332 = vmatmul.bf16.vlgmr.msra.gmra.mxu1 %v3299_v47 }
0x1422   : > { %v3617_v5 = vpop.permute.xlu2 %3616 }
0x143f   : > { %v3410_v63 = vpop.xlane.xlu0 %3409 }
0x1440   : > { %v3413_v19 = vsub.f32 %v5941_v21, %v3410_v63  ;;  %v3576_v49 = vpop.xlane.xlu1 %3575 }
0x1441   : > { %4692 = vrcp.f32 %v3576_v49  ;;  %v3590_v21 = vand.u32 2147483648, %v3576_v49  ;;  %vm3584_vm8 = vweird.f32 %v3576_v49  ;;  %v3588_v57 = vand.u32 2147483647, %v3576_v49 }
0x1442   : > { %v3415_v48 = vmul.f32 1.442695, %v3413_v19 }
0x1443   : > { %v3591_v52 = vor.u32 1.1754944e-38, %v3590_v21  ;;  %vm3589_vm13 = vcmp.eq.f32.partialorder %v3588_v57, 8.507059e+37 }
0x1444   : > { %4694 = vpow2.f32 %v3415_v48 }
0x1447   : > { %v4693_v50 = vpop.eup %4692 }
0x1448   : > { %v3580_v36 = vmul.f32 %v4693_v50, %v3576_v49  ;;  %v3578_v45 = vpop.xlane.xlu0 %3577  ;;  %vm3585_vm7 = vweird.f32 %v4693_v50 }
0x1449   : > { %4696 = vrcp.f32 %v3578_v45  ;;  %v3605_v60 = vand.u32 2147483648, %v3578_v45  ;;  %vm3586_vm9 = vmor %vm3584_vm8, %vm3585_vm7  ;;  %v3603_v6 = vand.u32 2147483647, %v3578_v45  ;;  %vm3599_vm11 = vweird.f32 %v3578_v45 }
0x144a   : > { %v5977_v34 = vpop.eup %4694  ;;  %v3581_v18 = vsub.f32 1.0, %v3580_v36 }
0x144b   : > { %3419 = vadd.xlane.f32.xlu0 %v5977_v34  ;;  %v3606_v12 = vor.u32 1.1754944e-38, %v3605_v60  ;;  %vm3604_vm2 = vcmp.eq.f32.partialorder %v3603_v6, 8.507059e+37 }
0x144c   : > { %v3582_v23 = vmul.f32 %v4693_v50, %v3581_v18 }
0x144e   : > { %v3583_v43 = vadd.f32 %v4693_v50, %v3582_v23 }
0x144f   : > { %v4697_v51 = vpop.eup %4696 }
0x1450   : > { %v3595_v53 = vmul.f32 %v4697_v51, %v3578_v45  ;;  %vm3600_vm10 = vweird.f32 %v4697_v51  ;;  %v3587_v8 = vsel %vm3586_vm9, %v4693_v50, %v3583_v43 }
0x1451   : > { %vm3601_vm14 = vmor %vm3599_vm11, %vm3600_vm10  ;;  %v3592_v25 = vsel %vm3589_vm13, %v3591_v52, %v3587_v8 }
0x1452   : > { %v3596_v56 = vsub.f32 1.0, %v3595_v53  ;;  %v5984_v20 = vmul.f32 %v5943_v55, %v3592_v25 }
0x1454   : > { %v3597_v0 = vmul.f32 %v4697_v51, %v3596_v56 }
0x1456   : > { %v3598_v10 = vadd.f32 %v4697_v51, %v3597_v0 }
0x1458   : > { %v3602_v15 = vsel %vm3601_vm14, %v4697_v51, %v3598_v10  ;;  %v3621_v31 = vpop.permute.xlu1 %3620 }
0x1459   : > { %3639 = vmatpush.bf16.msra.mxu0 %v3621_v31  ;;  %v3607_v40 = vsel %vm3604_vm2, %v3606_v12, %v3602_v15  ;;  %v3297_v12 = vadd.f32 %v5969_v46, %v5884_v13 }
0x145a   : > { %v5981_v16 = vmul.f32 %v5947_v59, %v3607_v40 }
0x145b   : > { %v3422_v1 = vpop.xlane.xlu2 %3421  ;;  %v3465_v58 = vpop.permute.xlu0 %3464 }
0x145c   : > { %4698 = vrcp.f32 %v3422_v1  ;;  %3483 = vmatpush.bf16.msrb.mxu1 %v3465_v58  ;;  %v3611_v62 = vpack.c.bf16 %v5981_v16, %v5984_v20  ;;  %v3449_v24 = vand.u32 2147483648, %v3422_v1  ;;  %v3447_v55 = vand.u32 2147483647, %v3422_v1 }
0x145d   : > { %3640 = vmatpush.bf16.msra.mxu0 %v3619_v14  ;;  %vm3443_vm4 = vweird.f32 %v3422_v1  ;;  %4700 = vrcp.f32 %v4911_v38 }
0x145e   : > { %v3450_v37 = vor.u32 1.1754944e-38, %v3449_v24  ;;  %vm3448_vm6 = vcmp.eq.f32.partialorder %v3447_v55, 8.507059e+37 }
0x145f   : > { %3614 = vrot.lane.b32.xlu0 %v5837_v54, %s4907_s10  ;;  %s6213_s10 = smov %s6212_s23 }
0x1460   : > { %v3459_v50 = vpop.permute.xlu1 %3458 }
0x1461   : > { %3641 = vmatpush.bf16.msra.mxu0 %v3617_v5 }
0x1462   : > { %v4699_v27 = vpop.eup %4698 }
0x1463   : > { %v3439_v17 = vmul.f32 %v4699_v27, %v3422_v1  ;;  %v3463_v22 = vpop.permute.xlu0 %3462  ;;  %vm3444_vm3 = vweird.f32 %v4699_v27  ;;  %v4701_v44 = vpop.eup %4700 }
0x1464   : > { %3484 = vmatpush.bf16.msrb.mxu1 %v3463_v22  ;;  %vm3445_vm5 = vmor %vm3443_vm4, %vm3444_vm3  ;;  %v3184_v39 = vmul.f32 16.0, %v4701_v44  ;;  %v3457_v36 = vpop.permute.xlu2 %3456  ;;  %vm3188_vm7 = vweird.f32 %v4701_v44 }
0x1465   : > { %v3440_v59 = vsub.f32 1.0, %v3439_v17 }
0x1466   : > { %v3185_v49 = vsub.f32 1.0, %v3184_v39  ;;  %v4417_v39 = vld [vmem:[%s6213_s10] sm:$0xff] }
0x1467   : > { %v3441_v2 = vmul.f32 %v4699_v27, %v3440_v59 }
0x1468   : > { %v3613_v1 = vpop.permute.xlu1 %3612 }
0x1469   : > { %v3442_v28 = vadd.f32 %v4699_v27, %v3441_v2 }
0x146b   : > { %v3446_v30 = vsel %vm3445_vm5, %v4699_v27, %v3442_v28  ;;  %v3461_v32 = vpop.permute.xlu0 %3460 }
0x146c   : > { %3485 = vmatpush.bf16.msrb.mxu1 %v3461_v32  ;;  %v3451_v54 = vsel %vm3448_vm6, %v3450_v37, %v3446_v30 }
0x146d   : > { %v3452_v4 = vmul.f32 %v5952_v9, %v3451_v54  ;;  %v3186_v9 = vmul.f32 %v4701_v44, %v3185_v49 }
0x146f   : > { %v3454_v3 = vadd.f32 %v3452_v4, %v3298_v33  ;;  %v3187_v45 = vadd.f32 %v4701_v44, %v3186_v9 }
0x1470   : > { %3486 = vmatpush.bf16.msrb.mxu1 %v3459_v50 }
0x1471   : > { %v3610_v61 = vadd.f32 %v5981_v16, %v3454_v3  ;;  %v5997_v51 = vsel %vm3188_vm7, %v4701_v44, %v3187_v45  ;;  %v4418_v44 = vld [vmem:[%s6212_s23 + $0x8] sm:$0xff] }
0x1473   : > { %v3710_v35 = vmul.f32 0.25, %v3610_v61 }
0x1474   : > { %3487 = vmatpush.bf16.msrb.mxu1 %v3457_v36 }
0x1475   : > { %3715 = vst [vmem:[%s5191_s18 + $0x8] sm:$0xff] %v3710_v35 }
0x1478   : > { %3702 = vmatpush.bf16.msra.mxu1 %v4418_v44 }
0x147c   : > { %3703 = vmatpush.bf16.msra.mxu1 %v4417_v39 }
0x149d   : > { %v3333_v42 = vpop.f32.mrf.mxu1 }
0x149e   : > { %v3338_v47 = vsel %vm1401_vm12, %v3333_v42, 0.0 }
0x14a5   : > { %v3335_v29 = vpop.f32.mrf.mxu1 }
0x14a6   : > { %v3339_v63 = vsel %vm1401_vm12, %v3335_v29, 0.0  ;;  %v3177_v29 = vrot.slane %v5899_v26, 4 }
0x14a7   : > { %v3340_v19 = vadd.f32 %v3339_v63, %v3338_v47 }
0x14a8   : > { %v3178_v47 = vadd.f32 %v3177_v29, %v5899_v26 }
0x14a9   : > { %v3341_v11 = vrot.slane %v3340_v19, 4 }
0x14aa   : > { %v3179_v63 = vrot.slane %v3178_v47, 2 }
0x14ab   : > { %v3342_v41 = vadd.f32 %v3341_v11, %v3340_v19 }
0x14ac   : > { %v3180_v19 = vadd.f32 %v3179_v63, %v3178_v47 }
0x14ad   : > { %v3343_v48 = vrot.slane %v3342_v41, 2 }
0x14ae   : > { %v3181_v49 = vrot.slane %v3180_v19, 1 }
0x14af   : > { %v3344_v14 = vadd.f32 %v3343_v48, %v3342_v41 }
0x14b0   : > { %v3182_v11 = vadd.f32 %v3181_v49, %v3180_v19 }
0x14b1   : > { %v3345_v18 = vrot.slane %v3344_v14, 1 }
0x14b2   : > { %v3190_v9 = vmul.f32 %v5997_v51, %v3182_v11 }
0x14b3   : > { %v3346_v23 = vadd.f32 %v3345_v18, %v3344_v14 }
0x14b5   : > { %v3347_v53 = vmul.f32 %v3346_v23, %v5997_v51  ;;  %v3680_v23 = vld [vmem:[%s6216_s26] sm:$0x1] }
0x14b7   : > { %3661 = vrot.lane.b32.xlu0 %v3347_v53, %s4908_s15  ;;  %s6215_s15 = sld [smem:[#allocation20_spill]] }
0x14bd   : > { %v2884_v26 = vld [vmem:[%s6215_s15] sm:$0x1] }
0x14be   : > { %v3420_v43 = vpop.xlane.xlu0 %3419 }
0x14bf   : > { %4702 = vrcp.f32 %v3420_v43  ;;  %v3434_v57 = vand.u32 2147483648, %v3420_v43  ;;  %v3432_v0 = vand.u32 2147483647, %v3420_v43  ;;  %vm3428_vm9 = vweird.f32 %v3420_v43 }
0x14c1   : > { %v3435_v8 = vor.u32 1.1754944e-38, %v3434_v57  ;;  %vm3433_vm11 = vcmp.eq.f32.partialorder %v3432_v0, 8.507059e+37 }
0x14c5   : > { %v4703_v5 = vpop.eup %4702 }
0x14c6   : > { %v3424_v21 = vmul.f32 %v4703_v5, %v3420_v43  ;;  %vm3429_vm8 = vweird.f32 %v4703_v5  ;;  %v2910_v43 = vadd.f32 %v5789_v7, %v2884_v26 }
0x14c7   : > { %vm3430_vm10 = vmor %vm3428_vm9, %vm3429_vm8 }
0x14c8   : > { %v3425_v56 = vsub.f32 1.0, %v3424_v21 }
0x14ca   : > { %v3426_v60 = vmul.f32 %v4703_v5, %v3425_v56 }
0x14cc   : > { %v3427_v6 = vadd.f32 %v4703_v5, %v3426_v60 }
0x14ce   : > { %v3431_v52 = vsel %vm3430_vm10, %v4703_v5, %v3427_v6 }
0x14cf   : > { %v3436_v10 = vsel %vm3433_vm11, %v3435_v8, %v3431_v52 }
0x14d0   : > { %v3437_v15 = vmul.f32 %v5977_v34, %v3436_v10 }
0x14d1   : > { %v3615_v31 = vpop.permute.xlu0 %3614 }
0x14d2   : > { %3642 = vmatpush.bf16.msra.mxu0 %v3615_v31  ;;  %v3453_v25 = vadd.f32 %v3437_v15, %v3297_v12  ;;  %v3455_v40 = vpack.c.bf16 %v3452_v4, %v3437_v15 }
0x14d4   : > { %3488 = vmatmul.bf16.vlgmr.msrb.gmra.mxu1 %v3455_v40  ;;  %v3609_v58 = vadd.f32 %v5984_v20, %v3453_v25 }
0x14d6   : > { %3643 = vmatpush.bf16.msra.mxu0 %v3613_v1  ;;  %v3709_v27 = vmul.f32 0.25, %v3609_v58 }
0x14d8   : > { %3714 = vst [vmem:[%s5191_s18] sm:$0xff] %v3709_v27 }
0x14d9   : > { %3644 = vmatmul.bf16.vlgmr.msra.gmra.mxu0 %v3611_v62 }
0x1529   : > { %v3662_v41 = vpop.permute.xlu0 %3661 }
0x152a   : > { %v3672_v50 = vsel %vm1401_vm12, %v3190_v9, %v3662_v41 }
0x1551   : > { %v3489_v17 = vpop.f32.mrf.mxu1 }
0x1552   : > { %v3494_v46 = vsel %vm1401_vm12, %v3489_v17, 0.0 }
0x1556   : > { %v3645_v22 = vpop.f32.mrf.mxu0 }
0x1557   : > { %v3650_v55 = vsel %vm1401_vm12, %v3645_v22, 0.0 }
0x1559   : > { %v3491_v13 = vpop.f32.mrf.mxu1 }
0x155a   : > { %v3495_v34 = vsel %vm1401_vm12, %v3491_v13, 0.0 }
0x155b   : > { %v3496_v59 = vadd.f32 %v3495_v34, %v3494_v46 }
0x155d   : > { %v3497_v24 = vrot.slane %v3496_v59, 4 }
0x155e   : > { %v3647_v2 = vpop.f32.mrf.mxu0 }
0x155f   : > { %v3498_v28 = vadd.f32 %v3497_v24, %v3496_v59  ;;  %v3651_v37 = vsel %vm1401_vm12, %v3647_v2, 0.0 }
0x1560   : > { %v3652_v30 = vadd.f32 %v3651_v37, %v3650_v55 }
0x1561   : > { %v3499_v32 = vrot.slane %v3498_v28, 2 }
0x1562   : > { %v3653_v16 = vrot.slane %v3652_v30, 4 }
0x1563   : > { %v3500_v20 = vadd.f32 %v3499_v32, %v3498_v28 }
0x1564   : > { %v3654_v62 = vadd.f32 %v3653_v16, %v3652_v30 }
0x1565   : > { %v3501_v54 = vrot.slane %v3500_v20, 1 }
0x1566   : > { %v3655_v33 = vrot.slane %v3654_v62, 2 }
0x1567   : > { %v3502_v4 = vadd.f32 %v3501_v54, %v3500_v20 }
0x1568   : > { %v3656_v3 = vadd.f32 %v3655_v33, %v3654_v62 }
0x1569   : > { %v3503_v61 = vmul.f32 %v3502_v4, %v5997_v51 }
0x156a   : > { %v3657_v35 = vrot.slane %v3656_v3, 1 }
0x156b   : > { %3665 = vrot.lane.b32.xlu2 %v3503_v61, %s6214_s0 }
0x156c   : > { %v3658_v38 = vadd.f32 %v3657_v35, %v3656_v3 }
0x156e   : > { %v3659_v42 = vmul.f32 %v3658_v38, %v5997_v51 }
0x1570   : > { %3669 = vrot.lane.b32.xlu1 %v3659_v42, %s4910_s22 }
0x15c5   : > { %v3666_v48 = vpop.permute.xlu2 %3665 }
0x15c6   : > { %v3673_v14 = vsel %vm1867_vm0, %v3672_v50, %v3666_v48 }
0x15e2   : > { %v3670_v36 = vpop.permute.xlu1 %3669 }
0x15e3   : > { %v3674_v45 = vsel %vm1435_vm15, %v3673_v14, %v3670_v36 }
0x15e4   : > { %v3675_v18 = vpack.c.bf16 %v3674_v45, %v3674_v45 }
0x15e6   : > { %4345 = vmatmul.msk.bf16.vlgmr.msra.gmra.mxu1 %vm1261_vm1, %v3675_v18 }
0x1663   : > { %v3705_v53 = vpop.f32.mrf.mxu1 }
0x1664   : > { %v3706_v5 = vadd.f32 %v3705_v53, %v3680_v23 }
0x1666   : > { %v3711_v21 = vadd.f32 %v3706_v5, %v2910_v43 }
0x1668   : > { %3712 = vst [vmem:[%s6139_s28] sm:$0x1] %v3711_v21 }
0x166b   : > { %v3707_v51 = vpop.f32.mrf.mxu1 }
0x166c PF: > { %s6217_s22 = sld [smem:[#allocation39_spill]]  ;;  %s6223_s26 = scalar_lea.vmem [#allocation5], %s5147_s2 }
0x166d   : > { %s6219_s23 = sld [smem:[#allocation36_spill]]  ;;  %s3749_s5 = sshll.u32 %s6223_s26, 4  ;;  %s3750_s5 = int_to_ptr.vmem [resolvable:$true] %s3749_s5 }
0x166e   : > { %s6220_s0 = sld [smem:[#allocation30_spill]] }
0x1672   : > { %s6218_s16 = sadd.s32 4294967295, %s6217_s22  }
0x1673   : > { %s6033_s4 = sand.u32 1, %s6218_s16  }
0x1674   : > { %s6221_s1 = smov %s6220_s0  ;;  %s3747_s15 = scalar_lea.hbm %s6220_s0, %s6219_s23 }
0x1675   : > { %s3751_s6 = sshll.u32 %s3747_s15, 4  ;;  %s3721_s28 = scalar_lea.sflag [#allocation6], %s6033_s4  ;;  %s3752_s6 = int_to_ptr.hbm [resolvable:$true] %s3751_s6 }
0x1676   : > { %s4718_s7 = sshra.s32 %s3752_s6, 4  ;;  %s4724_s22 = scalar_lea.hbm %s6221_s1, 2  ;;  %s4719_s7 = int_to_ptr.hbm [resolvable:$true] %s4718_s7 }
0x1677   : > { %s4720_s8 = scalar_lea.hbm %s4719_s7, 1  ;;  %p4725_p6 = scmp.lt.s32.totalorder %s4719_s7, %s6221_s1 }
0x1678   : > { %p4721_p2 = scmp.ne.s32.totalorder %s4719_s7, %s4720_s8  ;;  %p4726_p7 = scmp.lt.s32.totalorder %s4724_s22, %s4720_s8 }
0x167a   : > { %p4722_p4 = pnand %p4721_p2, %p5124_p3  ;;  %p4727_p8 = por %p4726_p7, %p4725_p6 }
0x167c   : > { %p4723_p5 = pneg %p4722_p4 }
0x167e   : > { %p4728_p10 = pnand %p4727_p8, %p4723_p5 }
0x1680   : > { %4731 = shalt.err (!%p4728_p10)
}
0x1681   : > { %s6224_s16 = sld [smem:[#allocation29_spill]]  ;;  %s6226_s15 = scalar_lea.vmem [#allocation3], %s5147_s2 }
0x1682   : > { %4421 = dma.vmem_to_hbm [thread:$0]  (%p5124_p3), %s3750_s5, 16, %s3752_s6, %s3721_s28  }
0x1683   : > { %s3736_s7 = sshll.u32 %s6226_s15, 4  ;;  %s4419_s26 = sshll.u32 %s6219_s23, 4  ;;  %s3737_s7 = int_to_ptr.vmem [resolvable:$true] %s3736_s7 }
0x1684   : > { %s3717_s22 = scalar_lea.sflag [#allocation4], %s5147_s2 }
0x1687   : > { %s6225_s9 = smov %s6224_s16  ;;  %s3734_s0 = scalar_lea.hbm %s6224_s16, %s6219_s23 }
0x1688   : > { %s3738_s8 = sshll.u32 %s3734_s0, 4  ;;  %s4752_s11 = scalar_lea.hbm %s6225_s9, 2  ;;  %s3739_s8 = int_to_ptr.hbm [resolvable:$true] %s3738_s8 }
0x1689   : > { %s4746_s1 = sshra.s32 %s3739_s8, 4  ;;  %s4747_s1 = int_to_ptr.hbm [resolvable:$true] %s4746_s1 }
0x168a   : > { %s4748_s10 = scalar_lea.hbm %s4747_s1, 1  ;;  %p4753_p0 = scmp.lt.s32.totalorder %s4747_s1, %s6225_s9 }
0x168b   : > { %p4749_p11 = scmp.ne.s32.totalorder %s4747_s1, %s4748_s10  ;;  %p4754_p1 = scmp.lt.s32.totalorder %s4752_s11, %s4748_s10 }
0x168d   : > { %p4750_p12 = pnand %p4749_p11, %p5124_p3  ;;  %p4755_p2 = por %p4754_p1, %p4753_p0 }
0x168f   : > { %p4751_p13 = pneg %p4750_p12 }
0x1691   : > { %p4756_p4 = pnand %p4755_p2, %p4751_p13 }
0x1693   : > { %4759 = shalt.err (!%p4756_p4)
}
0x1694   : > { %s6227_s6 = sld [smem:[#allocation31_spill]]  ;;  %s3763_s5 = sshll.u32 %s5191_s18, 4  ;;  %s3764_s5 = int_to_ptr.vmem [resolvable:$true] %s3763_s5 }
0x1695   : > { %4420 = dma.vmem_to_hbm [thread:$0]  (%p5124_p3), %s3737_s7, 16, %s3739_s8, %s3717_s22  }
0x169a   : > { %s3762_s2 = scalar_lea.hbm %s6227_s6, %s4419_s26  ;;  %s4780_s11 = scalar_lea.hbm %s6227_s6, 32 }
0x169b   : > { %s3765_s23 = sshll.u32 %s3762_s2, 4  ;;  %s3766_s23 = int_to_ptr.hbm [resolvable:$true] %s3765_s23 }
0x169c   : > { %s4774_s16 = sshra.s32 %s3766_s23, 4  ;;  %s4775_s16 = int_to_ptr.hbm [resolvable:$true] %s4774_s16 }
0x169d   : > { %s4776_s1 = scalar_lea.hbm %s4775_s16, 16  ;;  %p4781_p8 = scmp.lt.s32.totalorder %s4775_s16, %s6227_s6 }
0x169e   : > { %p4777_p5 = scmp.ne.s32.totalorder %s4775_s16, %s4776_s1  ;;  %p4782_p10 = scmp.lt.s32.totalorder %s4780_s11, %s4776_s1 }
0x16a0   : > { %p4778_p6 = pnand %p4777_p5, %p5124_p3  ;;  %p4783_p11 = por %p4782_p10, %p4781_p8 }
0x16a2   : > { %p4779_p7 = pneg %p4778_p6 }
0x16a4   : > { %p4784_p12 = pnand %p4783_p11, %p4779_p7 }
0x16a6   : > { %4787 = shalt.err (!%p4784_p12)
}
0x16a7   : > { %s4912_s10 = smov 128   ;;  %s6228_s18 = smov 8  }
0x16a8   : > { %4422 = dma.vmem_to_hbm [thread:$0]  (%p5124_p3), %s3764_s5, 256, %s3766_s23, %s3721_s28, %s4912_s10, %s4912_s10, %s6228_s18  }
0x16a9 PF: > { %s6229_s0 = sld [smem:[#allocation39_spill]] }
0x16aa   : > { %s6230_s15 = sld [smem:[#allocation32_spill]] }
0x16af   : > { %p4436_p13 = scmp.ge.s32.totalorder %s6229_s0, 2 }
0x16b0   : > { %s3780_s8 = sand.u32 1, %s6230_s15  }
0x16b1   : > { %p4427_p0 = pnand %p4436_p13, %p5136_p9  ;;  %s3781_s26 = scalar_lea.sflag [#allocation4], %s3780_s8 }
0x16b3   : > { %p4428_p1 = pneg %p4427_p0 }
0x16b5   : > { %4821 = dma.done.wait (%p4428_p1), %s3781_s26, 16  }
0x16b6   : > { %4823 = vsyncadd (%p4428_p1), %s3781_s26, 4294967280  ;;  %s6232_s22 = sadd.s32 4294967294, %s6229_s0  }
0x16b7   : > { %s3789_s2 = sand.u32 1, %s6232_s22  }
0x16b8   : > { %s3790_s3 = scalar_lea.sflag [#allocation6], %s3789_s2 }
0x16b9   : > { %4825 = dma.done.wait (%p4428_p1), %s3790_s3, 272  }
0x16ba   : > { %4827 = vsyncadd (%p4428_p1), %s3790_s3, 4294967024  ;;  %s78_s0 = sadd.s32 1, %s6229_s0   ;;  %s6233_s15 = sld [smem:[#allocation33_spill]] }
0x16bb   : > { %p75_p3 = scmp.ge.s32.totalorder %s78_s0, 6   ;;  %s6234_s16 = sld [smem:[#allocation34_spill]] }
0x16bc   : > { %s6235_s18 = sld [smem:[#allocation44_spill]] }
0x16bd   : > { %s6236_s22 = sld [smem:[#allocation37_spill]]  ;;  %77 = sbr.rel (!%p75_p3) target bundleno = 64 (0x40), region = 273 }
0x16be   : > { %s6237_s23 = sld [smem:[#allocation38_spill]] }
0x16bf   : > { %s6238_s26 = sld [smem:[#allocation40_spill]] }
0x16c0   : > { %s6239_s28 = sld [smem:[#allocation42_spill]] }
0x16c2   :  { %3805 = vsyncpa [#allocation4], 1 }
0x16c3   :  { %3807 = vsyncpa [#allocation4 + $0x1], 1 }
0x16c4   :  { %3808 = vsyncpa [#allocation6], 1 }
0x16c5   :  { %3810 = vsyncpa [#allocation6 + $0x1], 1 }

</bundles_post_ra>
